<compile_context>
chip_gen: v7x
topology: tpu7x:2x2x1
jax: 0.10.0
libtpu: 0.0.40
codegen_flags: <defaults>
</compile_context>

<pallas_src>
import functools
import math

import jax
import jax.numpy as jnp
from jax import lax
from jax.experimental import pallas as pl
from jax.experimental.pallas import tpu as pltpu

BN_EPS = 1e-5
EXPANSION = 4
ACT_DTYPE = jnp.bfloat16            # MXU operand / inter-layer activation dtype


def _round_up(x, m):
    return ((x + m - 1) // m) * m


_TUNING = None


def _tpu_tuning():
    """(vmem_limit_bytes, max_tm) derived from the chip's physical VMEM."""
    global _TUNING
    if _TUNING is None:
        try:
            cap = int(pltpu.get_tpu_info().vmem_capacity_bytes)
        except Exception:
            cap = 64 * 1024 * 1024          # conservative (v7x-sized) fallback
        vmem_limit = max(32 * 1024 * 1024, (cap * 3) // 4)
        max_tm = 1024 if cap > 64 * 1024 * 1024 else 512
        _TUNING = (int(vmem_limit), int(max_tm))
    return _TUNING


def _choose_m_tiles(m):
    """(padded_M, TM): single full tile when small; otherwise the largest divisor of M
    that is a multiple of 8 (zero padding); padding only as a last resort."""
    _, max_tm = _tpu_tuning()
    if m <= max_tm:
        return m, m
    for d in range(max_tm, 63, -8):
        if m % d == 0:
            return m, d
    mp = _round_up(m, 8)
    for d in range(max_tm, 63, -8):
        if mp % d == 0:
            return mp, d
    mp = _round_up(m, 256)
    return mp, 256


def _choose_tn(n):
    if n <= 128:
        return n                    # full-dim block (legal even when < 128)
    for tn in (256, 128):
        if n % tn == 0:
            return tn
    return n


# ----------------------------------------------------------------------------
# Pallas kernels
# ----------------------------------------------------------------------------
def _mm2d_kernel(*refs, pre_relu, post_relu, has_rs, has_res):
    it = iter(refs)
    x_ref = next(it)
    w_ref = next(it)
    b_ref = next(it)
    rs_ref = next(it) if has_rs else None
    res_ref = next(it) if has_res else None
    o_ref = next(it)

    y = jnp.dot(x_ref[...], w_ref[...], preferred_element_type=jnp.float32) + b_ref[...]
    if pre_relu:
        y = jnp.maximum(y, 0.0)
    if has_rs:
        y = y * rs_ref[...].astype(jnp.float32)
    if has_res:
        y = y + res_ref[...].astype(jnp.float32)
    if post_relu:
        y = jnp.maximum(y, 0.0)
    o_ref[...] = y.astype(o_ref.dtype)


def _mm3d_kernel(*refs, pre_relu, post_relu, has_rs, has_res):
    it = iter(refs)
    x_ref = next(it)
    w_ref = next(it)
    b_ref = next(it)
    cm_ref = next(it)
    rs_ref = next(it) if has_rs else None
    res_ref = next(it) if has_res else None
    o_ref = next(it)

    y = jnp.dot(x_ref[0], w_ref[...], preferred_element_type=jnp.float32) + b_ref[...]
    if pre_relu:
        y = jnp.maximum(y, 0.0)
    y = y * cm_ref[0].astype(jnp.float32)
    if has_rs:
        y = y * rs_ref[0].astype(jnp.float32)
    if has_res:
        y = y + res_ref[0].astype(jnp.float32)
    if post_relu:
        y = jnp.maximum(y, 0.0)
    o_ref[0] = y.astype(o_ref.dtype)


def _matmul2d(x, w, bias, *, pre_relu, post_relu, row_scale, residual, out_dtype):
    """Batch-folded fused matmul: x (M, K), w (K, N), bias (N,)."""
    M, K = x.shape
    N = w.shape[1]
    Mp, TM = _choose_m_tiles(M)
    TN = _choose_tn(N)
    n_m, n_n = Mp // TM, N // TN
    vmem_limit, _ = _tpu_tuning()

    if Mp != M:
        x = jnp.pad(x, ((0, Mp - M), (0, 0)))
        if row_scale is not None:
            row_scale = jnp.pad(row_scale, ((0, Mp - M),))
        if residual is not None:
            residual = jnp.pad(residual, ((0, Mp - M), (0, 0)))

    # Put the larger parallel axis outermost (megacore on v7x).
    if n_m >= n_n:
        grid = (n_m, n_n)
        row_map = lambda i, j: (i, 0)
        col_map = lambda i, j: (0, j)
        out_map = lambda i, j: (i, j)
    else:
        grid = (n_n, n_m)
        row_map = lambda j, i: (i, 0)
        col_map = lambda j, i: (0, j)
        out_map = lambda j, i: (i, j)

    args = [x.astype(ACT_DTYPE), w.astype(ACT_DTYPE),
            bias.reshape(1, N).astype(jnp.float32)]
    in_specs = [
        pl.BlockSpec((TM, K), row_map),
        pl.BlockSpec((K, TN), col_map),
        pl.BlockSpec((1, TN), col_map),
    ]
    has_rs = row_scale is not None
    has_res = residual is not None
    if has_rs:
        args.append(row_scale.reshape(Mp, 1).astype(ACT_DTYPE))
        in_specs.append(pl.BlockSpec((TM, 1), row_map))
    if has_res:
        args.append(residual.astype(ACT_DTYPE))
        in_specs.append(pl.BlockSpec((TM, TN), out_map))

    out = pl.pallas_call(
        functools.partial(_mm2d_kernel, pre_relu=pre_relu, post_relu=post_relu,
                          has_rs=has_rs, has_res=has_res),
        out_shape=jax.ShapeDtypeStruct((Mp, N), out_dtype),
        grid=grid,
        in_specs=in_specs,
        out_specs=pl.BlockSpec((TM, TN), out_map),
        compiler_params=pltpu.CompilerParams(
            dimension_semantics=("parallel", "parallel"),
            vmem_limit_bytes=vmem_limit),
    )(*args)
    return out[:M] if Mp != M else out


def _matmul3d(x, w, bias, col_mask, *, pre_relu, post_relu, row_scale, residual,
              out_dtype):
    """Per-sample fused matmul (needed when a per-(sample, channel) mask exists)."""
    B, M, K = x.shape
    N = w.shape[1]
    Mp, TM = _choose_m_tiles(M)
    TN = _choose_tn(N)
    n_m, n_n = Mp // TM, N // TN
    vmem_limit, _ = _tpu_tuning()

    if Mp != M:
        x = jnp.pad(x, ((0, 0), (0, Mp - M), (0, 0)))
        if row_scale is not None:
            row_scale = jnp.pad(row_scale, ((0, 0), (0, Mp - M)))
        if residual is not None:
            residual = jnp.pad(residual, ((0, 0), (0, Mp - M), (0, 0)))

    args = [x.astype(ACT_DTYPE), w.astype(ACT_DTYPE),
            bias.reshape(1, N).astype(jnp.float32),
            col_mask.reshape(B, 1, N).astype(ACT_DTYPE)]
    in_specs = [
        pl.BlockSpec((1, TM, K), lambda b, i, j: (b, i, 0)),
        pl.BlockSpec((K, TN), lambda b, i, j: (0, j)),
        pl.BlockSpec((1, TN), lambda b, i, j: (0, j)),
        pl.BlockSpec((1, 1, TN), lambda b, i, j: (b, 0, j)),
    ]
    has_rs = row_scale is not None
    has_res = residual is not None
    if has_rs:
        args.append(row_scale.reshape(B, Mp, 1).astype(ACT_DTYPE))
        in_specs.append(pl.BlockSpec((1, TM, 1), lambda b, i, j: (b, i, 0)))
    if has_res:
        args.append(residual.astype(ACT_DTYPE))
        in_specs.append(pl.BlockSpec((1, TM, TN), lambda b, i, j: (b, i, j)))

    out = pl.pallas_call(
        functools.partial(_mm3d_kernel, pre_relu=pre_relu, post_relu=post_relu,
                          has_rs=has_rs, has_res=has_res),
        out_shape=jax.ShapeDtypeStruct((B, Mp, N), out_dtype),
        grid=(B, n_m, n_n),
        in_specs=in_specs,
        out_specs=pl.BlockSpec((1, TM, TN), lambda b, i, j: (b, i, j)),
        compiler_params=pltpu.CompilerParams(
            dimension_semantics=("parallel", "parallel", "parallel"),
            vmem_limit_bytes=vmem_limit),
    )(*args)
    if Mp != M:
        out = out[:, :M, :]
    return out


def matmul_fused(x, w, bias, *, pre_relu=False, post_relu=False,
                 col_mask=None, row_scale=None, residual=None, out_dtype=ACT_DTYPE):
    """y = epilogue(x @ w + bias).

    Without col_mask (per-sample channel mask), the batch axis is folded into the
    row axis so small per-sample spatial extents (stages 3/4) become a few
    full-height MXU tiles instead of many tiny grid steps.
    x: (B, M, K) or (M, K); w: (K, N); bias: (N,)
    col_mask:  (B, N)             (forces per-sample grid)
    row_scale: same leading shape as x's rows
    residual:  same shape as the output, added before post_relu
    """
    N_out = w.shape[1]
    if col_mask is None:
        lead = x.shape[:-1]
        x2 = x.reshape(-1, x.shape[-1])
        rs2 = None if row_scale is None else row_scale.reshape(-1)
        res2 = None if residual is None else residual.reshape(-1, residual.shape[-1])
        out = _matmul2d(x2, w, bias, pre_relu=pre_relu, post_relu=post_relu,
                        row_scale=rs2, residual=res2, out_dtype=out_dtype)
        return out.reshape(lead + (N_out,))
    return _matmul3d(x, w, bias, col_mask, pre_relu=pre_relu, post_relu=post_relu,
                     row_scale=row_scale, residual=residual, out_dtype=out_dtype)


def _conv3x3_kernel(*refs, wp, m, has_cm, has_rs):
    it = iter(refs)
    x_ref = next(it)
    w_ref = next(it)
    b_ref = next(it)
    cm_ref = next(it) if has_cm else None
    rs_ref = next(it) if has_rs else None
    o_ref = next(it)
    acc_ref = next(it)

    # Three sublane-aligned shifted-row matmuls (K = 3*Cin each), accumulated in a
    # persistent f32 VMEM scratch tile.
    acc_ref[...] = jnp.dot(x_ref[0, pl.ds(0, m), :], w_ref[0],
                           preferred_element_type=jnp.float32)
    acc_ref[...] += jnp.dot(x_ref[0, pl.ds(wp, m), :], w_ref[1],
                            preferred_element_type=jnp.float32)
    acc_ref[...] += jnp.dot(x_ref[0, pl.ds(2 * wp, m), :], w_ref[2],
                            preferred_element_type=jnp.float32)

    y = acc_ref[...] + b_ref[...]
    y = jnp.maximum(y, 0.0)                      # conv2 is always followed by ReLU
    if has_cm:
        y = y * cm_ref[0].astype(jnp.float32)
    if has_rs:
        y = y * rs_ref[0].astype(jnp.float32)
    o_ref[0] = y.astype(o_ref.dtype)


def conv3x3_s1_fused(x, w3, bias, *, col_mask=None, row_scale=None,
                     out_dtype=ACT_DTYPE):
    """3x3 / stride 1 / pad 1 conv + BN bias + ReLU + channel/spatial masks, fused.

    The wrapper merges the 3 horizontal taps into a K=3*Cin layout (xcat) and pads
    the row width to a multiple of 8, so the kernel only needs 3 sublane-aligned
    shifted-row matmuls (tap offsets 0, Wp, 2*Wp).
    x: (B,H,W,Cin); w3: (3, 3*Cin, Cout) (BN scale pre-folded, bf16);
    col_mask: (B,Cout); row_scale: (B,H,W,1).
    """
    B, H, W, Cin = x.shape
    Cout = w3.shape[-1]
    Hp = H + 2
    Wp = _round_up(W + 2, 8)
    M = H * Wp                               # output rows on the padded-width grid
    R = Hp * Wp
    vmem_limit, _ = _tpu_tuning()

    xp = jnp.pad(x.astype(ACT_DTYPE), ((0, 0), (1, 1), (1, Wp - W - 1), (0, 0)))
    xf = xp.reshape(B, R, Cin)
    xf = jnp.pad(xf, ((0, 0), (0, 2), (0, 0)))
    # xcat[:, r, kw*Cin:(kw+1)*Cin] = xf[:, r + kw]  (horizontal taps merged into K)
    xcat = jnp.concatenate([xf[:, 0:R], xf[:, 1:R + 1], xf[:, 2:R + 2]], axis=-1)

    TN = _choose_tn(Cout)
    n_n = Cout // TN

    args = [xcat, w3.astype(ACT_DTYPE), bias.reshape(1, Cout).astype(jnp.float32)]
    in_specs = [
        pl.BlockSpec((1, R, 3 * Cin), lambda b, j: (b, 0, 0)),
        pl.BlockSpec((3, 3 * Cin, TN), lambda b, j: (0, 0, j)),
        pl.BlockSpec((1, TN), lambda b, j: (0, j)),
    ]
    has_cm = col_mask is not None
    has_rs = row_scale is not None
    if has_cm:
        args.append(col_mask.reshape(B, 1, Cout).astype(ACT_DTYPE))
        in_specs.append(pl.BlockSpec((1, 1, TN), lambda b, j: (b, 0, j)))
    if has_rs:
        rs = jnp.pad(row_scale.reshape(B, H, W, 1).astype(ACT_DTYPE),
                     ((0, 0), (0, 0), (0, Wp - W), (0, 0))).reshape(B, M, 1)
        args.append(rs)
        in_specs.append(pl.BlockSpec((1, M, 1), lambda b, j: (b, 0, 0)))

    out = pl.pallas_call(
        functools.partial(_conv3x3_kernel, wp=Wp, m=M, has_cm=has_cm, has_rs=has_rs),
        out_shape=jax.ShapeDtypeStruct((B, M, Cout), out_dtype),
        grid=(B, n_n),
        in_specs=in_specs,
        out_specs=pl.BlockSpec((1, M, TN), lambda b, j: (b, 0, j)),
        scratch_shapes=[pltpu.VMEM((M, TN), jnp.float32)],
        compiler_params=pltpu.CompilerParams(
            dimension_semantics=("parallel", "parallel"),
            vmem_limit_bytes=vmem_limit),
    )(*args)
    # TODO(synk): the Wp->W compaction below costs one extra pass over the conv2
    # activations; carrying the padded layout into conv3 would need a padded residual.
    return out.reshape(B, H, Wp, Cout)[:, :, :W, :]


# ----------------------------------------------------------------------------
# Non-Pallas glue (XLA conv for stem / stride-2 3x3 with a fused jnp epilogue, pooling)
# ----------------------------------------------------------------------------
def conv_xla(x, w, stride, padding):
    # TODO(synk): 7x7 stem and stride-2 3x3 convs use XLA's native conv (strided tap
    # gathers have no clean BlockSpec form); bias/ReLU/mask epilogue is plain jnp so
    # XLA fuses it into the conv (no extra HBM round-trip).
    return lax.conv_general_dilated(
        x.astype(ACT_DTYPE), w.astype(ACT_DTYPE),
        window_strides=(stride, stride),
        padding=((padding, padding), (padding, padding)),
        dimension_numbers=('NHWC', 'HWIO', 'NHWC'),
        preferred_element_type=jnp.float32)


def max_pool(x, k, s, p):
    init = jnp.array(-jnp.inf, dtype=x.dtype)
    return lax.reduce_window(x, init, lax.max, (1, k, k, 1), (1, s, s, 1),
                             ((0, 0), (p, p), (p, p), (0, 0)))


# ----------------------------------------------------------------------------
# Parameter construction (deterministic, synthetic; BN scale pre-folded, bf16 weights)
# ----------------------------------------------------------------------------
def build_resdg_params(key, h, w, layers=(1, 1, 1, 1), num_classes=10):
    keys = list(jax.random.split(key, 512))
    kidx = [0]

    def nk():
        k = keys[kidx[0]]
        kidx[0] += 1
        return k

    def conv_w4(kh, kw, cin, cout):
        fan_out = cout * kh * kw
        return jax.random.normal(nk(), (kh, kw, cin, cout), jnp.float32) * math.sqrt(2.0 / fan_out)

    def bn_affine(c):
        # eval-mode BN with gamma=1, beta=0, running_mean=0, running_var=1
        scale = jnp.full((c,), 1.0 / math.sqrt(1.0 + BN_EPS), jnp.float32)
        return scale, jnp.zeros((c,), jnp.float32)

    def fold1x1(cin, cout):
        wconv = conv_w4(1, 1, cin, cout).reshape(cin, cout)
        s, b = bn_affine(cout)
        return (wconv * s[None, :]).astype(ACT_DTYPE), b

    params = {}
    w7 = conv_w4(7, 7, 3, 64)
    s7, b7 = bn_affine(64)
    params['conv1_w'] = (w7 * s7[None, None, None, :]).astype(ACT_DTYPE)
    params['conv1_b'] = b7
    h_c = (h + 6 - 7) // 2 + 1
    w_c = (w + 6 - 7) // 2 + 1
    params['flops_conv1'] = jnp.array([49.0 * h_c * w_c * 64 * 3], jnp.float32)
    h = (h_c + 2 - 3) // 2 + 1
    w = (w_c + 2 - 3) // 2 + 1

    # ResDG default: DPACS=True -> channels_prune = [False, False, True, True]
    channels_prune = [False, False, True, True]
    planes_list = [64, 128, 256, 512]
    strides = [1, 2, 2, 2]

    inplanes = 64
    blocks = []
    for stage in range(4):
        planes = planes_list[stage]
        for b in range(layers[stage]):
            stride = strides[stage] if b == 0 else 1
            width = planes
            out_c = planes * EXPANSION
            h2 = (h - 1) // stride + 1
            w2 = (w - 1) // stride + 1
            has_ds = (stride != 1) or (inplanes != out_c)
            channel_stage = channels_prune[stage]

            p = {}
            p['mask_s_w'] = (jax.random.normal(nk(), (inplanes, 1), jnp.float32)
                             * math.sqrt(2.0 / inplanes))
            if channel_stage:
                p['mask_c1_w'] = ((jax.random.normal(nk(), (inplanes, width), jnp.float32)
                                   * math.sqrt(2.0 / inplanes)).astype(ACT_DTYPE))
            p['conv1_w'], p['conv1_b'] = fold1x1(inplanes, width)
            w2r = conv_w4(3, 3, width, width)
            s2, bb2 = bn_affine(width)
            w2f = w2r * s2[None, None, None, :]
            if stride == 1:
                p['conv2_w'] = w2f.reshape(3, 3 * width, width).astype(ACT_DTYPE)
            else:
                p['conv2_w'] = w2f.astype(ACT_DTYPE)          # HWIO for XLA conv
            p['conv2_b'] = bb2
            p['conv3_w'], p['conv3_b'] = fold1x1(width, out_c)
            if has_ds:
                p['ds_w'], p['ds_b'] = fold1x1(inplanes, out_c)

            flops_ds = float(h2 * w2 * out_c * inplanes) if has_ds else 0.0
            flops_full = float(h * w * width * inplanes + 9 * h2 * w2 * width * width
                               + h2 * w2 * width * out_c) + flops_ds
            # TODO(synk): Mask_s/Mask_c.get_flops() source unavailable; estimated as 1x1-conv / FC cost.
            flops_mask = float((stride * h2) * (stride * w2) * inplanes)
            if channel_stage:
                flops_mask += float(inplanes * width)

            cfg = dict(inplanes=inplanes, width=width, out_c=out_c, stride=stride,
                       h1=h, w1=w, h2=h2, w2=w2,
                       channel_stage=channel_stage, has_ds=has_ds,
                       flops_ds=flops_ds, flops_full=flops_full, flops_mask=flops_mask)
            blocks.append((p, cfg))
            h, w = h2, w2
            inplanes = out_c
    params['blocks'] = blocks
    params['fc_w'] = ((jax.random.normal(nk(), (512 * EXPANSION, num_classes), jnp.float32)
                       * math.sqrt(1.0 / (512 * EXPANSION))).astype(ACT_DTYPE))
    params['fc_b'] = jnp.zeros((num_classes,), jnp.float32)
    params['flops_fc'] = jnp.array([float(512 * EXPANSION * num_classes)], jnp.float32)
    return params


# ----------------------------------------------------------------------------
# Forward pass
# ----------------------------------------------------------------------------
def bottleneck_forward(p, cfg, x, norm1_rows, norm2_rows, flops_rows, meta):
    N = x.shape[0]
    inp, width, out_c = cfg['inplanes'], cfg['width'], cfg['out_c']
    h1, w1, h2, w2, stride = cfg['h1'], cfg['w1'], cfg['h2'], cfg['w2'], cfg['stride']

    xf32 = x.astype(jnp.float32)

    # ---- Mask_s (DPACS): spatial gating at input resolution -----------------
    # TODO(synk): Mask_s source unavailable; representative 1x1-conv + hard threshold.
    ms_logit = jnp.einsum('nhwc,co->nhwo', xf32, p['mask_s_w'])        # (N,h1,w1,1)
    mask_s1 = (ms_logit > 0.0).astype(jnp.float32)
    norm_s = jnp.sum(mask_s1, axis=(1, 2, 3))
    norm_s_t = jnp.array([float(h1 * w1)], jnp.float32)
    if stride > 1:
        mask_s = lax.reduce_window(mask_s1, -jnp.inf, lax.max,
                                   (1, stride, stride, 1), (1, stride, stride, 1), 'VALID')
    else:
        mask_s = mask_s1                                               # (N,h2,w2,1)
    mask_s1_k = mask_s1.astype(ACT_DTYPE)                              # kernel copies (bf16)
    mask_s_k = mask_s.astype(ACT_DTYPE)

    # ---- Mask_c1 (DPACS channel gating) --------------------------------------
    if cfg['channel_stage']:
        # TODO(synk): DPACS Mask_c consumes `meta`; source unavailable -> GAP+FC gating.
        gap = jnp.mean(xf32, axis=(1, 2))                              # (N, inp)
        c_logit = matmul_fused(gap, p['mask_c1_w'],
                               jnp.zeros((width,), jnp.float32),
                               out_dtype=jnp.float32)                  # (N, width)
        mask_c1_vec = (c_logit > 0.0).astype(jnp.float32)
        mask_c1_k = mask_c1_vec.astype(ACT_DTYPE)
        norm_c1 = jnp.sum(mask_c1_vec, axis=1)
    else:
        mask_c1_vec = None
        mask_c1_k = None                                               # ones -> skip multiply
        norm_c1 = jnp.full((N,), float(width), jnp.float32)
    norm_c1_t = jnp.array([float(width)], jnp.float32)
    norm_c2 = jnp.full((N,), float(width), jnp.float32)                # DPACS: mask_c2 == ones
    norm_c2_t = jnp.array([float(width)], jnp.float32)

    # ---- conv1 (1x1) + bn1(bias) + relu + mask_c1 + mask_s1   (single fused kernel)
    out = matmul_fused(x.reshape(N, h1 * w1, inp), p['conv1_w'], p['conv1_b'],
                       pre_relu=True, col_mask=mask_c1_k,
                       row_scale=mask_s1_k.reshape(N, h1 * w1))
    out = out.reshape(N, h1, w1, width)

    # ---- conv2 (3x3, stride) + bn2 + relu + mask_c1 + mask_s -------------------
    if stride == 1:
        out = conv3x3_s1_fused(out, p['conv2_w'], p['conv2_b'],
                               col_mask=mask_c1_k, row_scale=mask_s_k)
        out = out.reshape(N, h2 * w2, width)
    else:
        y = conv_xla(out, p['conv2_w'], stride, 1)                     # (N,h2,w2,width) f32
        y = jnp.maximum(y + p['conv2_b'], 0.0)
        if mask_c1_vec is not None:
            y = y * mask_c1_vec[:, None, None, :]
        y = y * mask_s
        out = y.astype(ACT_DTYPE).reshape(N, h2 * w2, width)

    # ---- downsample identity ---------------------------------------------------
    if cfg['has_ds']:
        xs = x[:, ::stride, ::stride, :]
        identity = matmul_fused(xs.reshape(N, h2 * w2, inp), p['ds_w'], p['ds_b'])
    else:
        identity = x.reshape(N, h2 * w2, out_c)

    # ---- conv3 (1x1) + bn3 + mask_s + residual add + relu   (single fused kernel)
    # TODO(synk): meta['saliency_mask'] (pre-residual tensor) not materialized; the
    # Mask_c stub above does not consume it.
    out = matmul_fused(out, p['conv3_w'], p['conv3_b'],
                       row_scale=mask_s_k.reshape(N, h2 * w2),
                       residual=identity, post_relu=True)
    out = out.reshape(N, h2, w2, out_c)

    # ---- bookkeeping: norms & per-sample FLOPs --------------------------------
    norm1_rows.append(jnp.concatenate([norm_s, norm_s_t]))
    norm2_rows.append(jnp.concatenate([norm_c1, norm_c1_t]))
    norm2_rows.append(jnp.concatenate([norm_c2, norm_c2_t]))
    s_sum = jnp.sum(mask_s, axis=(1, 2, 3))
    s_sum_1 = jnp.sum(mask_s1, axis=(1, 2, 3))
    c1_sum = norm_c1
    c2_sum = norm_c2
    flops_conv1 = s_sum_1 * c1_sum * inp
    flops_conv2 = 9.0 * s_sum * c2_sum * c1_sum
    flops_conv3 = s_sum * out_c * c2_sum
    flops_b = flops_conv1 + flops_conv2 + flops_conv3 + cfg['flops_ds']
    flops_rows.append(jnp.concatenate([flops_b,
                                       jnp.array([cfg['flops_mask']], jnp.float32),
                                       jnp.array([cfg['flops_full']], jnp.float32)]))
    return out


def resdg_forward(params, x_nchw, label=None, den_target=0.5, lbda=1.0, gamma=1.0, p=2.0):
    x = jnp.transpose(x_nchw, (0, 2, 3, 1)).astype(jnp.float32)    # NCHW -> NHWC
    N = x.shape[0]

    # stem: 7x7 / stride 2 conv (XLA, BN scale pre-folded) + fused jnp bias+ReLU,
    # then 3x3 maxpool
    y = conv_xla(x, params['conv1_w'], 2, 3)
    y = jnp.maximum(y + params['conv1_b'], 0.0)
    x = max_pool(y.astype(ACT_DTYPE), 3, 2, 1)

    meta = {'stage_id': 0}
    norm1_rows = [jnp.zeros((N + 1,), jnp.float32)]
    norm2_rows = [jnp.zeros((N + 1,), jnp.float32)]
    flops_rows = [jnp.zeros((N + 2,), jnp.float32)]

    for p_blk, cfg in params['blocks']:
        x = bottleneck_forward(p_blk, cfg, x, norm1_rows, norm2_rows, flops_rows, meta)

    feat = jnp.mean(x.astype(jnp.float32), axis=(1, 2))            # AdaptiveAvgPool2d + flatten
    logits = matmul_fused(feat, params['fc_w'], params['fc_b'], out_dtype=jnp.float32)

    norm1 = jnp.stack(norm1_rows)
    norm2 = jnp.stack(norm2_rows)
    flops = jnp.stack(flops_rows)
    norm_s = jnp.transpose(norm1[1:, 0:N])
    norm_c = jnp.transpose(norm2[1:, 0:N])
    norm_s_t = norm1[1:, -1][None, :]
    norm_c_t = norm2[1:, -1][None, :]
    flops_real = [jnp.transpose(flops[1:, 0:N]), params['flops_conv1'], params['flops_fc']]
    flops_mask = flops[1:, -2][None, :]
    flops_ori = flops[1:, -1][None, :]

    outputs = {}
    # TODO(synk): self.criterion is set externally via set_criterion(); loss not reproducible here.
    outputs['closs'] = jnp.zeros((), jnp.float32)
    outputs['rloss'] = jnp.zeros((), jnp.float32)
    outputs['bloss'] = jnp.zeros((), jnp.float32)
    outputs['out'] = logits
    outputs['flops_real'] = flops_real
    outputs['flops_mask'] = flops_mask
    outputs['flops_ori'] = flops_ori
    outputs['norm_s'] = norm_s
    outputs['norm_c'] = norm_c
    outputs['norm_s_t'] = norm_s_t
    outputs['norm_c_t'] = norm_c_t
    return outputs


if __name__ == "__main__":
    key = jax.random.PRNGKey(0)
    kp, kx, kl = jax.random.split(key, 3)
    H = W = 32
    N = 2
    NUM_CLASSES = 10

    params = build_resdg_params(kp, H, W, layers=(1, 1, 1, 1), num_classes=NUM_CLASSES)
    x = jax.random.normal(kx, (N, 3, H, W), jnp.float32)
    label = jax.random.randint(kl, (N,), 0, NUM_CLASSES)

    fwd = jax.jit(lambda xx: resdg_forward(params, xx, label, 0.5, 1.0, 1.0, 2.0))
    outputs = fwd(x)
    jax.block_until_ready(outputs['out'])
    jax.block_until_ready(outputs['flops_real'][0])
    jax.block_until_ready(outputs['flops_mask'])
    print("KERNEL_OK")
</pallas_src>

<mosaic_0001>
module attributes {stable_mosaic.version = 11 : i64} {
  func.func @_mm2d_kernel(%arg0: i32, %arg1: i32, %arg2: memref<128x64xbf16, #tpu.memory_space<vmem>>, %arg3: memref<64x64xbf16, #tpu.memory_space<vmem>>, %arg4: memref<1x64xf32, #tpu.memory_space<vmem>>, %arg5: memref<128x1xbf16, #tpu.memory_space<vmem>>, %arg6: memref<128x64xbf16, #tpu.memory_space<vmem>>) attributes {dimension_semantics = [#tpu.dimension_semantics<parallel>, #tpu.dimension_semantics<parallel>], iteration_bounds = array<i64: 1, 1>, scalar_prefetch = 0 : i64, scratch_operands = 0 : i64, tpu.core_type = #tpu.core_type<tc>, window_params = [{transform_indices = @transform_0, window_bounds = array<i64: 128, 64>}, {transform_indices = @transform_1, window_bounds = array<i64: 64, 64>}, {transform_indices = @transform_2, window_bounds = array<i64: 1, 64>}, {transform_indices = @transform_3, window_bounds = array<i64: 128, 1>}, {transform_indices = @transform_4, window_bounds = array<i64: 128, 64>}]} {
    %c0 = arith.constant 0 : index
    %c0_0 = arith.constant 0 : index
    %0 = vector.load %arg2[%c0, %c0_0] : memref<128x64xbf16, #tpu.memory_space<vmem>>, vector<128x64xbf16>
    %c0_1 = arith.constant 0 : index
    %c0_2 = arith.constant 0 : index
    %1 = vector.load %arg3[%c0_1, %c0_2] : memref<64x64xbf16, #tpu.memory_space<vmem>>, vector<64x64xbf16>
    %cst = arith.constant dense<0.000000e+00> : vector<128x64xf32>
    %2 = tpu.matmul %0, %1, %cst {dimension_numbers = #tpu.dot_dimension_numbers<[1], [0], [0], [1], [0, 0, 1, 1], [], []>} : vector<128x64xbf16>, vector<64x64xbf16>, vector<128x64xf32> -> vector<128x64xf32>
    %c0_3 = arith.constant 0 : index
    %c0_4 = arith.constant 0 : index
    %3 = vector.load %arg4[%c0_3, %c0_4] : memref<1x64xf32, #tpu.memory_space<vmem>>, vector<1x64xf32>
    %4 = vector.broadcast %3 : vector<1x64xf32> to vector<128x64xf32>
    %5 = arith.addf %2, %4 : vector<128x64xf32>
    %cst_5 = arith.constant 0.000000e+00 : f32
    %6 = vector.broadcast %cst_5 : f32 to vector<128x64xf32>
    %7 = arith.maximumf %5, %6 : vector<128x64xf32>
    %c0_6 = arith.constant 0 : index
    %c0_7 = arith.constant 0 : index
    %8 = vector.load %arg5[%c0_6, %c0_7] : memref<128x1xbf16, #tpu.memory_space<vmem>>, vector<128x1xbf16>
    %9 = arith.extf %8 : vector<128x1xbf16> to vector<128x1xf32>
    %10 = vector.broadcast %9 : vector<128x1xf32> to vector<128x64xf32>
    %11 = arith.mulf %7, %10 : vector<128x64xf32>
    %12 = arith.truncf %11 : vector<128x64xf32> to vector<128x64xbf16>
    %c0_8 = arith.constant 0 : index
    %c0_9 = arith.constant 0 : index
    %13 = vector.load %arg6[%c0_8, %c0_9] : memref<128x64xbf16, #tpu.memory_space<vmem>>, vector<128x64xbf16>
    tpu.vector_store %arg6[%c0_8, %c0_9], %12 {strides = array<i32>} : memref<128x64xbf16, #tpu.memory_space<vmem>>, vector<128x64xbf16>,
    return
  }
  func.func @transform_0(%arg0: i32, %arg1: i32) -> (i32, i32) {
    %c0_i32 = arith.constant 0 : i32
    %c0_i32_0 = arith.constant 0 : i32
    return %arg0, %c0_i32 : i32, i32
  }
  func.func @transform_1(%arg0: i32, %arg1: i32) -> (i32, i32) {
    %c0_i32 = arith.constant 0 : i32
    %c0_i32_0 = arith.constant 0 : i32
    return %c0_i32, %arg1 : i32, i32
  }
  func.func @transform_2(%arg0: i32, %arg1: i32) -> (i32, i32) {
    %c0_i32 = arith.constant 0 : i32
    %c0_i32_0 = arith.constant 0 : i32
    return %c0_i32, %arg1 : i32, i32
  }
  func.func @transform_3(%arg0: i32, %arg1: i32) -> (i32, i32) {
    %c0_i32 = arith.constant 0 : i32
    %c0_i32_0 = arith.constant 0 : i32
    return %arg0, %c0_i32 : i32, i32
  }
  func.func @transform_4(%arg0: i32, %arg1: i32) -> (i32, i32) {
    %c0_i32 = arith.constant 0 : i32
    return %arg0, %arg1 : i32, i32
  }
}

module attributes {stable_mosaic.version = 11 : i64} {
  func.func @_conv3x3_kernel(%arg0: i32, %arg1: i32, %arg2: memref<1x160x192xbf16, #tpu.memory_space<vmem>>, %arg3: memref<3x192x64xbf16, #tpu.memory_space<vmem>>, %arg4: memref<1x64xf32, #tpu.memory_space<vmem>>, %arg5: memref<1x128x1xbf16, #tpu.memory_space<vmem>>, %arg6: memref<1x128x64xbf16, #tpu.memory_space<vmem>>, %arg7: memref<128x64xf32, #tpu.memory_space<vmem>>) attributes {dimension_semantics = [#tpu.dimension_semantics<parallel>, #tpu.dimension_semantics<parallel>], iteration_bounds = array<i64: 2, 1>, scalar_prefetch = 0 : i64, scratch_operands = 1 : i64, tpu.core_type = #tpu.core_type<tc>, window_params = [{transform_indices = @transform_0, window_bounds = array<i64: 1, 160, 192>}, {transform_indices = @transform_1, window_bounds = array<i64: 3, 192, 64>}, {transform_indices = @transform_2, window_bounds = array<i64: 1, 64>}, {transform_indices = @transform_3, window_bounds = array<i64: 1, 128, 1>}, {transform_indices = @transform_4, window_bounds = array<i64: 1, 128, 64>}]} {
    %c0 = arith.constant 0 : index
    %c0_0 = arith.constant 0 : index
    %c0_1 = arith.constant 0 : index
    %0 = vector.load %arg2[%c0, %c0_0, %c0_1] : memref<1x160x192xbf16, #tpu.memory_space<vmem>>, vector<1x128x192xbf16>
    %1 = vector.shape_cast %0 : vector<1x128x192xbf16> to vector<128x192xbf16>
    %c0_2 = arith.constant 0 : index
    %c0_3 = arith.constant 0 : index
    %c0_4 = arith.constant 0 : index
    %2 = vector.load %arg3[%c0_2, %c0_3, %c0_4] : memref<3x192x64xbf16, #tpu.memory_space<vmem>>, vector<1x192x64xbf16>
    %3 = vector.shape_cast %2 : vector<1x192x64xbf16> to vector<192x64xbf16>
    %cst = arith.constant dense<0.000000e+00> : vector<128x64xf32>
    %4 = tpu.matmul %1, %3, %cst {dimension_numbers = #tpu.dot_dimension_numbers<[1], [0], [0], [1], [0, 0, 1, 1], [], []>} : vector<128x192xbf16>, vector<192x64xbf16>, vector<128x64xf32> -> vector<128x64xf32>
    %c0_5 = arith.constant 0 : index
    %c0_6 = arith.constant 0 : index
    %5 = vector.load %arg7[%c0_5, %c0_6] : memref<128x64xf32, #tpu.memory_space<vmem>>, vector<128x64xf32>
    tpu.vector_store %arg7[%c0_5, %c0_6], %4 {strides = array<i32>} : memref<128x64xf32, #tpu.memory_space<vmem>>, vector<128x64xf32>,
    %c0_7 = arith.constant 0 : index
    %c0_8 = arith.constant 0 : index
    %6 = vector.load %arg7[%c0_7, %c0_8] : memref<128x64xf32, #tpu.memory_space<vmem>>, vector<128x64xf32>
    %c0_9 = arith.constant 0 : index
    %c16 = arith.constant 16 : index
    %c0_10 = arith.constant 0 : index
    %7 = vector.load %arg2[%c0_9, %c16, %c0_10] : memref<1x160x192xbf16, #tpu.memory_space<vmem>>, vector<1x128x192xbf16>
    %8 = vector.shape_cast %7 : vector<1x128x192xbf16> to vector<128x192xbf16>
    %c1 = arith.constant 1 : index
    %c0_11 = arith.constant 0 : index
    %c0_12 = arith.constant 0 : index
    %9 = vector.load %arg3[%c1, %c0_11, %c0_12] : memref<3x192x64xbf16, #tpu.memory_space<vmem>>, vector<1x192x64xbf16>
    %10 = vector.shape_cast %9 : vector<1x192x64xbf16> to vector<192x64xbf16>
    %cst_13 = arith.constant dense<0.000000e+00> : vector<128x64xf32>
    %11 = tpu.matmul %8, %10, %cst_13 {dimension_numbers = #tpu.dot_dimension_numbers<[1], [0], [0], [1], [0, 0, 1, 1], [], []>} : vector<128x192xbf16>, vector<192x64xbf16>, vector<128x64xf32> -> vector<128x64xf32>
    %12 = arith.addf %6, %11 : vector<128x64xf32>
    %c0_14 = arith.constant 0 : index
    %c0_15 = arith.constant 0 : index
    %13 = vector.load %arg7[%c0_14, %c0_15] : memref<128x64xf32, #tpu.memory_space<vmem>>, vector<128x64xf32>
    tpu.vector_store %arg7[%c0_14, %c0_15], %12 {strides = array<i32>} : memref<128x64xf32, #tpu.memory_space<vmem>>, vector<128x64xf32>,
    %c0_16 = arith.constant 0 : index
    %c0_17 = arith.constant 0 : index
    %14 = vector.load %arg7[%c0_16, %c0_17] : memref<128x64xf32, #tpu.memory_space<vmem>>, vector<128x64xf32>
    %c0_18 = arith.constant 0 : index
    %c32 = arith.constant 32 : index
    %c0_19 = arith.constant 0 : index
    %15 = vector.load %arg2[%c0_18, %c32, %c0_19] : memref<1x160x192xbf16, #tpu.memory_space<vmem>>, vector<1x128x192xbf16>
    %16 = vector.shape_cast %15 : vector<1x128x192xbf16> to vector<128x192xbf16>
    %c2 = arith.constant 2 : index
    %c0_20 = arith.constant 0 : index
    %c0_21 = arith.constant 0 : index
    %17 = vector.load %arg3[%c2, %c0_20, %c0_21] : memref<3x192x64xbf16, #tpu.memory_space<vmem>>, vector<1x192x64xbf16>
    %18 = vector.shape_cast %17 : vector<1x192x64xbf16> to vector<192x64xbf16>
    %cst_22 = arith.constant dense<0.000000e+00> : vector<128x64xf32>
    %19 = tpu.matmul %16, %18, %cst_22 {dimension_numbers = #tpu.dot_dimension_numbers<[1], [0], [0], [1], [0, 0, 1, 1], [], []>} : vector<128x192xbf16>, vector<192x64xbf16>, vector<128x64xf32> -> vector<128x64xf32>
    %20 = arith.addf %14, %19 : vector<128x64xf32>
    %c0_23 = arith.constant 0 : index
    %c0_24 = arith.constant 0 : index
    %21 = vector.load %arg7[%c0_23, %c0_24] : memref<128x64xf32, #tpu.memory_space<vmem>>, vector<128x64xf32>
    tpu.vector_store %arg7[%c0_23, %c0_24], %20 {strides = array<i32>} : memref<128x64xf32, #tpu.memory_space<vmem>>, vector<128x64xf32>,
    %c0_25 = arith.constant 0 : index
    %c0_26 = arith.constant 0 : index
    %22 = vector.load %arg7[%c0_25, %c0_26] : memref<128x64xf32, #tpu.memory_space<vmem>>, vector<128x64xf32>
    %c0_27 = arith.constant 0 : index
    %c0_28 = arith.constant 0 : index
    %23 = vector.load %arg4[%c0_27, %c0_28] : memref<1x64xf32, #tpu.memory_space<vmem>>, vector<1x64xf32>
    %24 = vector.broadcast %23 : vector<1x64xf32> to vector<128x64xf32>
    %25 = arith.addf %22, %24 : vector<128x64xf32>
    %cst_29 = arith.constant 0.000000e+00 : f32
    %26 = vector.broadcast %cst_29 : f32 to vector<128x64xf32>
    %27 = arith.maximumf %25, %26 : vector<128x64xf32>
    %c0_30 = arith.constant 0 : index
    %c0_31 = arith.constant 0 : index
    %c0_32 = arith.constant 0 : index
    %28 = vector.load %arg5[%c0_30, %c0_31, %c0_32] : memref<1x128x1xbf16, #tpu.memory_space<vmem>>, vector<1x128x1xbf16>
    %29 = vector.shape_cast %28 : vector<1x128x1xbf16> to vector<128x1xbf16>
    %30 = arith.extf %29 : vector<128x1xbf16> to vector<128x1xf32>
    %31 = vector.broadcast %30 : vector<128x1xf32> to vector<128x64xf32>
    %32 = arith.mulf %27, %31 : vector<128x64xf32>
    %33 = arith.truncf %32 : vector<128x64xf32> to vector<128x64xbf16>
    %c0_33 = arith.constant 0 : index
    %c0_34 = arith.constant 0 : index
    %c0_35 = arith.constant 0 : index
    %34 = vector.load %arg6[%c0_33, %c0_34, %c0_35] : memref<1x128x64xbf16, #tpu.memory_space<vmem>>, vector<1x128x64xbf16>
    %35 = vector.shape_cast %34 : vector<1x128x64xbf16> to vector<128x64xbf16>
    %36 = vector.shape_cast %33 : vector<128x64xbf16> to vector<1x128x64xbf16>
    tpu.vector_store %arg6[%c0_33, %c0_34, %c0_35], %36 {strides = array<i32>} : memref<1x128x64xbf16, #tpu.memory_space<vmem>>, vector<1x128x64xbf16>,
    return
  }
  func.func @transform_0(%arg0: i32, %arg1: i32) -> (i32, i32, i32) {
    %c0_i32 = arith.constant 0 : i32
    %c0_i32_0 = arith.constant 0 : i32
    %c0_i32_1 = arith.constant 0 : i32
    return %arg0, %c0_i32, %c0_i32_0 : i32, i32, i32
  }
  func.func @transform_1(%arg0: i32, %arg1: i32) -> (i32, i32, i32) {
    %c0_i32 = arith.constant 0 : i32
    %c0_i32_0 = arith.constant 0 : i32
    %c0_i32_1 = arith.constant 0 : i32
    return %c0_i32, %c0_i32_0, %arg1 : i32, i32, i32
  }
  func.func @transform_2(%arg0: i32, %arg1: i32) -> (i32, i32) {
    %c0_i32 = arith.constant 0 : i32
    %c0_i32_0 = arith.constant 0 : i32
    return %c0_i32, %arg1 : i32, i32
  }
  func.func @transform_3(%arg0: i32, %arg1: i32) -> (i32, i32, i32) {
    %c0_i32 = arith.constant 0 : i32
    %c0_i32_0 = arith.constant 0 : i32
    %c0_i32_1 = arith.constant 0 : i32
    return %arg0, %c0_i32, %c0_i32_0 : i32, i32, i32
  }
  func.func @transform_4(%arg0: i32, %arg1: i32) -> (i32, i32, i32) {
    %c0_i32 = arith.constant 0 : i32
    %c0_i32_0 = arith.constant 0 : i32
    return %arg0, %c0_i32, %arg1 : i32, i32, i32
  }
}

module attributes {stable_mosaic.version = 11 : i64} {
  func.func @_mm2d_kernel(%arg0: i32, %arg1: i32, %arg2: memref<128x64xbf16, #tpu.memory_space<vmem>>, %arg3: memref<64x256xbf16, #tpu.memory_space<vmem>>, %arg4: memref<1x256xf32, #tpu.memory_space<vmem>>, %arg5: memref<128x256xbf16, #tpu.memory_space<vmem>>) attributes {dimension_semantics = [#tpu.dimension_semantics<parallel>, #tpu.dimension_semantics<parallel>], iteration_bounds = array<i64: 1, 1>, scalar_prefetch = 0 : i64, scratch_operands = 0 : i64, tpu.core_type = #tpu.core_type<tc>, window_params = [{transform_indices = @transform_0, window_bounds = array<i64: 128, 64>}, {transform_indices = @transform_1, window_bounds = array<i64: 64, 256>}, {transform_indices = @transform_2, window_bounds = array<i64: 1, 256>}, {transform_indices = @transform_3, window_bounds = array<i64: 128, 256>}]} {
    %c0 = arith.constant 0 : index
    %c0_0 = arith.constant 0 : index
    %0 = vector.load %arg2[%c0, %c0_0] : memref<128x64xbf16, #tpu.memory_space<vmem>>, vector<128x64xbf16>
    %c0_1 = arith.constant 0 : index
    %c0_2 = arith.constant 0 : index
    %1 = vector.load %arg3[%c0_1, %c0_2] : memref<64x256xbf16, #tpu.memory_space<vmem>>, vector<64x256xbf16>
    %cst = arith.constant dense<0.000000e+00> : vector<128x256xf32>
    %2 = tpu.matmul %0, %1, %cst {dimension_numbers = #tpu.dot_dimension_numbers<[1], [0], [0], [1], [0, 0, 1, 1], [], []>} : vector<128x64xbf16>, vector<64x256xbf16>, vector<128x256xf32> -> vector<128x256xf32>
    %c0_3 = arith.constant 0 : index
    %c0_4 = arith.constant 0 : index
    %3 = vector.load %arg4[%c0_3, %c0_4] : memref<1x256xf32, #tpu.memory_space<vmem>>, vector<1x256xf32>
    %4 = vector.broadcast %3 : vector<1x256xf32> to vector<128x256xf32>
    %5 = arith.addf %2, %4 : vector<128x256xf32>
    %6 = arith.truncf %5 : vector<128x256xf32> to vector<128x256xbf16>
    %c0_5 = arith.constant 0 : index
    %c0_6 = arith.constant 0 : index
    %7 = vector.load %arg5[%c0_5, %c0_6] : memref<128x256xbf16, #tpu.memory_space<vmem>>, vector<128x256xbf16>
    tpu.vector_store %arg5[%c0_5, %c0_6], %6 {strides = array<i32>} : memref<128x256xbf16, #tpu.memory_space<vmem>>, vector<128x256xbf16>,
    return
  }
  func.func @transform_0(%arg0: i32, %arg1: i32) -> (i32, i32) {
    %c0_i32 = arith.constant 0 : i32
    %c0_i32_0 = arith.constant 0 : i32
    return %arg0, %c0_i32 : i32, i32
  }
  func.func @transform_1(%arg0: i32, %arg1: i32) -> (i32, i32) {
    %c0_i32 = arith.constant 0 : i32
    %c0_i32_0 = arith.constant 0 : i32
    return %c0_i32, %arg1 : i32, i32
  }
  func.func @transform_2(%arg0: i32, %arg1: i32) -> (i32, i32) {
    %c0_i32 = arith.constant 0 : i32
    %c0_i32_0 = arith.constant 0 : i32
    return %c0_i32, %arg1 : i32, i32
  }
  func.func @transform_3(%arg0: i32, %arg1: i32) -> (i32, i32) {
    %c0_i32 = arith.constant 0 : i32
    return %arg0, %arg1 : i32, i32
  }
}

module attributes {stable_mosaic.version = 11 : i64} {
  func.func @_mm2d_kernel(%arg0: i32, %arg1: i32, %arg2: memref<128x64xbf16, #tpu.memory_space<vmem>>, %arg3: memref<64x256xbf16, #tpu.memory_space<vmem>>, %arg4: memref<1x256xf32, #tpu.memory_space<vmem>>, %arg5: memref<128x1xbf16, #tpu.memory_space<vmem>>, %arg6: memref<128x256xbf16, #tpu.memory_space<vmem>>, %arg7: memref<128x256xbf16, #tpu.memory_space<vmem>>) attributes {dimension_semantics = [#tpu.dimension_semantics<parallel>, #tpu.dimension_semantics<parallel>], iteration_bounds = array<i64: 1, 1>, scalar_prefetch = 0 : i64, scratch_operands = 0 : i64, tpu.core_type = #tpu.core_type<tc>, window_params = [{transform_indices = @transform_0, window_bounds = array<i64: 128, 64>}, {transform_indices = @transform_1, window_bounds = array<i64: 64, 256>}, {transform_indices = @transform_2, window_bounds = array<i64: 1, 256>}, {transform_indices = @transform_3, window_bounds = array<i64: 128, 1>}, {transform_indices = @transform_4, window_bounds = array<i64: 128, 256>}, {transform_indices = @transform_5, window_bounds = array<i64: 128, 256>}]} {
    %c0 = arith.constant 0 : index
    %c0_0 = arith.constant 0 : index
    %0 = vector.load %arg2[%c0, %c0_0] : memref<128x64xbf16, #tpu.memory_space<vmem>>, vector<128x64xbf16>
    %c0_1 = arith.constant 0 : index
    %c0_2 = arith.constant 0 : index
    %1 = vector.load %arg3[%c0_1, %c0_2] : memref<64x256xbf16, #tpu.memory_space<vmem>>, vector<64x256xbf16>
    %cst = arith.constant dense<0.000000e+00> : vector<128x256xf32>
    %2 = tpu.matmul %0, %1, %cst {dimension_numbers = #tpu.dot_dimension_numbers<[1], [0], [0], [1], [0, 0, 1, 1], [], []>} : vector<128x64xbf16>, vector<64x256xbf16>, vector<128x256xf32> -> vector<128x256xf32>
    %c0_3 = arith.constant 0 : index
    %c0_4 = arith.constant 0 : index
    %3 = vector.load %arg4[%c0_3, %c0_4] : memref<1x256xf32, #tpu.memory_space<vmem>>, vector<1x256xf32>
    %4 = vector.broadcast %3 : vector<1x256xf32> to vector<128x256xf32>
    %5 = arith.addf %2, %4 : vector<128x256xf32>
    %c0_5 = arith.constant 0 : index
    %c0_6 = arith.constant 0 : index
    %6 = vector.load %arg5[%c0_5, %c0_6] : memref<128x1xbf16, #tpu.memory_space<vmem>>, vector<128x1xbf16>
    %7 = arith.extf %6 : vector<128x1xbf16> to vector<128x1xf32>
    %8 = vector.broadcast %7 : vector<128x1xf32> to vector<128x256xf32>
    %9 = arith.mulf %5, %8 : vector<128x256xf32>
    %c0_7 = arith.constant 0 : index
    %c0_8 = arith.constant 0 : index
    %10 = vector.load %arg6[%c0_7, %c0_8] : memref<128x256xbf16, #tpu.memory_space<vmem>>, vector<128x256xbf16>
    %11 = arith.extf %10 : vector<128x256xbf16> to vector<128x256xf32>
    %12 = arith.addf %9, %11 : vector<128x256xf32>
    %cst_9 = arith.constant 0.000000e+00 : f32
    %13 = vector.broadcast %cst_9 : f32 to vector<128x256xf32>
    %14 = arith.maximumf %12, %13 : vector<128x256xf32>
    %15 = arith.truncf %14 : vector<128x256xf32> to vector<128x256xbf16>
    %c0_10 = arith.constant 0 : index
    %c0_11 = arith.constant 0 : index
    %16 = vector.load %arg7[%c0_10, %c0_11] : memref<128x256xbf16, #tpu.memory_space<vmem>>, vector<128x256xbf16>
    tpu.vector_store %arg7[%c0_10, %c0_11], %15 {strides = array<i32>} : memref<128x256xbf16, #tpu.memory_space<vmem>>, vector<128x256xbf16>,
    return
  }
  func.func @transform_0(%arg0: i32, %arg1: i32) -> (i32, i32) {
    %c0_i32 = arith.constant 0 : i32
    %c0_i32_0 = arith.constant 0 : i32
    return %arg0, %c0_i32 : i32, i32
  }
  func.func @transform_1(%arg0: i32, %arg1: i32) -> (i32, i32) {
    %c0_i32 = arith.constant 0 : i32
    %c0_i32_0 = arith.constant 0 : i32
    return %c0_i32, %arg1 : i32, i32
  }
  func.func @transform_2(%arg0: i32, %arg1: i32) -> (i32, i32) {
    %c0_i32 = arith.constant 0 : i32
    %c0_i32_0 = arith.constant 0 : i32
    return %c0_i32, %arg1 : i32, i32
  }
  func.func @transform_3(%arg0: i32, %arg1: i32) -> (i32, i32) {
    %c0_i32 = arith.constant 0 : i32
    %c0_i32_0 = arith.constant 0 : i32
    return %arg0, %c0_i32 : i32, i32
  }
  func.func @transform_4(%arg0: i32, %arg1: i32) -> (i32, i32) {
    %c0_i32 = arith.constant 0 : i32
    return %arg0, %arg1 : i32, i32
  }
  func.func @transform_5(%arg0: i32, %arg1: i32) -> (i32, i32) {
    %c0_i32 = arith.constant 0 : i32
    return %arg0, %arg1 : i32, i32
  }
}

module attributes {stable_mosaic.version = 11 : i64} {
  func.func @_mm2d_kernel(%arg0: i32, %arg1: i32, %arg2: memref<128x256xbf16, #tpu.memory_space<vmem>>, %arg3: memref<256x128xbf16, #tpu.memory_space<vmem>>, %arg4: memref<1x128xf32, #tpu.memory_space<vmem>>, %arg5: memref<128x1xbf16, #tpu.memory_space<vmem>>, %arg6: memref<128x128xbf16, #tpu.memory_space<vmem>>) attributes {dimension_semantics = [#tpu.dimension_semantics<parallel>, #tpu.dimension_semantics<parallel>], iteration_bounds = array<i64: 1, 1>, scalar_prefetch = 0 : i64, scratch_operands = 0 : i64, tpu.core_type = #tpu.core_type<tc>, window_params = [{transform_indices = @transform_0, window_bounds = array<i64: 128, 256>}, {transform_indices = @transform_1, window_bounds = array<i64: 256, 128>}, {transform_indices = @transform_2, window_bounds = array<i64: 1, 128>}, {transform_indices = @transform_3, window_bounds = array<i64: 128, 1>}, {transform_indices = @transform_4, window_bounds = array<i64: 128, 128>}]} {
    %c0 = arith.constant 0 : index
    %c0_0 = arith.constant 0 : index
    %0 = vector.load %arg2[%c0, %c0_0] : memref<128x256xbf16, #tpu.memory_space<vmem>>, vector<128x256xbf16>
    %c0_1 = arith.constant 0 : index
    %c0_2 = arith.constant 0 : index
    %1 = vector.load %arg3[%c0_1, %c0_2] : memref<256x128xbf16, #tpu.memory_space<vmem>>, vector<256x128xbf16>
    %cst = arith.constant dense<0.000000e+00> : vector<128x128xf32>
    %2 = tpu.matmul %0, %1, %cst {dimension_numbers = #tpu.dot_dimension_numbers<[1], [0], [0], [1], [0, 0, 1, 1], [], []>} : vector<128x256xbf16>, vector<256x128xbf16>, vector<128x128xf32> -> vector<128x128xf32>
    %c0_3 = arith.constant 0 : index
    %c0_4 = arith.constant 0 : index
    %3 = vector.load %arg4[%c0_3, %c0_4] : memref<1x128xf32, #tpu.memory_space<vmem>>, vector<1x128xf32>
    %4 = vector.broadcast %3 : vector<1x128xf32> to vector<128x128xf32>
    %5 = arith.addf %2, %4 : vector<128x128xf32>
    %cst_5 = arith.constant 0.000000e+00 : f32
    %6 = vector.broadcast %cst_5 : f32 to vector<128x128xf32>
    %7 = arith.maximumf %5, %6 : vector<128x128xf32>
    %c0_6 = arith.constant 0 : index
    %c0_7 = arith.constant 0 : index
    %8 = vector.load %arg5[%c0_6, %c0_7] : memref<128x1xbf16, #tpu.memory_space<vmem>>, vector<128x1xbf16>
    %9 = arith.extf %8 : vector<128x1xbf16> to vector<128x1xf32>
    %10 = vector.broadcast %9 : vector<128x1xf32> to vector<128x128xf32>
    %11 = arith.mulf %7, %10 : vector<128x128xf32>
    %12 = arith.truncf %11 : vector<128x128xf32> to vector<128x128xbf16>
    %c0_8 = arith.constant 0 : index
    %c0_9 = arith.constant 0 : index
    %13 = vector.load %arg6[%c0_8, %c0_9] : memref<128x128xbf16, #tpu.memory_space<vmem>>, vector<128x128xbf16>
    tpu.vector_store %arg6[%c0_8, %c0_9], %12 {strides = array<i32>} : memref<128x128xbf16, #tpu.memory_space<vmem>>, vector<128x128xbf16>,
    return
  }
  func.func @transform_0(%arg0: i32, %arg1: i32) -> (i32, i32) {
    %c0_i32 = arith.constant 0 : i32
    %c0_i32_0 = arith.constant 0 : i32
    return %arg0, %c0_i32 : i32, i32
  }
  func.func @transform_1(%arg0: i32, %arg1: i32) -> (i32, i32) {
    %c0_i32 = arith.constant 0 : i32
    %c0_i32_0 = arith.constant 0 : i32
    return %c0_i32, %arg1 : i32, i32
  }
  func.func @transform_2(%arg0: i32, %arg1: i32) -> (i32, i32) {
    %c0_i32 = arith.constant 0 : i32
    %c0_i32_0 = arith.constant 0 : i32
    return %c0_i32, %arg1 : i32, i32
  }
  func.func @transform_3(%arg0: i32, %arg1: i32) -> (i32, i32) {
    %c0_i32 = arith.constant 0 : i32
    %c0_i32_0 = arith.constant 0 : i32
    return %arg0, %c0_i32 : i32, i32
  }
  func.func @transform_4(%arg0: i32, %arg1: i32) -> (i32, i32) {
    %c0_i32 = arith.constant 0 : i32
    return %arg0, %arg1 : i32, i32
  }
}

module attributes {stable_mosaic.version = 11 : i64} {
  func.func @_mm2d_kernel(%arg0: i32, %arg1: i32, %arg2: memref<32x256xbf16, #tpu.memory_space<vmem>>, %arg3: memref<256x256xbf16, #tpu.memory_space<vmem>>, %arg4: memref<1x256xf32, #tpu.memory_space<vmem>>, %arg5: memref<32x256xbf16, #tpu.memory_space<vmem>>) attributes {dimension_semantics = [#tpu.dimension_semantics<parallel>, #tpu.dimension_semantics<parallel>], iteration_bounds = array<i64: 2, 1>, scalar_prefetch = 0 : i64, scratch_operands = 0 : i64, tpu.core_type = #tpu.core_type<tc>, window_params = [{transform_indices = @transform_0, window_bounds = array<i64: 32, 256>}, {transform_indices = @transform_1, window_bounds = array<i64: 256, 256>}, {transform_indices = @transform_2, window_bounds = array<i64: 1, 256>}, {transform_indices = @transform_3, window_bounds = array<i64: 32, 256>}]} {
    %c0 = arith.constant 0 : index
    %c0_0 = arith.constant 0 : index
    %0 = vector.load %arg2[%c0, %c0_0] : memref<32x256xbf16, #tpu.memory_space<vmem>>, vector<32x256xbf16>
    %c0_1 = arith.constant 0 : index
    %c0_2 = arith.constant 0 : index
    %1 = vector.load %arg3[%c0_1, %c0_2] : memref<256x256xbf16, #tpu.memory_space<vmem>>, vector<256x256xbf16>
    %cst = arith.constant dense<0.000000e+00> : vector<32x256xf32>
    %2 = tpu.matmul %0, %1, %cst {dimension_numbers = #tpu.dot_dimension_numbers<[1], [0], [0], [1], [0, 0, 1, 1], [], []>} : vector<32x256xbf16>, vector<256x256xbf16>, vector<32x256xf32> -> vector<32x256xf32>
    %c0_3 = arith.constant 0 : index
    %c0_4 = arith.constant 0 : index
    %3 = vector.load %arg4[%c0_3, %c0_4] : memref<1x256xf32, #tpu.memory_space<vmem>>, vector<1x256xf32>
    %4 = vector.broadcast %3 : vector<1x256xf32> to vector<32x256xf32>
    %5 = arith.addf %2, %4 : vector<32x256xf32>
    %6 = arith.truncf %5 : vector<32x256xf32> to vector<32x256xbf16>
    %c0_5 = arith.constant 0 : index
    %c0_6 = arith.constant 0 : index
    %7 = vector.load %arg5[%c0_5, %c0_6] : memref<32x256xbf16, #tpu.memory_space<vmem>>, vector<32x256xbf16>
    tpu.vector_store %arg5[%c0_5, %c0_6], %6 {strides = array<i32>} : memref<32x256xbf16, #tpu.memory_space<vmem>>, vector<32x256xbf16>,
    return
  }
  func.func @transform_0(%arg0: i32, %arg1: i32) -> (i32, i32) {
    %c0_i32 = arith.constant 0 : i32
    %c0_i32_0 = arith.constant 0 : i32
    return %arg1, %c0_i32 : i32, i32
  }
  func.func @transform_1(%arg0: i32, %arg1: i32) -> (i32, i32) {
    %c0_i32 = arith.constant 0 : i32
    %c0_i32_0 = arith.constant 0 : i32
    return %c0_i32, %arg0 : i32, i32
  }
  func.func @transform_2(%arg0: i32, %arg1: i32) -> (i32, i32) {
    %c0_i32 = arith.constant 0 : i32
    %c0_i32_0 = arith.constant 0 : i32
    return %c0_i32, %arg0 : i32, i32
  }
  func.func @transform_3(%arg0: i32, %arg1: i32) -> (i32, i32) {
    %c0_i32 = arith.constant 0 : i32
    return %arg1, %arg0 : i32, i32
  }
}

module attributes {stable_mosaic.version = 11 : i64} {
  func.func @_mm2d_kernel(%arg0: i32, %arg1: i32, %arg2: memref<32x128xbf16, #tpu.memory_space<vmem>>, %arg3: memref<128x256xbf16, #tpu.memory_space<vmem>>, %arg4: memref<1x256xf32, #tpu.memory_space<vmem>>, %arg5: memref<32x1xbf16, #tpu.memory_space<vmem>>, %arg6: memref<32x256xbf16, #tpu.memory_space<vmem>>, %arg7: memref<32x256xbf16, #tpu.memory_space<vmem>>) attributes {dimension_semantics = [#tpu.dimension_semantics<parallel>, #tpu.dimension_semantics<parallel>], iteration_bounds = array<i64: 2, 1>, scalar_prefetch = 0 : i64, scratch_operands = 0 : i64, tpu.core_type = #tpu.core_type<tc>, window_params = [{transform_indices = @transform_0, window_bounds = array<i64: 32, 128>}, {transform_indices = @transform_1, window_bounds = array<i64: 128, 256>}, {transform_indices = @transform_2, window_bounds = array<i64: 1, 256>}, {transform_indices = @transform_3, window_bounds = array<i64: 32, 1>}, {transform_indices = @transform_4, window_bounds = array<i64: 32, 256>}, {transform_indices = @transform_5, window_bounds = array<i64: 32, 256>}]} {
    %c0 = arith.constant 0 : index
    %c0_0 = arith.constant 0 : index
    %0 = vector.load %arg2[%c0, %c0_0] : memref<32x128xbf16, #tpu.memory_space<vmem>>, vector<32x128xbf16>
    %c0_1 = arith.constant 0 : index
    %c0_2 = arith.constant 0 : index
    %1 = vector.load %arg3[%c0_1, %c0_2] : memref<128x256xbf16, #tpu.memory_space<vmem>>, vector<128x256xbf16>
    %cst = arith.constant dense<0.000000e+00> : vector<32x256xf32>
    %2 = tpu.matmul %0, %1, %cst {dimension_numbers = #tpu.dot_dimension_numbers<[1], [0], [0], [1], [0, 0, 1, 1], [], []>} : vector<32x128xbf16>, vector<128x256xbf16>, vector<32x256xf32> -> vector<32x256xf32>
    %c0_3 = arith.constant 0 : index
    %c0_4 = arith.constant 0 : index
    %3 = vector.load %arg4[%c0_3, %c0_4] : memref<1x256xf32, #tpu.memory_space<vmem>>, vector<1x256xf32>
    %4 = vector.broadcast %3 : vector<1x256xf32> to vector<32x256xf32>
    %5 = arith.addf %2, %4 : vector<32x256xf32>
    %c0_5 = arith.constant 0 : index
    %c0_6 = arith.constant 0 : index
    %6 = vector.load %arg5[%c0_5, %c0_6] : memref<32x1xbf16, #tpu.memory_space<vmem>>, vector<32x1xbf16>
    %7 = arith.extf %6 : vector<32x1xbf16> to vector<32x1xf32>
    %8 = vector.broadcast %7 : vector<32x1xf32> to vector<32x256xf32>
    %9 = arith.mulf %5, %8 : vector<32x256xf32>
    %c0_7 = arith.constant 0 : index
    %c0_8 = arith.constant 0 : index
    %10 = vector.load %arg6[%c0_7, %c0_8] : memref<32x256xbf16, #tpu.memory_space<vmem>>, vector<32x256xbf16>
    %11 = arith.extf %10 : vector<32x256xbf16> to vector<32x256xf32>
    %12 = arith.addf %9, %11 : vector<32x256xf32>
    %cst_9 = arith.constant 0.000000e+00 : f32
    %13 = vector.broadcast %cst_9 : f32 to vector<32x256xf32>
    %14 = arith.maximumf %12, %13 : vector<32x256xf32>
    %15 = arith.truncf %14 : vector<32x256xf32> to vector<32x256xbf16>
    %c0_10 = arith.constant 0 : index
    %c0_11 = arith.constant 0 : index
    %16 = vector.load %arg7[%c0_10, %c0_11] : memref<32x256xbf16, #tpu.memory_space<vmem>>, vector<32x256xbf16>
    tpu.vector_store %arg7[%c0_10, %c0_11], %15 {strides = array<i32>} : memref<32x256xbf16, #tpu.memory_space<vmem>>, vector<32x256xbf16>,
    return
  }
  func.func @transform_0(%arg0: i32, %arg1: i32) -> (i32, i32) {
    %c0_i32 = arith.constant 0 : i32
    %c0_i32_0 = arith.constant 0 : i32
    return %arg1, %c0_i32 : i32, i32
  }
  func.func @transform_1(%arg0: i32, %arg1: i32) -> (i32, i32) {
    %c0_i32 = arith.constant 0 : i32
    %c0_i32_0 = arith.constant 0 : i32
    return %c0_i32, %arg0 : i32, i32
  }
  func.func @transform_2(%arg0: i32, %arg1: i32) -> (i32, i32) {
    %c0_i32 = arith.constant 0 : i32
    %c0_i32_0 = arith.constant 0 : i32
    return %c0_i32, %arg0 : i32, i32
  }
  func.func @transform_3(%arg0: i32, %arg1: i32) -> (i32, i32) {
    %c0_i32 = arith.constant 0 : i32
    %c0_i32_0 = arith.constant 0 : i32
    return %arg1, %c0_i32 : i32, i32
  }
  func.func @transform_4(%arg0: i32, %arg1: i32) -> (i32, i32) {
    %c0_i32 = arith.constant 0 : i32
    return %arg1, %arg0 : i32, i32
  }
  func.func @transform_5(%arg0: i32, %arg1: i32) -> (i32, i32) {
    %c0_i32 = arith.constant 0 : i32
    return %arg1, %arg0 : i32, i32
  }
}

module attributes {stable_mosaic.version = 11 : i64} {
  func.func @_mm2d_kernel(%arg0: i32, %arg1: i32, %arg2: memref<2x512xbf16, #tpu.memory_space<vmem>>, %arg3: memref<512x256xbf16, #tpu.memory_space<vmem>>, %arg4: memref<1x256xf32, #tpu.memory_space<vmem>>, %arg5: memref<2x256xf32, #tpu.memory_space<vmem>>) attributes {dimension_semantics = [#tpu.dimension_semantics<parallel>, #tpu.dimension_semantics<parallel>], iteration_bounds = array<i64: 1, 1>, scalar_prefetch = 0 : i64, scratch_operands = 0 : i64, tpu.core_type = #tpu.core_type<tc>, window_params = [{transform_indices = @transform_0, window_bounds = array<i64: 2, 512>}, {transform_indices = @transform_1, window_bounds = array<i64: 512, 256>}, {transform_indices = @transform_2, window_bounds = array<i64: 1, 256>}, {transform_indices = @transform_3, window_bounds = array<i64: 2, 256>}]} {
    %c0 = arith.constant 0 : index
    %c0_0 = arith.constant 0 : index
    %0 = vector.load %arg2[%c0, %c0_0] : memref<2x512xbf16, #tpu.memory_space<vmem>>, vector<2x512xbf16>
    %c0_1 = arith.constant 0 : index
    %c0_2 = arith.constant 0 : index
    %1 = vector.load %arg3[%c0_1, %c0_2] : memref<512x256xbf16, #tpu.memory_space<vmem>>, vector<512x256xbf16>
    %cst = arith.constant dense<0.000000e+00> : vector<2x256xf32>
    %2 = tpu.matmul %0, %1, %cst {dimension_numbers = #tpu.dot_dimension_numbers<[1], [0], [0], [1], [0, 0, 1, 1], [], []>} : vector<2x512xbf16>, vector<512x256xbf16>, vector<2x256xf32> -> vector<2x256xf32>
    %c0_3 = arith.constant 0 : index
    %c0_4 = arith.constant 0 : index
    %3 = vector.load %arg4[%c0_3, %c0_4] : memref<1x256xf32, #tpu.memory_space<vmem>>, vector<1x256xf32>
    %4 = vector.broadcast %3 : vector<1x256xf32> to vector<2x256xf32>
    %5 = arith.addf %2, %4 : vector<2x256xf32>
    %c0_5 = arith.constant 0 : index
    %c0_6 = arith.constant 0 : index
    %6 = vector.load %arg5[%c0_5, %c0_6] : memref<2x256xf32, #tpu.memory_space<vmem>>, vector<2x256xf32>
    tpu.vector_store %arg5[%c0_5, %c0_6], %5 {strides = array<i32>} : memref<2x256xf32, #tpu.memory_space<vmem>>, vector<2x256xf32>,
    return
  }
  func.func @transform_0(%arg0: i32, %arg1: i32) -> (i32, i32) {
    %c0_i32 = arith.constant 0 : i32
    %c0_i32_0 = arith.constant 0 : i32
    return %arg0, %c0_i32 : i32, i32
  }
  func.func @transform_1(%arg0: i32, %arg1: i32) -> (i32, i32) {
    %c0_i32 = arith.constant 0 : i32
    %c0_i32_0 = arith.constant 0 : i32
    return %c0_i32, %arg1 : i32, i32
  }
  func.func @transform_2(%arg0: i32, %arg1: i32) -> (i32, i32) {
    %c0_i32 = arith.constant 0 : i32
    %c0_i32_0 = arith.constant 0 : i32
    return %c0_i32, %arg1 : i32, i32
  }
  func.func @transform_3(%arg0: i32, %arg1: i32) -> (i32, i32) {
    %c0_i32 = arith.constant 0 : i32
    return %arg0, %arg1 : i32, i32
  }
}

module attributes {stable_mosaic.version = 11 : i64} {
  func.func @_mm3d_kernel(%arg0: i32, %arg1: i32, %arg2: i32, %arg3: memref<1x16x512xbf16, #tpu.memory_space<vmem>>, %arg4: memref<512x256xbf16, #tpu.memory_space<vmem>>, %arg5: memref<1x256xf32, #tpu.memory_space<vmem>>, %arg6: memref<1x1x256xbf16, #tpu.memory_space<vmem>>, %arg7: memref<1x16x1xbf16, #tpu.memory_space<vmem>>, %arg8: memref<1x16x256xbf16, #tpu.memory_space<vmem>>) attributes {dimension_semantics = [#tpu.dimension_semantics<parallel>, #tpu.dimension_semantics<parallel>, #tpu.dimension_semantics<parallel>], iteration_bounds = array<i64: 2, 1, 1>, scalar_prefetch = 0 : i64, scratch_operands = 0 : i64, tpu.core_type = #tpu.core_type<tc>, window_params = [{transform_indices = @transform_0, window_bounds = array<i64: 1, 16, 512>}, {transform_indices = @transform_1, window_bounds = array<i64: 512, 256>}, {transform_indices = @transform_2, window_bounds = array<i64: 1, 256>}, {transform_indices = @transform_3, window_bounds = array<i64: 1, 1, 256>}, {transform_indices = @transform_4, window_bounds = array<i64: 1, 16, 1>}, {transform_indices = @transform_5, window_bounds = array<i64: 1, 16, 256>}]} {
    %c0 = arith.constant 0 : index
    %c0_0 = arith.constant 0 : index
    %c0_1 = arith.constant 0 : index
    %0 = vector.load %arg3[%c0, %c0_0, %c0_1] : memref<1x16x512xbf16, #tpu.memory_space<vmem>>, vector<1x16x512xbf16>
    %1 = vector.shape_cast %0 : vector<1x16x512xbf16> to vector<16x512xbf16>
    %c0_2 = arith.constant 0 : index
    %c0_3 = arith.constant 0 : index
    %2 = vector.load %arg4[%c0_2, %c0_3] : memref<512x256xbf16, #tpu.memory_space<vmem>>, vector<512x256xbf16>
    %cst = arith.constant dense<0.000000e+00> : vector<16x256xf32>
    %3 = tpu.matmul %1, %2, %cst {dimension_numbers = #tpu.dot_dimension_numbers<[1], [0], [0], [1], [0, 0, 1, 1], [], []>} : vector<16x512xbf16>, vector<512x256xbf16>, vector<16x256xf32> -> vector<16x256xf32>
    %c0_4 = arith.constant 0 : index
    %c0_5 = arith.constant 0 : index
    %4 = vector.load %arg5[%c0_4, %c0_5] : memref<1x256xf32, #tpu.memory_space<vmem>>, vector<1x256xf32>
    %5 = vector.broadcast %4 : vector<1x256xf32> to vector<16x256xf32>
    %6 = arith.addf %3, %5 : vector<16x256xf32>
    %cst_6 = arith.constant 0.000000e+00 : f32
    %7 = vector.broadcast %cst_6 : f32 to vector<16x256xf32>
    %8 = arith.maximumf %6, %7 : vector<16x256xf32>
    %c0_7 = arith.constant 0 : index
    %c0_8 = arith.constant 0 : index
    %c0_9 = arith.constant 0 : index
    %9 = vector.load %arg6[%c0_7, %c0_8, %c0_9] : memref<1x1x256xbf16, #tpu.memory_space<vmem>>, vector<1x1x256xbf16>
    %10 = vector.shape_cast %9 : vector<1x1x256xbf16> to vector<1x256xbf16>
    %11 = arith.extf %10 : vector<1x256xbf16> to vector<1x256xf32>
    %12 = vector.broadcast %11 : vector<1x256xf32> to vector<16x256xf32>
    %13 = arith.mulf %8, %12 : vector<16x256xf32>
    %c0_10 = arith.constant 0 : index
    %c0_11 = arith.constant 0 : index
    %c0_12 = arith.constant 0 : index
    %14 = vector.load %arg7[%c0_10, %c0_11, %c0_12] : memref<1x16x1xbf16, #tpu.memory_space<vmem>>, vector<1x16x1xbf16>
    %15 = vector.shape_cast %14 : vector<1x16x1xbf16> to vector<16x1xbf16>
    %16 = arith.extf %15 : vector<16x1xbf16> to vector<16x1xf32>
    %17 = vector.broadcast %16 : vector<16x1xf32> to vector<16x256xf32>
    %18 = arith.mulf %13, %17 : vector<16x256xf32>
    %19 = arith.truncf %18 : vector<16x256xf32> to vector<16x256xbf16>
    %c0_13 = arith.constant 0 : index
    %c0_14 = arith.constant 0 : index
    %c0_15 = arith.constant 0 : index
    %20 = vector.load %arg8[%c0_13, %c0_14, %c0_15] : memref<1x16x256xbf16, #tpu.memory_space<vmem>>, vector<1x16x256xbf16>
    %21 = vector.shape_cast %20 : vector<1x16x256xbf16> to vector<16x256xbf16>
    %22 = vector.shape_cast %19 : vector<16x256xbf16> to vector<1x16x256xbf16>
    tpu.vector_store %arg8[%c0_13, %c0_14, %c0_15], %22 {strides = array<i32>} : memref<1x16x256xbf16, #tpu.memory_space<vmem>>, vector<1x16x256xbf16>,
    return
  }
  func.func @transform_0(%arg0: i32, %arg1: i32, %arg2: i32) -> (i32, i32, i32) {
    %c0_i32 = arith.constant 0 : i32
    %c0_i32_0 = arith.constant 0 : i32
    return %arg0, %arg1, %c0_i32 : i32, i32, i32
  }
  func.func @transform_1(%arg0: i32, %arg1: i32, %arg2: i32) -> (i32, i32) {
    %c0_i32 = arith.constant 0 : i32
    %c0_i32_0 = arith.constant 0 : i32
    return %c0_i32, %arg2 : i32, i32
  }
  func.func @transform_2(%arg0: i32, %arg1: i32, %arg2: i32) -> (i32, i32) {
    %c0_i32 = arith.constant 0 : i32
    %c0_i32_0 = arith.constant 0 : i32
    return %c0_i32, %arg2 : i32, i32
  }
  func.func @transform_3(%arg0: i32, %arg1: i32, %arg2: i32) -> (i32, i32, i32) {
    %c0_i32 = arith.constant 0 : i32
    %c0_i32_0 = arith.constant 0 : i32
    return %arg0, %c0_i32, %arg2 : i32, i32, i32
  }
  func.func @transform_4(%arg0: i32, %arg1: i32, %arg2: i32) -> (i32, i32, i32) {
    %c0_i32 = arith.constant 0 : i32
    %c0_i32_0 = arith.constant 0 : i32
    return %arg0, %arg1, %c0_i32 : i32, i32, i32
  }
  func.func @transform_5(%arg0: i32, %arg1: i32, %arg2: i32) -> (i32, i32, i32) {
    %c0_i32 = arith.constant 0 : i32
    return %arg0, %arg1, %arg2 : i32, i32, i32
  }
}

module attributes {stable_mosaic.version = 11 : i64} {
  func.func @_mm2d_kernel(%arg0: i32, %arg1: i32, %arg2: memref<8x512xbf16, #tpu.memory_space<vmem>>, %arg3: memref<512x256xbf16, #tpu.memory_space<vmem>>, %arg4: memref<1x256xf32, #tpu.memory_space<vmem>>, %arg5: memref<8x256xbf16, #tpu.memory_space<vmem>>) attributes {dimension_semantics = [#tpu.dimension_semantics<parallel>, #tpu.dimension_semantics<parallel>], iteration_bounds = array<i64: 4, 1>, scalar_prefetch = 0 : i64, scratch_operands = 0 : i64, tpu.core_type = #tpu.core_type<tc>, window_params = [{transform_indices = @transform_0, window_bounds = array<i64: 8, 512>}, {transform_indices = @transform_1, window_bounds = array<i64: 512, 256>}, {transform_indices = @transform_2, window_bounds = array<i64: 1, 256>}, {transform_indices = @transform_3, window_bounds = array<i64: 8, 256>}]} {
    %c0 = arith.constant 0 : index
    %c0_0 = arith.constant 0 : index
    %0 = vector.load %arg2[%c0, %c0_0] : memref<8x512xbf16, #tpu.memory_space<vmem>>, vector<8x512xbf16>
    %c0_1 = arith.constant 0 : index
    %c0_2 = arith.constant 0 : index
    %1 = vector.load %arg3[%c0_1, %c0_2] : memref<512x256xbf16, #tpu.memory_space<vmem>>, vector<512x256xbf16>
    %cst = arith.constant dense<0.000000e+00> : vector<8x256xf32>
    %2 = tpu.matmul %0, %1, %cst {dimension_numbers = #tpu.dot_dimension_numbers<[1], [0], [0], [1], [0, 0, 1, 1], [], []>} : vector<8x512xbf16>, vector<512x256xbf16>, vector<8x256xf32> -> vector<8x256xf32>
    %c0_3 = arith.constant 0 : index
    %c0_4 = arith.constant 0 : index
    %3 = vector.load %arg4[%c0_3, %c0_4] : memref<1x256xf32, #tpu.memory_space<vmem>>, vector<1x256xf32>
    %4 = vector.broadcast %3 : vector<1x256xf32> to vector<8x256xf32>
    %5 = arith.addf %2, %4 : vector<8x256xf32>
    %6 = arith.truncf %5 : vector<8x256xf32> to vector<8x256xbf16>
    %c0_5 = arith.constant 0 : index
    %c0_6 = arith.constant 0 : index
    %7 = vector.load %arg5[%c0_5, %c0_6] : memref<8x256xbf16, #tpu.memory_space<vmem>>, vector<8x256xbf16>
    tpu.vector_store %arg5[%c0_5, %c0_6], %6 {strides = array<i32>} : memref<8x256xbf16, #tpu.memory_space<vmem>>, vector<8x256xbf16>,
    return
  }
  func.func @transform_0(%arg0: i32, %arg1: i32) -> (i32, i32) {
    %c0_i32 = arith.constant 0 : i32
    %c0_i32_0 = arith.constant 0 : i32
    return %arg1, %c0_i32 : i32, i32
  }
  func.func @transform_1(%arg0: i32, %arg1: i32) -> (i32, i32) {
    %c0_i32 = arith.constant 0 : i32
    %c0_i32_0 = arith.constant 0 : i32
    return %c0_i32, %arg0 : i32, i32
  }
  func.func @transform_2(%arg0: i32, %arg1: i32) -> (i32, i32) {
    %c0_i32 = arith.constant 0 : i32
    %c0_i32_0 = arith.constant 0 : i32
    return %c0_i32, %arg0 : i32, i32
  }
  func.func @transform_3(%arg0: i32, %arg1: i32) -> (i32, i32) {
    %c0_i32 = arith.constant 0 : i32
    return %arg1, %arg0 : i32, i32
  }
}

module attributes {stable_mosaic.version = 11 : i64} {
  func.func @_mm2d_kernel(%arg0: i32, %arg1: i32, %arg2: memref<8x256xbf16, #tpu.memory_space<vmem>>, %arg3: memref<256x256xbf16, #tpu.memory_space<vmem>>, %arg4: memref<1x256xf32, #tpu.memory_space<vmem>>, %arg5: memref<8x1xbf16, #tpu.memory_space<vmem>>, %arg6: memref<8x256xbf16, #tpu.memory_space<vmem>>, %arg7: memref<8x256xbf16, #tpu.memory_space<vmem>>) attributes {dimension_semantics = [#tpu.dimension_semantics<parallel>, #tpu.dimension_semantics<parallel>], iteration_bounds = array<i64: 4, 1>, scalar_prefetch = 0 : i64, scratch_operands = 0 : i64, tpu.core_type = #tpu.core_type<tc>, window_params = [{transform_indices = @transform_0, window_bounds = array<i64: 8, 256>}, {transform_indices = @transform_1, window_bounds = array<i64: 256, 256>}, {transform_indices = @transform_2, window_bounds = array<i64: 1, 256>}, {transform_indices = @transform_3, window_bounds = array<i64: 8, 1>}, {transform_indices = @transform_4, window_bounds = array<i64: 8, 256>}, {transform_indices = @transform_5, window_bounds = array<i64: 8, 256>}]} {
    %c0 = arith.constant 0 : index
    %c0_0 = arith.constant 0 : index
    %0 = vector.load %arg2[%c0, %c0_0] : memref<8x256xbf16, #tpu.memory_space<vmem>>, vector<8x256xbf16>
    %c0_1 = arith.constant 0 : index
    %c0_2 = arith.constant 0 : index
    %1 = vector.load %arg3[%c0_1, %c0_2] : memref<256x256xbf16, #tpu.memory_space<vmem>>, vector<256x256xbf16>
    %cst = arith.constant dense<0.000000e+00> : vector<8x256xf32>
    %2 = tpu.matmul %0, %1, %cst {dimension_numbers = #tpu.dot_dimension_numbers<[1], [0], [0], [1], [0, 0, 1, 1], [], []>} : vector<8x256xbf16>, vector<256x256xbf16>, vector<8x256xf32> -> vector<8x256xf32>
    %c0_3 = arith.constant 0 : index
    %c0_4 = arith.constant 0 : index
    %3 = vector.load %arg4[%c0_3, %c0_4] : memref<1x256xf32, #tpu.memory_space<vmem>>, vector<1x256xf32>
    %4 = vector.broadcast %3 : vector<1x256xf32> to vector<8x256xf32>
    %5 = arith.addf %2, %4 : vector<8x256xf32>
    %c0_5 = arith.constant 0 : index
    %c0_6 = arith.constant 0 : index
    %6 = vector.load %arg5[%c0_5, %c0_6] : memref<8x1xbf16, #tpu.memory_space<vmem>>, vector<8x1xbf16>
    %7 = arith.extf %6 : vector<8x1xbf16> to vector<8x1xf32>
    %8 = vector.broadcast %7 : vector<8x1xf32> to vector<8x256xf32>
    %9 = arith.mulf %5, %8 : vector<8x256xf32>
    %c0_7 = arith.constant 0 : index
    %c0_8 = arith.constant 0 : index
    %10 = vector.load %arg6[%c0_7, %c0_8] : memref<8x256xbf16, #tpu.memory_space<vmem>>, vector<8x256xbf16>
    %11 = arith.extf %10 : vector<8x256xbf16> to vector<8x256xf32>
    %12 = arith.addf %9, %11 : vector<8x256xf32>
    %cst_9 = arith.constant 0.000000e+00 : f32
    %13 = vector.broadcast %cst_9 : f32 to vector<8x256xf32>
    %14 = arith.maximumf %12, %13 : vector<8x256xf32>
    %15 = arith.truncf %14 : vector<8x256xf32> to vector<8x256xbf16>
    %c0_10 = arith.constant 0 : index
    %c0_11 = arith.constant 0 : index
    %16 = vector.load %arg7[%c0_10, %c0_11] : memref<8x256xbf16, #tpu.memory_space<vmem>>, vector<8x256xbf16>
    tpu.vector_store %arg7[%c0_10, %c0_11], %15 {strides = array<i32>} : memref<8x256xbf16, #tpu.memory_space<vmem>>, vector<8x256xbf16>,
    return
  }
  func.func @transform_0(%arg0: i32, %arg1: i32) -> (i32, i32) {
    %c0_i32 = arith.constant 0 : i32
    %c0_i32_0 = arith.constant 0 : i32
    return %arg1, %c0_i32 : i32, i32
  }
  func.func @transform_1(%arg0: i32, %arg1: i32) -> (i32, i32) {
    %c0_i32 = arith.constant 0 : i32
    %c0_i32_0 = arith.constant 0 : i32
    return %c0_i32, %arg0 : i32, i32
  }
  func.func @transform_2(%arg0: i32, %arg1: i32) -> (i32, i32) {
    %c0_i32 = arith.constant 0 : i32
    %c0_i32_0 = arith.constant 0 : i32
    return %c0_i32, %arg0 : i32, i32
  }
  func.func @transform_3(%arg0: i32, %arg1: i32) -> (i32, i32) {
    %c0_i32 = arith.constant 0 : i32
    %c0_i32_0 = arith.constant 0 : i32
    return %arg1, %c0_i32 : i32, i32
  }
  func.func @transform_4(%arg0: i32, %arg1: i32) -> (i32, i32) {
    %c0_i32 = arith.constant 0 : i32
    return %arg1, %arg0 : i32, i32
  }
  func.func @transform_5(%arg0: i32, %arg1: i32) -> (i32, i32) {
    %c0_i32 = arith.constant 0 : i32
    return %arg1, %arg0 : i32, i32
  }
}

module attributes {stable_mosaic.version = 11 : i64} {
  func.func @_mm2d_kernel(%arg0: i32, %arg1: i32, %arg2: memref<2x1024xbf16, #tpu.memory_space<vmem>>, %arg3: memref<1024x256xbf16, #tpu.memory_space<vmem>>, %arg4: memref<1x256xf32, #tpu.memory_space<vmem>>, %arg5: memref<2x256xbf16, #tpu.memory_space<vmem>>) attributes {dimension_semantics = [#tpu.dimension_semantics<parallel>, #tpu.dimension_semantics<parallel>], iteration_bounds = array<i64: 8, 1>, scalar_prefetch = 0 : i64, scratch_operands = 0 : i64, tpu.core_type = #tpu.core_type<tc>, window_params = [{transform_indices = @transform_0, window_bounds = array<i64: 2, 1024>}, {transform_indices = @transform_1, window_bounds = array<i64: 1024, 256>}, {transform_indices = @transform_2, window_bounds = array<i64: 1, 256>}, {transform_indices = @transform_3, window_bounds = array<i64: 2, 256>}]} {
    %c0 = arith.constant 0 : index
    %c0_0 = arith.constant 0 : index
    %0 = vector.load %arg2[%c0, %c0_0] : memref<2x1024xbf16, #tpu.memory_space<vmem>>, vector<2x1024xbf16>
    %c0_1 = arith.constant 0 : index
    %c0_2 = arith.constant 0 : index
    %1 = vector.load %arg3[%c0_1, %c0_2] : memref<1024x256xbf16, #tpu.memory_space<vmem>>, vector<1024x256xbf16>
    %cst = arith.constant dense<0.000000e+00> : vector<2x256xf32>
    %2 = tpu.matmul %0, %1, %cst {dimension_numbers = #tpu.dot_dimension_numbers<[1], [0], [0], [1], [0, 0, 1, 1], [], []>} : vector<2x1024xbf16>, vector<1024x256xbf16>, vector<2x256xf32> -> vector<2x256xf32>
    %c0_3 = arith.constant 0 : index
    %c0_4 = arith.constant 0 : index
    %3 = vector.load %arg4[%c0_3, %c0_4] : memref<1x256xf32, #tpu.memory_space<vmem>>, vector<1x256xf32>
    %4 = vector.broadcast %3 : vector<1x256xf32> to vector<2x256xf32>
    %5 = arith.addf %2, %4 : vector<2x256xf32>
    %6 = arith.truncf %5 : vector<2x256xf32> to vector<2x256xbf16>
    %c0_5 = arith.constant 0 : index
    %c0_6 = arith.constant 0 : index
    %7 = vector.load %arg5[%c0_5, %c0_6] : memref<2x256xbf16, #tpu.memory_space<vmem>>, vector<2x256xbf16>
    tpu.vector_store %arg5[%c0_5, %c0_6], %6 {strides = array<i32>} : memref<2x256xbf16, #tpu.memory_space<vmem>>, vector<2x256xbf16>,
    return
  }
  func.func @transform_0(%arg0: i32, %arg1: i32) -> (i32, i32) {
    %c0_i32 = arith.constant 0 : i32
    %c0_i32_0 = arith.constant 0 : i32
    return %arg1, %c0_i32 : i32, i32
  }
  func.func @transform_1(%arg0: i32, %arg1: i32) -> (i32, i32) {
    %c0_i32 = arith.constant 0 : i32
    %c0_i32_0 = arith.constant 0 : i32
    return %c0_i32, %arg0 : i32, i32
  }
  func.func @transform_2(%arg0: i32, %arg1: i32) -> (i32, i32) {
    %c0_i32 = arith.constant 0 : i32
    %c0_i32_0 = arith.constant 0 : i32
    return %c0_i32, %arg0 : i32, i32
  }
  func.func @transform_3(%arg0: i32, %arg1: i32) -> (i32, i32) {
    %c0_i32 = arith.constant 0 : i32
    return %arg1, %arg0 : i32, i32
  }
}

module attributes {stable_mosaic.version = 11 : i64} {
  func.func @_mm2d_kernel(%arg0: i32, %arg1: i32, %arg2: memref<2x1024xbf16, #tpu.memory_space<vmem>>, %arg3: memref<1024x256xbf16, #tpu.memory_space<vmem>>, %arg4: memref<1x256xf32, #tpu.memory_space<vmem>>, %arg5: memref<2x256xf32, #tpu.memory_space<vmem>>) attributes {dimension_semantics = [#tpu.dimension_semantics<parallel>, #tpu.dimension_semantics<parallel>], iteration_bounds = array<i64: 2, 1>, scalar_prefetch = 0 : i64, scratch_operands = 0 : i64, tpu.core_type = #tpu.core_type<tc>, window_params = [{transform_indices = @transform_0, window_bounds = array<i64: 2, 1024>}, {transform_indices = @transform_1, window_bounds = array<i64: 1024, 256>}, {transform_indices = @transform_2, window_bounds = array<i64: 1, 256>}, {transform_indices = @transform_3, window_bounds = array<i64: 2, 256>}]} {
    %c0 = arith.constant 0 : index
    %c0_0 = arith.constant 0 : index
    %0 = vector.load %arg2[%c0, %c0_0] : memref<2x1024xbf16, #tpu.memory_space<vmem>>, vector<2x1024xbf16>
    %c0_1 = arith.constant 0 : index
    %c0_2 = arith.constant 0 : index
    %1 = vector.load %arg3[%c0_1, %c0_2] : memref<1024x256xbf16, #tpu.memory_space<vmem>>, vector<1024x256xbf16>
    %cst = arith.constant dense<0.000000e+00> : vector<2x256xf32>
    %2 = tpu.matmul %0, %1, %cst {dimension_numbers = #tpu.dot_dimension_numbers<[1], [0], [0], [1], [0, 0, 1, 1], [], []>} : vector<2x1024xbf16>, vector<1024x256xbf16>, vector<2x256xf32> -> vector<2x256xf32>
    %c0_3 = arith.constant 0 : index
    %c0_4 = arith.constant 0 : index
    %3 = vector.load %arg4[%c0_3, %c0_4] : memref<1x256xf32, #tpu.memory_space<vmem>>, vector<1x256xf32>
    %4 = vector.broadcast %3 : vector<1x256xf32> to vector<2x256xf32>
    %5 = arith.addf %2, %4 : vector<2x256xf32>
    %c0_5 = arith.constant 0 : index
    %c0_6 = arith.constant 0 : index
    %6 = vector.load %arg5[%c0_5, %c0_6] : memref<2x256xf32, #tpu.memory_space<vmem>>, vector<2x256xf32>
    tpu.vector_store %arg5[%c0_5, %c0_6], %5 {strides = array<i32>} : memref<2x256xf32, #tpu.memory_space<vmem>>, vector<2x256xf32>,
    return
  }
  func.func @transform_0(%arg0: i32, %arg1: i32) -> (i32, i32) {
    %c0_i32 = arith.constant 0 : i32
    %c0_i32_0 = arith.constant 0 : i32
    return %arg1, %c0_i32 : i32, i32
  }
  func.func @transform_1(%arg0: i32, %arg1: i32) -> (i32, i32) {
    %c0_i32 = arith.constant 0 : i32
    %c0_i32_0 = arith.constant 0 : i32
    return %c0_i32, %arg0 : i32, i32
  }
  func.func @transform_2(%arg0: i32, %arg1: i32) -> (i32, i32) {
    %c0_i32 = arith.constant 0 : i32
    %c0_i32_0 = arith.constant 0 : i32
    return %c0_i32, %arg0 : i32, i32
  }
  func.func @transform_3(%arg0: i32, %arg1: i32) -> (i32, i32) {
    %c0_i32 = arith.constant 0 : i32
    return %arg1, %arg0 : i32, i32
  }
}

module attributes {stable_mosaic.version = 11 : i64} {
  func.func @_mm3d_kernel(%arg0: i32, %arg1: i32, %arg2: i32, %arg3: memref<1x4x1024xbf16, #tpu.memory_space<vmem>>, %arg4: memref<1024x256xbf16, #tpu.memory_space<vmem>>, %arg5: memref<1x256xf32, #tpu.memory_space<vmem>>, %arg6: memref<1x1x256xbf16, #tpu.memory_space<vmem>>, %arg7: memref<1x4x1xbf16, #tpu.memory_space<vmem>>, %arg8: memref<1x4x256xbf16, #tpu.memory_space<vmem>>) attributes {dimension_semantics = [#tpu.dimension_semantics<parallel>, #tpu.dimension_semantics<parallel>, #tpu.dimension_semantics<parallel>], iteration_bounds = array<i64: 2, 1, 2>, scalar_prefetch = 0 : i64, scratch_operands = 0 : i64, tpu.core_type = #tpu.core_type<tc>, window_params = [{transform_indices = @transform_0, window_bounds = array<i64: 1, 4, 1024>}, {transform_indices = @transform_1, window_bounds = array<i64: 1024, 256>}, {transform_indices = @transform_2, window_bounds = array<i64: 1, 256>}, {transform_indices = @transform_3, window_bounds = array<i64: 1, 1, 256>}, {transform_indices = @transform_4, window_bounds = array<i64: 1, 4, 1>}, {transform_indices = @transform_5, window_bounds = array<i64: 1, 4, 256>}]} {
    %c0 = arith.constant 0 : index
    %c0_0 = arith.constant 0 : index
    %c0_1 = arith.constant 0 : index
    %0 = vector.load %arg3[%c0, %c0_0, %c0_1] : memref<1x4x1024xbf16, #tpu.memory_space<vmem>>, vector<1x4x1024xbf16>
    %1 = vector.shape_cast %0 : vector<1x4x1024xbf16> to vector<4x1024xbf16>
    %c0_2 = arith.constant 0 : index
    %c0_3 = arith.constant 0 : index
    %2 = vector.load %arg4[%c0_2, %c0_3] : memref<1024x256xbf16, #tpu.memory_space<vmem>>, vector<1024x256xbf16>
    %cst = arith.constant dense<0.000000e+00> : vector<4x256xf32>
    %3 = tpu.matmul %1, %2, %cst {dimension_numbers = #tpu.dot_dimension_numbers<[1], [0], [0], [1], [0, 0, 1, 1], [], []>} : vector<4x1024xbf16>, vector<1024x256xbf16>, vector<4x256xf32> -> vector<4x256xf32>
    %c0_4 = arith.constant 0 : index
    %c0_5 = arith.constant 0 : index
    %4 = vector.load %arg5[%c0_4, %c0_5] : memref<1x256xf32, #tpu.memory_space<vmem>>, vector<1x256xf32>
    %5 = vector.broadcast %4 : vector<1x256xf32> to vector<4x256xf32>
    %6 = arith.addf %3, %5 : vector<4x256xf32>
    %cst_6 = arith.constant 0.000000e+00 : f32
    %7 = vector.broadcast %cst_6 : f32 to vector<4x256xf32>
    %8 = arith.maximumf %6, %7 : vector<4x256xf32>
    %c0_7 = arith.constant 0 : index
    %c0_8 = arith.constant 0 : index
    %c0_9 = arith.constant 0 : index
    %9 = vector.load %arg6[%c0_7, %c0_8, %c0_9] : memref<1x1x256xbf16, #tpu.memory_space<vmem>>, vector<1x1x256xbf16>
    %10 = vector.shape_cast %9 : vector<1x1x256xbf16> to vector<1x256xbf16>
    %11 = arith.extf %10 : vector<1x256xbf16> to vector<1x256xf32>
    %12 = vector.broadcast %11 : vector<1x256xf32> to vector<4x256xf32>
    %13 = arith.mulf %8, %12 : vector<4x256xf32>
    %c0_10 = arith.constant 0 : index
    %c0_11 = arith.constant 0 : index
    %c0_12 = arith.constant 0 : index
    %14 = vector.load %arg7[%c0_10, %c0_11, %c0_12] : memref<1x4x1xbf16, #tpu.memory_space<vmem>>, vector<1x4x1xbf16>
    %15 = vector.shape_cast %14 : vector<1x4x1xbf16> to vector<4x1xbf16>
    %16 = arith.extf %15 : vector<4x1xbf16> to vector<4x1xf32>
    %17 = vector.broadcast %16 : vector<4x1xf32> to vector<4x256xf32>
    %18 = arith.mulf %13, %17 : vector<4x256xf32>
    %19 = arith.truncf %18 : vector<4x256xf32> to vector<4x256xbf16>
    %c0_13 = arith.constant 0 : index
    %c0_14 = arith.constant 0 : index
    %c0_15 = arith.constant 0 : index
    %20 = vector.load %arg8[%c0_13, %c0_14, %c0_15] : memref<1x4x256xbf16, #tpu.memory_space<vmem>>, vector<1x4x256xbf16>
    %21 = vector.shape_cast %20 : vector<1x4x256xbf16> to vector<4x256xbf16>
    %22 = vector.shape_cast %19 : vector<4x256xbf16> to vector<1x4x256xbf16>
    tpu.vector_store %arg8[%c0_13, %c0_14, %c0_15], %22 {strides = array<i32>} : memref<1x4x256xbf16, #tpu.memory_space<vmem>>, vector<1x4x256xbf16>,
    return
  }
  func.func @transform_0(%arg0: i32, %arg1: i32, %arg2: i32) -> (i32, i32, i32) {
    %c0_i32 = arith.constant 0 : i32
    %c0_i32_0 = arith.constant 0 : i32
    return %arg0, %arg1, %c0_i32 : i32, i32, i32
  }
  func.func @transform_1(%arg0: i32, %arg1: i32, %arg2: i32) -> (i32, i32) {
    %c0_i32 = arith.constant 0 : i32
    %c0_i32_0 = arith.constant 0 : i32
    return %c0_i32, %arg2 : i32, i32
  }
  func.func @transform_2(%arg0: i32, %arg1: i32, %arg2: i32) -> (i32, i32) {
    %c0_i32 = arith.constant 0 : i32
    %c0_i32_0 = arith.constant 0 : i32
    return %c0_i32, %arg2 : i32, i32
  }
  func.func @transform_3(%arg0: i32, %arg1: i32, %arg2: i32) -> (i32, i32, i32) {
    %c0_i32 = arith.constant 0 : i32
    %c0_i32_0 = arith.constant 0 : i32
    return %arg0, %c0_i32, %arg2 : i32, i32, i32
  }
  func.func @transform_4(%arg0: i32, %arg1: i32, %arg2: i32) -> (i32, i32, i32) {
    %c0_i32 = arith.constant 0 : i32
    %c0_i32_0 = arith.constant 0 : i32
    return %arg0, %arg1, %c0_i32 : i32, i32, i32
  }
  func.func @transform_5(%arg0: i32, %arg1: i32, %arg2: i32) -> (i32, i32, i32) {
    %c0_i32 = arith.constant 0 : i32
    return %arg0, %arg1, %arg2 : i32, i32, i32
  }
}

module attributes {stable_mosaic.version = 11 : i64} {
  func.func @_mm2d_kernel(%arg0: i32, %arg1: i32, %arg2: memref<2x512xbf16, #tpu.memory_space<vmem>>, %arg3: memref<512x256xbf16, #tpu.memory_space<vmem>>, %arg4: memref<1x256xf32, #tpu.memory_space<vmem>>, %arg5: memref<2x1xbf16, #tpu.memory_space<vmem>>, %arg6: memref<2x256xbf16, #tpu.memory_space<vmem>>, %arg7: memref<2x256xbf16, #tpu.memory_space<vmem>>) attributes {dimension_semantics = [#tpu.dimension_semantics<parallel>, #tpu.dimension_semantics<parallel>], iteration_bounds = array<i64: 8, 1>, scalar_prefetch = 0 : i64, scratch_operands = 0 : i64, tpu.core_type = #tpu.core_type<tc>, window_params = [{transform_indices = @transform_0, window_bounds = array<i64: 2, 512>}, {transform_indices = @transform_1, window_bounds = array<i64: 512, 256>}, {transform_indices = @transform_2, window_bounds = array<i64: 1, 256>}, {transform_indices = @transform_3, window_bounds = array<i64: 2, 1>}, {transform_indices = @transform_4, window_bounds = array<i64: 2, 256>}, {transform_indices = @transform_5, window_bounds = array<i64: 2, 256>}]} {
    %c0 = arith.constant 0 : index
    %c0_0 = arith.constant 0 : index
    %0 = vector.load %arg2[%c0, %c0_0] : memref<2x512xbf16, #tpu.memory_space<vmem>>, vector<2x512xbf16>
    %c0_1 = arith.constant 0 : index
    %c0_2 = arith.constant 0 : index
    %1 = vector.load %arg3[%c0_1, %c0_2] : memref<512x256xbf16, #tpu.memory_space<vmem>>, vector<512x256xbf16>
    %cst = arith.constant dense<0.000000e+00> : vector<2x256xf32>
    %2 = tpu.matmul %0, %1, %cst {dimension_numbers = #tpu.dot_dimension_numbers<[1], [0], [0], [1], [0, 0, 1, 1], [], []>} : vector<2x512xbf16>, vector<512x256xbf16>, vector<2x256xf32> -> vector<2x256xf32>
    %c0_3 = arith.constant 0 : index
    %c0_4 = arith.constant 0 : index
    %3 = vector.load %arg4[%c0_3, %c0_4] : memref<1x256xf32, #tpu.memory_space<vmem>>, vector<1x256xf32>
    %4 = vector.broadcast %3 : vector<1x256xf32> to vector<2x256xf32>
    %5 = arith.addf %2, %4 : vector<2x256xf32>
    %c0_5 = arith.constant 0 : index
    %c0_6 = arith.constant 0 : index
    %6 = vector.load %arg5[%c0_5, %c0_6] : memref<2x1xbf16, #tpu.memory_space<vmem>>, vector<2x1xbf16>
    %7 = arith.extf %6 : vector<2x1xbf16> to vector<2x1xf32>
    %8 = vector.broadcast %7 : vector<2x1xf32> to vector<2x256xf32>
    %9 = arith.mulf %5, %8 : vector<2x256xf32>
    %c0_7 = arith.constant 0 : index
    %c0_8 = arith.constant 0 : index
    %10 = vector.load %arg6[%c0_7, %c0_8] : memref<2x256xbf16, #tpu.memory_space<vmem>>, vector<2x256xbf16>
    %11 = arith.extf %10 : vector<2x256xbf16> to vector<2x256xf32>
    %12 = arith.addf %9, %11 : vector<2x256xf32>
    %cst_9 = arith.constant 0.000000e+00 : f32
    %13 = vector.broadcast %cst_9 : f32 to vector<2x256xf32>
    %14 = arith.maximumf %12, %13 : vector<2x256xf32>
    %15 = arith.truncf %14 : vector<2x256xf32> to vector<2x256xbf16>
    %c0_10 = arith.constant 0 : index
    %c0_11 = arith.constant 0 : index
    %16 = vector.load %arg7[%c0_10, %c0_11] : memref<2x256xbf16, #tpu.memory_space<vmem>>, vector<2x256xbf16>
    tpu.vector_store %arg7[%c0_10, %c0_11], %15 {strides = array<i32>} : memref<2x256xbf16, #tpu.memory_space<vmem>>, vector<2x256xbf16>,
    return
  }
  func.func @transform_0(%arg0: i32, %arg1: i32) -> (i32, i32) {
    %c0_i32 = arith.constant 0 : i32
    %c0_i32_0 = arith.constant 0 : i32
    return %arg1, %c0_i32 : i32, i32
  }
  func.func @transform_1(%arg0: i32, %arg1: i32) -> (i32, i32) {
    %c0_i32 = arith.constant 0 : i32
    %c0_i32_0 = arith.constant 0 : i32
    return %c0_i32, %arg0 : i32, i32
  }
  func.func @transform_2(%arg0: i32, %arg1: i32) -> (i32, i32) {
    %c0_i32 = arith.constant 0 : i32
    %c0_i32_0 = arith.constant 0 : i32
    return %c0_i32, %arg0 : i32, i32
  }
  func.func @transform_3(%arg0: i32, %arg1: i32) -> (i32, i32) {
    %c0_i32 = arith.constant 0 : i32
    %c0_i32_0 = arith.constant 0 : i32
    return %arg1, %c0_i32 : i32, i32
  }
  func.func @transform_4(%arg0: i32, %arg1: i32) -> (i32, i32) {
    %c0_i32 = arith.constant 0 : i32
    return %arg1, %arg0 : i32, i32
  }
  func.func @transform_5(%arg0: i32, %arg1: i32) -> (i32, i32) {
    %c0_i32 = arith.constant 0 : i32
    return %arg1, %arg0 : i32, i32
  }
}

module attributes {stable_mosaic.version = 11 : i64} {
  func.func @_mm2d_kernel(%arg0: i32, %arg1: i32, %arg2: memref<2x2048xbf16, #tpu.memory_space<vmem>>, %arg3: memref<2048x10xbf16, #tpu.memory_space<vmem>>, %arg4: memref<1x10xf32, #tpu.memory_space<vmem>>, %arg5: memref<2x10xf32, #tpu.memory_space<vmem>>) attributes {dimension_semantics = [#tpu.dimension_semantics<parallel>, #tpu.dimension_semantics<parallel>], iteration_bounds = array<i64: 1, 1>, scalar_prefetch = 0 : i64, scratch_operands = 0 : i64, tpu.core_type = #tpu.core_type<tc>, window_params = [{transform_indices = @transform_0, window_bounds = array<i64: 2, 2048>}, {transform_indices = @transform_1, window_bounds = array<i64: 2048, 10>}, {transform_indices = @transform_2, window_bounds = array<i64: 1, 10>}, {transform_indices = @transform_3, window_bounds = array<i64: 2, 10>}]} {
    %c0 = arith.constant 0 : index
    %c0_0 = arith.constant 0 : index
    %0 = vector.load %arg2[%c0, %c0_0] : memref<2x2048xbf16, #tpu.memory_space<vmem>>, vector<2x2048xbf16>
    %c0_1 = arith.constant 0 : index
    %c0_2 = arith.constant 0 : index
    %1 = vector.load %arg3[%c0_1, %c0_2] : memref<2048x10xbf16, #tpu.memory_space<vmem>>, vector<2048x10xbf16>
    %cst = arith.constant dense<0.000000e+00> : vector<2x10xf32>
    %2 = tpu.matmul %0, %1, %cst {dimension_numbers = #tpu.dot_dimension_numbers<[1], [0], [0], [1], [0, 0, 1, 1], [], []>} : vector<2x2048xbf16>, vector<2048x10xbf16>, vector<2x10xf32> -> vector<2x10xf32>
    %c0_3 = arith.constant 0 : index
    %c0_4 = arith.constant 0 : index
    %3 = vector.load %arg4[%c0_3, %c0_4] : memref<1x10xf32, #tpu.memory_space<vmem>>, vector<1x10xf32>
    %4 = vector.broadcast %3 : vector<1x10xf32> to vector<2x10xf32>
    %5 = arith.addf %2, %4 : vector<2x10xf32>
    %c0_5 = arith.constant 0 : index
    %c0_6 = arith.constant 0 : index
    %6 = vector.load %arg5[%c0_5, %c0_6] : memref<2x10xf32, #tpu.memory_space<vmem>>, vector<2x10xf32>
    tpu.vector_store %arg5[%c0_5, %c0_6], %5 {strides = array<i32>} : memref<2x10xf32, #tpu.memory_space<vmem>>, vector<2x10xf32>,
    return
  }
  func.func @transform_0(%arg0: i32, %arg1: i32) -> (i32, i32) {
    %c0_i32 = arith.constant 0 : i32
    %c0_i32_0 = arith.constant 0 : i32
    return %arg0, %c0_i32 : i32, i32
  }
  func.func @transform_1(%arg0: i32, %arg1: i32) -> (i32, i32) {
    %c0_i32 = arith.constant 0 : i32
    %c0_i32_0 = arith.constant 0 : i32
    return %c0_i32, %arg1 : i32, i32
  }
  func.func @transform_2(%arg0: i32, %arg1: i32) -> (i32, i32) {
    %c0_i32 = arith.constant 0 : i32
    %c0_i32_0 = arith.constant 0 : i32
    return %c0_i32, %arg1 : i32, i32
  }
  func.func @transform_3(%arg0: i32, %arg1: i32) -> (i32, i32) {
    %c0_i32 = arith.constant 0 : i32
    return %arg0, %arg1 : i32, i32
  }
}

</mosaic_0001>

<bundles_post_ra>
// kernel: _lambda_.16
= control target key start
LH: loop header
LB: loop body
LE: loop exit
PB: predicated region body
PF: predicated region fallthrough
CT: control target
= control target key end

     0   :  { %v655_v1 = vmov 0   ;;  %vm113_vm0 = vcmask 523264   ;;  %vm443_vm1 = vcmask 519168   ;;  %s866_s1 = inlined_call_operand.vmem [shape: bf16[64,64], index: 1, kind: input, shape index: {}]   ;;  %s867_s0 = inlined_call_operand.vmem [shape: bf16[128,64], index: 0, kind: input, shape index: {}]   ;;  %s868_s3 = inlined_call_operand.vmem [shape: bf16[128,1], index: 3, kind: input, shape index: {}]   ;;  %s869_s2 = inlined_call_operand.vmem [shape: f32[1,64], index: 2, kind: input, shape index: {}]   ;;  %s870_s4 = inlined_call_operand.vmem [shape: bf16[128,64], index: 4, kind: output, shape index: {}]  }
   0x1   :  { %v643_v0 = vld [vmem:[%s866_s1] sm:$0xff]   ;;  %612 = vset.pattern.permute.xlu1 %v655_v1  ;;  %601 = vset.pattern.permute.xlu0 %v655_v1  ;;  %v644_v2 = vld [vmem:[%s866_s1 + $0x8] sm:$0xff]   ;;  %v645_v3 = vld [vmem:[%s866_s1 + $0x10] sm:$0xff]  }
   0x2   :  { %568 = vmatprep.subr.bf16.mxu0 %v643_v0  ;;  %592 = vmatprep.subr.bf16.mxu1 %v643_v0  ;;  %v647_v4 = vld [vmem:[%s867_s0] sm:$0xff]   ;;  %v646_v6 = vld [vmem:[%s866_s1 + $0x18] sm:$0xff]   ;;  %v550_v7 = vld [vmem:[%s868_s3 + $0x10] sm:$0xff]  }
   0x3   :  { %569 = vmatpush3.bf16.msra.mxu0 %v643_v0  ;;  %596 = vmatpush3.bf16.msra.mxu1 %v643_v0  ;;  %v648_v5 = vld [vmem:[%s867_s0 + $0x20] sm:$0xff]   ;;  %v551_v9 = vld [vmem:[%s868_s3 + $0x18] sm:$0xff]   ;;  %v527_v10 = vunpack.c.l.bf16 %v550_v7  ;;  %v528_v11 = vunpack.c.h.bf16 %v550_v7  ;;  %v549_v14 = vld [vmem:[%s868_s3 + $0x8] sm:$0xff]  }
   0x4   :  { %570 = vmatprep.subr.bf16.mxu0 %v644_v2  ;;  %593 = vmatprep.subr.bf16.mxu1 %v644_v2  ;;  %v518_v8 = vld [vmem:[%s868_s3] sm:$0xff]   ;;  %v553_v15 = vld [vmem:[%s868_s3 + $0x28] sm:$0xff]   ;;  %v531_v18 = vunpack.c.l.bf16 %v551_v9  ;;  %v532_v19 = vunpack.c.h.bf16 %v551_v9  ;;  %v523_v20 = vunpack.c.l.bf16 %v549_v14  ;;  %v524_v21 = vunpack.c.h.bf16 %v549_v14  ;;  %v651_v23 = vld [vmem:[%s867_s0 + $0x10] sm:$0xff]  }
   0x5   :  { %576 = vmatprep.mubr.msk.bf16.mxu0 %vm113_vm0, %v647_v4  ;;  %584 = vmatprep.mubr.msk.bf16.mxu1 %vm113_vm0, %v648_v5  ;;  %v519_v12 = vunpack.c.l.bf16 %v518_v8  ;;  %v520_v13 = vunpack.c.h.bf16 %v518_v8  ;;  %v649_v16 = vld [vmem:[%s867_s0 + $0x8] sm:$0xff]   ;;  %v552_v22 = vld [vmem:[%s868_s3 + $0x20] sm:$0xff]   ;;  %v652_v24 = vld [vmem:[%s867_s0 + $0x30] sm:$0xff]   ;;  %v613_v25 = vpack.i.bf16 %v528_v11, %v527_v10  ;;  %v539_v27 = vunpack.c.l.bf16 %v553_v15 }
   0x6   :  { %v650_v17 = vld [vmem:[%s867_s0 + $0x28] sm:$0xff]   ;;  %v540_v28 = vunpack.c.h.bf16 %v553_v15  ;;  %v618_v29 = vpack.i.bf16 %v532_v19, %v531_v18  ;;  %v607_v30 = vpack.i.bf16 %v524_v21, %v523_v20  ;;  %v535_v31 = vunpack.c.l.bf16 %v552_v22  ;;  %v555_v33 = vld [vmem:[%s868_s3 + $0x38] sm:$0xff]   ;;  %v554_v34 = vld [vmem:[%s868_s3 + $0x30] sm:$0xff]  }
   0x7   :  { %571 = vmatpush3.bf16.msra.mxu0 %v644_v2  ;;  %597 = vmatpush3.bf16.msra.mxu1 %v644_v2  ;;  %v602_v26 = vpack.i.bf16 %v520_v13, %v519_v12  ;;  %v536_v32 = vunpack.c.h.bf16 %v552_v22  ;;  %v547_v36 = vunpack.c.l.bf16 %v555_v33  ;;  %v548_v38 = vunpack.c.h.bf16 %v555_v33  ;;  %v653_v41 = vld [vmem:[%s867_s0 + $0x18] sm:$0xff]   ;;  %v758_v55 = vld [vmem:[%s869_s2] ss:$0 sm:$0xff] }
   0x8   :  { %572 = vmatprep.subr.bf16.mxu0 %v645_v3  ;;  %594 = vmatprep.subr.bf16.mxu1 %v645_v3  ;;  %v628_v35 = vpack.i.bf16 %v540_v28, %v539_v27  ;;  %v543_v39 = vunpack.c.l.bf16 %v554_v34  ;;  %v544_v40 = vunpack.c.h.bf16 %v554_v34  ;;  %v654_v42 = vld [vmem:[%s867_s0 + $0x38] sm:$0xff]  }
   0x9   :  { %614 = vperm.xlu1 %612, %v613_v25   ;;  %603 = vperm.xlu0 %601, %v602_v26   ;;  %v623_v37 = vpack.i.bf16 %v536_v32, %v535_v31  ;;  %v638_v43 = vpack.i.bf16 %v548_v38, %v547_v36 }
   0xa   :  { %v633_v44 = vpack.i.bf16 %v544_v40, %v543_v39 }
   0xb   :  { %573 = vmatpush3.bf16.msra.mxu0 %v645_v3  ;;  %598 = vmatpush3.bf16.msra.mxu1 %v645_v3 }
   0xc   :  { %574 = vmatprep.subr.bf16.mxu0 %v646_v6  ;;  %595 = vmatprep.subr.bf16.mxu1 %v646_v6 }
   0xd   :  { %619 = vperm.xlu1 %612, %v618_v29   ;;  %608 = vperm.xlu0 %601, %v607_v30  }
   0xf   :  { %575 = vmatpush3.bf16.msra.mxu0 %v646_v6  ;;  %599 = vmatpush3.bf16.msra.mxu1 %v646_v6 }
  0x11   :  { %629 = vperm.xlu1 %612, %v628_v35   ;;  %624 = vperm.xlu0 %601, %v623_v37  }
  0x12   :  { %577 = vmatmul.mubr.msk.bf16.vlgmr.msra.gmra.mrb[0].mxu0 %vm113_vm0, %v649_v16  ;;  %585 = vmatmul.mubr.msk.bf16.vlgmr.msra.gmra.mrb[0].mxu1 %vm113_vm0, %v650_v17 }
  0x13   :  { %580 = vmatprep.mubr.msk.bf16.mxu0 %vm113_vm0, %v651_v23  ;;  %588 = vmatprep.mubr.msk.bf16.mxu1 %vm113_vm0, %v652_v24 }
  0x15   :  { %639 = vperm.xlu1 %612, %v638_v43   ;;  %634 = vperm.xlu0 %601, %v633_v44  }
  0x1a   :  { %581 = vmatmul.mubr.msk.bf16.gmra.mrb[4].mxu0 %vm113_vm0, %v653_v41  ;;  %589 = vmatmul.mubr.msk.bf16.gmra.mrb[4].mxu1 %vm113_vm0, %v654_v42 }
  0x88   :  { %v749_v45 = vpop.permute.xlu1 %614  ;;  %v604_v46 = vpop.permute.xlu0 %603 }
  0x89   :  { %v617_v51 = vunpack.i.h.bf16 %v749_v45  ;;  %v616_v52 = vunpack.i.l.bf16 %v749_v45  ;;  %v606_v53 = vunpack.i.h.bf16 %v604_v46  ;;  %v605_v54 = vunpack.i.l.bf16 %v604_v46 }
  0x8c   :  { %v751_v47 = vpop.permute.xlu1 %619  ;;  %v609_v48 = vpop.permute.xlu0 %608 }
  0x8d   :  { %v622_v57 = vunpack.i.h.bf16 %v751_v47  ;;  %v621_v58 = vunpack.i.l.bf16 %v751_v47  ;;  %v611_v59 = vunpack.i.h.bf16 %v609_v48  ;;  %v610_v60 = vunpack.i.l.bf16 %v609_v48 }
  0x90   :  { %v630_v49 = vpop.permute.xlu1 %629  ;;  %v625_v50 = vpop.permute.xlu0 %624 }
  0x91   :  { %v632_v62 = vunpack.i.h.bf16 %v630_v49  ;;  %v631_v63 = vunpack.i.l.bf16 %v630_v49  ;;  %v627_v0 = vunpack.i.h.bf16 %v625_v50  ;;  %v626_v1 = vunpack.i.l.bf16 %v625_v50 }
  0x94   :  { %v760_v56 = vpop.permute.xlu1 %639  ;;  %v764_v61 = vpop.permute.xlu0 %634 }
  0x95   :  { %v642_v6 = vunpack.i.h.bf16 %v760_v56  ;;  %v641_v7 = vunpack.i.l.bf16 %v760_v56  ;;  %v637_v10 = vunpack.i.h.bf16 %v764_v61  ;;  %v636_v11 = vunpack.i.l.bf16 %v764_v61 }
  0xe5   :  { %v578_v2 = vpop.f32.mrb[0].mxu0  ;;  %v586_v3 = vpop.f32.mrb[0].mxu1 }
  0xe6   :  { %v181_v4 = vadd.f32 %v578_v2, %v758_v55  ;;  %v213_v5 = vadd.f32 %v586_v3, %v758_v55  ;;  %v172_v8 = vpop.f32.mrb[1].mxu0  ;;  %v204_v9 = vpop.f32.mrb[1].mxu1 }
  0xe7   :  { %v173_v12 = vadd.f32 %v758_v55, %v172_v8  ;;  %v205_v13 = vadd.f32 %v758_v55, %v204_v9  ;;  %v579_v14 = vpop.f32.mrb[2].mxu0  ;;  %v587_v15 = vpop.f32.mrb[2].mxu1 }
  0xe8   :  { %v237_v16 = vmax.f32 %v181_v4, 0.0  ;;  %v245_v17 = vmax.f32 %v213_v5, 0.0  ;;  %v184_v18 = vadd.f32 %v579_v14, %v758_v55  ;;  %v216_v19 = vadd.f32 %v587_v15, %v758_v55  ;;  %v175_v20 = vpop.f32.mrb[3].mxu0  ;;  %v207_v21 = vpop.f32.mrb[3].mxu1 }
  0xe9   :  { %v235_v22 = vmax.f32 %v173_v12, 0.0  ;;  %v243_v23 = vmax.f32 %v205_v13, 0.0  ;;  %v176_v24 = vadd.f32 %v758_v55, %v175_v20  ;;  %v208_v25 = vadd.f32 %v758_v55, %v207_v21 }
  0xea   :  { %v365_v26 = vmul.f32 %v610_v60, %v237_v16  ;;  %v373_v27 = vmul.f32 %v631_v63, %v245_v17  ;;  %v238_v28 = vmax.f32 %v184_v18, 0.0  ;;  %v246_v29 = vmax.f32 %v216_v19, 0.0 }
  0xeb   :  { %v363_v30 = vmul.f32 %v605_v54, %v235_v22  ;;  %v371_v31 = vmul.f32 %v626_v1, %v243_v23  ;;  %v236_v32 = vmax.f32 %v176_v24, 0.0  ;;  %v244_v33 = vmax.f32 %v208_v25, 0.0 }
  0xec   :  { %v503_v34 = vpack.c.bf16 %v365_v26, %v365_v26  ;;  %v511_v35 = vpack.c.bf16 %v373_v27, %v373_v27  ;;  %v366_v36 = vmul.f32 %v611_v59, %v238_v28  ;;  %v374_v37 = vmul.f32 %v632_v62, %v246_v29 }
  0xed   :  { %v501_v38 = vpack.c.bf16 %v363_v30, %v363_v30  ;;  %v509_v39 = vpack.c.bf16 %v371_v31, %v371_v31  ;;  %v364_v40 = vmul.f32 %v606_v53, %v236_v32  ;;  %v372_v41 = vmul.f32 %v627_v0, %v244_v33  ;;  %v582_v42 = vpop.f32.mrb[4].mxu0  ;;  %v590_v43 = vpop.f32.mrb[4].mxu1 }
  0xee   :  { %446 = vst.msk [vmem:[%s870_s4 + $0x8] sm:$0xf] %vm443_vm1, %v503_v34  ;;  %454 = vst.msk [vmem:[%s870_s4 + $0x28] sm:$0xf] %vm443_vm1, %v511_v35  ;;  %v504_v44 = vpack.c.bf16 %v366_v36, %v366_v36  ;;  %v512_v46 = vpack.c.bf16 %v374_v37, %v374_v37  ;;  %v197_v48 = vadd.f32 %v582_v42, %v758_v55  ;;  %v188_v50 = vpop.f32.mrb[5].mxu0  ;;  %v220_v53 = vpop.f32.mrb[5].mxu1 }
  0xef   :  { %v229_v49 = vadd.f32 %v590_v43, %v758_v55  ;;  %444 = vst.msk [vmem:[%s870_s4] sm:$0xf] %vm443_vm1, %v501_v38  ;;  %452 = vst.msk [vmem:[%s870_s4 + $0x20] sm:$0xf] %vm443_vm1, %v509_v39  ;;  %v502_v54 = vpack.c.bf16 %v364_v40, %v364_v40  ;;  %v510_v59 = vpack.c.bf16 %v372_v41, %v372_v41  ;;  %v583_v63 = vpop.f32.mrb[6].mxu0  ;;  %v591_v0 = vpop.f32.mrb[6].mxu1 }
  0xf0   :  { %v189_v60 = vadd.f32 %v758_v55, %v188_v50  ;;  %v221_v62 = vadd.f32 %v758_v55, %v220_v53  ;;  %447 = vst.msk [vmem:[%s870_s4 + $0xc] sm:$0xf] %vm443_vm1, %v504_v44  ;;  %455 = vst.msk [vmem:[%s870_s4 + $0x2c] sm:$0xf] %vm443_vm1, %v512_v46  ;;  %v241_v1 = vmax.f32 %v197_v48, 0.0  ;;  %v200_v3 = vadd.f32 %v583_v63, %v758_v55  ;;  %v191_v5 = vpop.f32.mrb[7].mxu0 }
  0xf1   :  { %v249_v2 = vmax.f32 %v229_v49, 0.0  ;;  %v232_v4 = vadd.f32 %v591_v0, %v758_v55  ;;  %v223_v8 = vpop.f32.mrb[7].mxu1  ;;  %445 = vst.msk [vmem:[%s870_s4 + $0x4] sm:$0xf] %vm443_vm1, %v502_v54  ;;  %453 = vst.msk [vmem:[%s870_s4 + $0x24] sm:$0xf] %vm443_vm1, %v510_v59  ;;  %v192_v13 = vadd.f32 %v758_v55, %v191_v5 }
  0xf2   :  { %v239_v9 = vmax.f32 %v189_v60, 0.0  ;;  %v247_v12 = vmax.f32 %v221_v62, 0.0  ;;  %v224_v14 = vadd.f32 %v758_v55, %v223_v8  ;;  %v369_v15 = vmul.f32 %v621_v58, %v241_v1 }
  0xf3   :  { %v377_v16 = vmul.f32 %v641_v7, %v249_v2  ;;  %v242_v17 = vmax.f32 %v200_v3, 0.0  ;;  %v250_v18 = vmax.f32 %v232_v4, 0.0  ;;  %v240_v21 = vmax.f32 %v192_v13, 0.0 }
  0xf4   :  { %v367_v19 = vmul.f32 %v616_v52, %v239_v9  ;;  %v375_v20 = vmul.f32 %v636_v11, %v247_v12  ;;  %v248_v22 = vmax.f32 %v224_v14, 0.0  ;;  %v507_v23 = vpack.c.bf16 %v369_v15, %v369_v15 }
  0xf5   :  { %v515_v24 = vpack.c.bf16 %v377_v16, %v377_v16  ;;  %v370_v55 = vmul.f32 %v622_v57, %v242_v17  ;;  %v378_v58 = vmul.f32 %v642_v6, %v250_v18  ;;  %v368_v26 = vmul.f32 %v617_v51, %v240_v21 }
  0xf6   :  { %v505_v25 = vpack.c.bf16 %v367_v19, %v367_v19  ;;  %v513_v7 = vpack.c.bf16 %v375_v20, %v375_v20  ;;  %v376_v52 = vmul.f32 %v637_v10, %v248_v22  ;;  %450 = vst.msk [vmem:[%s870_s4 + $0x18] sm:$0xf] %vm443_vm1, %v507_v23 }
  0xf7   :  { %458 = vst.msk [vmem:[%s870_s4 + $0x38] sm:$0xf] %vm443_vm1, %v515_v24  ;;  %v508_v47 = vpack.c.bf16 %v370_v55, %v370_v55  ;;  %v516_v56 = vpack.c.bf16 %v378_v58, %v378_v58  ;;  %v506_v45 = vpack.c.bf16 %v368_v26, %v368_v26 }
  0xf8   :  { %448 = vst.msk [vmem:[%s870_s4 + $0x10] sm:$0xf] %vm443_vm1, %v505_v25  ;;  %456 = vst.msk [vmem:[%s870_s4 + $0x30] sm:$0xf] %vm443_vm1, %v513_v7  ;;  %v514_v51 = vpack.c.bf16 %v376_v52, %v376_v52 }
  0xf9   :  { %451 = vst.msk [vmem:[%s870_s4 + $0x1c] sm:$0xf] %vm443_vm1, %v508_v47  ;;  %459 = vst.msk [vmem:[%s870_s4 + $0x3c] sm:$0xf] %vm443_vm1, %v516_v56 }
  0xfa   :  { %449 = vst.msk [vmem:[%s870_s4 + $0x14] sm:$0xf] %vm443_vm1, %v506_v45  ;;  %457 = vst.msk [vmem:[%s870_s4 + $0x34] sm:$0xf] %vm443_vm1, %v514_v51 }

// kernel: _lambda_.17
= control target key start
LH: loop header
LB: loop body
LE: loop exit
PB: predicated region body
PF: predicated region fallthrough
CT: control target
= control target key end

     0   :  { %s2133_s15 = smov 0   ;;  %s2135_s16 = smov 0   ;;  %s2549_s0 = inlined_call_operand.vmem [shape: bf16[2,160,192], index: 0, kind: input, shape index: {}]   ;;  %s2550_s1 = inlined_call_operand.vmem [shape: bf16[3,192,64], index: 1, kind: input, shape index: {}]   ;;  %s2551_s2 = inlined_call_operand.vmem [shape: f32[1,64], index: 2, kind: input, shape index: {}]   ;;  %s2552_s3 = inlined_call_operand.vmem [shape: bf16[2,128,1], index: 3, kind: input, shape index: {}]   ;;  %s2553_s4 = inlined_call_operand.vmem [shape: bf16[2,128,64], index: 4, kind: output, shape index: {}]  }
   0x1   :  { %s2137_s17 = smov 0  }
   0x2 LB: > { %s26_s18 = sadd.s32 1, %s2101_s16  ;;  %p1687_p0 = scmp.ge.s32.totalorder %s2105_s17, 1  ;;  %s2105_s17 = sphi %s2137_s17, %s14_s17   ;;  %s2101_s16 = sphi %s2135_s16, %s2555_s16   ;;  %s2097_s15 = sphi %s2133_s15, %s2554_s15  }
   0x3   : > { %p28_p1 = scmp.ge.s32.totalorder %s26_s18, 2  ;;  %p203_p2 = scmp.lt.s32.totalorder %s2105_s17, 3 }
   0x5   : > { %s2557_s18 = smov (%p28_p1, %s26_s18), 0  ;;  %p204_p3 = pnand %p1687_p0, %p203_p2 }
   0x6   : > { %v2017_v0 = vld [vmem:[%s2550_s1] sm:$0xff] (!%p204_p3)   ;;  %v2107_v1 = vmov (!%p204_p3), 0   ;;  %v2019_v3 = vld [vmem:[%s2550_s1 + $0x8] sm:$0xff] (!%p204_p3)   ;;  %v2021_v5 = vld [vmem:[%s2550_s1 + $0x10] sm:$0xff] (!%p204_p3)   ;;  %p244_p4 = scmp.lt.s32.totalorder (!%p204_p3), %s2097_s15, 1  ;;  %vm454_vm0 = vcmask (!%p204_p3), 523264  }
   0x7   : > { %207 = sbr.rel (%p204_p3) target bundleno = 378 (0x17a), region = 36  ;;  %479 = vmatprep.subr.bf16.mxu0 (!%p204_p3), %v2107_v1  ;;  %817 = vmatprep.subr.bf16.mxu1 (!%p204_p3), %v2107_v1  ;;  %v2018_v2 = vld [vmem:[%s2550_s1 + $0x60] sm:$0xff] (!%p204_p3)   ;;  %v2020_v4 = vld [vmem:[%s2550_s1 + $0x68] sm:$0xff] (!%p204_p3)   ;;  %v2022_v6 = vld [vmem:[%s2550_s1 + $0x70] sm:$0xff] (!%p204_p3)   ;;  %vm1547_vm1 = vcmask (!%p204_p3), 519168  }
   0x8   : > { %480 = vmatpush1.bf16.msra.mxu0 (!%p204_p3), %v2017_v0  ;;  %1975 = vset.pattern.permute.xlu0 (!%p204_p3), %v2107_v1  ;;  %v2023_v7 = vld [vmem:[%s2550_s1 + $0x18] sm:$0xff] (!%p204_p3)   ;;  %v2025_v9 = vld [vmem:[%s2550_s1 + $0x20] sm:$0xff] (!%p204_p3)   ;;  %v2027_v11 = vld [vmem:[%s2550_s1 + $0x28] sm:$0xff] (!%p204_p3)  }
   0x9   : > { %818 = vmatpush1.bf16.msra.mxu1 (!%p204_p3), %v2018_v2  ;;  %481 = vmatprep.subr.bf16.mxu0 (!%p204_p3), %v2107_v1  ;;  %v2024_v8 = vld [vmem:[%s2550_s1 + $0x78] sm:$0xff] (!%p204_p3)   ;;  %v2026_v10 = vld [vmem:[%s2550_s1 + $0x80] sm:$0xff] (!%p204_p3)   ;;  %v2028_v12 = vld [vmem:[%s2550_s1 + $0x88] sm:$0xff] (!%p204_p3)  }
   0xa   : > { %819 = vmatprep.subr.bf16.mxu1 (!%p204_p3), %v2107_v1  ;;  %1986 = vset.pattern.permute.xlu1 (!%p204_p3), %v2107_v1  ;;  %v2029_v13 = vld [vmem:[%s2550_s1 + $0x30] sm:$0xff] (!%p204_p3)   ;;  %v2031_v16 = vld [vmem:[%s2550_s1 + $0x38] sm:$0xff] (!%p204_p3)   ;;  %v2033_v19 = vld [vmem:[%s2550_s1 + $0x40] sm:$0xff] (!%p204_p3)  }
   0xb   : > { %v2030_v14 = vld [vmem:[%s2550_s1 + $0x90] sm:$0xff] (!%p204_p3)   ;;  %v2032_v18 = vld [vmem:[%s2550_s1 + $0x98] sm:$0xff] (!%p204_p3)   ;;  %v2034_v20 = vld [vmem:[%s2550_s1 + $0xa0] sm:$0xff] (!%p204_p3)  }
   0xc   : > { %482 = vmatpush1.bf16.msra.mxu0 (!%p204_p3), %v2019_v3  ;;  %v2035_v21 = vld [vmem:[%s2550_s1 + $0x48] sm:$0xff] (!%p204_p3)   ;;  %v2037_v23 = vld [vmem:[%s2550_s1 + $0x50] sm:$0xff] (!%p204_p3)   ;;  %v2039_v25 = vld [vmem:[%s2550_s1 + $0x58] sm:$0xff] (!%p204_p3)  }
   0xd   : > { %820 = vmatpush1.bf16.msra.mxu1 (!%p204_p3), %v2020_v4  ;;  %483 = vmatprep.subr.bf16.mxu0 (!%p204_p3), %v2107_v1  ;;  %v2036_v22 = vld [vmem:[%s2550_s1 + $0xa8] sm:$0xff] (!%p204_p3)   ;;  %v2038_v24 = vld [vmem:[%s2550_s1 + $0xb0] sm:$0xff] (!%p204_p3)   ;;  %v2040_v26 = vld [vmem:[%s2550_s1 + $0xb8] sm:$0xff] (!%p204_p3)  }
   0xe   : > { %821 = vmatprep.subr.bf16.mxu1 %v2107_v1  ;;  %s2559_s15 = smov (!%p244_p4, %s2097_s15), 1  ;;  %v2047_v29 = vld [vmem:[%s2550_s1 + $0xc0] sm:$0xff]   ;;  %v2050_v32 = vld [vmem:[%s2550_s1 + $0xc8] sm:$0xff]   ;;  %v2052_v45 = vld [vmem:[%s2550_s1 + $0xd0] sm:$0xff]  }
   0xf   : > { %s1949_s19 = smul.u32 160, %s2559_s15  ;;  %s1868_s28 = sshll.u32 %s2559_s15, 6  ;;  %v2056_v53 = vld [vmem:[%s2550_s1 + $0xd8] sm:$0xff]   ;;  %v2059_v0 = vld [vmem:[%s2550_s1 + $0xe0] sm:$0xff]  }
  0x10   : > { %484 = vmatpush1.bf16.msra.mxu0 %v2021_v5  ;;  %s2276_s7 = scalar_lea.vmem %s2552_s3, %s1868_s28  ;;  %v2061_v5 = vld [vmem:[%s2550_s1 + $0xe8] sm:$0xff]   ;;  %s2480_s13 = scalar_lea.vmem %s2553_s4, %s1868_s28 }
  0x11   : > { %822 = vmatpush1.bf16.msra.mxu1 %v2022_v6  ;;  %485 = vmatprep.subr.bf16.mxu0 %v2107_v1  ;;  %s2214_s26 = scalar_lea.vmem %s2549_s0, %s1949_s19  ;;  %v1887_v31 = vld [vmem:[%s2276_s7] sm:$0xff]   ;;  %v1918_v35 = vld [vmem:[%s2276_s7 + $0x8] sm:$0xff]   ;;  %v1919_v36 = vld [vmem:[%s2276_s7 + $0x10] sm:$0xff]  }
  0x12   : > { %823 = vmatprep.subr.bf16.mxu1 %v2107_v1  ;;  %v2043_v15 = vld [vmem:[%s2214_s26 + $0x4] ss:$8 sps:$4 sm:$0xff]   ;;  %v2046_v17 = vld [vmem:[%s2214_s26 + $0x14] ss:$8 sps:$4 sm:$0xff]   ;;  %v2041_v27 = vld [vmem:[%s2214_s26] ss:$8 sps:$4 sm:$0xff]   ;;  %v1888_v33 = vunpack.c.l.bf16 %v1887_v31  ;;  %v1889_v34 = vunpack.c.h.bf16 %v1887_v31  ;;  %v1896_v37 = vunpack.c.l.bf16 %v1919_v36  ;;  %v1897_v38 = vunpack.c.h.bf16 %v1919_v36 }
  0x13   : > { %1721 = vmatprep.mubr.msk.bf16.mxu0 %vm454_vm0, %v2043_v15  ;;  %1781 = vmatprep.mubr.msk.bf16.mxu1 %vm454_vm0, %v2046_v17  ;;  %v2044_v28 = vld [vmem:[%s2214_s26 + $0x10] ss:$8 sps:$4 sm:$0xff]   ;;  %v2281_v30 = vld [vmem:[%s2214_s26 + $0x24] ss:$8 sps:$4 sm:$0xff]   ;;  %v1892_v41 = vunpack.c.l.bf16 %v1918_v35  ;;  %v1893_v42 = vunpack.c.h.bf16 %v1918_v35  ;;  %v2296_v44 = vld [vmem:[%s2214_s26 + $0x20] ss:$8 sps:$4 sm:$0xff]  }
  0x14   : > { %486 = vmatpush1.bf16.msra.mxu0 %v2023_v7  ;;  %v1920_v39 = vld [vmem:[%s2276_s7 + $0x18] sm:$0xff]   ;;  %v1976_v40 = vpack.i.bf16 %v1889_v34, %v1888_v33  ;;  %v1987_v43 = vpack.i.bf16 %v1897_v38, %v1896_v37  ;;  %v1921_v46 = vld [vmem:[%s2276_s7 + $0x20] sm:$0xff]   ;;  %v1922_v55 = vld [vmem:[%s2276_s7 + $0x28] sm:$0xff]  }
  0x15   : > { %824 = vmatpush1.bf16.msra.mxu1 %v2024_v8  ;;  %487 = vmatprep.subr.bf16.mxu0 %v2107_v1  ;;  %v1900_v47 = vunpack.c.l.bf16 %v1920_v39  ;;  %v1901_v48 = vunpack.c.h.bf16 %v1920_v39  ;;  %v2305_v49 = vld [vmem:[%s2214_s26 + $0x34] ss:$8 sps:$4 sm:$0xff]   ;;  %v1981_v50 = vpack.i.bf16 %v1893_v42, %v1892_v41  ;;  %v1904_v51 = vunpack.c.l.bf16 %v1921_v46  ;;  %v2320_v60 = vld [vmem:[%s2214_s26 + $0x30] ss:$8 sps:$4 sm:$0xff]   ;;  %v2324_v63 = vld [vmem:[%s2214_s26 + $0x44] ss:$8 sps:$4 sm:$0xff]  }
  0x16   : > { %825 = vmatprep.subr.bf16.mxu1 %v2107_v1  ;;  %1977 = vperm.xlu0 %1975, %v1976_v40   ;;  %v1905_v52 = vunpack.c.h.bf16 %v1921_v46  ;;  %v1923_v56 = vld [vmem:[%s2276_s7 + $0x30] sm:$0xff]   ;;  %v1908_v58 = vunpack.c.l.bf16 %v1922_v55  ;;  %v1909_v59 = vunpack.c.h.bf16 %v1922_v55  ;;  %v1924_v3 = vld [vmem:[%s2276_s7 + $0x38] sm:$0xff]   ;;  %v2343_v8 = vld [vmem:[%s2214_s26 + $0x40] ss:$8 sps:$4 sm:$0xff]  }
  0x17   : > { %1988 = vperm.xlu1 %1986, %v1987_v43   ;;  %v1992_v54 = vpack.i.bf16 %v1901_v48, %v1900_v47  ;;  %v1912_v61 = vunpack.c.l.bf16 %v1923_v56  ;;  %v1913_v62 = vunpack.c.h.bf16 %v1923_v56  ;;  %v1916_v6 = vunpack.c.l.bf16 %v1924_v3  ;;  %v2070_v15 = vld [vmem:[%s2550_s1 + $0x100] sm:$0xff]  }
  0x18   : > { %488 = vmatpush1.bf16.msra.mxu0 %v2025_v9  ;;  %v1997_v57 = vpack.i.bf16 %v1905_v52, %v1904_v51  ;;  %v2002_v2 = vpack.i.bf16 %v1909_v59, %v1908_v58  ;;  %v1917_v7 = vunpack.c.h.bf16 %v1924_v3  ;;  %v2346_v9 = vld [vmem:[%s2214_s26 + $0x54] ss:$8 sps:$4 sm:$0xff]  }
  0x19   : > { %826 = vmatpush1.bf16.msra.mxu1 %v2026_v10  ;;  %489 = vmatprep.subr.bf16.mxu0 %v2107_v1  ;;  %v2007_v4 = vpack.i.bf16 %v1913_v62, %v1912_v61  ;;  %v2065_v10 = vld [vmem:[%s2550_s1 + $0xf0] sm:$0xff]  }
  0x1a   : > { %827 = vmatprep.subr.bf16.mxu1 %v2107_v1  ;;  %1982 = vperm.xlu0 %1975, %v1981_v50  }
  0x1b   : > { %1993 = vperm.xlu1 %1986, %v1992_v54  }
  0x1c   : > { %490 = vmatpush1.bf16.msra.mxu0 %v2027_v11  ;;  %v2012_v11 = vpack.i.bf16 %v1917_v7, %v1916_v6 }
  0x1d   : > { %828 = vmatpush1.bf16.msra.mxu1 %v2028_v12  ;;  %491 = vmatprep.subr.bf16.mxu0 %v2107_v1  ;;  %v2068_v12 = vld [vmem:[%s2550_s1 + $0xf8] sm:$0xff]  }
  0x1e   : > { %829 = vmatprep.subr.bf16.mxu1 %v2107_v1  ;;  %1998 = vperm.xlu0 %1975, %v1997_v57  }
  0x1f   : > { %2003 = vperm.xlu1 %1986, %v2002_v2  }
  0x20   : > { %492 = vmatpush1.bf16.msra.mxu0 %v2029_v13  ;;  %v2064_v13 = vld [vmem:[%s2214_s26 + $0x50] ss:$8 sps:$4 sm:$0xff]  }
  0x21   : > { %830 = vmatpush1.bf16.msra.mxu1 %v2030_v14  ;;  %493 = vmatprep.subr.bf16.mxu0 %v2107_v1  ;;  %v2066_v14 = vld [vmem:[%s2214_s26 + $0x64] ss:$8 sps:$4 sm:$0xff]  }
  0x22   : > { %831 = vmatprep.subr.bf16.mxu1 %v2107_v1  ;;  %2008 = vperm.xlu0 %1975, %v2007_v4  }
  0x23   : > { %2013 = vperm.xlu1 %1986, %v2012_v11  }
  0x24   : > { %494 = vmatpush1.bf16.msra.mxu0 %v2031_v16  ;;  %v2074_v16 = vld [vmem:[%s2550_s1 + $0x108] sm:$0xff]  }
  0x25   : > { %832 = vmatpush1.bf16.msra.mxu1 %v2032_v18  ;;  %495 = vmatprep.subr.bf16.mxu0 %v2107_v1  ;;  %v2071_v18 = vld [vmem:[%s2214_s26 + $0x74] ss:$8 sps:$4 sm:$0xff]  }
  0x26   : > { %833 = vmatprep.subr.bf16.mxu1 %v2107_v1 }
  0x28   : > { %496 = vmatpush1.bf16.msra.mxu0 %v2033_v19  ;;  %v2077_v19 = vld [vmem:[%s2550_s1 + $0x110] sm:$0xff]  }
  0x29   : > { %834 = vmatpush1.bf16.msra.mxu1 %v2034_v20  ;;  %497 = vmatprep.subr.bf16.mxu0 %v2107_v1  ;;  %v2079_v20 = vld [vmem:[%s2550_s1 + $0x118] sm:$0xff]  }
  0x2a   : > { %835 = vmatprep.subr.bf16.mxu1 %v2107_v1 }
  0x2c   : > { %498 = vmatpush1.bf16.msra.mxu0 %v2035_v21  ;;  %v2073_v21 = vld [vmem:[%s2214_s26 + $0x70] ss:$8 sps:$4 sm:$0xff]  }
  0x2d   : > { %836 = vmatpush1.bf16.msra.mxu1 %v2036_v22  ;;  %499 = vmatprep.subr.bf16.mxu0 %v2107_v1  ;;  %v2075_v22 = vld [vmem:[%s2214_s26 + $0x84] ss:$8 sps:$4 sm:$0xff]  }
  0x2e   : > { %837 = vmatprep.subr.bf16.mxu1 %v2107_v1 }
  0x30   : > { %500 = vmatpush1.bf16.msra.mxu0 %v2037_v23  ;;  %v2078_v23 = vld [vmem:[%s2214_s26 + $0x80] ss:$8 sps:$4 sm:$0xff]  }
  0x31   : > { %838 = vmatpush1.bf16.msra.mxu1 %v2038_v24  ;;  %501 = vmatprep.subr.bf16.mxu0 %v2107_v1  ;;  %v2082_v24 = vld [vmem:[%s2214_s26 + $0x90] ss:$8 sps:$4 sm:$0xff]  }
  0x32   : > { %839 = vmatprep.subr.bf16.mxu1 %v2107_v1 }
  0x34   : > { %502 = vmatpush1.bf16.msra.mxu0 %v2039_v25 }
  0x35   : > { %840 = vmatpush1.bf16.msra.mxu1 %v2040_v26  ;;  %1171 = vmatprep.subr.bf16.mxu0 %v2107_v1 }
  0x36   : > { %1925 = vmatprep.subr.bf16.mxu1 %v2107_v1 }
  0x37   : > { %512 = vmatmul.mubr.bf16.vlgmr.msra.gmra.mrb[0].mxu0 %v2041_v27 }
  0x38   : > { %850 = vmatmul.mubr.bf16.vlgmr.msra.gmra.mrb[0].mxu1 %v2044_v28  ;;  %1172 = vmatpush1.bf16.msra.mxu0 %v2047_v29 }
  0x39   : > { %1937 = vmatpush1.bf16.msra.mxu1 %v2047_v29  ;;  %1173 = vmatprep.subr.bf16.mxu0 %v2107_v1 }
  0x3a   : > { %1926 = vmatprep.subr.bf16.mxu1 %v2107_v1  ;;  %1722 = vmatprep.mubr.msk.bf16.mxu0 %vm454_vm0, %v2046_v17  ;;  %v2069_v17 = vld [vmem:[%s2214_s26 + $0x60] ss:$8 sps:$4 sm:$0xff]  }
  0x3b   : > { %1782 = vmatprep.mubr.msk.bf16.mxu1 %vm454_vm0, %v2281_v30 }
  0x3c   : > { %1174 = vmatpush1.bf16.msra.mxu0 %v2050_v32 }
  0x3d   : > { %1938 = vmatpush1.bf16.msra.mxu1 %v2050_v32  ;;  %1175 = vmatprep.subr.bf16.mxu0 %v2107_v1 }
  0x3e   : > { %1927 = vmatprep.subr.bf16.mxu1 %v2107_v1 }
  0x3f   : > { %520 = vmatmul.mubr.bf16.gmra.mrb[4].mxu0 %v2044_v28 }
  0x40   : > { %858 = vmatmul.mubr.bf16.gmra.mrb[4].mxu1 %v2296_v44  ;;  %1176 = vmatpush1.bf16.msra.mxu0 %v2052_v45 }
  0x41   : > { %1939 = vmatpush1.bf16.msra.mxu1 %v2052_v45  ;;  %1723 = vmatprep.mubr.msk.bf16.mxu0 %vm454_vm0, %v2281_v30 }
  0x42   : > { %1783 = vmatprep.mubr.msk.bf16.mxu1 %vm454_vm0, %v2305_v49  ;;  %1177 = vmatprep.subr.bf16.mxu0 %v2107_v1 }
  0x43   : > { %1928 = vmatprep.subr.bf16.mxu1 %v2107_v1 }
  0x44   : > { %1178 = vmatpush1.bf16.msra.mxu0 %v2056_v53 }
  0x45   : > { %1940 = vmatpush1.bf16.msra.mxu1 %v2056_v53  ;;  %1179 = vmatprep.subr.bf16.mxu0 %v2107_v1 }
  0x46   : > { %1929 = vmatprep.subr.bf16.mxu1 %v2107_v1 }
  0x47   : > { %528 = vmatmul.mubr.bf16.gmra.mrb[8].mxu0 %v2296_v44 }
  0x48   : > { %866 = vmatmul.mubr.bf16.gmra.mrb[8].mxu1 %v2320_v60  ;;  %1724 = vmatprep.mubr.msk.bf16.mxu0 %vm454_vm0, %v2305_v49 }
  0x49   : > { %1784 = vmatprep.mubr.msk.bf16.mxu1 %vm454_vm0, %v2324_v63  ;;  %1180 = vmatpush1.bf16.msra.mxu0 %v2059_v0 }
  0x4a   : > { %1941 = vmatpush1.bf16.msra.mxu1 %v2059_v0  ;;  %1181 = vmatprep.subr.bf16.mxu0 %v2107_v1 }
  0x4b   : > { %1930 = vmatprep.subr.bf16.mxu1 %v2107_v1 }
  0x4d   : > { %1182 = vmatpush1.bf16.msra.mxu0 %v2061_v5 }
  0x4e   : > { %1942 = vmatpush1.bf16.msra.mxu1 %v2061_v5  ;;  %1183 = vmatprep.subr.bf16.mxu0 %v2107_v1 }
  0x4f   : > { %536 = vmatmul.mubr.bf16.gmra.mrb[12].mxu0 %v2320_v60  ;;  %1931 = vmatprep.subr.bf16.mxu1 %v2107_v1 }
  0x50   : > { %874 = vmatmul.mubr.bf16.gmra.mrb[12].mxu1 %v2343_v8  ;;  %1725 = vmatprep.mubr.msk.bf16.mxu0 %vm454_vm0, %v2324_v63 }
  0x51   : > { %1785 = vmatprep.mubr.msk.bf16.mxu1 %vm454_vm0, %v2346_v9  ;;  %1184 = vmatpush1.bf16.msra.mxu0 %v2065_v10 }
  0x52   : > { %1943 = vmatpush1.bf16.msra.mxu1 %v2065_v10  ;;  %1185 = vmatprep.subr.bf16.mxu0 %v2107_v1 }
  0x53   : > { %1932 = vmatprep.subr.bf16.mxu1 %v2107_v1 }
  0x55   : > { %1186 = vmatpush1.bf16.msra.mxu0 %v2068_v12 }
  0x56   : > { %1944 = vmatpush1.bf16.msra.mxu1 %v2068_v12  ;;  %1187 = vmatprep.subr.bf16.mxu0 %v2107_v1 }
  0x57   : > { %544 = vmatmul.mubr.bf16.gmra.mrb[16].mxu0 %v2343_v8  ;;  %1933 = vmatprep.subr.bf16.mxu1 %v2107_v1 }
  0x58   : > { %882 = vmatmul.mubr.bf16.gmra.mrb[16].mxu1 %v2064_v13  ;;  %1726 = vmatprep.mubr.msk.bf16.mxu0 %vm454_vm0, %v2346_v9 }
  0x59   : > { %1786 = vmatprep.mubr.msk.bf16.mxu1 %vm454_vm0, %v2066_v14  ;;  %1188 = vmatpush1.bf16.msra.mxu0 %v2070_v15 }
  0x5a   : > { %1945 = vmatpush1.bf16.msra.mxu1 %v2070_v15  ;;  %1189 = vmatprep.subr.bf16.mxu0 %v2107_v1 }
  0x5b   : > { %1934 = vmatprep.subr.bf16.mxu1 %v2107_v1 }
  0x5d   : > { %1190 = vmatpush1.bf16.msra.mxu0 %v2074_v16 }
  0x5e   : > { %1946 = vmatpush1.bf16.msra.mxu1 %v2074_v16  ;;  %1191 = vmatprep.subr.bf16.mxu0 %v2107_v1 }
  0x5f   : > { %552 = vmatmul.mubr.bf16.gmra.mrb[20].mxu0 %v2064_v13  ;;  %1935 = vmatprep.subr.bf16.mxu1 %v2107_v1 }
  0x60   : > { %890 = vmatmul.mubr.bf16.gmra.mrb[20].mxu1 %v2069_v17  ;;  %1727 = vmatprep.mubr.msk.bf16.mxu0 %vm454_vm0, %v2066_v14 }
  0x61   : > { %1787 = vmatprep.mubr.msk.bf16.mxu1 %vm454_vm0, %v2071_v18  ;;  %1192 = vmatpush1.bf16.msra.mxu0 %v2077_v19 }
  0x62   : > { %1947 = vmatpush1.bf16.msra.mxu1 %v2077_v19  ;;  %1193 = vmatprep.subr.bf16.mxu0 %v2107_v1 }
  0x63   : > { %1936 = vmatprep.subr.bf16.mxu1 %v2107_v1  ;;  %v2080_v1 = vld [vmem:[%s2214_s26 + $0x94] ss:$8 sps:$4 sm:$0xff]  }
  0x65   : > { %1194 = vmatpush1.bf16.msra.mxu0 %v2079_v20 }
  0x66   : > { %1948 = vmatpush1.bf16.msra.mxu1 %v2079_v20 }
  0x67   : > { %560 = vmatmul.mubr.bf16.gmra.mrb[24].mxu0 %v2069_v17 }
  0x68   : > { %898 = vmatmul.mubr.bf16.gmra.mrb[24].mxu1 %v2073_v21  ;;  %1728 = vmatprep.mubr.msk.bf16.mxu0 %vm454_vm0, %v2071_v18 }
  0x69   : > { %1788 = vmatprep.mubr.msk.bf16.mxu1 %vm454_vm0, %v2075_v22 }
  0x6f   : > { %568 = vmatmul.mubr.bf16.gmra.mrb[28].mxu0 %v2073_v21 }
  0x70   : > { %906 = vmatmul.mubr.bf16.gmra.mrb[28].mxu1 %v2078_v23  ;;  %1841 = vmatprep.mubr.msk.bf16.mxu0 %vm454_vm0, %v2281_v30 }
  0x71   : > { %1845 = vmatprep.mubr.msk.bf16.mxu1 %vm454_vm0, %v2066_v14 }
  0x77   : > { %1204 = vmatmul.mubr.bf16.vlgmr.msra.gmra.mrb[32].mxu0 %v2296_v44 }
  0x78   : > { %1236 = vmatmul.mubr.bf16.vlgmr.msra.gmra.mrb[32].mxu1 %v2069_v17  ;;  %1842 = vmatprep.mubr.msk.bf16.mxu0 %vm454_vm0, %v2305_v49 }
  0x79   : > { %1846 = vmatprep.mubr.msk.bf16.mxu1 %vm454_vm0, %v2071_v18 }
  0x7f   : > { %1212 = vmatmul.mubr.bf16.gmra.mrb[36].mxu0 %v2320_v60 }
  0x80   : > { %1244 = vmatmul.mubr.bf16.gmra.mrb[36].mxu1 %v2073_v21  ;;  %1843 = vmatprep.mubr.msk.bf16.mxu0 %vm454_vm0, %v2324_v63 }
  0x81   : > { %1847 = vmatprep.mubr.msk.bf16.mxu1 %vm454_vm0, %v2075_v22 }
  0x87   : > { %1220 = vmatmul.mubr.bf16.gmra.mrb[40].mxu0 %v2343_v8 }
  0x88   : > { %1252 = vmatmul.mubr.bf16.gmra.mrb[40].mxu1 %v2078_v23  ;;  %1844 = vmatprep.mubr.msk.bf16.mxu0 %vm454_vm0, %v2346_v9 }
  0x89   : > { %1848 = vmatprep.mubr.msk.bf16.mxu1 %vm454_vm0, %v2080_v1 }
  0x8f   : > { %1228 = vmatmul.mubr.bf16.gmra.mrb[44].mxu0 %v2064_v13 }
  0x90   : > { %1260 = vmatmul.mubr.bf16.gmra.mrb[44].mxu1 %v2082_v24 }
 0x10a   : > { %v513_v25 = vpop.f32.mrb[0].mxu0 }
 0x10b   : > { %576 = vst.msk [vmem:[#allocation2] sm:$0xff] %vm454_vm0, %v513_v25  ;;  %v851_v26 = vpop.f32.mrb[0].mxu1  ;;  %v515_v27 = vpop.f32.mrb[1].mxu0 }
 0x10c   : > { %v853_v28 = vpop.f32.mrb[1].mxu1  ;;  %v516_v29 = vpop.f32.mrb[2].mxu0 }
 0x10d   : > { %577 = vst.msk [vmem:[#allocation2 + $0x8] sm:$0xff] %vm454_vm0, %v516_v29  ;;  %v854_v30 = vpop.f32.mrb[2].mxu1  ;;  %v518_v31 = vpop.f32.mrb[3].mxu0 }
 0x10e   : > { %v856_v32 = vpop.f32.mrb[3].mxu1 }
 0x112   : > { %v592_v33 = vld [vmem:[#allocation2] sm:$0xff]  ;;  %v521_v34 = vpop.f32.mrb[4].mxu0 }
 0x113   : > { %v914_v35 = vadd.f32 %v851_v26, %v592_v33  ;;  %578 = vst.msk [vmem:[#allocation2 + $0x10] sm:$0xff] %vm454_vm0, %v521_v34  ;;  %v859_v36 = vpop.f32.mrb[4].mxu1  ;;  %v523_v37 = vpop.f32.mrb[5].mxu0 }
 0x114   : > { %v593_v38 = vld [vmem:[#allocation2 + $0x8] sm:$0xff]  ;;  %v861_v39 = vpop.f32.mrb[5].mxu1  ;;  %v524_v40 = vpop.f32.mrb[6].mxu0 }
 0x115   : > { %930 = vst.msk [vmem:[#allocation2] sm:$0xff] %vm454_vm0, %v914_v35  ;;  %v915_v41 = vadd.f32 %v854_v30, %v593_v38  ;;  %579 = vst.msk [vmem:[#allocation2 + $0x18] sm:$0xff] %vm454_vm0, %v524_v40  ;;  %v862_v42 = vpop.f32.mrb[6].mxu1  ;;  %v526_v43 = vpop.f32.mrb[7].mxu0 }
 0x116   : > { %v864_v44 = vpop.f32.mrb[7].mxu1  ;;  %v2442_v43 = vpop.permute.xlu0 %1977 }
 0x117   : > { %931 = vst.msk [vmem:[#allocation2 + $0x8] sm:$0xff] %vm454_vm0, %v915_v41 }
 0x11a   : > { %v594_v45 = vld [vmem:[#allocation2 + $0x10] sm:$0xff]  ;;  %v529_v46 = vpop.f32.mrb[8].mxu0 }
 0x11b   : > { %v916_v47 = vadd.f32 %v859_v36, %v594_v45  ;;  %580 = vst.msk [vmem:[#allocation2 + $0x20] sm:$0xff] %vm454_vm0, %v529_v46  ;;  %v867_v48 = vpop.f32.mrb[8].mxu1  ;;  %v531_v49 = vpop.f32.mrb[9].mxu0 }
 0x11c   : > { %v595_v50 = vld [vmem:[#allocation2 + $0x18] sm:$0xff]  ;;  %v869_v51 = vpop.f32.mrb[9].mxu1  ;;  %v532_v52 = vpop.f32.mrb[10].mxu0 }
 0x11d   : > { %932 = vst.msk [vmem:[#allocation2 + $0x10] sm:$0xff] %vm454_vm0, %v916_v47  ;;  %v917_v53 = vadd.f32 %v862_v42, %v595_v50  ;;  %581 = vst.msk [vmem:[#allocation2 + $0x28] sm:$0xff] %vm454_vm0, %v532_v52  ;;  %v870_v54 = vpop.f32.mrb[10].mxu1  ;;  %v534_v55 = vpop.f32.mrb[11].mxu0 }
 0x11e   : > { %v872_v56 = vpop.f32.mrb[11].mxu1 }
 0x11f   : > { %933 = vst.msk [vmem:[#allocation2 + $0x18] sm:$0xff] %vm454_vm0, %v917_v53  ;;  %v946_v56 = vld [vmem:[#allocation2] sm:$0xff] }
 0x122   : > { %v596_v57 = vld [vmem:[#allocation2 + $0x20] sm:$0xff]  ;;  %v537_v58 = vpop.f32.mrb[12].mxu0 }
 0x123   : > { %v918_v59 = vadd.f32 %v867_v48, %v596_v57  ;;  %582 = vst.msk [vmem:[#allocation2 + $0x30] sm:$0xff] %vm454_vm0, %v537_v58  ;;  %v875_v60 = vpop.f32.mrb[12].mxu1  ;;  %v539_v61 = vpop.f32.mrb[13].mxu0 }
 0x124   : > { %v597_v62 = vld [vmem:[#allocation2 + $0x28] sm:$0xff]  ;;  %v877_v63 = vpop.f32.mrb[13].mxu1  ;;  %v540_v0 = vpop.f32.mrb[14].mxu0 }
 0x125   : > { %934 = vst.msk [vmem:[#allocation2 + $0x20] sm:$0xff] %vm454_vm0, %v918_v59  ;;  %v919_v2 = vadd.f32 %v870_v54, %v597_v62  ;;  %583 = vst.msk [vmem:[#allocation2 + $0x38] sm:$0xff] %vm454_vm0, %v540_v0  ;;  %v878_v3 = vpop.f32.mrb[14].mxu1  ;;  %v542_v4 = vpop.f32.mrb[15].mxu0 }
 0x126   : > { %v880_v5 = vpop.f32.mrb[15].mxu1  ;;  %v2448_v54 = vpop.permute.xlu0 %1982  ;;  %v947_v4 = vld [vmem:[#allocation2 + $0x8] sm:$0xff] }
 0x127   : > { %935 = vst.msk [vmem:[#allocation2 + $0x28] sm:$0xff] %vm454_vm0, %v919_v2  ;;  %v2450_v58 = vpop.permute.xlu1 %1988 }
 0x12a   : > { %v598_v6 = vld [vmem:[#allocation2 + $0x30] sm:$0xff]  ;;  %v545_v7 = vpop.f32.mrb[16].mxu0 }
 0x12b   : > { %v920_v8 = vadd.f32 %v875_v60, %v598_v6  ;;  %584 = vst.msk [vmem:[#allocation2 + $0x40] sm:$0xff] %vm454_vm0, %v545_v7  ;;  %v883_v9 = vpop.f32.mrb[16].mxu1  ;;  %v547_v10 = vpop.f32.mrb[17].mxu0 }
 0x12c   : > { %v599_v11 = vld [vmem:[#allocation2 + $0x38] sm:$0xff]  ;;  %v885_v12 = vpop.f32.mrb[17].mxu1  ;;  %v548_v13 = vpop.f32.mrb[18].mxu0 }
 0x12d   : > { %936 = vst.msk [vmem:[#allocation2 + $0x30] sm:$0xff] %vm454_vm0, %v920_v8  ;;  %v921_v14 = vadd.f32 %v878_v3, %v599_v11  ;;  %585 = vst.msk [vmem:[#allocation2 + $0x48] sm:$0xff] %vm454_vm0, %v548_v13  ;;  %v886_v15 = vpop.f32.mrb[18].mxu1  ;;  %v550_v16 = vpop.f32.mrb[19].mxu0 }
 0x12e   : > { %v888_v17 = vpop.f32.mrb[19].mxu1  ;;  %v1999_v13 = vpop.permute.xlu0 %1998 }
 0x12f   : > { %937 = vst.msk [vmem:[#allocation2 + $0x38] sm:$0xff] %vm454_vm0, %v921_v14  ;;  %v2461_v14 = vld [vmem:[%s2551_s2] ss:$0 sm:$0xff]  ;;  %v2463_v17 = vpop.permute.xlu1 %1993 }
 0x132   : > { %v600_v18 = vld [vmem:[#allocation2 + $0x40] sm:$0xff]  ;;  %v553_v19 = vpop.f32.mrb[20].mxu0 }
 0x133   : > { %v922_v20 = vadd.f32 %v883_v9, %v600_v18  ;;  %586 = vst.msk [vmem:[#allocation2 + $0x50] sm:$0xff] %vm454_vm0, %v553_v19  ;;  %v891_v21 = vpop.f32.mrb[20].mxu1  ;;  %v555_v22 = vpop.f32.mrb[21].mxu0 }
 0x134   : > { %v601_v23 = vld [vmem:[#allocation2 + $0x48] sm:$0xff]  ;;  %v893_v1 = vpop.f32.mrb[21].mxu1  ;;  %v556_v24 = vpop.f32.mrb[22].mxu0 }
 0x135   : > { %938 = vst.msk [vmem:[#allocation2 + $0x40] sm:$0xff] %vm454_vm0, %v922_v20  ;;  %v923_v25 = vadd.f32 %v886_v15, %v601_v23  ;;  %587 = vst.msk [vmem:[#allocation2 + $0x58] sm:$0xff] %vm454_vm0, %v556_v24  ;;  %v894_v26 = vpop.f32.mrb[22].mxu1  ;;  %v558_v27 = vpop.f32.mrb[23].mxu0  ;;  %v948_v15 = vld [vmem:[#allocation2 + $0x10] sm:$0xff]  ;;  %v949_v24 = vld [vmem:[#allocation2 + $0x18] sm:$0xff] }
 0x136   : > { %v896_v28 = vpop.f32.mrb[23].mxu1 }
 0x137   : > { %939 = vst.msk [vmem:[#allocation2 + $0x48] sm:$0xff] %vm454_vm0, %v923_v25 }
 0x13a   : > { %v602_v29 = vld [vmem:[#allocation2 + $0x50] sm:$0xff]  ;;  %v561_v30 = vpop.f32.mrb[24].mxu0 }
 0x13b   : > { %v924_v31 = vadd.f32 %v891_v21, %v602_v29  ;;  %588 = vst.msk [vmem:[#allocation2 + $0x60] sm:$0xff] %vm454_vm0, %v561_v30  ;;  %v899_v32 = vpop.f32.mrb[24].mxu1  ;;  %v563_v33 = vpop.f32.mrb[25].mxu0 }
 0x13c   : > { %v603_v34 = vld [vmem:[#allocation2 + $0x58] sm:$0xff]  ;;  %v901_v35 = vpop.f32.mrb[25].mxu1  ;;  %v564_v36 = vpop.f32.mrb[26].mxu0  ;;  %v954_v61 = vld [vmem:[#allocation2 + $0x40] sm:$0xff] }
 0x13d   : > { %940 = vst.msk [vmem:[#allocation2 + $0x50] sm:$0xff] %vm454_vm0, %v924_v31  ;;  %v925_v37 = vadd.f32 %v894_v26, %v603_v34  ;;  %589 = vst.msk [vmem:[#allocation2 + $0x68] sm:$0xff] %vm454_vm0, %v564_v36  ;;  %v902_v38 = vpop.f32.mrb[26].mxu1  ;;  %v566_v39 = vpop.f32.mrb[27].mxu0  ;;  %v1979_v26 = vunpack.i.l.bf16 %v2442_v43  ;;  %v2000_v36 = vunpack.i.l.bf16 %v1999_v13 }
 0x13e   : > { %v904_v40 = vpop.f32.mrb[27].mxu1  ;;  %v955_v8 = vld [vmem:[#allocation2 + $0x48] sm:$0xff] }
 0x13f   : > { %941 = vst.msk [vmem:[#allocation2 + $0x58] sm:$0xff] %vm454_vm0, %v925_v37 }
 0x142   : > { %v604_v41 = vld [vmem:[#allocation2 + $0x60] sm:$0xff]  ;;  %v569_v42 = vpop.f32.mrb[28].mxu0 }
 0x143   : > { %v926_v44 = vadd.f32 %v899_v32, %v604_v41  ;;  %590 = vst.msk [vmem:[#allocation2 + $0x70] sm:$0xff] %vm454_vm0, %v569_v42  ;;  %v907_v45 = vpop.f32.mrb[28].mxu1  ;;  %v571_v46 = vpop.f32.mrb[29].mxu0  ;;  %v2001_v42 = vunpack.i.h.bf16 %v1999_v13 }
 0x144   : > { %v605_v47 = vld [vmem:[#allocation2 + $0x68] sm:$0xff]  ;;  %v909_v48 = vpop.f32.mrb[29].mxu1  ;;  %v572_v49 = vpop.f32.mrb[30].mxu0  ;;  %v956_v19 = vld [vmem:[#allocation2 + $0x50] sm:$0xff] }
 0x145   : > { %942 = vst.msk [vmem:[#allocation2 + $0x60] sm:$0xff] %vm454_vm0, %v926_v44  ;;  %v927_v50 = vadd.f32 %v902_v38, %v605_v47  ;;  %591 = vst.msk [vmem:[#allocation2 + $0x78] sm:$0xff] %vm454_vm0, %v572_v49  ;;  %v910_v51 = vpop.f32.mrb[30].mxu1  ;;  %v574_v52 = vpop.f32.mrb[31].mxu0  ;;  %v1980_v38 = vunpack.i.h.bf16 %v2442_v43  ;;  %v950_v49 = vld [vmem:[#allocation2 + $0x20] sm:$0xff] }
 0x146   : > { %v912_v53 = vpop.f32.mrb[31].mxu1  ;;  %v957_v29 = vld [vmem:[#allocation2 + $0x58] sm:$0xff] }
 0x147   : > { %943 = vst.msk [vmem:[#allocation2 + $0x68] sm:$0xff] %vm454_vm0, %v927_v50 }
 0x14a   : > { %v606_v55 = vld [vmem:[#allocation2 + $0x70] sm:$0xff]  ;;  %v1205_v57 = vpop.f32.mrb[32].mxu0 }
 0x14b   : > { %v928_v59 = vadd.f32 %v907_v45, %v606_v55  ;;  %v1268_v60 = vadd.f32 %v1205_v57, %v946_v56  ;;  %v1237_v62 = vpop.f32.mrb[32].mxu1  ;;  %v1207_v63 = vpop.f32.mrb[33].mxu0 }
 0x14c   : > { %v607_v0 = vld [vmem:[#allocation2 + $0x78] sm:$0xff]  ;;  %v1276_v2 = vadd.f32 %v1237_v62, %v954_v61  ;;  %v1239_v3 = vpop.f32.mrb[33].mxu1  ;;  %v1208_v5 = vpop.f32.mrb[34].mxu0  ;;  %v958_v56 = vld [vmem:[#allocation2 + $0x60] sm:$0xff] }
 0x14d   : > { %944 = vst.msk [vmem:[#allocation2 + $0x70] sm:$0xff] %vm454_vm0, %v928_v59  ;;  %v929_v6 = vadd.f32 %v910_v51, %v607_v0  ;;  %1284 = vst.msk [vmem:[#allocation2] sm:$0xff] %vm454_vm0, %v1268_v60  ;;  %v1269_v7 = vadd.f32 %v1208_v5, %v947_v4  ;;  %v1240_v9 = vpop.f32.mrb[34].mxu1  ;;  %v1210_v10 = vpop.f32.mrb[35].mxu0  ;;  %v1984_v5 = vunpack.i.l.bf16 %v2448_v54 }
 0x14e   : > { %1292 = vst.msk [vmem:[#allocation2 + $0x40] sm:$0xff] %vm454_vm0, %v1276_v2  ;;  %v1277_v11 = vadd.f32 %v1240_v9, %v955_v8  ;;  %v1242_v12 = vpop.f32.mrb[35].mxu1  ;;  %v2004_v51 = vpop.permute.xlu1 %2003  ;;  %v951_v2 = vld [vmem:[#allocation2 + $0x28] sm:$0xff] }
 0x14f   : > { %945 = vst.msk [vmem:[#allocation2 + $0x78] sm:$0xff] %vm454_vm0, %v929_v6  ;;  %1285 = vst.msk [vmem:[#allocation2 + $0x8] sm:$0xff] %vm454_vm0, %v1269_v7  ;;  %v959_v8 = vld [vmem:[#allocation2 + $0x68] sm:$0xff] }
 0x150   : > { %1293 = vst.msk [vmem:[#allocation2 + $0x48] sm:$0xff] %vm454_vm0, %v1277_v11 }
 0x152   : > { %v1213_v16 = vpop.f32.mrb[36].mxu0 }
 0x153   : > { %v1270_v18 = vadd.f32 %v1213_v16, %v948_v15  ;;  %v1245_v20 = vpop.f32.mrb[36].mxu1  ;;  %v1215_v21 = vpop.f32.mrb[37].mxu0 }
 0x154   : > { %v1300_v22 = vld [vmem:[#allocation2] sm:$0xff]  ;;  %v1278_v23 = vadd.f32 %v1245_v20, %v956_v19  ;;  %v1247_v1 = vpop.f32.mrb[37].mxu1  ;;  %v1216_v25 = vpop.f32.mrb[38].mxu0  ;;  %v1985_v20 = vunpack.i.h.bf16 %v2448_v54 }
 0x155   : > { %v1323_v27 = vadd.f32 %v2461_v14, %v1300_v22  ;;  %1286 = vst.msk [vmem:[#allocation2 + $0x10] sm:$0xff] %vm454_vm0, %v1270_v18  ;;  %v1271_v28 = vadd.f32 %v1216_v25, %v949_v24  ;;  %v1248_v30 = vpop.f32.mrb[38].mxu1  ;;  %v1218_v31 = vpop.f32.mrb[39].mxu0  ;;  %v1308_v32 = vld [vmem:[#allocation2 + $0x40] sm:$0xff]  ;;  %v2005_v18 = vunpack.i.l.bf16 %v2004_v51  ;;  %v2006_v1 = vunpack.i.h.bf16 %v2004_v51 }
 0x156   : > { %v1301_v33 = vld [vmem:[#allocation2 + $0x8] sm:$0xff]  ;;  %1294 = vst.msk [vmem:[#allocation2 + $0x50] sm:$0xff] %vm454_vm0, %v1278_v23  ;;  %v1279_v34 = vadd.f32 %v1248_v30, %v957_v29  ;;  %v1250_v35 = vpop.f32.mrb[39].mxu1  ;;  %v1331_v37 = vadd.f32 %v2461_v14, %v1308_v32  ;;  %v952_v30 = vld [vmem:[#allocation2 + $0x30] sm:$0xff]  ;;  %v2009_v31 = vpop.permute.xlu0 %2008 }
 0x157   : > { %v1324_v39 = vadd.f32 %v2461_v14, %v1301_v33  ;;  %v1339_v40 = vmax.f32 %v1323_v27, 0.0  ;;  %1287 = vst.msk [vmem:[#allocation2 + $0x18] sm:$0xff] %vm454_vm0, %v1271_v28  ;;  %v1309_v41 = vld [vmem:[#allocation2 + $0x48] sm:$0xff]  ;;  %v960_v35 = vld [vmem:[#allocation2 + $0x70] sm:$0xff] }
 0x158   : > { %1295 = vst.msk [vmem:[#allocation2 + $0x58] sm:$0xff] %vm454_vm0, %v1279_v34  ;;  %v1332_v44 = vadd.f32 %v2461_v14, %v1309_v41  ;;  %v1347_v45 = vmax.f32 %v1331_v37, 0.0 }
 0x159   : > { %v1340_v46 = vmax.f32 %v1324_v39, 0.0  ;;  %v1467_v47 = vmul.f32 %v1979_v26, %v1339_v40 }
 0x15a   : > { %v1348_v43 = vmax.f32 %v1332_v44, 0.0  ;;  %v1475_v48 = vmul.f32 %v2000_v36, %v1347_v45  ;;  %v1221_v50 = vpop.f32.mrb[40].mxu0  ;;  %v953_v44 = vld [vmem:[#allocation2 + $0x38] sm:$0xff] }
 0x15b   : > { %v1468_v52 = vmul.f32 %v1980_v38, %v1340_v46  ;;  %v1870_v53 = vpack.c.bf16 %v1467_v47, %v1467_v47  ;;  %v1272_v55 = vadd.f32 %v1221_v50, %v950_v49  ;;  %v1253_v57 = vpop.f32.mrb[40].mxu1  ;;  %v1223_v59 = vpop.f32.mrb[41].mxu0 }
 0x15c   : > { %v1302_v60 = vld [vmem:[#allocation2 + $0x10] sm:$0xff]  ;;  %v1476_v61 = vmul.f32 %v2001_v42, %v1348_v43  ;;  %v1878_v62 = vpack.c.bf16 %v1475_v48, %v1475_v48  ;;  %v1280_v63 = vadd.f32 %v1253_v57, %v958_v56  ;;  %v1255_v0 = vpop.f32.mrb[41].mxu1  ;;  %v1224_v3 = vpop.f32.mrb[42].mxu0  ;;  %v961_v48 = vld [vmem:[#allocation2 + $0x78] sm:$0xff]  ;;  %v1990_v59 = vunpack.i.l.bf16 %v2450_v58 }
 0x15d   : > { %v1871_v4 = vpack.c.bf16 %v1468_v52, %v1468_v52  ;;  %1548 = vst.msk [vmem:[%s2480_s13] sm:$0xf] %vm1547_vm1, %v1870_v53  ;;  %v1325_v6 = vadd.f32 %v2461_v14, %v1302_v60  ;;  %v1273_v7 = vadd.f32 %v1224_v3, %v951_v2  ;;  %v1256_v9 = vpop.f32.mrb[42].mxu1  ;;  %v1226_v10 = vpop.f32.mrb[43].mxu0  ;;  %v1310_v11 = vld [vmem:[#allocation2 + $0x50] sm:$0xff]  ;;  %v1991_v3 = vunpack.i.h.bf16 %v2450_v58 }
 0x15e   : > { %1288 = vst.msk [vmem:[#allocation2 + $0x20] sm:$0xff] %vm454_vm0, %v1272_v55  ;;  %v1303_v12 = vld [vmem:[#allocation2 + $0x18] sm:$0xff]  ;;  %v1879_v13 = vpack.c.bf16 %v1476_v61, %v1476_v61  ;;  %1296 = vst.msk [vmem:[#allocation2 + $0x60] sm:$0xff] %vm454_vm0, %v1280_v63  ;;  %v1281_v15 = vadd.f32 %v1256_v9, %v959_v8  ;;  %v1258_v16 = vpop.f32.mrb[43].mxu1  ;;  %v1333_v19 = vadd.f32 %v2461_v14, %v1310_v11  ;;  %v2010_v63 = vunpack.i.l.bf16 %v2009_v31 }
 0x15f   : > { %1556 = vst.msk [vmem:[%s2480_s13 + $0x20] sm:$0xf] %vm1547_vm1, %v1878_v62  ;;  %1549 = vst.msk [vmem:[%s2480_s13 + $0x4] sm:$0xf] %vm1547_vm1, %v1871_v4  ;;  %v1341_v21 = vmax.f32 %v1325_v6, 0.0  ;;  %v1326_v22 = vadd.f32 %v2461_v14, %v1303_v12  ;;  %v1311_v23 = vld [vmem:[#allocation2 + $0x58] sm:$0xff]  ;;  %v2011_v6 = vunpack.i.h.bf16 %v2009_v31 }
 0x160   : > { %1289 = vst.msk [vmem:[#allocation2 + $0x28] sm:$0xff] %vm454_vm0, %v1273_v7  ;;  %1297 = vst.msk [vmem:[#allocation2 + $0x68] sm:$0xff] %vm454_vm0, %v1281_v15  ;;  %v1334_v24 = vadd.f32 %v2461_v14, %v1311_v23  ;;  %v1349_v25 = vmax.f32 %v1333_v19, 0.0 }
 0x161   : > { %1557 = vst.msk [vmem:[%s2480_s13 + $0x24] sm:$0xf] %vm1547_vm1, %v1879_v13  ;;  %v1469_v26 = vmul.f32 %v1984_v5, %v1341_v21  ;;  %v1342_v27 = vmax.f32 %v1326_v22, 0.0  ;;  %v1995_v22 = vunpack.i.l.bf16 %v2463_v17 }
 0x162   : > { %v1350_v28 = vmax.f32 %v1334_v24, 0.0  ;;  %v1477_v29 = vmul.f32 %v2005_v18, %v1349_v25  ;;  %v1229_v54 = vpop.f32.mrb[44].mxu0  ;;  %v2014_v18 = vpop.permute.xlu1 %2013 }
 0x163   : > { %v1872_v32 = vpack.c.bf16 %v1469_v26, %v1469_v26  ;;  %v1470_v33 = vmul.f32 %v1985_v20, %v1342_v27  ;;  %v1274_v34 = vadd.f32 %v1229_v54, %v952_v30  ;;  %v1261_v36 = vpop.f32.mrb[44].mxu1  ;;  %v1231_v37 = vpop.f32.mrb[45].mxu0  ;;  %v2015_v25 = vunpack.i.l.bf16 %v2014_v18 }
 0x164   : > { %v1478_v39 = vmul.f32 %v2006_v1, %v1350_v28  ;;  %v1880_v40 = vpack.c.bf16 %v1477_v29, %v1477_v29  ;;  %v1282_v41 = vadd.f32 %v1261_v36, %v960_v35  ;;  %v1263_v42 = vpop.f32.mrb[45].mxu1  ;;  %v1232_v45 = vpop.f32.mrb[46].mxu0  ;;  %v1996_v28 = vunpack.i.h.bf16 %v2463_v17 }
 0x165   : > { %v1304_v38 = vld [vmem:[#allocation2 + $0x20] sm:$0xff]  ;;  %1550 = vst.msk [vmem:[%s2480_s13 + $0x8] sm:$0xf] %vm1547_vm1, %v1872_v32  ;;  %v1873_v46 = vpack.c.bf16 %v1470_v33, %v1470_v33  ;;  %v1275_v43 = vadd.f32 %v1232_v45, %v953_v44  ;;  %v1264_v49 = vpop.f32.mrb[46].mxu1  ;;  %v1234_v51 = vpop.f32.mrb[47].mxu0  ;;  %v2016_v54 = vunpack.i.h.bf16 %v2014_v18 }
 0x166   : > { %v1327_v47 = vadd.f32 %v2461_v14, %v1304_v38  ;;  %1290 = vst.msk [vmem:[#allocation2 + $0x30] sm:$0xff] %vm454_vm0, %v1274_v34  ;;  %v1312_v50 = vld [vmem:[#allocation2 + $0x60] sm:$0xff]  ;;  %v1881_v53 = vpack.c.bf16 %v1478_v39, %v1478_v39  ;;  %1298 = vst.msk [vmem:[#allocation2 + $0x70] sm:$0xff] %vm454_vm0, %v1282_v41  ;;  %v1283_v55 = vadd.f32 %v1264_v49, %v961_v48  ;;  %v1266_v57 = vpop.f32.mrb[47].mxu1 }
 0x167   : > { %v1305_v52 = vld [vmem:[#allocation2 + $0x28] sm:$0xff]  ;;  %1558 = vst.msk [vmem:[%s2480_s13 + $0x28] sm:$0xf] %vm1547_vm1, %v1880_v40  ;;  %v1335_v56 = vadd.f32 %v2461_v14, %v1312_v50  ;;  %1551 = vst.msk [vmem:[%s2480_s13 + $0xc] sm:$0xf] %vm1547_vm1, %v1873_v46 }
 0x168   : > { %v1343_v60 = vmax.f32 %v1327_v47, 0.0  ;;  %v1328_v61 = vadd.f32 %v2461_v14, %v1305_v52  ;;  %1291 = vst.msk [vmem:[#allocation2 + $0x38] sm:$0xff] %vm454_vm0, %v1275_v43  ;;  %v1313_v62 = vld [vmem:[#allocation2 + $0x68] sm:$0xff]  ;;  %1299 = vst.msk [vmem:[#allocation2 + $0x78] sm:$0xff] %vm454_vm0, %v1283_v55 }
 0x169   : > { %1559 = vst.msk [vmem:[%s2480_s13 + $0x2c] sm:$0xf] %vm1547_vm1, %v1881_v53  ;;  %v1336_v0 = vadd.f32 %v2461_v14, %v1313_v62  ;;  %v1351_v2 = vmax.f32 %v1335_v56, 0.0 }
 0x16a   : > { %v1471_v4 = vmul.f32 %v1990_v59, %v1343_v60  ;;  %v1344_v5 = vmax.f32 %v1328_v61, 0.0 }
 0x16b   : > { %v1352_v7 = vmax.f32 %v1336_v0, 0.0  ;;  %v1479_v8 = vmul.f32 %v2010_v63, %v1351_v2 }
 0x16c   : > { %v1874_v9 = vpack.c.bf16 %v1471_v4, %v1471_v4  ;;  %v1472_v10 = vmul.f32 %v1991_v3, %v1344_v5 }
 0x16d   : > { %v1306_v11 = vld [vmem:[#allocation2 + $0x30] sm:$0xff]  ;;  %v1480_v12 = vmul.f32 %v2011_v6, %v1352_v7  ;;  %v1882_v13 = vpack.c.bf16 %v1479_v8, %v1479_v8 }
 0x16e   : > { %1552 = vst.msk [vmem:[%s2480_s13 + $0x10] sm:$0xf] %vm1547_vm1, %v1874_v9  ;;  %v1875_v15 = vpack.c.bf16 %v1472_v10, %v1472_v10  ;;  %v1329_v16 = vadd.f32 %v2461_v14, %v1306_v11  ;;  %v1314_v58 = vld [vmem:[#allocation2 + $0x70] sm:$0xff] }
 0x16f   : > { %v1307_v19 = vld [vmem:[#allocation2 + $0x38] sm:$0xff]  ;;  %v1337_v20 = vadd.f32 %v2461_v14, %v1314_v58  ;;  %v1883_v21 = vpack.c.bf16 %v1480_v12, %v1480_v12  ;;  %1560 = vst.msk [vmem:[%s2480_s13 + $0x30] sm:$0xf] %vm1547_vm1, %v1882_v13 }
 0x170   : > { %1553 = vst.msk [vmem:[%s2480_s13 + $0x14] sm:$0xf] %vm1547_vm1, %v1875_v15  ;;  %v1345_v23 = vmax.f32 %v1329_v16, 0.0  ;;  %v1330_v1 = vadd.f32 %v2461_v14, %v1307_v19  ;;  %v1315_v24 = vld [vmem:[#allocation2 + $0x78] sm:$0xff] }
 0x171   : > { %v1338_v26 = vadd.f32 %v2461_v14, %v1315_v24  ;;  %v1353_v27 = vmax.f32 %v1337_v20, 0.0  ;;  %1561 = vst.msk [vmem:[%s2480_s13 + $0x34] sm:$0xf] %vm1547_vm1, %v1883_v21 }
 0x172   : > { %v1473_v29 = vmul.f32 %v1995_v22, %v1345_v23  ;;  %v1346_v30 = vmax.f32 %v1330_v1, 0.0 }
 0x173   : > { %v1354_v31 = vmax.f32 %v1338_v26, 0.0  ;;  %v1481_v32 = vmul.f32 %v2015_v25, %v1353_v27 }
 0x174   : > { %v1876_v33 = vpack.c.bf16 %v1473_v29, %v1473_v29  ;;  %v1474_v34 = vmul.f32 %v1996_v28, %v1346_v30 }
 0x175   : > { %v1482_v35 = vmul.f32 %v2016_v54, %v1354_v31  ;;  %v1884_v36 = vpack.c.bf16 %v1481_v32, %v1481_v32 }
 0x176   : > { %1554 = vst.msk [vmem:[%s2480_s13 + $0x18] sm:$0xf] %vm1547_vm1, %v1876_v33  ;;  %v1877_v14 = vpack.c.bf16 %v1474_v34, %v1474_v34 }
 0x177   : > { %v1885_v37 = vpack.c.bf16 %v1482_v35, %v1482_v35  ;;  %1562 = vst.msk [vmem:[%s2480_s13 + $0x38] sm:$0xf] %vm1547_vm1, %v1884_v36 }
 0x178   : > { %1555 = vst.msk [vmem:[%s2480_s13 + $0x1c] sm:$0xf] %vm1547_vm1, %v1877_v14 }
 0x179   : > { %1563 = vst.msk [vmem:[%s2480_s13 + $0x3c] sm:$0xf] %vm1547_vm1, %v1885_v37 }
 0x17a PF: > { %s14_s17 = sadd.s32 1, %s2105_s17   ;;  %s2554_s15 = smov %s2101_s16 }
 0x17b   : > { %p11_p5 = scmp.ge.s32.totalorder %s14_s17, 4   ;;  %s2555_s16 = smov %s2557_s18 }
 0x17d   :  { %13 = sbr.rel (!%p11_p5) target bundleno = 2 (0x2), region = 77 }

// kernel: _lambda_.18
= control target key start
LH: loop header
LB: loop body
LE: loop exit
PB: predicated region body
PF: predicated region fallthrough
CT: control target
= control target key end

     0   :  { %v470_v1 = vmov 0   ;;  %vm131_vm0 = vcmask 523264   ;;  %v41_v17 = vlaneseq  ;;  %s634_s1 = inlined_call_operand.vmem [shape: bf16[64,256], index: 1, kind: input, shape index: {}]   ;;  %s635_s0 = inlined_call_operand.vmem [shape: bf16[128,64], index: 0, kind: input, shape index: {}]   ;;  %s636_s2 = inlined_call_operand.vmem [shape: f32[1,256], index: 2, kind: input, shape index: {}]   ;;  %s637_s3 = inlined_call_operand.vmem [shape: bf16[128,256], index: 3, kind: output, shape index: {}]  }
   0x1   :  { %v450_v0 = vld [vmem:[%s634_s1 + $0x4] ss:$8 sps:$4 sm:$0xff]   ;;  %188 = vmatprep.mubr.bf16.mxu0 %v470_v1  ;;  %228 = vmatprep.mubr.bf16.mxu1 %v470_v1  ;;  %v452_v2 = vld [vmem:[%s634_s1] ss:$8 sps:$4 sm:$0xff]   ;;  %v453_v3 = vld [vmem:[%s634_s1 + $0x14] ss:$8 sps:$4 sm:$0xff]  }
   0x2   :  { %156 = vmatprep.subr.bf16.mxu0 %v450_v0  ;;  %441 = vmatprep.subr.bf16.mxu1 %v450_v0  ;;  %v455_v4 = vld [vmem:[%s634_s1 + $0x10] ss:$8 sps:$4 sm:$0xff]   ;;  %v456_v5 = vld [vmem:[%s634_s1 + $0x24] ss:$8 sps:$4 sm:$0xff]   ;;  %v458_v6 = vld [vmem:[%s634_s1 + $0x20] ss:$8 sps:$4 sm:$0xff]  }
   0x3   :  { %157 = vmatpush1.bf16.msra.mxu0 %v452_v2  ;;  %445 = vmatpush1.bf16.msra.mxu1 %v452_v2  ;;  %v459_v7 = vld [vmem:[%s634_s1 + $0x34] ss:$8 sps:$4 sm:$0xff]   ;;  %v461_v8 = vld [vmem:[%s634_s1 + $0x30] ss:$8 sps:$4 sm:$0xff]   ;;  %v462_v9 = vld [vmem:[%s635_s0] sm:$0xff]   ;;  %v42_v18 = vshrl.u32 %v41_v17, 7 }
   0x4   :  { %158 = vmatprep.subr.bf16.mxu0 %v453_v3  ;;  %442 = vmatprep.subr.bf16.mxu1 %v453_v3  ;;  %v463_v10 = vld [vmem:[%s635_s0 + $0x20] sm:$0xff]   ;;  %v464_v11 = vld [vmem:[%s635_s0 + $0x8] sm:$0xff]   ;;  %v466_v13 = vld [vmem:[%s635_s0 + $0x10] sm:$0xff]  }
   0x5   :  { %v465_v12 = vld [vmem:[%s635_s0 + $0x28] sm:$0xff]   ;;  %v467_v14 = vld [vmem:[%s635_s0 + $0x30] sm:$0xff]   ;;  %v468_v15 = vld [vmem:[%s635_s0 + $0x18] sm:$0xff]   ;;  %v43_v19 = vsub.s32 0, %v42_v18  ;;  %v47_v21 = vsub.s32 1, %v42_v18 }
   0x6   :  { %v469_v16 = vld [vmem:[%s635_s0 + $0x38] sm:$0xff]   ;;  %v39_v20 = vld [vmem:[%s636_s2] sm:$0x3] }
   0x7   :  { %159 = vmatpush1.bf16.msra.mxu0 %v455_v4  ;;  %446 = vmatpush1.bf16.msra.mxu1 %v455_v4  ;;  %v550_v22 = vrot.slane %v39_v20, %v43_v19  ;;  %v552_v23 = vrot.slane %v39_v20, %v47_v21 }
   0x8   :  { %160 = vmatprep.subr.bf16.mxu0 %v456_v5  ;;  %443 = vmatprep.subr.bf16.mxu1 %v456_v5 }
   0xb   :  { %161 = vmatpush1.bf16.msra.mxu0 %v458_v6  ;;  %447 = vmatpush1.bf16.msra.mxu1 %v458_v6 }
   0xc   :  { %162 = vmatprep.subr.bf16.mxu0 %v459_v7  ;;  %444 = vmatprep.subr.bf16.mxu1 %v459_v7 }
   0xf   :  { %163 = vmatpush1.bf16.msra.mxu0 %v461_v8  ;;  %448 = vmatpush1.bf16.msra.mxu1 %v461_v8 }
  0x12   :  { %401 = vmatmul.mubr.msk.bf16.vlgmr.msra.gmra.mrb[0].mxu0 %vm131_vm0, %v462_v9  ;;  %405 = vmatmul.mubr.msk.bf16.vlgmr.msra.gmra.mrb[0].mxu1 %vm131_vm0, %v463_v10 }
  0x13   :  { %198 = vmatprep.mubr.bf16.mxu0 %v470_v1  ;;  %238 = vmatprep.mubr.bf16.mxu1 %v470_v1 }
  0x1a   :  { %402 = vmatmul.mubr.msk.bf16.gmra.mrb[4].mxu0 %vm131_vm0, %v464_v11  ;;  %406 = vmatmul.mubr.msk.bf16.gmra.mrb[4].mxu1 %vm131_vm0, %v465_v12 }
  0x1b   :  { %208 = vmatprep.mubr.bf16.mxu0 %v470_v1  ;;  %248 = vmatprep.mubr.bf16.mxu1 %v470_v1 }
  0x22   :  { %403 = vmatmul.mubr.msk.bf16.gmra.mrb[8].mxu0 %vm131_vm0, %v466_v13  ;;  %407 = vmatmul.mubr.msk.bf16.gmra.mrb[8].mxu1 %vm131_vm0, %v467_v14 }
  0x23   :  { %218 = vmatprep.mubr.bf16.mxu0 %v470_v1  ;;  %258 = vmatprep.mubr.bf16.mxu1 %v470_v1 }
  0x2a   :  { %404 = vmatmul.mubr.msk.bf16.gmra.mrb[12].mxu0 %vm131_vm0, %v468_v15  ;;  %408 = vmatmul.mubr.msk.bf16.gmra.mrb[12].mxu1 %vm131_vm0, %v469_v16 }
  0xe5   :  { %v190_v24 = vpop.f32.mrb[0].mxu0  ;;  %v230_v25 = vpop.f32.mrb[0].mxu1 }
  0xe6   :  { %v191_v26 = vadd.f32 %v190_v24, %v550_v22  ;;  %v231_v27 = vadd.f32 %v230_v25, %v550_v22  ;;  %v192_v28 = vpop.f32.mrb[1].mxu0  ;;  %v232_v29 = vpop.f32.mrb[1].mxu1 }
  0xe7   :  { %v193_v30 = vadd.f32 %v192_v28, %v552_v23  ;;  %v233_v31 = vadd.f32 %v232_v29, %v552_v23  ;;  %v194_v32 = vpop.f32.mrb[2].mxu0  ;;  %v234_v33 = vpop.f32.mrb[2].mxu1 }
  0xe8   :  { %v195_v34 = vadd.f32 %v194_v32, %v550_v22  ;;  %v235_v35 = vadd.f32 %v234_v33, %v550_v22  ;;  %v196_v36 = vpop.f32.mrb[3].mxu0  ;;  %v236_v37 = vpop.f32.mrb[3].mxu1 }
  0xe9   :  { %v425_v38 = vpack.c.bf16 %v193_v30, %v191_v26  ;;  %v433_v39 = vpack.c.bf16 %v233_v31, %v231_v27  ;;  %v197_v40 = vadd.f32 %v196_v36, %v552_v23  ;;  %v237_v41 = vadd.f32 %v236_v37, %v552_v23 }
  0xeb   :  { %365 = vst [vmem:[%s637_s3] sm:$0xff] %v425_v38  ;;  %373 = vst [vmem:[%s637_s3 + $0x40] sm:$0xff] %v433_v39  ;;  %v426_v42 = vpack.c.bf16 %v197_v40, %v195_v34  ;;  %v434_v43 = vpack.c.bf16 %v237_v41, %v235_v35 }
  0xed   :  { %366 = vst [vmem:[%s637_s3 + $0x8] sm:$0xff] %v426_v42  ;;  %374 = vst [vmem:[%s637_s3 + $0x48] sm:$0xff] %v434_v43  ;;  %v200_v44 = vpop.f32.mrb[4].mxu0  ;;  %v240_v45 = vpop.f32.mrb[4].mxu1 }
  0xee   :  { %v201_v46 = vadd.f32 %v200_v44, %v550_v22  ;;  %v241_v47 = vadd.f32 %v240_v45, %v550_v22  ;;  %v202_v48 = vpop.f32.mrb[5].mxu0  ;;  %v242_v49 = vpop.f32.mrb[5].mxu1 }
  0xef   :  { %v203_v50 = vadd.f32 %v202_v48, %v552_v23  ;;  %v243_v51 = vadd.f32 %v242_v49, %v552_v23  ;;  %v204_v52 = vpop.f32.mrb[6].mxu0  ;;  %v244_v53 = vpop.f32.mrb[6].mxu1 }
  0xf0   :  { %v205_v54 = vadd.f32 %v204_v52, %v550_v22  ;;  %v245_v55 = vadd.f32 %v244_v53, %v550_v22  ;;  %v206_v56 = vpop.f32.mrb[7].mxu0  ;;  %v246_v57 = vpop.f32.mrb[7].mxu1 }
  0xf1   :  { %v427_v58 = vpack.c.bf16 %v203_v50, %v201_v46  ;;  %v435_v59 = vpack.c.bf16 %v243_v51, %v241_v47  ;;  %v207_v60 = vadd.f32 %v206_v56, %v552_v23  ;;  %v247_v61 = vadd.f32 %v246_v57, %v552_v23 }
  0xf3   :  { %367 = vst [vmem:[%s637_s3 + $0x10] sm:$0xff] %v427_v58  ;;  %375 = vst [vmem:[%s637_s3 + $0x50] sm:$0xff] %v435_v59  ;;  %v428_v62 = vpack.c.bf16 %v207_v60, %v205_v54  ;;  %v436_v63 = vpack.c.bf16 %v247_v61, %v245_v55 }
  0xf5   :  { %368 = vst [vmem:[%s637_s3 + $0x18] sm:$0xff] %v428_v62  ;;  %376 = vst [vmem:[%s637_s3 + $0x58] sm:$0xff] %v436_v63  ;;  %v210_v0 = vpop.f32.mrb[8].mxu0  ;;  %v250_v1 = vpop.f32.mrb[8].mxu1 }
  0xf6   :  { %v211_v2 = vadd.f32 %v210_v0, %v550_v22  ;;  %v251_v3 = vadd.f32 %v250_v1, %v550_v22  ;;  %v212_v4 = vpop.f32.mrb[9].mxu0  ;;  %v252_v5 = vpop.f32.mrb[9].mxu1 }
  0xf7   :  { %v213_v6 = vadd.f32 %v212_v4, %v552_v23  ;;  %v253_v7 = vadd.f32 %v252_v5, %v552_v23  ;;  %v214_v8 = vpop.f32.mrb[10].mxu0  ;;  %v254_v9 = vpop.f32.mrb[10].mxu1 }
  0xf8   :  { %v215_v10 = vadd.f32 %v214_v8, %v550_v22  ;;  %v255_v11 = vadd.f32 %v254_v9, %v550_v22  ;;  %v216_v12 = vpop.f32.mrb[11].mxu0  ;;  %v256_v13 = vpop.f32.mrb[11].mxu1 }
  0xf9   :  { %v429_v14 = vpack.c.bf16 %v213_v6, %v211_v2  ;;  %v437_v15 = vpack.c.bf16 %v253_v7, %v251_v3  ;;  %v217_v16 = vadd.f32 %v216_v12, %v552_v23  ;;  %v257_v17 = vadd.f32 %v256_v13, %v552_v23 }
  0xfb   :  { %369 = vst [vmem:[%s637_s3 + $0x20] sm:$0xff] %v429_v14  ;;  %377 = vst [vmem:[%s637_s3 + $0x60] sm:$0xff] %v437_v15  ;;  %v430_v18 = vpack.c.bf16 %v217_v16, %v215_v10  ;;  %v438_v19 = vpack.c.bf16 %v257_v17, %v255_v11 }
  0xfd   :  { %370 = vst [vmem:[%s637_s3 + $0x28] sm:$0xff] %v430_v18  ;;  %378 = vst [vmem:[%s637_s3 + $0x68] sm:$0xff] %v438_v19  ;;  %v220_v20 = vpop.f32.mrb[12].mxu0  ;;  %v260_v21 = vpop.f32.mrb[12].mxu1 }
  0xfe   :  { %v221_v24 = vadd.f32 %v220_v20, %v550_v22  ;;  %v261_v25 = vadd.f32 %v260_v21, %v550_v22  ;;  %v222_v26 = vpop.f32.mrb[13].mxu0  ;;  %v262_v27 = vpop.f32.mrb[13].mxu1 }
  0xff   :  { %v223_v28 = vadd.f32 %v222_v26, %v552_v23  ;;  %v263_v29 = vadd.f32 %v262_v27, %v552_v23  ;;  %v224_v30 = vpop.f32.mrb[14].mxu0  ;;  %v264_v31 = vpop.f32.mrb[14].mxu1 }
 0x100   :  { %v225_v32 = vadd.f32 %v224_v30, %v550_v22  ;;  %v265_v33 = vadd.f32 %v264_v31, %v550_v22  ;;  %v226_v34 = vpop.f32.mrb[15].mxu0  ;;  %v266_v35 = vpop.f32.mrb[15].mxu1 }
 0x101   :  { %v431_v36 = vpack.c.bf16 %v223_v28, %v221_v24  ;;  %v439_v37 = vpack.c.bf16 %v263_v29, %v261_v25  ;;  %v227_v38 = vadd.f32 %v226_v34, %v552_v23  ;;  %v267_v39 = vadd.f32 %v266_v35, %v552_v23 }
 0x103   :  { %371 = vst [vmem:[%s637_s3 + $0x30] sm:$0xff] %v431_v36  ;;  %379 = vst [vmem:[%s637_s3 + $0x70] sm:$0xff] %v439_v37  ;;  %v432_v40 = vpack.c.bf16 %v227_v38, %v225_v32  ;;  %v440_v41 = vpack.c.bf16 %v267_v39, %v265_v33 }
 0x105   :  { %372 = vst [vmem:[%s637_s3 + $0x38] sm:$0xff] %v432_v40  ;;  %380 = vst [vmem:[%s637_s3 + $0x78] sm:$0xff] %v440_v41 }

// kernel: _lambda_.19
= control target key start
LH: loop header
LB: loop body
LE: loop exit
PB: predicated region body
PF: predicated region fallthrough
CT: control target
= control target key end

     0   :  { %v813_v1 = vmov 0   ;;  %vm137_vm0 = vcmask 523264   ;;  %v47_v49 = vlaneseq  ;;  %s1273_s1 = inlined_call_operand.vmem [shape: bf16[64,256], index: 1, kind: input, shape index: {}]   ;;  %s1274_s0 = inlined_call_operand.vmem [shape: bf16[128,64], index: 0, kind: input, shape index: {}]   ;;  %s1275_s3 = inlined_call_operand.vmem [shape: bf16[128,1], index: 3, kind: input, shape index: {}]   ;;  %s1276_s2 = inlined_call_operand.vmem [shape: f32[1,256], index: 2, kind: input, shape index: {}]   ;;  %s1277_s4 = inlined_call_operand.vmem [shape: bf16[128,256], index: 4, kind: input, shape index: {}]   ;;  %s1278_s5 = inlined_call_operand.vmem [shape: bf16[128,256], index: 5, kind: output, shape index: {}]  }
   0x1   :  { %v793_v0 = vld [vmem:[%s1273_s1 + $0x4] ss:$8 sps:$4 sm:$0xff]   ;;  %194 = vmatprep.mubr.bf16.mxu0 %v813_v1  ;;  %234 = vmatprep.mubr.bf16.mxu1 %v813_v1  ;;  %v795_v2 = vld [vmem:[%s1273_s1] ss:$8 sps:$4 sm:$0xff]   ;;  %v796_v3 = vld [vmem:[%s1273_s1 + $0x14] ss:$8 sps:$4 sm:$0xff]  }
   0x2   :  { %751 = vset.pattern.permute.xlu0 %v813_v1  ;;  %762 = vset.pattern.permute.xlu1 %v813_v1  ;;  %v798_v4 = vld [vmem:[%s1273_s1 + $0x10] ss:$8 sps:$4 sm:$0xff]   ;;  %v799_v5 = vld [vmem:[%s1273_s1 + $0x24] ss:$8 sps:$4 sm:$0xff]   ;;  %v801_v6 = vld [vmem:[%s1273_s1 + $0x20] ss:$8 sps:$4 sm:$0xff]  }
   0x3   :  { %162 = vmatprep.subr.bf16.mxu0 %v793_v0  ;;  %742 = vmatprep.subr.bf16.mxu1 %v793_v0  ;;  %v802_v7 = vld [vmem:[%s1273_s1 + $0x34] ss:$8 sps:$4 sm:$0xff]   ;;  %v804_v8 = vld [vmem:[%s1273_s1 + $0x30] ss:$8 sps:$4 sm:$0xff]   ;;  %v805_v9 = vld [vmem:[%s1274_s0] sm:$0xff]   ;;  %v48_v50 = vshrl.u32 %v47_v49, 7 }
   0x4   :  { %163 = vmatpush1.bf16.msra.mxu0 %v795_v2  ;;  %746 = vmatpush1.bf16.msra.mxu1 %v795_v2  ;;  %v704_v10 = vld [vmem:[%s1275_s3] sm:$0xff]   ;;  %v735_v11 = vld [vmem:[%s1275_s3 + $0x8] sm:$0xff]   ;;  %v736_v15 = vld [vmem:[%s1275_s3 + $0x10] sm:$0xff]  }
   0x5   :  { %164 = vmatprep.subr.bf16.mxu0 %v796_v3  ;;  %743 = vmatprep.subr.bf16.mxu1 %v796_v3  ;;  %v806_v12 = vld [vmem:[%s1274_s0 + $0x20] sm:$0xff]   ;;  %v705_v13 = vunpack.c.l.bf16 %v704_v10  ;;  %v706_v14 = vunpack.c.h.bf16 %v704_v10  ;;  %v737_v16 = vld [vmem:[%s1275_s3 + $0x18] sm:$0xff]   ;;  %v709_v17 = vunpack.c.l.bf16 %v735_v11  ;;  %v713_v18 = vunpack.c.l.bf16 %v736_v15  ;;  %v739_v26 = vld [vmem:[%s1275_s3 + $0x28] sm:$0xff]  }
   0x6   :  { %v714_v19 = vunpack.c.h.bf16 %v736_v15  ;;  %v710_v21 = vunpack.c.h.bf16 %v735_v11  ;;  %v738_v22 = vld [vmem:[%s1275_s3 + $0x20] sm:$0xff]   ;;  %v717_v23 = vunpack.c.l.bf16 %v737_v16  ;;  %v718_v24 = vunpack.c.h.bf16 %v737_v16  ;;  %v741_v33 = vld [vmem:[%s1275_s3 + $0x38] sm:$0xff]   ;;  %v740_v34 = vld [vmem:[%s1275_s3 + $0x30] sm:$0xff]  }
   0x7   :  { %v752_v20 = vpack.i.bf16 %v706_v14, %v705_v13  ;;  %v721_v27 = vunpack.c.l.bf16 %v738_v22  ;;  %v722_v28 = vunpack.c.h.bf16 %v738_v22  ;;  %v725_v31 = vunpack.c.l.bf16 %v739_v26  ;;  %v807_v35 = vld [vmem:[%s1274_s0 + $0x8] sm:$0xff]   ;;  %v809_v45 = vld [vmem:[%s1274_s0 + $0x10] sm:$0xff]   ;;  %v811_v47 = vld [vmem:[%s1274_s0 + $0x18] sm:$0xff]  }
   0x8   :  { %165 = vmatpush1.bf16.msra.mxu0 %v798_v4  ;;  %747 = vmatpush1.bf16.msra.mxu1 %v798_v4  ;;  %v763_v25 = vpack.i.bf16 %v714_v19, %v713_v18  ;;  %v757_v29 = vpack.i.bf16 %v710_v21, %v709_v17  ;;  %v768_v30 = vpack.i.bf16 %v718_v24, %v717_v23  ;;  %v726_v32 = vunpack.c.h.bf16 %v739_v26  ;;  %v808_v36 = vld [vmem:[%s1274_s0 + $0x28] sm:$0xff]   ;;  %v810_v46 = vld [vmem:[%s1274_s0 + $0x30] sm:$0xff]   ;;  %v812_v48 = vld [vmem:[%s1274_s0 + $0x38] sm:$0xff]  }
   0x9   :  { %166 = vmatprep.subr.bf16.mxu0 %v799_v5  ;;  %744 = vmatprep.subr.bf16.mxu1 %v799_v5  ;;  %v773_v37 = vpack.i.bf16 %v722_v28, %v721_v27  ;;  %v733_v38 = vunpack.c.l.bf16 %v741_v33  ;;  %v734_v40 = vunpack.c.h.bf16 %v741_v33  ;;  %v729_v41 = vunpack.c.l.bf16 %v740_v34  ;;  %v45_v55 = vld [vmem:[%s1276_s2] sm:$0x3]  ;;  %v954_v58 = vld [vmem:[%s1277_s4 + $0x8] sm:$0xff]  ;;  %v972_v0 = vld [vmem:[%s1277_s4 + $0x10] sm:$0xff] }
   0xa   :  { %753 = vperm.xlu0 %751, %v752_v20   ;;  %764 = vperm.xlu1 %762, %v763_v25   ;;  %v778_v39 = vpack.i.bf16 %v726_v32, %v725_v31  ;;  %v730_v42 = vunpack.c.h.bf16 %v740_v34  ;;  %v49_v53 = vsub.s32 0, %v48_v50  ;;  %v53_v54 = vsub.s32 1, %v48_v50  ;;  %v944_v56 = vld [vmem:[%s1277_s4] sm:$0xff]  ;;  %v959_v59 = vld [vmem:[%s1277_s4 + $0x48] sm:$0xff]  ;;  %v1028_v24 = vld [vmem:[%s1277_s4 + $0x30] sm:$0xff] }
   0xb   :  { %v788_v43 = vpack.i.bf16 %v734_v40, %v733_v38  ;;  %v949_v57 = vld [vmem:[%s1277_s4 + $0x40] sm:$0xff]  ;;  %v435_v2 = vunpack.c.l.bf16 %v944_v56  ;;  %v436_v4 = vunpack.c.h.bf16 %v944_v56  ;;  %v438_v10 = vunpack.c.h.bf16 %v954_v58  ;;  %v1014_v18 = vld [vmem:[%s1277_s4 + $0x28] sm:$0xff]  ;;  %v1033_v25 = vld [vmem:[%s1277_s4 + $0x70] sm:$0xff] }
   0xc   :  { %167 = vmatpush1.bf16.msra.mxu0 %v801_v6  ;;  %748 = vmatpush1.bf16.msra.mxu1 %v801_v6  ;;  %v783_v44 = vpack.i.bf16 %v730_v42, %v729_v41  ;;  %v965_v62 = vrot.slane %v45_v55, %v49_v53  ;;  %v967_v63 = vrot.slane %v45_v55, %v53_v54  ;;  %v451_v3 = vunpack.c.l.bf16 %v949_v57  ;;  %v986_v6 = vld [vmem:[%s1277_s4 + $0x18] sm:$0xff]  ;;  %v1005_v13 = vld [vmem:[%s1277_s4 + $0x60] sm:$0xff]  ;;  %v1019_v19 = vld [vmem:[%s1277_s4 + $0x68] sm:$0xff] }
   0xd   :  { %168 = vmatprep.subr.bf16.mxu0 %v802_v7  ;;  %745 = vmatprep.subr.bf16.mxu1 %v802_v7  ;;  %v452_v5 = vunpack.c.h.bf16 %v949_v57  ;;  %v991_v7 = vld [vmem:[%s1277_s4 + $0x58] sm:$0xff]  ;;  %v454_v11 = vunpack.c.h.bf16 %v959_v59  ;;  %v439_v14 = vunpack.c.l.bf16 %v972_v0  ;;  %v440_v16 = vunpack.c.h.bf16 %v972_v0 }
   0xe   :  { %758 = vperm.xlu0 %751, %v757_v29   ;;  %769 = vperm.xlu1 %762, %v768_v30   ;;  %v441_v20 = vunpack.c.l.bf16 %v986_v6  ;;  %v1044_v31 = vld [vmem:[%s1277_s4 + $0x38] sm:$0xff] }
   0xf   :  { %v1049_v32 = vld [vmem:[%s1277_s4 + $0x78] sm:$0xff] }
  0x10   :  { %169 = vmatpush1.bf16.msra.mxu0 %v804_v8  ;;  %749 = vmatpush1.bf16.msra.mxu1 %v804_v8  ;;  %v437_v8 = vunpack.c.l.bf16 %v954_v58 }
  0x12   :  { %774 = vperm.xlu0 %751, %v773_v37   ;;  %779 = vperm.xlu1 %762, %v778_v39  }
  0x13   :  { %663 = vmatmul.mubr.msk.bf16.vlgmr.msra.gmra.mrb[0].mxu0 %vm137_vm0, %v805_v9  ;;  %667 = vmatmul.mubr.msk.bf16.vlgmr.msra.gmra.mrb[0].mxu1 %vm137_vm0, %v806_v12  ;;  %v453_v9 = vunpack.c.l.bf16 %v959_v59  ;;  %v1000_v12 = vld [vmem:[%s1277_s4 + $0x20] sm:$0xff] }
  0x14   :  { %204 = vmatprep.mubr.bf16.mxu0 %v813_v1  ;;  %244 = vmatprep.mubr.bf16.mxu1 %v813_v1 }
  0x16   :  { %789 = vperm.xlu1 %762, %v788_v43   ;;  %784 = vperm.xlu0 %751, %v783_v44  }
  0x1b   :  { %664 = vmatmul.mubr.msk.bf16.gmra.mrb[4].mxu0 %vm137_vm0, %v807_v35  ;;  %668 = vmatmul.mubr.msk.bf16.gmra.mrb[4].mxu1 %vm137_vm0, %v808_v36 }
  0x1c   :  { %214 = vmatprep.mubr.bf16.mxu0 %v813_v1  ;;  %254 = vmatprep.mubr.bf16.mxu1 %v813_v1 }
  0x23   :  { %665 = vmatmul.mubr.msk.bf16.gmra.mrb[8].mxu0 %vm137_vm0, %v809_v45  ;;  %669 = vmatmul.mubr.msk.bf16.gmra.mrb[8].mxu1 %vm137_vm0, %v810_v46 }
  0x24   :  { %224 = vmatprep.mubr.bf16.mxu0 %v813_v1  ;;  %264 = vmatprep.mubr.bf16.mxu1 %v813_v1  ;;  %v977_v1 = vld [vmem:[%s1277_s4 + $0x50] sm:$0xff] }
  0x25   :  { %v455_v15 = vunpack.c.l.bf16 %v977_v1  ;;  %v456_v17 = vunpack.c.h.bf16 %v977_v1 }
  0x2b   :  { %666 = vmatmul.mubr.msk.bf16.gmra.mrb[12].mxu0 %vm137_vm0, %v811_v47  ;;  %670 = vmatmul.mubr.msk.bf16.gmra.mrb[12].mxu1 %vm137_vm0, %v812_v48 }
  0x89   :  { %v934_v51 = vpop.permute.xlu1 %764  ;;  %v936_v52 = vpop.permute.xlu0 %753 }
  0x8a   :  { %v756_v46 = vunpack.i.h.bf16 %v936_v52  ;;  %v755_v47 = vunpack.i.l.bf16 %v936_v52 }
  0x8d   :  { %v961_v60 = vpop.permute.xlu1 %769  ;;  %v963_v61 = vpop.permute.xlu0 %758 }
  0x8e   :  { %v761_v53 = vunpack.i.h.bf16 %v963_v61  ;;  %v760_v54 = vunpack.i.l.bf16 %v963_v61  ;;  %v1281_v61 = vunpack.c.h.bf16 %v991_v7 }
  0x91   :  { %v1035_v26 = vpop.permute.xlu1 %779  ;;  %v775_v33 = vpop.permute.xlu0 %774 }
  0x92   :  { %v776_v55 = vunpack.i.l.bf16 %v775_v33  ;;  %v777_v45 = vunpack.i.h.bf16 %v775_v33  ;;  %v782_v40 = vunpack.i.h.bf16 %v1035_v26  ;;  %v781_v39 = vunpack.i.l.bf16 %v1035_v26 }
  0x95   :  { %v1067_v50 = vpop.permute.xlu1 %789  ;;  %v1072_v44 = vpop.permute.xlu0 %784 }
  0x96   :  { %v786_v28 = vunpack.i.l.bf16 %v1072_v44 }
  0xe6   :  { %v196_v42 = vpop.f32.mrb[0].mxu0  ;;  %v236_v41 = vpop.f32.mrb[0].mxu1 }
  0xe7   :  { %v197_v38 = vadd.f32 %v196_v42, %v965_v62  ;;  %v237_v37 = vadd.f32 %v236_v41, %v965_v62  ;;  %v198_v36 = vpop.f32.mrb[1].mxu0  ;;  %v238_v35 = vpop.f32.mrb[1].mxu1 }
  0xe8   :  { %v199_v33 = vadd.f32 %v198_v36, %v967_v63  ;;  %v239_v30 = vadd.f32 %v238_v35, %v967_v63  ;;  %v200_v29 = vpop.f32.mrb[2].mxu0  ;;  %v240_v52 = vpop.f32.mrb[2].mxu1 }
  0xe9   :  { %v387_v27 = vmul.f32 %v755_v47, %v197_v38  ;;  %v403_v42 = vmul.f32 %v776_v55, %v237_v37  ;;  %v201_v41 = vadd.f32 %v200_v29, %v965_v62  ;;  %v241_v49 = vadd.f32 %v240_v52, %v965_v62  ;;  %v202_v23 = vpop.f32.mrb[3].mxu0  ;;  %v242_v34 = vpop.f32.mrb[3].mxu1 }
  0xea   :  { %v388_v22 = vmul.f32 %v755_v47, %v199_v33  ;;  %v404_v43 = vmul.f32 %v776_v55, %v239_v30  ;;  %v203_v36 = vadd.f32 %v202_v23, %v967_v63  ;;  %v243_v35 = vadd.f32 %v242_v34, %v967_v63 }
  0xeb   :  { %v467_v21 = vadd.f32 %v435_v2, %v387_v27  ;;  %v483_v48 = vadd.f32 %v451_v3, %v403_v42  ;;  %v389_v38 = vmul.f32 %v756_v46, %v201_v41  ;;  %v405_v37 = vmul.f32 %v777_v45, %v241_v49 }
  0xec   :  { %v468_v29 = vadd.f32 %v436_v4, %v388_v22  ;;  %v484_v52 = vadd.f32 %v452_v5, %v404_v43  ;;  %v390_v47 = vmul.f32 %v756_v46, %v203_v36  ;;  %v406_v30 = vmul.f32 %v777_v45, %v243_v35 }
  0xed   :  { %v499_v55 = vmax.f32 %v467_v21, 0.0  ;;  %v515_v23 = vmax.f32 %v483_v48, 0.0  ;;  %v469_v34 = vadd.f32 %v437_v8, %v389_v38  ;;  %v485_v2 = vadd.f32 %v453_v9, %v405_v37 }
  0xee   :  { %v500_v27 = vmax.f32 %v468_v29, 0.0  ;;  %v516_v3 = vmax.f32 %v484_v52, 0.0  ;;  %v470_v49 = vadd.f32 %v438_v10, %v390_v47  ;;  %v486_v56 = vadd.f32 %v454_v11, %v406_v30  ;;  %v206_v57 = vpop.f32.mrb[4].mxu0  ;;  %v246_v4 = vpop.f32.mrb[4].mxu1 }
  0xef   :  { %v501_v5 = vmax.f32 %v469_v34, 0.0  ;;  %v517_v22 = vmax.f32 %v485_v2, 0.0  ;;  %v207_v21 = vadd.f32 %v206_v57, %v965_v62  ;;  %v247_v43 = vadd.f32 %v246_v4, %v965_v62  ;;  %v208_v8 = vpop.f32.mrb[5].mxu0  ;;  %v248_v45 = vpop.f32.mrb[5].mxu1 }
  0xf0   :  { %v687_v46 = vpack.c.bf16 %v500_v27, %v499_v55  ;;  %v695_v9 = vpack.c.bf16 %v516_v3, %v515_v23  ;;  %v502_v48 = vmax.f32 %v470_v49, 0.0  ;;  %v518_v33 = vmax.f32 %v486_v56, 0.0  ;;  %v210_v42 = vpop.f32.mrb[6].mxu0  ;;  %v250_v58 = vpop.f32.mrb[6].mxu1 }
  0xf1   :  { %v391_v59 = vmul.f32 %v760_v54, %v207_v21  ;;  %v407_v10 = vmul.f32 %v781_v39, %v247_v43  ;;  %v209_v11 = vadd.f32 %v208_v8, %v967_v63  ;;  %v249_v41 = vadd.f32 %v248_v45, %v967_v63  ;;  %v212_v36 = vpop.f32.mrb[7].mxu0  ;;  %v252_v35 = vpop.f32.mrb[7].mxu1 }
  0xf2   :  { %627 = vst [vmem:[%s1278_s5] sm:$0xff] %v687_v46  ;;  %635 = vst [vmem:[%s1278_s5 + $0x40] sm:$0xff] %v695_v9  ;;  %v688_v38 = vpack.c.bf16 %v502_v48, %v501_v5  ;;  %v696_v37 = vpack.c.bf16 %v518_v33, %v517_v22  ;;  %v211_v29 = vadd.f32 %v210_v42, %v965_v62  ;;  %v1279_v56 = vunpack.c.l.bf16 %v991_v7 }
  0xf3   :  { %v251_v52 = vadd.f32 %v250_v58, %v965_v62  ;;  %v471_v47 = vadd.f32 %v439_v14, %v391_v59  ;;  %v487_v30 = vadd.f32 %v455_v15, %v407_v10  ;;  %v392_v55 = vmul.f32 %v760_v54, %v209_v11 }
  0xf4   :  { %v408_v23 = vmul.f32 %v781_v39, %v249_v41  ;;  %628 = vst [vmem:[%s1278_s5 + $0x8] sm:$0xff] %v688_v38  ;;  %636 = vst [vmem:[%s1278_s5 + $0x48] sm:$0xff] %v696_v37  ;;  %v393_v14 = vmul.f32 %v761_v53, %v211_v29  ;;  %v213_v34 = vadd.f32 %v212_v36, %v967_v63  ;;  %v1280_v46 = vunpack.c.h.bf16 %v986_v6 }
  0xf5   :  { %v409_v15 = vmul.f32 %v782_v40, %v251_v52  ;;  %v253_v54 = vadd.f32 %v252_v35, %v967_v63  ;;  %v503_v2 = vmax.f32 %v471_v47, 0.0  ;;  %v519_v39 = vmax.f32 %v487_v30, 0.0 }
  0xf6   :  { %v472_v27 = vadd.f32 %v440_v16, %v392_v55  ;;  %v488_v3 = vadd.f32 %v456_v17, %v408_v23  ;;  %v473_v49 = vadd.f32 %v441_v20, %v393_v14  ;;  %v394_v4 = vmul.f32 %v761_v53, %v213_v34  ;;  %v216_v22 = vpop.f32.mrb[8].mxu0  ;;  %v256_v21 = vpop.f32.mrb[8].mxu1 }
  0xf7   :  { %v489_v57 = vadd.f32 %v1279_v56, %v409_v15  ;;  %v410_v5 = vmul.f32 %v782_v40, %v253_v54  ;;  %v217_v16 = vadd.f32 %v216_v22, %v965_v62  ;;  %v257_v1 = vadd.f32 %v256_v21, %v965_v62  ;;  %v218_v17 = vpop.f32.mrb[9].mxu0  ;;  %v258_v8 = vpop.f32.mrb[9].mxu1 }
  0xf8   :  { %v504_v43 = vmax.f32 %v472_v27, 0.0  ;;  %v520_v0 = vmax.f32 %v488_v3, 0.0  ;;  %v505_v20 = vmax.f32 %v473_v49, 0.0  ;;  %v474_v9 = vadd.f32 %v1280_v46, %v394_v4  ;;  %v220_v26 = vpop.f32.mrb[10].mxu0  ;;  %v260_v40 = vpop.f32.mrb[10].mxu1 }
  0xf9   :  { %v521_v45 = vmax.f32 %v489_v57, 0.0  ;;  %v490_v53 = vadd.f32 %v1281_v61, %v410_v5  ;;  %v1282_v42 = vunpack.i.l.bf16 %v934_v51  ;;  %v411_v59 = vmul.f32 %v786_v28, %v257_v1  ;;  %v222_v10 = vpop.f32.mrb[11].mxu0  ;;  %v262_v11 = vpop.f32.mrb[11].mxu1 }
  0xfa   :  { %v689_v48 = vpack.c.bf16 %v504_v43, %v503_v2  ;;  %v697_v33 = vpack.c.bf16 %v520_v0, %v519_v39  ;;  %v506_v41 = vmax.f32 %v474_v9, 0.0  ;;  %v219_v6 = vadd.f32 %v218_v17, %v967_v63 }
  0xfb   :  { %v395_v58 = vmul.f32 %v1282_v42, %v217_v16  ;;  %v522_v36 = vmax.f32 %v490_v53, 0.0  ;;  %v259_v35 = vadd.f32 %v258_v8, %v967_v63  ;;  %v1283_v7 = vunpack.c.l.bf16 %v1000_v12 }
  0xfc   :  { %629 = vst [vmem:[%s1278_s5 + $0x10] sm:$0xff] %v689_v48  ;;  %637 = vst [vmem:[%s1278_s5 + $0x50] sm:$0xff] %v697_v33  ;;  %v1284_v37 = vunpack.c.l.bf16 %v1005_v13  ;;  %v221_v52 = vadd.f32 %v220_v26, %v965_v62  ;;  %v261_v47 = vadd.f32 %v260_v40, %v965_v62  ;;  %v690_v30 = vpack.c.bf16 %v506_v41, %v505_v20 }
  0xfd   :  { %v475_v38 = vadd.f32 %v1283_v7, %v395_v58  ;;  %v698_v55 = vpack.c.bf16 %v522_v36, %v521_v45  ;;  %v1285_v23 = vmov %v1282_v42  ;;  %v412_v15 = vmul.f32 %v786_v28, %v259_v35 }
  0xfe   :  { %v491_v29 = vadd.f32 %v1284_v37, %v411_v59  ;;  %v396_v14 = vmul.f32 %v1285_v23, %v219_v6  ;;  %v1286_v2 = vunpack.i.h.bf16 %v934_v51  ;;  %v1287_v27 = vunpack.i.h.bf16 %v1072_v44  ;;  %630 = vst [vmem:[%s1278_s5 + $0x18] sm:$0xff] %v690_v30  ;;  %v226_v22 = vpop.f32.mrb[12].mxu0  ;;  %v266_v21 = vpop.f32.mrb[12].mxu1 }
  0xff   :  { %v507_v34 = vmax.f32 %v475_v38, 0.0  ;;  %638 = vst [vmem:[%s1278_s5 + $0x58] sm:$0xff] %v698_v55  ;;  %v1288_v49 = vunpack.c.h.bf16 %v1000_v12  ;;  %v1289_v28 = vunpack.c.h.bf16 %v1005_v13  ;;  %v223_v4 = vadd.f32 %v222_v10, %v967_v63  ;;  %v228_v8 = vpop.f32.mrb[13].mxu0  ;;  %v268_v20 = vpop.f32.mrb[13].mxu1 }
 0x100   :  { %v523_v54 = vmax.f32 %v491_v29, 0.0  ;;  %v397_v39 = vmul.f32 %v1286_v2, %v221_v52  ;;  %v413_v3 = vmul.f32 %v1287_v27, %v261_v47  ;;  %v263_v5 = vadd.f32 %v262_v11, %v967_v63  ;;  %v230_v26 = vpop.f32.mrb[14].mxu0  ;;  %v270_v40 = vpop.f32.mrb[14].mxu1 }
 0x101   :  { %v476_v56 = vadd.f32 %v1288_v49, %v396_v14  ;;  %v492_v57 = vadd.f32 %v1289_v28, %v412_v15  ;;  %v1290_v43 = vunpack.c.l.bf16 %v1014_v18  ;;  %v1291_v16 = vunpack.c.l.bf16 %v1019_v19  ;;  %v232_v11 = vpop.f32.mrb[15].mxu0  ;;  %v272_v41 = vpop.f32.mrb[15].mxu1 }
 0x102   :  { %v227_v17 = vadd.f32 %v226_v22, %v965_v62  ;;  %v267_v12 = vadd.f32 %v266_v21, %v965_v62  ;;  %v1292_v46 = vmov %v1286_v2  ;;  %v1293_v61 = vmov %v1287_v27 }
 0x103   :  { %v477_v0 = vadd.f32 %v1290_v43, %v397_v39  ;;  %v493_v1 = vadd.f32 %v1291_v16, %v413_v3  ;;  %v508_v13 = vmax.f32 %v476_v56, 0.0  ;;  %v524_v45 = vmax.f32 %v492_v57, 0.0 }
 0x104   :  { %v398_v9 = vmul.f32 %v1292_v46, %v223_v4  ;;  %v414_v53 = vmul.f32 %v1293_v61, %v263_v5  ;;  %v1294_v42 = vunpack.i.l.bf16 %v961_v60  ;;  %v1295_v59 = vunpack.i.l.bf16 %v1067_v50 }
 0x105   :  { %v509_v48 = vmax.f32 %v477_v0, 0.0  ;;  %v525_v33 = vmax.f32 %v493_v1, 0.0  ;;  %v691_v36 = vpack.c.bf16 %v508_v13, %v507_v34  ;;  %v699_v6 = vpack.c.bf16 %v524_v45, %v523_v54 }
 0x106   :  { %v399_v58 = vmul.f32 %v1294_v42, %v227_v17  ;;  %v415_v10 = vmul.f32 %v1295_v59, %v267_v12  ;;  %v1296_v51 = vunpack.c.h.bf16 %v1014_v18  ;;  %v1297_v44 = vunpack.c.h.bf16 %v1019_v19 }
 0x107   :  { %v1298_v38 = vunpack.c.l.bf16 %v1028_v24  ;;  %v1299_v29 = vunpack.c.l.bf16 %v1033_v25  ;;  %v229_v47 = vadd.f32 %v228_v8, %v967_v63  ;;  %v269_v30 = vadd.f32 %v268_v20, %v967_v63  ;;  %631 = vst [vmem:[%s1278_s5 + $0x20] sm:$0xff] %v691_v36  ;;  %639 = vst [vmem:[%s1278_s5 + $0x60] sm:$0xff] %v699_v6 }
 0x108   :  { %v478_v35 = vadd.f32 %v1296_v51, %v398_v9  ;;  %v494_v7 = vadd.f32 %v1297_v44, %v414_v53  ;;  %v231_v55 = vadd.f32 %v230_v26, %v965_v62  ;;  %v271_v23 = vadd.f32 %v270_v40, %v965_v62 }
 0x109   :  { %v479_v37 = vadd.f32 %v1298_v38, %v399_v58  ;;  %v495_v52 = vadd.f32 %v1299_v29, %v415_v10  ;;  %v1300_v34 = vmov %v1294_v42  ;;  %v1301_v2 = vmov %v1295_v59 }
 0x10a   :  { %v510_v18 = vmax.f32 %v478_v35, 0.0  ;;  %v526_v19 = vmax.f32 %v494_v7, 0.0  ;;  %v400_v54 = vmul.f32 %v1300_v34, %v229_v47  ;;  %v416_v39 = vmul.f32 %v1301_v2, %v269_v30 }
 0x10b   :  { %v511_v14 = vmax.f32 %v479_v37, 0.0  ;;  %v527_v15 = vmax.f32 %v495_v52, 0.0  ;;  %v1302_v49 = vunpack.i.h.bf16 %v961_v60  ;;  %v1303_v28 = vunpack.i.h.bf16 %v1067_v50 }
 0x10c   :  { %v692_v27 = vpack.c.bf16 %v510_v18, %v509_v48  ;;  %v700_v3 = vpack.c.bf16 %v526_v19, %v525_v33  ;;  %v1304_v4 = vunpack.c.h.bf16 %v1028_v24  ;;  %v1305_v62 = vunpack.c.h.bf16 %v1033_v25 }
 0x10d   :  { %v401_v56 = vmul.f32 %v1302_v49, %v231_v55  ;;  %v417_v57 = vmul.f32 %v1303_v28, %v271_v23  ;;  %v233_v21 = vadd.f32 %v232_v11, %v967_v63  ;;  %v273_v43 = vadd.f32 %v272_v41, %v967_v63 }
 0x10e   :  { %v480_v5 = vadd.f32 %v1304_v4, %v400_v54  ;;  %v496_v22 = vadd.f32 %v1305_v62, %v416_v39  ;;  %632 = vst [vmem:[%s1278_s5 + $0x28] sm:$0xff] %v692_v27  ;;  %640 = vst [vmem:[%s1278_s5 + $0x68] sm:$0xff] %v700_v3  ;;  %v1306_v0 = vunpack.c.l.bf16 %v1044_v31  ;;  %v1307_v24 = vunpack.c.l.bf16 %v1049_v32 }
 0x10f   :  { %v1308_v12 = vmov %v1302_v49  ;;  %v1309_v63 = vmov %v1303_v28  ;;  %v1310_v61 = vunpack.c.h.bf16 %v1044_v31  ;;  %v1311_v26 = vunpack.c.h.bf16 %v1049_v32 }
 0x110   :  { %v481_v16 = vadd.f32 %v1306_v0, %v401_v56  ;;  %v497_v1 = vadd.f32 %v1307_v24, %v417_v57  ;;  %v512_v25 = vmax.f32 %v480_v5, 0.0  ;;  %v528_v17 = vmax.f32 %v496_v22, 0.0 }
 0x111   :  { %v402_v8 = vmul.f32 %v1308_v12, %v233_v21  ;;  %v418_v20 = vmul.f32 %v1309_v63, %v273_v43 }
 0x112   :  { %v513_v13 = vmax.f32 %v481_v16, 0.0  ;;  %v529_v45 = vmax.f32 %v497_v1, 0.0  ;;  %v693_v46 = vpack.c.bf16 %v512_v25, %v511_v14  ;;  %v701_v9 = vpack.c.bf16 %v528_v17, %v527_v15 }
 0x113   :  { %v482_v53 = vadd.f32 %v1310_v61, %v402_v8  ;;  %v498_v40 = vadd.f32 %v1311_v26, %v418_v20 }
 0x114   :  { %633 = vst [vmem:[%s1278_s5 + $0x30] sm:$0xff] %v693_v46  ;;  %641 = vst [vmem:[%s1278_s5 + $0x70] sm:$0xff] %v701_v9 }
 0x115   :  { %v514_v60 = vmax.f32 %v482_v53, 0.0  ;;  %v530_v50 = vmax.f32 %v498_v40, 0.0 }
 0x117   :  { %v694_v48 = vpack.c.bf16 %v514_v60, %v513_v13  ;;  %v702_v33 = vpack.c.bf16 %v530_v50, %v529_v45 }
 0x119   :  { %634 = vst [vmem:[%s1278_s5 + $0x38] sm:$0xff] %v694_v48  ;;  %642 = vst [vmem:[%s1278_s5 + $0x78] sm:$0xff] %v702_v33 }

// kernel: _lambda_.20
= control target key start
LH: loop header
LB: loop body
LE: loop exit
PB: predicated region body
PF: predicated region fallthrough
CT: control target
= control target key end

     0   :  { %v888_v1 = vmov 0   ;;  %s1091_s1 = inlined_call_operand.vmem [shape: bf16[256,128], index: 1, kind: input, shape index: {}]   ;;  %s1092_s0 = inlined_call_operand.vmem [shape: bf16[128,256], index: 0, kind: input, shape index: {}]   ;;  %s1093_s3 = inlined_call_operand.vmem [shape: bf16[128,1], index: 3, kind: input, shape index: {}]   ;;  %s1094_s2 = inlined_call_operand.vmem [shape: f32[1,128], index: 2, kind: input, shape index: {}]   ;;  %s1095_s4 = inlined_call_operand.vmem [shape: bf16[128,128], index: 4, kind: output, shape index: {}]  }
   0x1   :  { %v848_v0 = vld [vmem:[%s1091_s1 + $0x40] sm:$0xff]   ;;  %806 = vset.pattern.permute.xlu0 %v888_v1  ;;  %817 = vset.pattern.permute.xlu1 %v888_v1  ;;  %v850_v3 = vld [vmem:[%s1091_s1 + $0x48] sm:$0xff]   ;;  %v852_v5 = vld [vmem:[%s1091_s1 + $0x50] sm:$0xff]  }
   0x2   :  { %v849_v2 = vld [vmem:[%s1091_s1] sm:$0xff]   ;;  %725 = vmatprep.subr.bf16.mxu0 %v848_v0  ;;  %789 = vmatprep.subr.bf16.mxu1 %v848_v0  ;;  %v851_v4 = vld [vmem:[%s1091_s1 + $0x8] sm:$0xff]   ;;  %v853_v6 = vld [vmem:[%s1091_s1 + $0x10] sm:$0xff]  }
   0x3   :  { %726 = vmatpush3.bf16.msra.mxu0 %v849_v2  ;;  %797 = vmatpush3.bf16.msra.mxu1 %v849_v2  ;;  %v854_v7 = vld [vmem:[%s1091_s1 + $0x58] sm:$0xff]   ;;  %v856_v9 = vld [vmem:[%s1091_s1 + $0x60] sm:$0xff]   ;;  %v858_v11 = vld [vmem:[%s1091_s1 + $0x68] sm:$0xff]  }
   0x4   :  { %727 = vmatprep.subr.bf16.mxu0 %v850_v3  ;;  %790 = vmatprep.subr.bf16.mxu1 %v850_v3  ;;  %v855_v8 = vld [vmem:[%s1091_s1 + $0x18] sm:$0xff]   ;;  %v857_v10 = vld [vmem:[%s1091_s1 + $0x20] sm:$0xff]   ;;  %v859_v14 = vld [vmem:[%s1091_s1 + $0x28] sm:$0xff]  }
   0x5   :  { %v866_v12 = vld [vmem:[%s1092_s0 + $0x4] ss:$8 sps:$4 sm:$0xff]   ;;  %v860_v15 = vld [vmem:[%s1091_s1 + $0x70] sm:$0xff]   ;;  %v862_v17 = vld [vmem:[%s1091_s1 + $0x78] sm:$0xff]  }
   0x6   :  { %v869_v13 = vld [vmem:[%s1092_s0 + $0x44] ss:$8 sps:$4 sm:$0xff]   ;;  %281 = vmatprep.mubr.bf16.mxu0 %v866_v12  ;;  %v861_v16 = vld [vmem:[%s1091_s1 + $0x30] sm:$0xff]   ;;  %v863_v19 = vld [vmem:[%s1091_s1 + $0x38] sm:$0xff]  }
   0x7   :  { %728 = vmatpush3.bf16.msra.mxu0 %v851_v4  ;;  %798 = vmatpush3.bf16.msra.mxu1 %v851_v4  ;;  %v640_v18 = vld [vmem:[%s1093_s3] sm:$0xff]   ;;  %v711_v22 = vld [vmem:[%s1093_s3 + $0x8] sm:$0xff]   ;;  %v712_v23 = vld [vmem:[%s1093_s3 + $0x10] sm:$0xff]  }
   0x8   :  { %729 = vmatprep.subr.bf16.mxu0 %v852_v5  ;;  %791 = vmatprep.subr.bf16.mxu1 %v852_v5  ;;  %v641_v20 = vunpack.c.l.bf16 %v640_v18  ;;  %v642_v21 = vunpack.c.h.bf16 %v640_v18  ;;  %v645_v24 = vunpack.c.l.bf16 %v711_v22  ;;  %v646_v25 = vunpack.c.h.bf16 %v711_v22  ;;  %v714_v28 = vld [vmem:[%s1093_s3 + $0x20] sm:$0xff]   ;;  %v713_v29 = vld [vmem:[%s1093_s3 + $0x18] sm:$0xff]   ;;  %v715_v32 = vld [vmem:[%s1093_s3 + $0x28] sm:$0xff]  }
   0x9   :  { %313 = vmatprep.mubr.bf16.mxu1 %v869_v13  ;;  %v649_v26 = vunpack.c.l.bf16 %v712_v23  ;;  %v650_v27 = vunpack.c.h.bf16 %v712_v23  ;;  %v653_v31 = vunpack.c.l.bf16 %v713_v29  ;;  %v864_v33 = vld [vmem:[%s1092_s0] ss:$8 sps:$4 sm:$0xff]   ;;  %v654_v36 = vunpack.c.h.bf16 %v713_v29  ;;  %v870_v37 = vld [vmem:[%s1092_s0 + $0x14] ss:$8 sps:$4 sm:$0xff]   ;;  %v874_v53 = vld [vmem:[%s1092_s0 + $0x10] ss:$8 sps:$4 sm:$0xff]  }
   0xa   :  { %v807_v30 = vpack.i.bf16 %v642_v21, %v641_v20  ;;  %v867_v34 = vld [vmem:[%s1092_s0 + $0x40] ss:$8 sps:$4 sm:$0xff]   ;;  %v872_v38 = vld [vmem:[%s1092_s0 + $0x54] ss:$8 sps:$4 sm:$0xff]   ;;  %v657_v39 = vunpack.c.l.bf16 %v714_v28  ;;  %v658_v40 = vunpack.c.h.bf16 %v714_v28  ;;  %v812_v41 = vpack.i.bf16 %v646_v25, %v645_v24  ;;  %v875_v54 = vld [vmem:[%s1092_s0 + $0x50] ss:$8 sps:$4 sm:$0xff]  }
   0xb   :  { %730 = vmatpush3.bf16.msra.mxu0 %v853_v6  ;;  %799 = vmatpush3.bf16.msra.mxu1 %v853_v6  ;;  %v818_v35 = vpack.i.bf16 %v650_v27, %v649_v26  ;;  %v823_v42 = vpack.i.bf16 %v654_v36, %v653_v31  ;;  %v661_v43 = vunpack.c.l.bf16 %v715_v32  ;;  %v662_v44 = vunpack.c.h.bf16 %v715_v32  ;;  %v717_v45 = vld [vmem:[%s1093_s3 + $0x38] sm:$0xff]   ;;  %v716_v46 = vld [vmem:[%s1093_s3 + $0x30] sm:$0xff]   ;;  %v876_v55 = vld [vmem:[%s1092_s0 + $0x24] ss:$8 sps:$4 sm:$0xff]  }
   0xc   :  { %731 = vmatprep.subr.bf16.mxu0 %v854_v7  ;;  %792 = vmatprep.subr.bf16.mxu1 %v854_v7  ;;  %v828_v47 = vpack.i.bf16 %v658_v40, %v657_v39  ;;  %v669_v48 = vunpack.c.l.bf16 %v717_v45  ;;  %v670_v50 = vunpack.c.h.bf16 %v717_v45  ;;  %v665_v51 = vunpack.c.l.bf16 %v716_v46  ;;  %v878_v56 = vld [vmem:[%s1092_s0 + $0x64] ss:$8 sps:$4 sm:$0xff]   ;;  %v880_v59 = vld [vmem:[%s1092_s0 + $0x20] ss:$8 sps:$4 sm:$0xff]   ;;  %v882_v61 = vld [vmem:[%s1092_s0 + $0x34] ss:$8 sps:$4 sm:$0xff]  }
   0xd   :  { %808 = vperm.xlu0 %806, %v807_v30   ;;  %819 = vperm.xlu1 %817, %v818_v35   ;;  %v833_v49 = vpack.i.bf16 %v662_v44, %v661_v43  ;;  %v666_v52 = vunpack.c.h.bf16 %v716_v46  ;;  %v881_v60 = vld [vmem:[%s1092_s0 + $0x60] ss:$8 sps:$4 sm:$0xff]   ;;  %v884_v62 = vld [vmem:[%s1092_s0 + $0x74] ss:$8 sps:$4 sm:$0xff]   ;;  %v886_v63 = vld [vmem:[%s1092_s0 + $0x30] ss:$8 sps:$4 sm:$0xff]  }
   0xe   :  { %v843_v57 = vpack.i.bf16 %v670_v50, %v669_v48  ;;  %v887_v0 = vld [vmem:[%s1092_s0 + $0x70] ss:$8 sps:$4 sm:$0xff]  }
   0xf   :  { %732 = vmatpush3.bf16.msra.mxu0 %v855_v8  ;;  %800 = vmatpush3.bf16.msra.mxu1 %v855_v8  ;;  %v838_v58 = vpack.i.bf16 %v666_v52, %v665_v51  ;;  %v1043_v8 = vld [vmem:[%s1094_s2] ss:$0 sm:$0xff] }
  0x10   :  { %733 = vmatprep.subr.bf16.mxu0 %v856_v9  ;;  %793 = vmatprep.subr.bf16.mxu1 %v856_v9 }
  0x11   :  { %813 = vperm.xlu0 %806, %v812_v41   ;;  %824 = vperm.xlu1 %817, %v823_v42  }
  0x13   :  { %734 = vmatpush3.bf16.msra.mxu0 %v857_v10  ;;  %801 = vmatpush3.bf16.msra.mxu1 %v857_v10 }
  0x14   :  { %735 = vmatprep.subr.bf16.mxu0 %v858_v11  ;;  %794 = vmatprep.subr.bf16.mxu1 %v858_v11 }
  0x15   :  { %829 = vperm.xlu0 %806, %v828_v47   ;;  %834 = vperm.xlu1 %817, %v833_v49  }
  0x17   :  { %736 = vmatpush3.bf16.msra.mxu0 %v859_v14  ;;  %802 = vmatpush3.bf16.msra.mxu1 %v859_v14 }
  0x18   :  { %737 = vmatprep.subr.bf16.mxu0 %v860_v15  ;;  %795 = vmatprep.subr.bf16.mxu1 %v860_v15 }
  0x19   :  { %844 = vperm.xlu1 %817, %v843_v57   ;;  %839 = vperm.xlu0 %806, %v838_v58  }
  0x1b   :  { %738 = vmatpush3.bf16.msra.mxu0 %v861_v16  ;;  %803 = vmatpush3.bf16.msra.mxu1 %v861_v16 }
  0x1c   :  { %739 = vmatprep.subr.bf16.mxu0 %v862_v17  ;;  %796 = vmatprep.subr.bf16.mxu1 %v862_v17 }
  0x1f   :  { %740 = vmatpush3.bf16.msra.mxu0 %v863_v19  ;;  %804 = vmatpush3.bf16.msra.mxu1 %v863_v19 }
  0x22   :  { %282 = vmatmul.mubr.bf16.vlgmr.msra.gmra.mrb[0].mxu0 %v864_v33  ;;  %314 = vmatmul.mubr.bf16.vlgmr.msra.gmra.mrb[0].mxu1 %v867_v34 }
  0x23   :  { %289 = vmatprep.mubr.bf16.mxu0 %v870_v37  ;;  %321 = vmatprep.mubr.bf16.mxu1 %v872_v38 }
  0x2a   :  { %290 = vmatmul.mubr.bf16.gmra.mrb[4].mxu0 %v874_v53  ;;  %322 = vmatmul.mubr.bf16.gmra.mrb[4].mxu1 %v875_v54 }
  0x2b   :  { %297 = vmatprep.mubr.bf16.mxu0 %v876_v55  ;;  %329 = vmatprep.mubr.bf16.mxu1 %v878_v56 }
  0x32   :  { %298 = vmatmul.mubr.bf16.gmra.mrb[8].mxu0 %v880_v59  ;;  %330 = vmatmul.mubr.bf16.gmra.mrb[8].mxu1 %v881_v60 }
  0x33   :  { %305 = vmatprep.mubr.bf16.mxu0 %v882_v61  ;;  %337 = vmatprep.mubr.bf16.mxu1 %v884_v62 }
  0x3a   :  { %306 = vmatmul.mubr.bf16.gmra.mrb[12].mxu0 %v886_v63  ;;  %338 = vmatmul.mubr.bf16.gmra.mrb[12].mxu1 %v887_v0 }
  0x8c   :  { %v809_v1 = vpop.permute.xlu0 %808  ;;  %v1036_v3 = vpop.permute.xlu1 %819 }
  0x8d   :  { %v811_v21 = vunpack.i.h.bf16 %v809_v1  ;;  %v810_v22 = vunpack.i.l.bf16 %v809_v1 }
  0x90   :  { %v1034_v2 = vpop.permute.xlu0 %813  ;;  %v1038_v5 = vpop.permute.xlu1 %824 }
  0x91   :  { %v816_v52 = vunpack.i.h.bf16 %v1034_v2  ;;  %v815_v53 = vunpack.i.l.bf16 %v1034_v2 }
  0x94   :  { %v830_v4 = vpop.permute.xlu0 %829  ;;  %v835_v29 = vpop.permute.xlu1 %834 }
  0x95   :  { %v832_v23 = vunpack.i.h.bf16 %v830_v4  ;;  %v831_v24 = vunpack.i.l.bf16 %v830_v4  ;;  %v837_v54 = vunpack.i.h.bf16 %v835_v29  ;;  %v836_v55 = vunpack.i.l.bf16 %v835_v29 }
  0xf5   :  { %v741_v6 = vpop.f32.mrb[0].mxu0  ;;  %v765_v7 = vpop.f32.mrb[0].mxu1 }
  0xf6   :  { %v742_v9 = vpop.f32.mrb[1].mxu0  ;;  %v766_v10 = vpop.f32.mrb[1].mxu1 }
  0xf7   :  { %v743_v11 = vadd.f32 %v742_v9, %v741_v6  ;;  %v767_v12 = vadd.f32 %v766_v10, %v765_v7  ;;  %v744_v13 = vpop.f32.mrb[2].mxu0  ;;  %v768_v14 = vpop.f32.mrb[2].mxu1 }
  0xf8   :  { %v745_v15 = vpop.f32.mrb[3].mxu0  ;;  %v769_v16 = vpop.f32.mrb[3].mxu1 }
  0xf9   :  { %v284_v17 = vadd.f32 %v743_v11, %v1043_v8  ;;  %v316_v18 = vadd.f32 %v767_v12, %v1043_v8  ;;  %v746_v19 = vadd.f32 %v745_v15, %v744_v13  ;;  %v770_v20 = vadd.f32 %v769_v16, %v768_v14 }
  0xfb   :  { %v346_v25 = vmax.f32 %v284_v17, 0.0  ;;  %v354_v26 = vmax.f32 %v316_v18, 0.0  ;;  %v287_v27 = vadd.f32 %v746_v19, %v1043_v8  ;;  %v319_v28 = vadd.f32 %v770_v20, %v1043_v8  ;;  %v840_v17 = vpop.permute.xlu0 %839 }
  0xfc   :  { %v842_v29 = vunpack.i.h.bf16 %v840_v17 }
  0xfd   :  { %v347_v30 = vmax.f32 %v287_v27, 0.0  ;;  %v355_v31 = vmax.f32 %v319_v28, 0.0  ;;  %v747_v32 = vpop.f32.mrb[4].mxu0  ;;  %v771_v33 = vpop.f32.mrb[4].mxu1  ;;  %v474_v34 = vmul.f32 %v810_v22, %v346_v25  ;;  %v482_v35 = vmul.f32 %v831_v24, %v354_v26 }
  0xfe   :  { %v748_v36 = vpop.f32.mrb[5].mxu0  ;;  %v772_v37 = vpop.f32.mrb[5].mxu1  ;;  %v821_v26 = vunpack.i.l.bf16 %v1036_v3  ;;  %v841_v27 = vunpack.i.l.bf16 %v840_v17  ;;  %v822_v28 = vunpack.i.h.bf16 %v1036_v3 }
  0xff   :  { %v475_v38 = vmul.f32 %v811_v21, %v347_v30  ;;  %v483_v39 = vmul.f32 %v832_v23, %v355_v31  ;;  %v749_v40 = vadd.f32 %v748_v36, %v747_v32  ;;  %v773_v41 = vadd.f32 %v772_v37, %v771_v33  ;;  %v750_v42 = vpop.f32.mrb[6].mxu0  ;;  %v774_v43 = vpop.f32.mrb[6].mxu1 }
 0x100   :  { %v751_v44 = vpop.f32.mrb[7].mxu0  ;;  %v775_v45 = vpop.f32.mrb[7].mxu1 }
 0x101   :  { %v674_v46 = vpack.c.bf16 %v475_v38, %v474_v34  ;;  %v694_v47 = vpack.c.bf16 %v483_v39, %v482_v35  ;;  %v292_v48 = vadd.f32 %v749_v40, %v1043_v8  ;;  %v324_v49 = vadd.f32 %v773_v41, %v1043_v8 }
 0x102   :  { %v752_v50 = vadd.f32 %v751_v44, %v750_v42  ;;  %v776_v51 = vadd.f32 %v775_v45, %v774_v43 }
 0x103   :  { %675 = vst [vmem:[%s1095_s4] sm:$0xff] %v674_v46   ;;  %721 = vst [vmem:[%s1095_s4 + $0x20] sm:$0xff] %v694_v47   ;;  %v348_v56 = vmax.f32 %v292_v48, 0.0  ;;  %v356_v57 = vmax.f32 %v324_v49, 0.0 }
 0x104   :  { %v295_v58 = vadd.f32 %v752_v50, %v1043_v8  ;;  %v327_v59 = vadd.f32 %v776_v51, %v1043_v8  ;;  %v845_v51 = vpop.permute.xlu1 %844 }
 0x105   :  { %v753_v60 = vpop.f32.mrb[8].mxu0  ;;  %v777_v61 = vpop.f32.mrb[8].mxu1  ;;  %v476_v9 = vmul.f32 %v815_v53, %v348_v56  ;;  %v484_v11 = vmul.f32 %v836_v55, %v356_v57  ;;  %v827_v56 = vunpack.i.h.bf16 %v1038_v5  ;;  %v826_v57 = vunpack.i.l.bf16 %v1038_v5 }
 0x106   :  { %v349_v62 = vmax.f32 %v295_v58, 0.0  ;;  %v357_v63 = vmax.f32 %v327_v59, 0.0  ;;  %v754_v0 = vpop.f32.mrb[9].mxu0  ;;  %v778_v1 = vpop.f32.mrb[9].mxu1  ;;  %v847_v58 = vunpack.i.h.bf16 %v845_v51  ;;  %v846_v59 = vunpack.i.l.bf16 %v845_v51 }
 0x107   :  { %v755_v2 = vadd.f32 %v754_v0, %v753_v60  ;;  %v779_v4 = vadd.f32 %v778_v1, %v777_v61  ;;  %v756_v6 = vpop.f32.mrb[10].mxu0  ;;  %v780_v7 = vpop.f32.mrb[10].mxu1 }
 0x108   :  { %v477_v10 = vmul.f32 %v816_v52, %v349_v62  ;;  %v485_v12 = vmul.f32 %v837_v54, %v357_v63  ;;  %v757_v13 = vpop.f32.mrb[11].mxu0  ;;  %v781_v14 = vpop.f32.mrb[11].mxu1 }
 0x109   :  { %v300_v15 = vadd.f32 %v755_v2, %v1043_v8  ;;  %v332_v16 = vadd.f32 %v779_v4, %v1043_v8  ;;  %v758_v18 = vadd.f32 %v757_v13, %v756_v6  ;;  %v782_v19 = vadd.f32 %v781_v14, %v780_v7 }
 0x10a   :  { %v679_v20 = vpack.c.bf16 %v477_v10, %v476_v9  ;;  %v699_v21 = vpack.c.bf16 %v485_v12, %v484_v11 }
 0x10b   :  { %v350_v22 = vmax.f32 %v300_v15, 0.0  ;;  %v358_v23 = vmax.f32 %v332_v16, 0.0  ;;  %v303_v24 = vadd.f32 %v758_v18, %v1043_v8  ;;  %v335_v25 = vadd.f32 %v782_v19, %v1043_v8 }
 0x10c   :  { %718 = vst [vmem:[%s1095_s4 + $0x8] sm:$0xff] %v679_v20   ;;  %722 = vst [vmem:[%s1095_s4 + $0x28] sm:$0xff] %v699_v21  }
 0x10d   :  { %v351_v30 = vmax.f32 %v303_v24, 0.0  ;;  %v359_v31 = vmax.f32 %v335_v25, 0.0  ;;  %v759_v32 = vpop.f32.mrb[12].mxu0  ;;  %v783_v33 = vpop.f32.mrb[12].mxu1  ;;  %v478_v34 = vmul.f32 %v821_v26, %v350_v22  ;;  %v486_v35 = vmul.f32 %v841_v27, %v358_v23 }
 0x10e   :  { %v760_v36 = vpop.f32.mrb[13].mxu0  ;;  %v784_v37 = vpop.f32.mrb[13].mxu1 }
 0x10f   :  { %v479_v38 = vmul.f32 %v822_v28, %v351_v30  ;;  %v487_v39 = vmul.f32 %v842_v29, %v359_v31  ;;  %v761_v40 = vadd.f32 %v760_v36, %v759_v32  ;;  %v785_v41 = vadd.f32 %v784_v37, %v783_v33  ;;  %v762_v42 = vpop.f32.mrb[14].mxu0  ;;  %v786_v43 = vpop.f32.mrb[14].mxu1 }
 0x110   :  { %v763_v44 = vpop.f32.mrb[15].mxu0  ;;  %v787_v45 = vpop.f32.mrb[15].mxu1 }
 0x111   :  { %v684_v46 = vpack.c.bf16 %v479_v38, %v478_v34  ;;  %v704_v47 = vpack.c.bf16 %v487_v39, %v486_v35  ;;  %v308_v3 = vadd.f32 %v761_v40, %v1043_v8  ;;  %v340_v48 = vadd.f32 %v785_v41, %v1043_v8 }
 0x112   :  { %v764_v49 = vadd.f32 %v763_v44, %v762_v42  ;;  %v788_v50 = vadd.f32 %v787_v45, %v786_v43 }
 0x113   :  { %719 = vst [vmem:[%s1095_s4 + $0x10] sm:$0xff] %v684_v46   ;;  %723 = vst [vmem:[%s1095_s4 + $0x30] sm:$0xff] %v704_v47   ;;  %v352_v52 = vmax.f32 %v308_v3, 0.0  ;;  %v360_v53 = vmax.f32 %v340_v48, 0.0 }
 0x114   :  { %v311_v54 = vadd.f32 %v764_v49, %v1043_v8  ;;  %v343_v55 = vadd.f32 %v788_v50, %v1043_v8 }
 0x115   :  { %v480_v62 = vmul.f32 %v826_v57, %v352_v52  ;;  %v488_v63 = vmul.f32 %v846_v59, %v360_v53 }
 0x116   :  { %v353_v60 = vmax.f32 %v311_v54, 0.0  ;;  %v361_v61 = vmax.f32 %v343_v55, 0.0 }
 0x118   :  { %v481_v0 = vmul.f32 %v827_v56, %v353_v60  ;;  %v489_v1 = vmul.f32 %v847_v58, %v361_v61 }
 0x11a   :  { %v689_v2 = vpack.c.bf16 %v481_v0, %v480_v62  ;;  %v709_v4 = vpack.c.bf16 %v489_v1, %v488_v63 }
 0x11c   :  { %720 = vst [vmem:[%s1095_s4 + $0x18] sm:$0xff] %v689_v2   ;;  %724 = vst [vmem:[%s1095_s4 + $0x38] sm:$0xff] %v709_v4  }

// kernel: _lambda_.22
= control target key start
LH: loop header
LB: loop body
LE: loop exit
PB: predicated region body
PF: predicated region fallthrough
CT: control target
= control target key end

     0   :  { %s1148_s18 = smov 0   ;;  %s1150_s19 = smov 0   ;;  %s1293_s0 = inlined_call_operand.vmem [shape: bf16[32,128], index: 0, kind: input, shape index: {}]   ;;  %s1294_s1 = inlined_call_operand.vmem [shape: bf16[128,512], index: 1, kind: input, shape index: {}]   ;;  %s1295_s2 = inlined_call_operand.vmem [shape: f32[1,512], index: 2, kind: input, shape index: {}]   ;;  %s1296_s3 = inlined_call_operand.vmem [shape: bf16[32,1], index: 3, kind: input, shape index: {}]   ;;  %s1297_s4 = inlined_call_operand.vmem [shape: bf16[32,512], index: 4, kind: input, shape index: {}]   ;;  %s1298_s5 = inlined_call_operand.vmem [shape: bf16[32,512], index: 5, kind: output, shape index: {}]  }
   0x1   :  { %s1152_s20 = smov 0   ;;  %s1154_s21 = smov 0  }
   0x2   :  { %s1156_s22 = smov 0  }
   0x3 LB: > { %s27_s23 = sadd.s32 1, %s1111_s21  ;;  %s923_s24 = sadd.s32 4294967295, %s1115_s22   ;;  %s1115_s22 = sphi %s1156_s22, %s15_s22   ;;  %s1111_s21 = sphi %s1154_s21, %s1304_s21   ;;  %s1107_s20 = sphi %s1152_s20, %s1303_s20   ;;  %s1103_s19 = sphi %s1150_s19, %s1302_s19   ;;  %s1099_s18 = sphi %s1148_s18, %s1301_s18  }
   0x4   : > { %p29_p0 = scmp.ge.s32.totalorder %s27_s23, 2  ;;  %p67_p1 = scmp.ne.s32.totalorder %s1103_s19, %s1099_s18 }
   0x5   : > { %p68_p2 = scmp.eq.s32.totalorder %s1115_s22, 0  ;;  %p179_p4 = scmp.eq.s32.totalorder %s923_s24, 1 }
   0x6   : > { %s1306_s23 = smov (%p29_p0, %s27_s23), 0  ;;  %s60_s27 = sadd.s32 1, %s1103_s19 }
   0x7   : > { %p1180_p3 = por %p68_p2, %p67_p1  ;;  %s57_s26 = ssub.s32 %s1111_s21, %s1306_s23 }
   0x8   : > { %p58_p5 = scmp.eq.s32.totalorder %s57_s26, 0  ;;  %p1187_p6 = por %p179_p4, %p67_p1 }
   0x9   : > { %p928_p7 = scmp.ge.s32.totalorder %s1115_s22, 2 }
   0xa   : > { %s1192_s29 = scalar_select %p58_p5, %s1103_s19, %s60_s27  }
   0xb   : > { %219 = sbr.rel (%p928_p7) target bundleno = 37 (0x25), region = 24 }
  0x12   : > { %222 = sbr.rel (!%p1180_p3) target bundleno = 30 (0x1e), region = 28  ;;  %s224_s30 = sand.u32 (%p1180_p3), 1, %s1103_s19  }
  0x13   : > { %s967_s6 = sshll.u32 (%p1180_p3), %s1111_s21, 3  ;;  %s929_s7 = sshll.u32 (%p1180_p3), %s224_s30, 7 }
  0x14   : > { %s1202_s10 = scalar_lea.vmem (%p1180_p3), %s1294_s1, %s967_s6  ;;  %s226_s11 = scalar_lea.vmem (%p1180_p3), [#allocation2], %s929_s7 }
  0x15   : > { %v287_v0 = vld [vmem:[%s1202_s10] sm:$0xff] (%p1180_p3)  ;;  %v289_v1 = vld [vmem:[%s1202_s10 + $0x10] sm:$0xff] (%p1180_p3) }
  0x16   : > { %v291_v2 = vld [vmem:[%s1202_s10 + $0x20] sm:$0xff] (%p1180_p3)  ;;  %288 = vst [vmem:[%s226_s11] sm:$0xff] (%p1180_p3), %v287_v0  ;;  %290 = vst [vmem:[%s226_s11 + $0x8] sm:$0xff] (%p1180_p3), %v289_v1  ;;  %v293_v3 = vld [vmem:[%s1202_s10 + $0x30] sm:$0xff] (%p1180_p3) }
  0x17   : > { %292 = vst [vmem:[%s226_s11 + $0x10] sm:$0xff] (%p1180_p3), %v291_v2  ;;  %v295_v4 = vld [vmem:[%s1202_s10 + $0x40] sm:$0xff] (%p1180_p3)  ;;  %v297_v5 = vld [vmem:[%s1202_s10 + $0x50] sm:$0xff] (%p1180_p3)  ;;  %294 = vst [vmem:[%s226_s11 + $0x18] sm:$0xff] (%p1180_p3), %v293_v3 }
  0x18   : > { %296 = vst [vmem:[%s226_s11 + $0x20] sm:$0xff] (%p1180_p3), %v295_v4  ;;  %298 = vst [vmem:[%s226_s11 + $0x28] sm:$0xff] (%p1180_p3), %v297_v5  ;;  %v299_v6 = vld [vmem:[%s1202_s10 + $0x60] sm:$0xff] (%p1180_p3)  ;;  %v301_v7 = vld [vmem:[%s1202_s10 + $0x70] sm:$0xff] (%p1180_p3) }
  0x19   : > { %v303_v8 = vld [vmem:[%s1202_s10 + $0x80] sm:$0xff]  ;;  %300 = vst [vmem:[%s226_s11 + $0x30] sm:$0xff] %v299_v6  ;;  %302 = vst [vmem:[%s226_s11 + $0x38] sm:$0xff] %v301_v7  ;;  %v305_v9 = vld [vmem:[%s1202_s10 + $0x90] sm:$0xff] }
  0x1a   : > { %304 = vst [vmem:[%s226_s11 + $0x40] sm:$0xff] %v303_v8  ;;  %v307_v10 = vld [vmem:[%s1202_s10 + $0xa0] sm:$0xff]  ;;  %v309_v11 = vld [vmem:[%s1202_s10 + $0xb0] sm:$0xff]  ;;  %306 = vst [vmem:[%s226_s11 + $0x48] sm:$0xff] %v305_v9 }
  0x1b   : > { %308 = vst [vmem:[%s226_s11 + $0x50] sm:$0xff] %v307_v10  ;;  %310 = vst [vmem:[%s226_s11 + $0x58] sm:$0xff] %v309_v11  ;;  %v311_v12 = vld [vmem:[%s1202_s10 + $0xc0] sm:$0xff]  ;;  %v313_v13 = vld [vmem:[%s1202_s10 + $0xd0] sm:$0xff] }
  0x1c   : > { %v315_v14 = vld [vmem:[%s1202_s10 + $0xe0] sm:$0xff]  ;;  %312 = vst [vmem:[%s226_s11 + $0x60] sm:$0xff] %v311_v12  ;;  %314 = vst [vmem:[%s226_s11 + $0x68] sm:$0xff] %v313_v13  ;;  %v317_v15 = vld [vmem:[%s1202_s10 + $0xf0] sm:$0xff] }
  0x1d   : > { %316 = vst [vmem:[%s226_s11 + $0x70] sm:$0xff] %v315_v14  ;;  %318 = vst [vmem:[%s226_s11 + $0x78] sm:$0xff] %v317_v15 }
  0x1e PF: > { %332 = sbr.rel (!%p1180_p3) target bundleno = 37 (0x25), region = 70  ;;  %s334_s12 = sand.u32 (%p1180_p3), 1, %s1103_s19  }
  0x1f   : > { %s968_s13 = sshll.u32 (%p1180_p3), %s1111_s21, 3  ;;  %s932_s14 = sshll.u32 (%p1180_p3), %s334_s12, 5 }
  0x20   : > { %s342_s17 = scalar_lea.vmem (%p1180_p3), %s1297_s4, %s968_s13  ;;  %s336_s24 = scalar_lea.vmem (%p1180_p3), [#allocation3], %s932_s14 }
  0x21   : > { %v376_v16 = vld [vmem:[%s342_s17] sm:$0xff] (%p1180_p3)  ;;  %v378_v17 = vld [vmem:[%s342_s17 + $0x10] sm:$0xff] (%p1180_p3) }
  0x22   : > { %v380_v18 = vld [vmem:[%s342_s17 + $0x20] sm:$0xff] (%p1180_p3)  ;;  %377 = vst [vmem:[%s336_s24] sm:$0xff] (%p1180_p3), %v376_v16  ;;  %379 = vst [vmem:[%s336_s24 + $0x8] sm:$0xff] (%p1180_p3), %v378_v17  ;;  %v382_v19 = vld [vmem:[%s342_s17 + $0x30] sm:$0xff] (%p1180_p3) }
  0x23   : > { %381 = vst [vmem:[%s336_s24 + $0x10] sm:$0xff] (%p1180_p3), %v380_v18  ;;  %383 = vst [vmem:[%s336_s24 + $0x18] sm:$0xff] (%p1180_p3), %v382_v19 }
  0x25 PF: > { %p935_p8 = scmp.ge.s32.totalorder %s1115_s22, 1  ;;  %p388_p9 = scmp.lt.s32.totalorder %s1115_s22, 3 }
  0x27   : > { %p389_p10 = pnand %p935_p8, %p388_p9 }
  0x28   : > { %s395_s25 = sand.u32 (!%p389_p10), 1, %s1099_s18   ;;  %v1117_v20 = vmov (!%p389_p10), 0   ;;  %v975_v21 = vld [vmem:[%s1296_s3] sm:$0xff] (!%p389_p10)   ;;  %v982_v22 = vld [vmem:[%s1296_s3 + $0x8] sm:$0xff] (!%p389_p10)   ;;  %s939_s13 = sshll.u32 (!%p389_p10), %s1107_s20, 1  ;;  %v491_v47 = vlaneseq (!%p389_p10) }
  0x29   : > { %392 = sbr.rel (%p389_p10) target bundleno = 310 (0x136), region = 108  ;;  %s936_s26 = sshll.u32 (!%p389_p10), %s395_s25, 7  ;;  %625 = vmatprep.mubr.bf16.mxu0 (!%p389_p10), %v1117_v20  ;;  %635 = vmatprep.mubr.bf16.mxu1 (!%p389_p10), %v1117_v20  ;;  %v976_v24 = vunpack.c.l.bf16 (!%p389_p10), %v975_v21  ;;  %v977_v25 = vunpack.c.h.bf16 (!%p389_p10), %v975_v21  ;;  %v980_v27 = vunpack.c.l.bf16 (!%p389_p10), %v982_v22  ;;  %v981_v28 = vunpack.c.h.bf16 (!%p389_p10), %v982_v22  ;;  %v1075_v45 = vld [vmem:[%s1293_s0] sm:$0xff] (!%p389_p10)   ;;  %v1076_v46 = vld [vmem:[%s1293_s0 + $0x8] sm:$0xff] (!%p389_p10)  }
  0x2a   : > { %1040 = vset.pattern.permute.xlu0 (!%p389_p10), %v1117_v20  ;;  %s1238_s8 = scalar_lea.vmem (!%p389_p10), [#allocation2], %s936_s26  ;;  %p454_p11 = scmp.lt.s32.totalorder (!%p389_p10), %s939_s13, 3  ;;  %v492_v48 = vshrl.u32 (!%p389_p10), %v491_v47, 7 }
  0x2b   : > { %v1051_v23 = vld [vmem:[%s1238_s8 + $0x4] ss:$8 sps:$4 sm:$0xff] (!%p389_p10)   ;;  %v1053_v26 = vld [vmem:[%s1238_s8] ss:$8 sps:$4 sm:$0xff] (!%p389_p10)   ;;  %v1054_v29 = vld [vmem:[%s1238_s8 + $0x14] ss:$8 sps:$4 sm:$0xff] (!%p389_p10)   ;;  %v1041_v30 = vpack.i.bf16 (!%p389_p10), %v977_v25, %v976_v24  ;;  %v1046_v33 = vpack.i.bf16 (!%p389_p10), %v981_v28, %v980_v27 }
  0x2c   : > { %593 = vmatprep.subr.bf16.mxu0 (!%p389_p10), %v1051_v23  ;;  %983 = vmatprep.subr.bf16.mxu1 (!%p389_p10), %v1051_v23  ;;  %v1056_v31 = vld [vmem:[%s1238_s8 + $0x10] ss:$8 sps:$4 sm:$0xff] (!%p389_p10)   ;;  %v1057_v32 = vld [vmem:[%s1238_s8 + $0x24] ss:$8 sps:$4 sm:$0xff] (!%p389_p10)   ;;  %v1059_v34 = vld [vmem:[%s1238_s8 + $0x20] ss:$8 sps:$4 sm:$0xff] (!%p389_p10)  }
  0x2d   : > { %594 = vmatpush1.bf16.msra.mxu0 (!%p389_p10), %v1053_v26  ;;  %991 = vmatpush1.bf16.msra.mxu1 (!%p389_p10), %v1053_v26  ;;  %v1060_v35 = vld [vmem:[%s1238_s8 + $0x34] ss:$8 sps:$4 sm:$0xff] (!%p389_p10)   ;;  %v1062_v36 = vld [vmem:[%s1238_s8 + $0x30] ss:$8 sps:$4 sm:$0xff] (!%p389_p10)   ;;  %v1063_v37 = vld [vmem:[%s1238_s8 + $0x44] ss:$8 sps:$4 sm:$0xff] (!%p389_p10)  }
  0x2e   : > { %595 = vmatprep.subr.bf16.mxu0 (!%p389_p10), %v1054_v29  ;;  %984 = vmatprep.subr.bf16.mxu1 (!%p389_p10), %v1054_v29  ;;  %v1065_v38 = vld [vmem:[%s1238_s8 + $0x40] ss:$8 sps:$4 sm:$0xff] (!%p389_p10)   ;;  %v1066_v39 = vld [vmem:[%s1238_s8 + $0x54] ss:$8 sps:$4 sm:$0xff] (!%p389_p10)   ;;  %v1068_v40 = vld [vmem:[%s1238_s8 + $0x50] ss:$8 sps:$4 sm:$0xff] (!%p389_p10)  }
  0x2f   : > { %1042 = vperm.xlu0 (!%p389_p10), %1040, %v1041_v30   ;;  %v1069_v41 = vld [vmem:[%s1238_s8 + $0x64] ss:$8 sps:$4 sm:$0xff] (!%p389_p10)   ;;  %v1071_v42 = vld [vmem:[%s1238_s8 + $0x60] ss:$8 sps:$4 sm:$0xff] (!%p389_p10)   ;;  %v1072_v43 = vld [vmem:[%s1238_s8 + $0x74] ss:$8 sps:$4 sm:$0xff] (!%p389_p10)  }
  0x30   : > { %v1074_v44 = vld [vmem:[%s1238_s8 + $0x70] ss:$8 sps:$4 sm:$0xff]   ;;  %s1308_s13 = smov (!%p454_p11, %s939_s13), 3  ;;  %s1265_s14 = sshll.u32 %s395_s25, 5  ;;  %v493_v50 = vsub.s32 0, %v492_v48  ;;  %v497_v52 = vsub.s32 1, %v492_v48 }
  0x31   : > { %596 = vmatpush1.bf16.msra.mxu0 %v1056_v31  ;;  %992 = vmatpush1.bf16.msra.mxu1 %v1056_v31  ;;  %s456_s17 = scalar_lea.vmem %s1295_s2, %s1308_s13  ;;  %s404_s24 = scalar_lea.vmem [#allocation3], %s1265_s14 }
  0x32   : > { %597 = vmatprep.subr.bf16.mxu0 %v1057_v32  ;;  %985 = vmatprep.subr.bf16.mxu1 %v1057_v32  ;;  %v489_v51 = vld [vmem:[%s456_s17] sm:$0x3]  ;;  %v684_v55 = vld [vmem:[%s404_s24 + $0x10] sm:$0xff]  ;;  %v683_v57 = vld [vmem:[%s404_s24 + $0x8] sm:$0xff]  ;;  %s445_s18 = scalar_lea.vmem [#allocation4], %s1265_s14  ;;  %s973_s25 = sshll.u32 (%p1187_p6), %s1107_s20, 3 }
  0x33   : > { %1047 = vperm.xlu0 %1040, %v1046_v33   ;;  %v682_v54 = vld [vmem:[%s404_s24] sm:$0xff]  ;;  %v494_v56 = vrot.slane %v489_v51, %v493_v50  ;;  %v685_v58 = vld [vmem:[%s404_s24 + $0x18] sm:$0xff]  ;;  %v498_v59 = vrot.slane %v489_v51, %v497_v52  ;;  %v690_v63 = vunpack.c.l.bf16 %v684_v55  ;;  %v691_v3 = vunpack.c.h.bf16 %v684_v55  ;;  %s750_s30 = scalar_lea.vmem (%p1187_p6), %s1298_s5, %s973_s25 }
  0x34   : > { %v686_v62 = vunpack.c.l.bf16 %v682_v54  ;;  %v687_v2 = vunpack.c.h.bf16 %v682_v54  ;;  %v688_v4 = vunpack.c.l.bf16 %v683_v57  ;;  %v692_v5 = vunpack.c.l.bf16 %v685_v58 }
  0x35   : > { %598 = vmatpush1.bf16.msra.mxu0 %v1059_v34  ;;  %993 = vmatpush1.bf16.msra.mxu1 %v1059_v34  ;;  %v689_v10 = vunpack.c.h.bf16 %v683_v57  ;;  %v693_v11 = vunpack.c.h.bf16 %v685_v58 }
  0x36   : > { %599 = vmatprep.subr.bf16.mxu0 %v1060_v35  ;;  %986 = vmatprep.subr.bf16.mxu1 %v1060_v35 }
  0x39   : > { %600 = vmatpush1.bf16.msra.mxu0 %v1062_v36  ;;  %994 = vmatpush1.bf16.msra.mxu1 %v1062_v36 }
  0x3a   : > { %601 = vmatprep.subr.bf16.mxu0 %v1063_v37  ;;  %987 = vmatprep.subr.bf16.mxu1 %v1063_v37 }
  0x3d   : > { %602 = vmatpush1.bf16.msra.mxu0 %v1065_v38  ;;  %995 = vmatpush1.bf16.msra.mxu1 %v1065_v38 }
  0x3e   : > { %603 = vmatprep.subr.bf16.mxu0 %v1066_v39  ;;  %988 = vmatprep.subr.bf16.mxu1 %v1066_v39 }
  0x41   : > { %604 = vmatpush1.bf16.msra.mxu0 %v1068_v40  ;;  %996 = vmatpush1.bf16.msra.mxu1 %v1068_v40 }
  0x42   : > { %605 = vmatprep.subr.bf16.mxu0 %v1069_v41  ;;  %989 = vmatprep.subr.bf16.mxu1 %v1069_v41 }
  0x45   : > { %606 = vmatpush1.bf16.msra.mxu0 %v1071_v42  ;;  %997 = vmatpush1.bf16.msra.mxu1 %v1071_v42 }
  0x46   : > { %607 = vmatprep.subr.bf16.mxu0 %v1072_v43  ;;  %990 = vmatprep.subr.bf16.mxu1 %v1072_v43 }
  0x49   : > { %608 = vmatpush1.bf16.msra.mxu0 %v1074_v44  ;;  %998 = vmatpush1.bf16.msra.mxu1 %v1074_v44 }
  0x4c   : > { %626 = vmatmul.mubr.bf16.vlgmr.msra.gmra.mrb[0].mxu0 %v1075_v45  ;;  %636 = vmatmul.mubr.bf16.vlgmr.msra.gmra.mrb[0].mxu1 %v1076_v46 }
  0xae   : > { %v1043_v49 = vpop.permute.xlu0 %1042 }
  0xaf   : > { %v1044_v60 = vunpack.i.l.bf16 %v1043_v49  ;;  %v1045_v12 = vunpack.i.h.bf16 %v1043_v49 }
  0xb2   : > { %v1048_v53 = vpop.permute.xlu0 %1047 }
  0xb3   : > { %v1049_v61 = vunpack.i.l.bf16 %v1048_v53  ;;  %v1050_v13 = vunpack.i.h.bf16 %v1048_v53 }
 0x11f   : > { %v627_v0 = vpop.f32.mrb[0].mxu0  ;;  %v637_v1 = vpop.f32.mrb[0].mxu1 }
 0x120   : > { %v628_v6 = vadd.f32 %v627_v0, %v494_v56  ;;  %v638_v7 = vadd.f32 %v637_v1, %v494_v56  ;;  %v629_v8 = vpop.f32.mrb[1].mxu0  ;;  %v639_v9 = vpop.f32.mrb[1].mxu1 }
 0x121   : > { %v630_v14 = vadd.f32 %v629_v8, %v498_v59  ;;  %v640_v15 = vadd.f32 %v639_v9, %v498_v59  ;;  %v631_v16 = vpop.f32.mrb[2].mxu0  ;;  %v641_v17 = vpop.f32.mrb[2].mxu1 }
 0x122   : > { %v674_v18 = vmul.f32 %v1044_v60, %v628_v6  ;;  %v678_v19 = vmul.f32 %v1049_v61, %v638_v7  ;;  %v632_v20 = vadd.f32 %v631_v16, %v494_v56  ;;  %v642_v21 = vadd.f32 %v641_v17, %v494_v56  ;;  %v633_v22 = vpop.f32.mrb[3].mxu0  ;;  %v643_v23 = vpop.f32.mrb[3].mxu1 }
 0x123   : > { %v675_v24 = vmul.f32 %v1044_v60, %v630_v14  ;;  %v679_v25 = vmul.f32 %v1049_v61, %v640_v15  ;;  %v634_v26 = vadd.f32 %v633_v22, %v498_v59  ;;  %v644_v27 = vadd.f32 %v643_v23, %v498_v59 }
 0x124   : > { %v694_v28 = vadd.f32 %v686_v62, %v674_v18  ;;  %v698_v29 = vadd.f32 %v690_v63, %v678_v19  ;;  %v676_v30 = vmul.f32 %v1045_v12, %v632_v20  ;;  %v680_v31 = vmul.f32 %v1050_v13, %v642_v21 }
 0x125   : > { %v695_v32 = vadd.f32 %v687_v2, %v675_v24  ;;  %v699_v33 = vadd.f32 %v691_v3, %v679_v25  ;;  %v677_v34 = vmul.f32 %v1045_v12, %v634_v26  ;;  %v681_v35 = vmul.f32 %v1050_v13, %v644_v27 }
 0x126   : > { %v702_v36 = vmax.f32 %v694_v28, 0.0  ;;  %v706_v37 = vmax.f32 %v698_v29, 0.0  ;;  %v696_v38 = vadd.f32 %v688_v4, %v676_v30  ;;  %v700_v39 = vadd.f32 %v692_v5, %v680_v31 }
 0x127   : > { %v703_v40 = vmax.f32 %v695_v32, 0.0  ;;  %v707_v41 = vmax.f32 %v699_v33, 0.0  ;;  %v697_v42 = vadd.f32 %v689_v10, %v677_v34  ;;  %v701_v43 = vadd.f32 %v693_v11, %v681_v35  ;;  %744 = sbr.rel (!%p1187_p6) target bundleno = 310 (0x136), region = 120 }
 0x128   : > { %v704_v44 = vmax.f32 %v696_v38, 0.0  ;;  %v708_v45 = vmax.f32 %v700_v39, 0.0 }
 0x129   : > { %v969_v46 = vpack.c.bf16 %v703_v40, %v702_v36  ;;  %v971_v47 = vpack.c.bf16 %v707_v41, %v706_v37  ;;  %v705_v48 = vmax.f32 %v697_v42, 0.0  ;;  %v709_v49 = vmax.f32 %v701_v43, 0.0 }
 0x12b   : > { %734 = vst [vmem:[%s445_s18] sm:$0xff] %v969_v46  ;;  %736 = vst [vmem:[%s445_s18 + $0x10] sm:$0xff] %v971_v47  ;;  %v970_v50 = vpack.c.bf16 %v705_v48, %v704_v44  ;;  %v972_v51 = vpack.c.bf16 %v709_v49, %v708_v45 }
 0x12d   : > { %735 = vst [vmem:[%s445_s18 + $0x8] sm:$0xff] %v970_v50  ;;  %737 = vst [vmem:[%s445_s18 + $0x18] sm:$0xff] %v972_v51 }
 0x132   : > { %v784_v52 = vld [vmem:[%s445_s18] sm:$0xff]  ;;  %v788_v54 = vld [vmem:[%s445_s18 + $0x10] sm:$0xff] }
 0x133   : > { %785 = vst [vmem:[%s750_s30] sm:$0xff] %v784_v52  ;;  %789 = vst [vmem:[%s750_s30 + $0x20] sm:$0xff] %v788_v54 }
 0x134   : > { %v786_v53 = vld [vmem:[%s445_s18 + $0x8] sm:$0xff]  ;;  %v790_v55 = vld [vmem:[%s445_s18 + $0x18] sm:$0xff] }
 0x135   : > { %787 = vst [vmem:[%s750_s30 + $0x10] sm:$0xff] %v786_v53  ;;  %791 = vst [vmem:[%s750_s30 + $0x30] sm:$0xff] %v790_v55 }
 0x136 PF: > { %s15_s22 = sadd.s32 1, %s1115_s22   ;;  %s1301_s18 = smov %s1103_s19 }
 0x137   : > { %p12_p12 = scmp.ge.s32.totalorder %s15_s22, 4   ;;  %s1302_s19 = smov %s1192_s29 }
 0x138   : > { %s1303_s20 = smov %s1111_s21  ;;  %s1304_s21 = smov %s1306_s23 }
 0x139   :  { %14 = sbr.rel (!%p12_p12) target bundleno = 3 (0x3), region = 206 }

// kernel: _lambda_.21
= control target key start
LH: loop header
LB: loop body
LE: loop exit
PB: predicated region body
PF: predicated region fallthrough
CT: control target
= control target key end

     0   :  { %s1092_s12 = smov 0   ;;  %s1094_s13 = smov 0   ;;  %s1286_s0 = inlined_call_operand.vmem [shape: bf16[32,256], index: 0, kind: input, shape index: {}]   ;;  %s1287_s1 = inlined_call_operand.vmem [shape: bf16[256,512], index: 1, kind: input, shape index: {}]   ;;  %s1288_s2 = inlined_call_operand.vmem [shape: f32[1,512], index: 2, kind: input, shape index: {}]   ;;  %s1289_s3 = inlined_call_operand.vmem [shape: bf16[32,512], index: 3, kind: output, shape index: {}]  }
   0x1   :  { %s1096_s14 = smov 0   ;;  %s1098_s15 = smov 0  }
   0x2   :  { %s1100_s16 = smov 0  }
   0x3 LB: > { %s25_s17 = sadd.s32 1, %s1066_s15  ;;  %s843_s18 = sadd.s32 4294967295, %s1070_s16   ;;  %s1070_s16 = sphi %s1100_s16, %s13_s16   ;;  %s1066_s15 = sphi %s1098_s15, %s1294_s15   ;;  %s1062_s14 = sphi %s1096_s14, %s1293_s14   ;;  %s1058_s13 = sphi %s1094_s13, %s1292_s13   ;;  %s1054_s12 = sphi %s1092_s12, %s1291_s12  }
   0x4   : > { %p27_p0 = scmp.ge.s32.totalorder %s25_s17, 2  ;;  %p65_p1 = scmp.ne.s32.totalorder %s1058_s13, %s1054_s12 }
   0x5   : > { %p66_p2 = scmp.eq.s32.totalorder %s1070_s16, 0  ;;  %p123_p4 = scmp.eq.s32.totalorder %s843_s18, 1 }
   0x6   : > { %s1296_s17 = smov (%p27_p0, %s25_s17), 0  ;;  %s58_s20 = sadd.s32 1, %s1058_s13 }
   0x7   : > { %p67_p3 = por %p66_p2, %p65_p1  ;;  %s55_s19 = ssub.s32 %s1066_s15, %s1296_s17 }
   0x8   : > { %p56_p5 = scmp.eq.s32.totalorder %s55_s19, 0  ;;  %p1127_p6 = por %p123_p4, %p65_p1 }
   0x9   : > { %p847_p7 = scmp.ge.s32.totalorder %s1070_s16, 2 }
   0xa   : > { %s1132_s22 = scalar_select %p56_p5, %s1058_s13, %s58_s20  }
   0xb   : > { %155 = sbr.rel (%p847_p7) target bundleno = 38 (0x26), region = 20 }
  0x12   : > { %158 = sbr.rel (!%p67_p3) target bundleno = 38 (0x26), region = 24  ;;  %s160_s23 = sand.u32 (%p67_p3), 1, %s1058_s13  }
  0x13   : > { %s900_s24 = sshll.u32 (%p67_p3), %s1066_s15, 3  ;;  %s848_s25 = sshll.u32 (%p67_p3), %s160_s23, 8 }
  0x14   : > { %s1140_s28 = scalar_lea.vmem (%p67_p3), %s1287_s1, %s900_s24  ;;  %s1145_s29 = scalar_lea.vmem (%p67_p3), [#allocation2], %s848_s25 }
  0x15   : > { %v255_v0 = vld [vmem:[%s1140_s28] sm:$0xff] (%p67_p3)  ;;  %v257_v1 = vld [vmem:[%s1140_s28 + $0x10] sm:$0xff] (%p67_p3) }
  0x16   : > { %v259_v2 = vld [vmem:[%s1140_s28 + $0x20] sm:$0xff] (%p67_p3)  ;;  %256 = vst [vmem:[%s1145_s29] sm:$0xff] (%p67_p3), %v255_v0  ;;  %258 = vst [vmem:[%s1145_s29 + $0x8] sm:$0xff] (%p67_p3), %v257_v1  ;;  %v261_v3 = vld [vmem:[%s1140_s28 + $0x30] sm:$0xff] (%p67_p3) }
  0x17   : > { %260 = vst [vmem:[%s1145_s29 + $0x10] sm:$0xff] (%p67_p3), %v259_v2  ;;  %v263_v4 = vld [vmem:[%s1140_s28 + $0x40] sm:$0xff] (%p67_p3)  ;;  %v265_v5 = vld [vmem:[%s1140_s28 + $0x50] sm:$0xff] (%p67_p3)  ;;  %262 = vst [vmem:[%s1145_s29 + $0x18] sm:$0xff] (%p67_p3), %v261_v3 }
  0x18   : > { %264 = vst [vmem:[%s1145_s29 + $0x20] sm:$0xff] (%p67_p3), %v263_v4  ;;  %266 = vst [vmem:[%s1145_s29 + $0x28] sm:$0xff] (%p67_p3), %v265_v5  ;;  %v267_v6 = vld [vmem:[%s1140_s28 + $0x60] sm:$0xff] (%p67_p3)  ;;  %v269_v7 = vld [vmem:[%s1140_s28 + $0x70] sm:$0xff] (%p67_p3) }
  0x19   : > { %v271_v8 = vld [vmem:[%s1140_s28 + $0x80] sm:$0xff]  ;;  %268 = vst [vmem:[%s1145_s29 + $0x30] sm:$0xff] %v267_v6  ;;  %270 = vst [vmem:[%s1145_s29 + $0x38] sm:$0xff] %v269_v7  ;;  %v273_v9 = vld [vmem:[%s1140_s28 + $0x90] sm:$0xff] }
  0x1a   : > { %272 = vst [vmem:[%s1145_s29 + $0x40] sm:$0xff] %v271_v8  ;;  %v275_v10 = vld [vmem:[%s1140_s28 + $0xa0] sm:$0xff]  ;;  %v277_v11 = vld [vmem:[%s1140_s28 + $0xb0] sm:$0xff]  ;;  %274 = vst [vmem:[%s1145_s29 + $0x48] sm:$0xff] %v273_v9 }
  0x1b   : > { %276 = vst [vmem:[%s1145_s29 + $0x50] sm:$0xff] %v275_v10  ;;  %278 = vst [vmem:[%s1145_s29 + $0x58] sm:$0xff] %v277_v11  ;;  %v279_v12 = vld [vmem:[%s1140_s28 + $0xc0] sm:$0xff]  ;;  %v281_v13 = vld [vmem:[%s1140_s28 + $0xd0] sm:$0xff] }
  0x1c   : > { %v283_v14 = vld [vmem:[%s1140_s28 + $0xe0] sm:$0xff]  ;;  %280 = vst [vmem:[%s1145_s29 + $0x60] sm:$0xff] %v279_v12  ;;  %282 = vst [vmem:[%s1145_s29 + $0x68] sm:$0xff] %v281_v13  ;;  %v285_v15 = vld [vmem:[%s1140_s28 + $0xf0] sm:$0xff] }
  0x1d   : > { %284 = vst [vmem:[%s1145_s29 + $0x70] sm:$0xff] %v283_v14  ;;  %v287_v16 = vld [vmem:[%s1140_s28 + $0x100] sm:$0xff]  ;;  %v289_v17 = vld [vmem:[%s1140_s28 + $0x110] sm:$0xff]  ;;  %286 = vst [vmem:[%s1145_s29 + $0x78] sm:$0xff] %v285_v15 }
  0x1e   : > { %288 = vst [vmem:[%s1145_s29 + $0x80] sm:$0xff] %v287_v16  ;;  %290 = vst [vmem:[%s1145_s29 + $0x88] sm:$0xff] %v289_v17  ;;  %v291_v18 = vld [vmem:[%s1140_s28 + $0x120] sm:$0xff]  ;;  %v293_v19 = vld [vmem:[%s1140_s28 + $0x130] sm:$0xff] }
  0x1f   : > { %v295_v20 = vld [vmem:[%s1140_s28 + $0x140] sm:$0xff]  ;;  %292 = vst [vmem:[%s1145_s29 + $0x90] sm:$0xff] %v291_v18  ;;  %294 = vst [vmem:[%s1145_s29 + $0x98] sm:$0xff] %v293_v19  ;;  %v297_v21 = vld [vmem:[%s1140_s28 + $0x150] sm:$0xff] }
  0x20   : > { %296 = vst [vmem:[%s1145_s29 + $0xa0] sm:$0xff] %v295_v20  ;;  %v299_v22 = vld [vmem:[%s1140_s28 + $0x160] sm:$0xff]  ;;  %v301_v23 = vld [vmem:[%s1140_s28 + $0x170] sm:$0xff]  ;;  %298 = vst [vmem:[%s1145_s29 + $0xa8] sm:$0xff] %v297_v21 }
  0x21   : > { %300 = vst [vmem:[%s1145_s29 + $0xb0] sm:$0xff] %v299_v22  ;;  %302 = vst [vmem:[%s1145_s29 + $0xb8] sm:$0xff] %v301_v23  ;;  %v303_v24 = vld [vmem:[%s1140_s28 + $0x180] sm:$0xff]  ;;  %v305_v25 = vld [vmem:[%s1140_s28 + $0x190] sm:$0xff] }
  0x22   : > { %v307_v26 = vld [vmem:[%s1140_s28 + $0x1a0] sm:$0xff]  ;;  %304 = vst [vmem:[%s1145_s29 + $0xc0] sm:$0xff] %v303_v24  ;;  %306 = vst [vmem:[%s1145_s29 + $0xc8] sm:$0xff] %v305_v25  ;;  %v309_v27 = vld [vmem:[%s1140_s28 + $0x1b0] sm:$0xff] }
  0x23   : > { %308 = vst [vmem:[%s1145_s29 + $0xd0] sm:$0xff] %v307_v26  ;;  %v311_v28 = vld [vmem:[%s1140_s28 + $0x1c0] sm:$0xff]  ;;  %v313_v29 = vld [vmem:[%s1140_s28 + $0x1d0] sm:$0xff]  ;;  %310 = vst [vmem:[%s1145_s29 + $0xd8] sm:$0xff] %v309_v27 }
  0x24   : > { %312 = vst [vmem:[%s1145_s29 + $0xe0] sm:$0xff] %v311_v28  ;;  %314 = vst [vmem:[%s1145_s29 + $0xe8] sm:$0xff] %v313_v29  ;;  %v315_v30 = vld [vmem:[%s1140_s28 + $0x1e0] sm:$0xff]  ;;  %v317_v31 = vld [vmem:[%s1140_s28 + $0x1f0] sm:$0xff] }
  0x25   : > { %316 = vst [vmem:[%s1145_s29 + $0xf0] sm:$0xff] %v315_v30  ;;  %318 = vst [vmem:[%s1145_s29 + $0xf8] sm:$0xff] %v317_v31 }
  0x26 PF: > { %p851_p8 = scmp.ge.s32.totalorder %s1070_s16, 1  ;;  %p331_p9 = scmp.lt.s32.totalorder %s1070_s16, 3 }
  0x28   : > { %p332_p10 = pnand %p851_p8, %p331_p9 }
  0x29   : > { %s338_s30 = sand.u32 (!%p332_p10), 1, %s1054_s12   ;;  %v1028_v32 = vld [vmem:[%s1286_s0 + $0x4] ss:$8 sps:$4 sm:$0xff] (!%p332_p10)   ;;  %v1031_v33 = vld [vmem:[%s1286_s0 + $0x14] ss:$8 sps:$4 sm:$0xff] (!%p332_p10)   ;;  %s854_s20 = sshll.u32 (!%p332_p10), %s1062_s14, 1  ;;  %v423_v4 = vlaneseq (!%p332_p10) }
  0x2a   : > { %335 = sbr.rel (%p332_p10) target bundleno = 337 (0x151), region = 66  ;;  %s852_s4 = sshll.u32 (!%p332_p10), %s338_s30, 8  ;;  %645 = vmatprep.mubr.bf16.mxu0 (!%p332_p10), %v1028_v32  ;;  %655 = vmatprep.mubr.bf16.mxu1 (!%p332_p10), %v1031_v33  ;;  %v1026_v2 = vld [vmem:[%s1286_s0] ss:$8 sps:$4 sm:$0xff] (!%p332_p10)   ;;  %v1029_v3 = vld [vmem:[%s1286_s0 + $0x10] ss:$8 sps:$4 sm:$0xff] (!%p332_p10)  }
  0x2b   : > { %s1219_s9 = scalar_lea.vmem (!%p332_p10), [#allocation2], %s852_s4  ;;  %p379_p11 = scmp.lt.s32.totalorder (!%p332_p10), %s854_s20, 3  ;;  %v424_v5 = vshrl.u32 (!%p332_p10), %v423_v4, 7 }
  0x2c   : > { %v978_v34 = vld [vmem:[%s1219_s9 + $0x4] ss:$8 sps:$4 sm:$0xff] (!%p332_p10)   ;;  %v980_v35 = vld [vmem:[%s1219_s9] ss:$8 sps:$4 sm:$0xff] (!%p332_p10)   ;;  %v981_v36 = vld [vmem:[%s1219_s9 + $0x14] ss:$8 sps:$4 sm:$0xff] (!%p332_p10)  }
  0x2d   : > { %613 = vmatprep.subr.bf16.mxu0 (!%p332_p10), %v978_v34  ;;  %906 = vmatprep.subr.bf16.mxu1 (!%p332_p10), %v978_v34  ;;  %v983_v37 = vld [vmem:[%s1219_s9 + $0x10] ss:$8 sps:$4 sm:$0xff] (!%p332_p10)   ;;  %v984_v38 = vld [vmem:[%s1219_s9 + $0x24] ss:$8 sps:$4 sm:$0xff] (!%p332_p10)   ;;  %v986_v39 = vld [vmem:[%s1219_s9 + $0x20] ss:$8 sps:$4 sm:$0xff] (!%p332_p10)  }
  0x2e   : > { %614 = vmatpush1.bf16.msra.mxu0 (!%p332_p10), %v980_v35  ;;  %922 = vmatpush1.bf16.msra.mxu1 (!%p332_p10), %v980_v35  ;;  %v987_v40 = vld [vmem:[%s1219_s9 + $0x34] ss:$8 sps:$4 sm:$0xff] (!%p332_p10)   ;;  %v989_v41 = vld [vmem:[%s1219_s9 + $0x30] ss:$8 sps:$4 sm:$0xff] (!%p332_p10)   ;;  %v990_v42 = vld [vmem:[%s1219_s9 + $0x44] ss:$8 sps:$4 sm:$0xff] (!%p332_p10)  }
  0x2f   : > { %615 = vmatprep.subr.bf16.mxu0 (!%p332_p10), %v981_v36  ;;  %907 = vmatprep.subr.bf16.mxu1 (!%p332_p10), %v981_v36  ;;  %v992_v43 = vld [vmem:[%s1219_s9 + $0x40] ss:$8 sps:$4 sm:$0xff] (!%p332_p10)   ;;  %v993_v44 = vld [vmem:[%s1219_s9 + $0x54] ss:$8 sps:$4 sm:$0xff] (!%p332_p10)   ;;  %v995_v45 = vld [vmem:[%s1219_s9 + $0x50] ss:$8 sps:$4 sm:$0xff] (!%p332_p10)  }
  0x30   : > { %v996_v46 = vld [vmem:[%s1219_s9 + $0x64] ss:$8 sps:$4 sm:$0xff] (!%p332_p10)   ;;  %v998_v47 = vld [vmem:[%s1219_s9 + $0x60] ss:$8 sps:$4 sm:$0xff] (!%p332_p10)   ;;  %v999_v48 = vld [vmem:[%s1219_s9 + $0x74] ss:$8 sps:$4 sm:$0xff] (!%p332_p10)  }
  0x31   : > { %v1001_v49 = vld [vmem:[%s1219_s9 + $0x70] ss:$8 sps:$4 sm:$0xff]   ;;  %v1002_v50 = vld [vmem:[%s1219_s9 + $0x84] ss:$8 sps:$4 sm:$0xff]   ;;  %v1004_v51 = vld [vmem:[%s1219_s9 + $0x80] ss:$8 sps:$4 sm:$0xff]  }
  0x32   : > { %616 = vmatpush1.bf16.msra.mxu0 %v983_v37  ;;  %923 = vmatpush1.bf16.msra.mxu1 %v983_v37  ;;  %v1005_v52 = vld [vmem:[%s1219_s9 + $0x94] ss:$8 sps:$4 sm:$0xff]   ;;  %v1007_v53 = vld [vmem:[%s1219_s9 + $0x90] ss:$8 sps:$4 sm:$0xff]   ;;  %v1008_v54 = vld [vmem:[%s1219_s9 + $0xa4] ss:$8 sps:$4 sm:$0xff]  }
  0x33   : > { %617 = vmatprep.subr.bf16.mxu0 %v984_v38  ;;  %908 = vmatprep.subr.bf16.mxu1 %v984_v38  ;;  %v1010_v55 = vld [vmem:[%s1219_s9 + $0xa0] ss:$8 sps:$4 sm:$0xff]   ;;  %v1011_v56 = vld [vmem:[%s1219_s9 + $0xb4] ss:$8 sps:$4 sm:$0xff]   ;;  %v1013_v57 = vld [vmem:[%s1219_s9 + $0xb0] ss:$8 sps:$4 sm:$0xff]  }
  0x34   : > { %v1014_v58 = vld [vmem:[%s1219_s9 + $0xc4] ss:$8 sps:$4 sm:$0xff]   ;;  %v1016_v59 = vld [vmem:[%s1219_s9 + $0xc0] ss:$8 sps:$4 sm:$0xff]   ;;  %v1017_v60 = vld [vmem:[%s1219_s9 + $0xd4] ss:$8 sps:$4 sm:$0xff]  }
  0x35   : > { %v1019_v61 = vld [vmem:[%s1219_s9 + $0xd0] ss:$8 sps:$4 sm:$0xff]   ;;  %v1020_v62 = vld [vmem:[%s1219_s9 + $0xe4] ss:$8 sps:$4 sm:$0xff]   ;;  %v1022_v63 = vld [vmem:[%s1219_s9 + $0xe0] ss:$8 sps:$4 sm:$0xff]  }
  0x36   : > { %618 = vmatpush1.bf16.msra.mxu0 %v986_v39  ;;  %924 = vmatpush1.bf16.msra.mxu1 %v986_v39  ;;  %v1023_v0 = vld [vmem:[%s1219_s9 + $0xf4] ss:$8 sps:$4 sm:$0xff]   ;;  %v1025_v1 = vld [vmem:[%s1219_s9 + $0xf0] ss:$8 sps:$4 sm:$0xff]   ;;  %s1298_s20 = smov (!%p379_p11, %s854_s20), 3  ;;  %v425_v6 = vsub.s32 0, %v424_v5 }
  0x37   : > { %619 = vmatprep.subr.bf16.mxu0 %v987_v40  ;;  %909 = vmatprep.subr.bf16.mxu1 %v987_v40  ;;  %s381_s25 = scalar_lea.vmem %s1288_s2, %s1298_s20  ;;  %v429_v8 = vsub.s32 1, %v424_v5  ;;  %s853_s26 = sshll.u32 %s338_s30, 5 }
  0x38   : > { %v421_v7 = vld [vmem:[%s381_s25] sm:$0x3]  ;;  %s369_s27 = scalar_lea.vmem [#allocation3], %s853_s26  ;;  %s905_s12 = sshll.u32 (%p1127_p6), %s1062_s14, 3 }
  0x39   : > { %v426_v9 = vrot.slane %v421_v7, %v425_v6  ;;  %v430_v10 = vrot.slane %v421_v7, %v429_v8  ;;  %s706_s30 = scalar_lea.vmem (%p1127_p6), %s1289_s3, %s905_s12 }
  0x3a   : > { %620 = vmatpush1.bf16.msra.mxu0 %v989_v41  ;;  %925 = vmatpush1.bf16.msra.mxu1 %v989_v41 }
  0x3b   : > { %621 = vmatprep.subr.bf16.mxu0 %v990_v42  ;;  %910 = vmatprep.subr.bf16.mxu1 %v990_v42 }
  0x3e   : > { %622 = vmatpush1.bf16.msra.mxu0 %v992_v43  ;;  %926 = vmatpush1.bf16.msra.mxu1 %v992_v43 }
  0x3f   : > { %623 = vmatprep.subr.bf16.mxu0 %v993_v44  ;;  %911 = vmatprep.subr.bf16.mxu1 %v993_v44 }
  0x42   : > { %624 = vmatpush1.bf16.msra.mxu0 %v995_v45  ;;  %927 = vmatpush1.bf16.msra.mxu1 %v995_v45 }
  0x43   : > { %625 = vmatprep.subr.bf16.mxu0 %v996_v46  ;;  %912 = vmatprep.subr.bf16.mxu1 %v996_v46 }
  0x46   : > { %626 = vmatpush1.bf16.msra.mxu0 %v998_v47  ;;  %928 = vmatpush1.bf16.msra.mxu1 %v998_v47 }
  0x47   : > { %627 = vmatprep.subr.bf16.mxu0 %v999_v48  ;;  %913 = vmatprep.subr.bf16.mxu1 %v999_v48 }
  0x4a   : > { %628 = vmatpush1.bf16.msra.mxu0 %v1001_v49  ;;  %929 = vmatpush1.bf16.msra.mxu1 %v1001_v49 }
  0x4b   : > { %629 = vmatprep.subr.bf16.mxu0 %v1002_v50  ;;  %914 = vmatprep.subr.bf16.mxu1 %v1002_v50 }
  0x4e   : > { %630 = vmatpush1.bf16.msra.mxu0 %v1004_v51  ;;  %930 = vmatpush1.bf16.msra.mxu1 %v1004_v51 }
  0x4f   : > { %631 = vmatprep.subr.bf16.mxu0 %v1005_v52  ;;  %915 = vmatprep.subr.bf16.mxu1 %v1005_v52 }
  0x52   : > { %632 = vmatpush1.bf16.msra.mxu0 %v1007_v53  ;;  %931 = vmatpush1.bf16.msra.mxu1 %v1007_v53 }
  0x53   : > { %633 = vmatprep.subr.bf16.mxu0 %v1008_v54  ;;  %916 = vmatprep.subr.bf16.mxu1 %v1008_v54 }
  0x56   : > { %634 = vmatpush1.bf16.msra.mxu0 %v1010_v55  ;;  %932 = vmatpush1.bf16.msra.mxu1 %v1010_v55 }
  0x57   : > { %635 = vmatprep.subr.bf16.mxu0 %v1011_v56  ;;  %917 = vmatprep.subr.bf16.mxu1 %v1011_v56 }
  0x5a   : > { %636 = vmatpush1.bf16.msra.mxu0 %v1013_v57  ;;  %933 = vmatpush1.bf16.msra.mxu1 %v1013_v57 }
  0x5b   : > { %637 = vmatprep.subr.bf16.mxu0 %v1014_v58  ;;  %918 = vmatprep.subr.bf16.mxu1 %v1014_v58 }
  0x5e   : > { %638 = vmatpush1.bf16.msra.mxu0 %v1016_v59  ;;  %934 = vmatpush1.bf16.msra.mxu1 %v1016_v59 }
  0x5f   : > { %639 = vmatprep.subr.bf16.mxu0 %v1017_v60  ;;  %919 = vmatprep.subr.bf16.mxu1 %v1017_v60 }
  0x62   : > { %640 = vmatpush1.bf16.msra.mxu0 %v1019_v61  ;;  %935 = vmatpush1.bf16.msra.mxu1 %v1019_v61 }
  0x63   : > { %641 = vmatprep.subr.bf16.mxu0 %v1020_v62  ;;  %920 = vmatprep.subr.bf16.mxu1 %v1020_v62 }
  0x66   : > { %642 = vmatpush1.bf16.msra.mxu0 %v1022_v63  ;;  %936 = vmatpush1.bf16.msra.mxu1 %v1022_v63 }
  0x67   : > { %643 = vmatprep.subr.bf16.mxu0 %v1023_v0  ;;  %921 = vmatprep.subr.bf16.mxu1 %v1023_v0 }
  0x6a   : > { %644 = vmatpush1.bf16.msra.mxu0 %v1025_v1  ;;  %937 = vmatpush1.bf16.msra.mxu1 %v1025_v1 }
  0x6d   : > { %646 = vmatmul.mubr.bf16.vlgmr.msra.gmra.mrb[0].mxu0 %v1026_v2  ;;  %656 = vmatmul.mubr.bf16.vlgmr.msra.gmra.mrb[0].mxu1 %v1029_v3 }
 0x140   : > { %v647_v11 = vpop.f32.mrb[0].mxu0  ;;  %v657_v12 = vpop.f32.mrb[0].mxu1 }
 0x141   : > { %v648_v13 = vadd.f32 %v647_v11, %v426_v9  ;;  %v658_v14 = vadd.f32 %v657_v12, %v426_v9  ;;  %v649_v15 = vpop.f32.mrb[1].mxu0  ;;  %v659_v16 = vpop.f32.mrb[1].mxu1 }
 0x142   : > { %v650_v17 = vadd.f32 %v649_v15, %v430_v10  ;;  %v660_v18 = vadd.f32 %v659_v16, %v430_v10  ;;  %v651_v19 = vpop.f32.mrb[2].mxu0  ;;  %v661_v20 = vpop.f32.mrb[2].mxu1  ;;  %700 = sbr.rel (!%p1127_p6) target bundleno = 337 (0x151), region = 74 }
 0x143   : > { %v652_v21 = vadd.f32 %v651_v19, %v426_v9  ;;  %v662_v22 = vadd.f32 %v661_v20, %v426_v9  ;;  %v653_v23 = vpop.f32.mrb[3].mxu0  ;;  %v663_v24 = vpop.f32.mrb[3].mxu1 }
 0x144   : > { %v901_v25 = vpack.c.bf16 %v650_v17, %v648_v13  ;;  %v903_v26 = vpack.c.bf16 %v660_v18, %v658_v14  ;;  %v654_v27 = vadd.f32 %v653_v23, %v430_v10  ;;  %v664_v28 = vadd.f32 %v663_v24, %v430_v10 }
 0x146   : > { %690 = vst [vmem:[%s369_s27] sm:$0xff] %v901_v25  ;;  %692 = vst [vmem:[%s369_s27 + $0x10] sm:$0xff] %v903_v26  ;;  %v902_v29 = vpack.c.bf16 %v654_v27, %v652_v21  ;;  %v904_v30 = vpack.c.bf16 %v664_v28, %v662_v22 }
 0x148   : > { %691 = vst [vmem:[%s369_s27 + $0x8] sm:$0xff] %v902_v29  ;;  %693 = vst [vmem:[%s369_s27 + $0x18] sm:$0xff] %v904_v30 }
 0x14d   : > { %v740_v31 = vld [vmem:[%s369_s27] sm:$0xff]  ;;  %v744_v33 = vld [vmem:[%s369_s27 + $0x10] sm:$0xff] }
 0x14e   : > { %741 = vst [vmem:[%s706_s30] sm:$0xff] %v740_v31  ;;  %745 = vst [vmem:[%s706_s30 + $0x20] sm:$0xff] %v744_v33 }
 0x14f   : > { %v742_v32 = vld [vmem:[%s369_s27 + $0x8] sm:$0xff]  ;;  %v746_v34 = vld [vmem:[%s369_s27 + $0x18] sm:$0xff] }
 0x150   : > { %743 = vst [vmem:[%s706_s30 + $0x10] sm:$0xff] %v742_v32  ;;  %747 = vst [vmem:[%s706_s30 + $0x30] sm:$0xff] %v746_v34 }
 0x151 PF: > { %s13_s16 = sadd.s32 1, %s1070_s16   ;;  %s1291_s12 = smov %s1058_s13 }
 0x152   : > { %p10_p12 = scmp.ge.s32.totalorder %s13_s16, 4   ;;  %s1292_s13 = smov %s1132_s22 }
 0x153   : > { %s1293_s14 = smov %s1066_s15  ;;  %s1294_s15 = smov %s1296_s17 }
 0x154   :  { %12 = sbr.rel (!%p10_p12) target bundleno = 3 (0x3), region = 149 }

// kernel: _lambda_.23
= control target key start
LH: loop header
LB: loop body
LE: loop exit
PB: predicated region body
PF: predicated region fallthrough
CT: control target
= control target key end

     0   :  { %v81_v38 = vlaneseq  ;;  %v705_v39 = vmov 1966171168   ;;  %s932_s1 = inlined_call_operand.vmem [shape: bf16[512,256], index: 1, kind: input, shape index: {}]   ;;  %s933_s0 = inlined_call_operand.vmem [shape: bf16[2,512], index: 0, kind: input, shape index: {}]   ;;  %s934_s2 = inlined_call_operand.vmem [shape: f32[1,256], index: 2, kind: input, shape index: {}]   ;;  %s935_s3 = inlined_call_operand.vmem [shape: f32[2,256], index: 3, kind: output, shape index: {}]  }
   0x1   :  { %v609_v0 = vld [vmem:[%s932_s1 + $0x4] ss:$8 sps:$4 sm:$0xff]   ;;  %v613_v2 = vld [vmem:[%s932_s1] ss:$8 sps:$4 sm:$0xff]   ;;  %v615_v4 = vld [vmem:[%s932_s1 + $0x14] ss:$8 sps:$4 sm:$0xff]   ;;  %v101_v40 = vunpack.c.l.s4 %v705_v39 }
   0x2   :  { %v611_v1 = vld [vmem:[%s932_s1 + $0x104] ss:$8 sps:$4 sm:$0xff]   ;;  %440 = vmatprep.subr.bf16.mxu1 %v609_v0  ;;  %v614_v3 = vld [vmem:[%s932_s1 + $0x100] ss:$8 sps:$4 sm:$0xff]   ;;  %v617_v5 = vld [vmem:[%s932_s1 + $0x114] ss:$8 sps:$4 sm:$0xff]  }
   0x3   :  { %481 = vmatprep.subr.bf16.mxu0 %v611_v1  ;;  %441 = vmatpush1.bf16.msra.mxu1 %v613_v2  ;;  %v619_v6 = vld [vmem:[%s932_s1 + $0x10] ss:$8 sps:$4 sm:$0xff]   ;;  %v621_v8 = vld [vmem:[%s932_s1 + $0x24] ss:$8 sps:$4 sm:$0xff]   ;;  %v625_v10 = vld [vmem:[%s932_s1 + $0x20] ss:$8 sps:$4 sm:$0xff]   ;;  %v102_v46 = vunpack.c.0.s8 %v101_v40 }
   0x4   :  { %482 = vmatpush1.bf16.msra.mxu0 %v614_v3  ;;  %442 = vmatprep.subr.bf16.mxu1 %v615_v4  ;;  %v620_v7 = vld [vmem:[%s932_s1 + $0x110] ss:$8 sps:$4 sm:$0xff]   ;;  %v623_v9 = vld [vmem:[%s932_s1 + $0x124] ss:$8 sps:$4 sm:$0xff]   ;;  %v626_v11 = vld [vmem:[%s932_s1 + $0x120] ss:$8 sps:$4 sm:$0xff]  }
   0x5   :  { %483 = vmatprep.subr.bf16.mxu0 %v617_v5  ;;  %v627_v12 = vld [vmem:[%s932_s1 + $0x34] ss:$8 sps:$4 sm:$0xff]   ;;  %v631_v14 = vld [vmem:[%s932_s1 + $0x30] ss:$8 sps:$4 sm:$0xff]   ;;  %v633_v16 = vld [vmem:[%s932_s1 + $0x44] ss:$8 sps:$4 sm:$0xff]  }
   0x6   :  { %v629_v13 = vld [vmem:[%s932_s1 + $0x134] ss:$8 sps:$4 sm:$0xff]   ;;  %v632_v15 = vld [vmem:[%s932_s1 + $0x130] ss:$8 sps:$4 sm:$0xff]   ;;  %v635_v17 = vld [vmem:[%s932_s1 + $0x144] ss:$8 sps:$4 sm:$0xff]  }
   0x7   :  { %443 = vmatpush1.bf16.msra.mxu1 %v619_v6  ;;  %v637_v18 = vld [vmem:[%s932_s1 + $0x40] ss:$8 sps:$4 sm:$0xff]   ;;  %v639_v20 = vld [vmem:[%s932_s1 + $0x54] ss:$8 sps:$4 sm:$0xff]   ;;  %v643_v22 = vld [vmem:[%s932_s1 + $0x50] ss:$8 sps:$4 sm:$0xff]  }
   0x8   :  { %484 = vmatpush1.bf16.msra.mxu0 %v620_v7  ;;  %444 = vmatprep.subr.bf16.mxu1 %v621_v8  ;;  %v638_v19 = vld [vmem:[%s932_s1 + $0x140] ss:$8 sps:$4 sm:$0xff]   ;;  %v641_v21 = vld [vmem:[%s932_s1 + $0x154] ss:$8 sps:$4 sm:$0xff]   ;;  %v644_v23 = vld [vmem:[%s932_s1 + $0x150] ss:$8 sps:$4 sm:$0xff]  }
   0x9   :  { %485 = vmatprep.subr.bf16.mxu0 %v623_v9  ;;  %v645_v24 = vld [vmem:[%s932_s1 + $0x64] ss:$8 sps:$4 sm:$0xff]   ;;  %v649_v26 = vld [vmem:[%s932_s1 + $0x60] ss:$8 sps:$4 sm:$0xff]   ;;  %v651_v28 = vld [vmem:[%s932_s1 + $0x74] ss:$8 sps:$4 sm:$0xff]  }
   0xa   :  { %v647_v25 = vld [vmem:[%s932_s1 + $0x164] ss:$8 sps:$4 sm:$0xff]   ;;  %v650_v27 = vld [vmem:[%s932_s1 + $0x160] ss:$8 sps:$4 sm:$0xff]   ;;  %v653_v29 = vld [vmem:[%s932_s1 + $0x174] ss:$8 sps:$4 sm:$0xff]  }
   0xb   :  { %445 = vmatpush1.bf16.msra.mxu1 %v625_v10  ;;  %v655_v30 = vld [vmem:[%s932_s1 + $0x70] ss:$8 sps:$4 sm:$0xff]   ;;  %v657_v32 = vld [vmem:[%s932_s1 + $0x84] ss:$8 sps:$4 sm:$0xff]   ;;  %v661_v34 = vld [vmem:[%s932_s1 + $0x80] ss:$8 sps:$4 sm:$0xff]  }
   0xc   :  { %486 = vmatpush1.bf16.msra.mxu0 %v626_v11  ;;  %446 = vmatprep.subr.bf16.mxu1 %v627_v12  ;;  %v656_v31 = vld [vmem:[%s932_s1 + $0x170] ss:$8 sps:$4 sm:$0xff]   ;;  %v659_v33 = vld [vmem:[%s932_s1 + $0x184] ss:$8 sps:$4 sm:$0xff]   ;;  %v662_v35 = vld [vmem:[%s932_s1 + $0x180] ss:$8 sps:$4 sm:$0xff]  }
   0xd   :  { %487 = vmatprep.subr.bf16.mxu0 %v629_v13  ;;  %v663_v36 = vld [vmem:[%s932_s1 + $0x94] ss:$8 sps:$4 sm:$0xff]   ;;  %v667_v41 = vld [vmem:[%s932_s1 + $0x90] ss:$8 sps:$4 sm:$0xff]   ;;  %v669_v43 = vld [vmem:[%s932_s1 + $0xa4] ss:$8 sps:$4 sm:$0xff]  }
   0xe   :  { %v665_v37 = vld [vmem:[%s932_s1 + $0x194] ss:$8 sps:$4 sm:$0xff]   ;;  %v668_v42 = vld [vmem:[%s932_s1 + $0x190] ss:$8 sps:$4 sm:$0xff]   ;;  %v671_v44 = vld [vmem:[%s932_s1 + $0x1a4] ss:$8 sps:$4 sm:$0xff]  }
   0xf   :  { %447 = vmatpush1.bf16.msra.mxu1 %v631_v14  ;;  %v852_v45 = vshrl.u32 %v81_v38, 7  ;;  %v673_v47 = vld [vmem:[%s932_s1 + $0xa0] ss:$8 sps:$4 sm:$0xff]   ;;  %v675_v49 = vld [vmem:[%s932_s1 + $0xb4] ss:$8 sps:$4 sm:$0xff]  }
  0x10   :  { %488 = vmatpush1.bf16.msra.mxu0 %v632_v15  ;;  %448 = vmatprep.subr.bf16.mxu1 %v633_v16  ;;  %v674_v48 = vld [vmem:[%s932_s1 + $0x1a0] ss:$8 sps:$4 sm:$0xff]   ;;  %v677_v50 = vld [vmem:[%s932_s1 + $0x1b4] ss:$8 sps:$4 sm:$0xff]   ;;  %v679_v53 = vld [vmem:[%s932_s1 + $0xb0] ss:$8 sps:$4 sm:$0xff]  }
  0x11   :  { %489 = vmatprep.subr.bf16.mxu0 %v635_v17  ;;  %v105_v51 = vsub.s32 %v102_v46, %v852_v45  ;;  %v538_v52 = vld.sshfl [vmem:[%s933_s0] sm:$0x33 pattern:$0x75316420]  ;;  %v680_v54 = vld [vmem:[%s932_s1 + $0x1b0] ss:$8 sps:$4 sm:$0xff]  }
  0x12   :  { %v99_v55 = vcombine.high %v538_v52, %v538_v52  ;;  %v681_v56 = vld [vmem:[%s932_s1 + $0xc4] ss:$8 sps:$4 sm:$0xff]   ;;  %v685_v59 = vld [vmem:[%s932_s1 + $0xc0] ss:$8 sps:$4 sm:$0xff]   ;;  %v687_v62 = vld [vmem:[%s932_s1 + $0xd4] ss:$8 sps:$4 sm:$0xff]  }
  0x13   :  { %449 = vmatpush1.bf16.msra.mxu1 %v637_v18  ;;  %v683_v57 = vld [vmem:[%s932_s1 + $0x1c4] ss:$8 sps:$4 sm:$0xff]   ;;  %v686_v60 = vld [vmem:[%s932_s1 + $0x1c0] ss:$8 sps:$4 sm:$0xff]   ;;  %v689_v63 = vld [vmem:[%s932_s1 + $0x1d4] ss:$8 sps:$4 sm:$0xff]   ;;  %v106_v8 = vrot.slane %v538_v52, %v105_v51 }
  0x14   :  { %490 = vmatpush1.bf16.msra.mxu0 %v638_v19  ;;  %450 = vmatprep.subr.bf16.mxu1 %v639_v20  ;;  %v113_v58 = vrot.slane %v99_v55, %v105_v51  ;;  %v691_v0 = vld [vmem:[%s932_s1 + $0xd0] ss:$8 sps:$4 sm:$0xff]   ;;  %v693_v2 = vld [vmem:[%s932_s1 + $0xe4] ss:$8 sps:$4 sm:$0xff]   ;;  %v697_v4 = vld [vmem:[%s932_s1 + $0xe0] ss:$8 sps:$4 sm:$0xff]  }
  0x15   :  { %491 = vmatprep.subr.bf16.mxu0 %v641_v21  ;;  %v692_v1 = vld [vmem:[%s932_s1 + $0x1d0] ss:$8 sps:$4 sm:$0xff]   ;;  %v695_v3 = vld [vmem:[%s932_s1 + $0x1e4] ss:$8 sps:$4 sm:$0xff]   ;;  %v698_v5 = vld [vmem:[%s932_s1 + $0x1e0] ss:$8 sps:$4 sm:$0xff]   ;;  %v114_v11 = vcombine.high %v106_v8, %v106_v8 }
  0x16   :  { %v115_v61 = vcombine.high %v113_v58, %v113_v58  ;;  %472 = vmatprep.mubr.bf16.mxu1 %v113_v58  ;;  %v699_v6 = vld [vmem:[%s932_s1 + $0xf4] ss:$8 sps:$4 sm:$0xff]   ;;  %v703_v9 = vld [vmem:[%s932_s1 + $0xf0] ss:$8 sps:$4 sm:$0xff]   ;;  %v83_v12 = vsub.s32 0, %v852_v45  ;;  %v87_v14 = vsub.s32 1, %v852_v45 }
  0x17   :  { %451 = vmatpush1.bf16.msra.mxu1 %v643_v22  ;;  %v701_v7 = vld [vmem:[%s932_s1 + $0x1f4] ss:$8 sps:$4 sm:$0xff]   ;;  %v704_v10 = vld [vmem:[%s932_s1 + $0x1f0] ss:$8 sps:$4 sm:$0xff]   ;;  %v79_v13 = vld [vmem:[%s934_s2] sm:$0x3] }
  0x18   :  { %492 = vmatpush1.bf16.msra.mxu0 %v644_v23  ;;  %452 = vmatprep.subr.bf16.mxu1 %v645_v24  ;;  %v84_v15 = vrot.slane %v79_v13, %v83_v12  ;;  %v88_v16 = vrot.slane %v79_v13, %v87_v14 }
  0x19   :  { %493 = vmatprep.subr.bf16.mxu0 %v647_v25  ;;  %513 = vmatprep.mubr.bf16.mxu0 %v115_v61 }
  0x1b   :  { %453 = vmatpush1.bf16.msra.mxu1 %v649_v26 }
  0x1c   :  { %494 = vmatpush1.bf16.msra.mxu0 %v650_v27  ;;  %454 = vmatprep.subr.bf16.mxu1 %v651_v28 }
  0x1d   :  { %495 = vmatprep.subr.bf16.mxu0 %v653_v29 }
  0x1f   :  { %455 = vmatpush1.bf16.msra.mxu1 %v655_v30 }
  0x20   :  { %496 = vmatpush1.bf16.msra.mxu0 %v656_v31  ;;  %456 = vmatprep.subr.bf16.mxu1 %v657_v32 }
  0x21   :  { %497 = vmatprep.subr.bf16.mxu0 %v659_v33 }
  0x23   :  { %457 = vmatpush1.bf16.msra.mxu1 %v661_v34 }
  0x24   :  { %498 = vmatpush1.bf16.msra.mxu0 %v662_v35  ;;  %458 = vmatprep.subr.bf16.mxu1 %v663_v36 }
  0x25   :  { %499 = vmatprep.subr.bf16.mxu0 %v665_v37 }
  0x27   :  { %459 = vmatpush1.bf16.msra.mxu1 %v667_v41 }
  0x28   :  { %500 = vmatpush1.bf16.msra.mxu0 %v668_v42  ;;  %460 = vmatprep.subr.bf16.mxu1 %v669_v43 }
  0x29   :  { %501 = vmatprep.subr.bf16.mxu0 %v671_v44 }
  0x2b   :  { %461 = vmatpush1.bf16.msra.mxu1 %v673_v47 }
  0x2c   :  { %502 = vmatpush1.bf16.msra.mxu0 %v674_v48  ;;  %462 = vmatprep.subr.bf16.mxu1 %v675_v49 }
  0x2d   :  { %503 = vmatprep.subr.bf16.mxu0 %v677_v50 }
  0x2f   :  { %463 = vmatpush1.bf16.msra.mxu1 %v679_v53 }
  0x30   :  { %504 = vmatpush1.bf16.msra.mxu0 %v680_v54  ;;  %464 = vmatprep.subr.bf16.mxu1 %v681_v56 }
  0x31   :  { %505 = vmatprep.subr.bf16.mxu0 %v683_v57 }
  0x33   :  { %465 = vmatpush1.bf16.msra.mxu1 %v685_v59 }
  0x34   :  { %506 = vmatpush1.bf16.msra.mxu0 %v686_v60  ;;  %466 = vmatprep.subr.bf16.mxu1 %v687_v62 }
  0x35   :  { %507 = vmatprep.subr.bf16.mxu0 %v689_v63 }
  0x37   :  { %467 = vmatpush1.bf16.msra.mxu1 %v691_v0 }
  0x38   :  { %508 = vmatpush1.bf16.msra.mxu0 %v692_v1  ;;  %468 = vmatprep.subr.bf16.mxu1 %v693_v2 }
  0x39   :  { %509 = vmatprep.subr.bf16.mxu0 %v695_v3 }
  0x3b   :  { %469 = vmatpush1.bf16.msra.mxu1 %v697_v4 }
  0x3c   :  { %510 = vmatpush1.bf16.msra.mxu0 %v698_v5  ;;  %470 = vmatprep.subr.bf16.mxu1 %v699_v6 }
  0x3d   :  { %511 = vmatprep.subr.bf16.mxu0 %v701_v7 }
  0x3f   :  { %471 = vmatpush1.bf16.msra.mxu1 %v703_v9 }
  0x40   :  { %512 = vmatpush1.bf16.msra.mxu0 %v704_v10 }
  0x42   :  { %473 = vmatmul.mubr.bf16.vlgmr.msra.gmra.mrb[0].mxu1 %v106_v8 }
  0x43   :  { %514 = vmatmul.mubr.bf16.vlgmr.msra.gmra.mrb[0].mxu0 %v114_v11 }
 0x115   :  { %v474_v17 = vpop.f32.mrb[0].mxu1 }
 0x116   :  { %v515_v18 = vpop.f32.mrb[0].mxu0  ;;  %v475_v19 = vadd.f32 %v474_v17, %v84_v15  ;;  %v476_v20 = vpop.f32.mrb[1].mxu1 }
 0x117   :  { %v517_v21 = vpop.f32.mrb[1].mxu0  ;;  %v477_v22 = vadd.f32 %v476_v20, %v88_v16  ;;  %v478_v23 = vpop.f32.mrb[2].mxu1 }
 0x118   :  { %v519_v24 = vpop.f32.mrb[2].mxu0  ;;  %v516_v25 = vadd.f32 %v515_v18, %v475_v19  ;;  %v479_v26 = vpop.f32.mrb[3].mxu1 }
 0x119   :  { %v520_v27 = vpop.f32.mrb[3].mxu0  ;;  %v518_v28 = vadd.f32 %v517_v21, %v477_v22 }
 0x11b   :  { %v524_v29 = vcombine.low %v516_v25, %v518_v28 }
 0x11d   :  { %603 = vst.sshfl [vmem:[%s935_s3] sm:$0x33 pattern:$0x76325410] %v524_v29 }

// kernel: _lambda_.24
= control target key start
LH: loop header
LB: loop body
LE: loop exit
PB: predicated region body
PF: predicated region fallthrough
CT: control target
= control target key end

     0   :  { %s1427_s18 = smov 0   ;;  %s1429_s19 = smov 0   ;;  %s1677_s0 = inlined_call_operand.vmem [shape: bf16[2,16,512], index: 0, kind: input, shape index: {}]   ;;  %s1678_s1 = inlined_call_operand.vmem [shape: bf16[512,256], index: 1, kind: input, shape index: {}]   ;;  %s1679_s2 = inlined_call_operand.vmem [shape: f32[1,256], index: 2, kind: input, shape index: {}]   ;;  %s1680_s3 = inlined_call_operand.vmem [shape: bf16[2,1,256], index: 3, kind: input, shape index: {}]   ;;  %s1681_s4 = inlined_call_operand.vmem [shape: bf16[2,16,1], index: 4, kind: input, shape index: {}]   ;;  %s1682_s5 = inlined_call_operand.vmem [shape: bf16[2,16,256], index: 5, kind: output, shape index: {}]  }
   0x1   :  { %s1431_s20 = smov 0  }
   0x2 LB: > { %s34_s21 = sadd.s32 1, %s1390_s19  ;;  %p1142_p0 = scmp.ge.s32.totalorder %s1394_s20, 1  ;;  %s1394_s20 = sphi %s1431_s20, %s15_s20   ;;  %s1390_s19 = sphi %s1429_s19, %s1684_s19   ;;  %s1386_s18 = sphi %s1427_s18, %s1683_s18  }
   0x3   : > { %p36_p1 = scmp.ge.s32.totalorder %s34_s21, 2  ;;  %p272_p2 = scmp.lt.s32.totalorder %s1394_s20, 3 }
   0x5   : > { %s1686_s21 = smov (%p36_p1, %s34_s21), 0  ;;  %p273_p3 = pnand %p1142_p0, %p272_p2 }
   0x6   : > { %v1270_v0 = vld [vmem:[%s1678_s1 + $0x4] ss:$8 sps:$4 sm:$0xff] (!%p273_p3)   ;;  %v1396_v2 = vmov (!%p273_p3), 0   ;;  %v1274_v3 = vld [vmem:[%s1678_s1] ss:$8 sps:$4 sm:$0xff] (!%p273_p3)   ;;  %p341_p4 = scmp.lt.s32.totalorder (!%p273_p3), %s1386_s18, 1 }
   0x7   : > { %276 = sbr.rel (%p273_p3) target bundleno = 299 (0x12b), region = 40  ;;  %v1272_v1 = vld [vmem:[%s1678_s1 + $0x104] ss:$8 sps:$4 sm:$0xff] (!%p273_p3)   ;;  %1264 = vset.pattern.permute.xlu0 (!%p273_p3), %v1396_v2  ;;  %817 = vmatprep.subr.bf16.mxu1 (!%p273_p3), %v1270_v0  ;;  %v1275_v4 = vld [vmem:[%s1678_s1 + $0x100] ss:$8 sps:$4 sm:$0xff] (!%p273_p3)  }
   0x8   : > { %860 = vmatprep.subr.bf16.mxu0 (!%p273_p3), %v1272_v1  ;;  %v1276_v5 = vld [vmem:[%s1678_s1 + $0x14] ss:$8 sps:$4 sm:$0xff] (!%p273_p3)   ;;  %818 = vmatpush1.bf16.msra.mxu1 (!%p273_p3), %v1274_v3  ;;  %v1280_v7 = vld [vmem:[%s1678_s1 + $0x10] ss:$8 sps:$4 sm:$0xff] (!%p273_p3)   ;;  %v1282_v9 = vld [vmem:[%s1678_s1 + $0x24] ss:$8 sps:$4 sm:$0xff] (!%p273_p3)  }
   0x9   : > { %861 = vmatpush1.bf16.msra.mxu0 (!%p273_p3), %v1275_v4  ;;  %v1278_v6 = vld [vmem:[%s1678_s1 + $0x114] ss:$8 sps:$4 sm:$0xff] (!%p273_p3)   ;;  %819 = vmatprep.subr.bf16.mxu1 (!%p273_p3), %v1276_v5  ;;  %v1281_v8 = vld [vmem:[%s1678_s1 + $0x110] ss:$8 sps:$4 sm:$0xff] (!%p273_p3)   ;;  %v1284_v10 = vld [vmem:[%s1678_s1 + $0x124] ss:$8 sps:$4 sm:$0xff] (!%p273_p3)  }
   0xa   : > { %862 = vmatprep.subr.bf16.mxu0 (!%p273_p3), %v1278_v6  ;;  %v1286_v11 = vld [vmem:[%s1678_s1 + $0x20] ss:$8 sps:$4 sm:$0xff] (!%p273_p3)   ;;  %v1288_v13 = vld [vmem:[%s1678_s1 + $0x34] ss:$8 sps:$4 sm:$0xff] (!%p273_p3)   ;;  %v1292_v15 = vld [vmem:[%s1678_s1 + $0x30] ss:$8 sps:$4 sm:$0xff] (!%p273_p3)  }
   0xb   : > { %v1287_v12 = vld [vmem:[%s1678_s1 + $0x120] ss:$8 sps:$4 sm:$0xff] (!%p273_p3)   ;;  %v1290_v14 = vld [vmem:[%s1678_s1 + $0x134] ss:$8 sps:$4 sm:$0xff] (!%p273_p3)   ;;  %v1293_v16 = vld [vmem:[%s1678_s1 + $0x130] ss:$8 sps:$4 sm:$0xff] (!%p273_p3)  }
   0xc   : > { %820 = vmatpush1.bf16.msra.mxu1 (!%p273_p3), %v1280_v7  ;;  %v1294_v17 = vld [vmem:[%s1678_s1 + $0x44] ss:$8 sps:$4 sm:$0xff] (!%p273_p3)   ;;  %v1298_v19 = vld [vmem:[%s1678_s1 + $0x40] ss:$8 sps:$4 sm:$0xff] (!%p273_p3)   ;;  %v1300_v21 = vld [vmem:[%s1678_s1 + $0x54] ss:$8 sps:$4 sm:$0xff] (!%p273_p3)  }
   0xd   : > { %863 = vmatpush1.bf16.msra.mxu0 (!%p273_p3), %v1281_v8  ;;  %821 = vmatprep.subr.bf16.mxu1 (!%p273_p3), %v1282_v9  ;;  %v1296_v18 = vld [vmem:[%s1678_s1 + $0x144] ss:$8 sps:$4 sm:$0xff] (!%p273_p3)   ;;  %v1299_v20 = vld [vmem:[%s1678_s1 + $0x140] ss:$8 sps:$4 sm:$0xff] (!%p273_p3)   ;;  %v1302_v22 = vld [vmem:[%s1678_s1 + $0x154] ss:$8 sps:$4 sm:$0xff] (!%p273_p3)   ;;  %v467_v9 = vlaneseq (!%p273_p3) }
   0xe   : > { %864 = vmatprep.subr.bf16.mxu0 %v1284_v10  ;;  %v1304_v23 = vld [vmem:[%s1678_s1 + $0x50] ss:$8 sps:$4 sm:$0xff]   ;;  %v1306_v25 = vld [vmem:[%s1678_s1 + $0x64] ss:$8 sps:$4 sm:$0xff]   ;;  %v1310_v27 = vld [vmem:[%s1678_s1 + $0x60] ss:$8 sps:$4 sm:$0xff]  }
   0xf   : > { %v1305_v24 = vld [vmem:[%s1678_s1 + $0x150] ss:$8 sps:$4 sm:$0xff]   ;;  %v1308_v26 = vld [vmem:[%s1678_s1 + $0x164] ss:$8 sps:$4 sm:$0xff]   ;;  %v1311_v28 = vld [vmem:[%s1678_s1 + $0x160] ss:$8 sps:$4 sm:$0xff]  }
  0x10   : > { %822 = vmatpush1.bf16.msra.mxu1 %v1286_v11  ;;  %v1312_v29 = vld [vmem:[%s1678_s1 + $0x74] ss:$8 sps:$4 sm:$0xff]   ;;  %v1316_v31 = vld [vmem:[%s1678_s1 + $0x70] ss:$8 sps:$4 sm:$0xff]   ;;  %v1318_v33 = vld [vmem:[%s1678_s1 + $0x84] ss:$8 sps:$4 sm:$0xff]  }
  0x11   : > { %865 = vmatpush1.bf16.msra.mxu0 %v1287_v12  ;;  %823 = vmatprep.subr.bf16.mxu1 %v1288_v13  ;;  %v1314_v30 = vld [vmem:[%s1678_s1 + $0x174] ss:$8 sps:$4 sm:$0xff]   ;;  %v1317_v32 = vld [vmem:[%s1678_s1 + $0x170] ss:$8 sps:$4 sm:$0xff]   ;;  %v1320_v34 = vld [vmem:[%s1678_s1 + $0x184] ss:$8 sps:$4 sm:$0xff]  }
  0x12   : > { %866 = vmatprep.subr.bf16.mxu0 %v1290_v14  ;;  %v1322_v35 = vld [vmem:[%s1678_s1 + $0x80] ss:$8 sps:$4 sm:$0xff]   ;;  %v1324_v37 = vld [vmem:[%s1678_s1 + $0x94] ss:$8 sps:$4 sm:$0xff]   ;;  %s1688_s18 = smov (!%p341_p4, %s1386_s18), 1  ;;  %v468_v10 = vshrl.u32 %v467_v9, 7 }
  0x13   : > { %v1323_v36 = vld [vmem:[%s1678_s1 + $0x180] ss:$8 sps:$4 sm:$0xff]   ;;  %v1326_v38 = vld [vmem:[%s1678_s1 + $0x194] ss:$8 sps:$4 sm:$0xff]   ;;  %v1328_v39 = vld [vmem:[%s1678_s1 + $0x90] ss:$8 sps:$4 sm:$0xff]  }
  0x14   : > { %824 = vmatpush1.bf16.msra.mxu1 %v1292_v15  ;;  %v1329_v40 = vld [vmem:[%s1678_s1 + $0x190] ss:$8 sps:$4 sm:$0xff]   ;;  %v1330_v41 = vld [vmem:[%s1678_s1 + $0xa4] ss:$8 sps:$4 sm:$0xff]   ;;  %s1222_s22 = sshll.u32 %s1688_s18, 5  ;;  %s1223_s27 = sshll.u32 %s1688_s18, 3 }
  0x15   : > { %867 = vmatpush1.bf16.msra.mxu0 %v1293_v16  ;;  %825 = vmatprep.subr.bf16.mxu1 %v1294_v17  ;;  %v1332_v42 = vld [vmem:[%s1678_s1 + $0x1a4] ss:$8 sps:$4 sm:$0xff]   ;;  %v1334_v43 = vld [vmem:[%s1678_s1 + $0xa0] ss:$8 sps:$4 sm:$0xff]   ;;  %v1336_v45 = vld [vmem:[%s1678_s1 + $0xb4] ss:$8 sps:$4 sm:$0xff]   ;;  %s1591_s7 = scalar_lea.vmem %s1677_s0, %s1222_s22  ;;  %s379_s14 = scalar_lea.vmem %s1681_s4, %s1223_s27 }
  0x16   : > { %868 = vmatprep.subr.bf16.mxu0 %v1296_v18  ;;  %v1335_v44 = vld [vmem:[%s1678_s1 + $0x1a0] ss:$8 sps:$4 sm:$0xff]   ;;  %v1338_v46 = vld [vmem:[%s1678_s1 + $0x1b4] ss:$8 sps:$4 sm:$0xff]   ;;  %v1340_v47 = vld [vmem:[%s1678_s1 + $0xb0] ss:$8 sps:$4 sm:$0xff]  }
  0x17   : > { %v1341_v48 = vld [vmem:[%s1678_s1 + $0x1b0] ss:$8 sps:$4 sm:$0xff]   ;;  %v1368_v49 = vld [vmem:[%s1591_s7 + $0x4] ss:$16 sps:$4 sm:$0xff]   ;;  %v1371_v52 = vld [vmem:[%s1591_s7 + $0xc] ss:$16 sps:$4 sm:$0xff]  }
  0x18   : > { %826 = vmatpush1.bf16.msra.mxu1 %v1298_v19  ;;  %v1342_v50 = vld [vmem:[%s1678_s1 + $0xc4] ss:$8 sps:$4 sm:$0xff]   ;;  %849 = vmatprep.mubr.bf16.mxu1 %v1368_v49  ;;  %v1346_v56 = vld [vmem:[%s1678_s1 + $0xc0] ss:$8 sps:$4 sm:$0xff]   ;;  %v1348_v59 = vld [vmem:[%s1678_s1 + $0xd4] ss:$8 sps:$4 sm:$0xff]  }
  0x19   : > { %869 = vmatpush1.bf16.msra.mxu0 %v1299_v20  ;;  %827 = vmatprep.subr.bf16.mxu1 %v1300_v21  ;;  %v1344_v51 = vld [vmem:[%s1678_s1 + $0x1c4] ss:$8 sps:$4 sm:$0xff]   ;;  %v1347_v57 = vld [vmem:[%s1678_s1 + $0x1c0] ss:$8 sps:$4 sm:$0xff]   ;;  %v1350_v60 = vld [vmem:[%s1678_s1 + $0x1d4] ss:$8 sps:$4 sm:$0xff]  }
  0x1a   : > { %870 = vmatprep.subr.bf16.mxu0 %v1302_v22  ;;  %v1228_v53 = vld [vmem:[%s379_s14] sm:$0xff]   ;;  %892 = vmatprep.mubr.bf16.mxu0 %v1371_v52  ;;  %v1352_v61 = vld [vmem:[%s1678_s1 + $0xd0] ss:$8 sps:$4 sm:$0xff]   ;;  %v1360_v3 = vld [vmem:[%s1678_s1 + $0xf4] ss:$8 sps:$4 sm:$0xff]   ;;  %s1145_s9 = sshll.u32 %s1688_s18, 1 }
  0x1b   : > { %v1229_v54 = vunpack.c.l.bf16 %v1228_v53  ;;  %v1230_v55 = vunpack.c.h.bf16 %v1228_v53  ;;  %v1353_v62 = vld [vmem:[%s1678_s1 + $0x1d0] ss:$8 sps:$4 sm:$0xff]   ;;  %v1354_v63 = vld [vmem:[%s1678_s1 + $0xe4] ss:$8 sps:$4 sm:$0xff]   ;;  %v1358_v1 = vld [vmem:[%s1678_s1 + $0xe0] ss:$8 sps:$4 sm:$0xff]   ;;  %s369_s12 = scalar_lea.vmem %s1680_s3, %s1145_s9 }
  0x1c   : > { %828 = vmatpush1.bf16.msra.mxu1 %v1304_v23  ;;  %v1356_v0 = vld [vmem:[%s1678_s1 + $0x1e4] ss:$8 sps:$4 sm:$0xff]   ;;  %v1359_v2 = vld [vmem:[%s1678_s1 + $0x1e0] ss:$8 sps:$4 sm:$0xff]   ;;  %v1362_v4 = vld [vmem:[%s1678_s1 + $0x1f4] ss:$8 sps:$4 sm:$0xff]  }
  0x1d   : > { %871 = vmatpush1.bf16.msra.mxu0 %v1305_v24  ;;  %829 = vmatprep.subr.bf16.mxu1 %v1306_v25  ;;  %v1265_v58 = vpack.i.bf16 %v1230_v55, %v1229_v54  ;;  %v1364_v5 = vld [vmem:[%s1678_s1 + $0xf0] ss:$8 sps:$4 sm:$0xff]   ;;  %v907_v11 = vld [vmem:[%s369_s12] sm:$0x3]  ;;  %v469_v12 = vsub.s32 0, %v468_v10  ;;  %v473_v14 = vsub.s32 1, %v468_v10 }
  0x1e   : > { %872 = vmatprep.subr.bf16.mxu0 %v1308_v26  ;;  %v1365_v6 = vld [vmem:[%s1678_s1 + $0x1f0] ss:$8 sps:$4 sm:$0xff]   ;;  %v465_v13 = vld [vmem:[%s1679_s2] sm:$0x3]  ;;  %v908_v15 = vunpack.c.l.bf16 %v907_v11  ;;  %v916_v16 = vsub.s32 2, %v468_v10 }
  0x1f   : > { %1266 = vperm.xlu0 %1264, %v1265_v58   ;;  %v1366_v7 = vld [vmem:[%s1591_s7] ss:$16 sps:$4 sm:$0xff]   ;;  %v1369_v8 = vld [vmem:[%s1591_s7 + $0x8] ss:$16 sps:$4 sm:$0xff]   ;;  %v470_v17 = vrot.slane %v465_v13, %v469_v12  ;;  %v474_v18 = vrot.slane %v465_v13, %v473_v14  ;;  %s1224_s7 = sshll.u32 %s1688_s18, 4 }
  0x20   : > { %830 = vmatpush1.bf16.msra.mxu1 %v1310_v27  ;;  %v913_v19 = vrot.slane %v908_v15, %v469_v12  ;;  %v917_v23 = vrot.slane %v908_v15, %v916_v16  ;;  %s394_s17 = scalar_lea.vmem %s1682_s5, %s1224_s7 }
  0x21   : > { %873 = vmatpush1.bf16.msra.mxu0 %v1311_v28  ;;  %831 = vmatprep.subr.bf16.mxu1 %v1312_v29 }
  0x22   : > { %874 = vmatprep.subr.bf16.mxu0 %v1314_v30 }
  0x24   : > { %832 = vmatpush1.bf16.msra.mxu1 %v1316_v31  ;;  %v923_v31 = vrot.slane %v913_v19, %v469_v12 }
  0x25   : > { %875 = vmatpush1.bf16.msra.mxu0 %v1317_v32  ;;  %833 = vmatprep.subr.bf16.mxu1 %v1318_v33 }
  0x26   : > { %876 = vmatprep.subr.bf16.mxu0 %v1320_v34 }
  0x28   : > { %834 = vmatpush1.bf16.msra.mxu1 %v1322_v35 }
  0x29   : > { %877 = vmatpush1.bf16.msra.mxu0 %v1323_v36  ;;  %835 = vmatprep.subr.bf16.mxu1 %v1324_v37  ;;  %v927_v36 = vrot.slane %v917_v23, %v469_v12 }
  0x2a   : > { %878 = vmatprep.subr.bf16.mxu0 %v1326_v38 }
  0x2c   : > { %836 = vmatpush1.bf16.msra.mxu1 %v1328_v39 }
  0x2d   : > { %879 = vmatpush1.bf16.msra.mxu0 %v1329_v40  ;;  %837 = vmatprep.subr.bf16.mxu1 %v1330_v41 }
  0x2e   : > { %880 = vmatprep.subr.bf16.mxu0 %v1332_v42 }
  0x30   : > { %838 = vmatpush1.bf16.msra.mxu1 %v1334_v43 }
  0x31   : > { %881 = vmatpush1.bf16.msra.mxu0 %v1335_v44  ;;  %839 = vmatprep.subr.bf16.mxu1 %v1336_v45 }
  0x32   : > { %882 = vmatprep.subr.bf16.mxu0 %v1338_v46 }
  0x34   : > { %840 = vmatpush1.bf16.msra.mxu1 %v1340_v47 }
  0x35   : > { %883 = vmatpush1.bf16.msra.mxu0 %v1341_v48  ;;  %841 = vmatprep.subr.bf16.mxu1 %v1342_v50 }
  0x36   : > { %884 = vmatprep.subr.bf16.mxu0 %v1344_v51 }
  0x38   : > { %842 = vmatpush1.bf16.msra.mxu1 %v1346_v56 }
  0x39   : > { %885 = vmatpush1.bf16.msra.mxu0 %v1347_v57  ;;  %843 = vmatprep.subr.bf16.mxu1 %v1348_v59 }
  0x3a   : > { %886 = vmatprep.subr.bf16.mxu0 %v1350_v60 }
  0x3c   : > { %844 = vmatpush1.bf16.msra.mxu1 %v1352_v61 }
  0x3d   : > { %887 = vmatpush1.bf16.msra.mxu0 %v1353_v62  ;;  %845 = vmatprep.subr.bf16.mxu1 %v1354_v63 }
  0x3e   : > { %888 = vmatprep.subr.bf16.mxu0 %v1356_v0 }
  0x40   : > { %846 = vmatpush1.bf16.msra.mxu1 %v1358_v1 }
  0x41   : > { %889 = vmatpush1.bf16.msra.mxu0 %v1359_v2  ;;  %847 = vmatprep.subr.bf16.mxu1 %v1360_v3 }
  0x42   : > { %890 = vmatprep.subr.bf16.mxu0 %v1362_v4 }
  0x44   : > { %848 = vmatpush1.bf16.msra.mxu1 %v1364_v5 }
  0x45   : > { %891 = vmatpush1.bf16.msra.mxu0 %v1365_v6 }
  0x47   : > { %850 = vmatmul.mubr.bf16.vlgmr.msra.gmra.mrb[0].mxu1 %v1366_v7 }
  0x48   : > { %893 = vmatmul.mubr.bf16.vlgmr.msra.gmra.mrb[0].mxu0 %v1369_v8 }
  0x9e   : > { %v1267_v20 = vpop.permute.xlu0 %1266 }
  0x9f   : > { %v1268_v40 = vunpack.i.l.bf16 %v1267_v20  ;;  %v1269_v45 = vunpack.i.h.bf16 %v1267_v20 }
 0x11a   : > { %v851_v21 = vpop.f32.mrb[0].mxu1 }
 0x11b   : > { %v894_v22 = vpop.f32.mrb[0].mxu0  ;;  %v852_v24 = vadd.f32 %v851_v21, %v470_v17  ;;  %v853_v25 = vpop.f32.mrb[1].mxu1 }
 0x11c   : > { %v896_v26 = vpop.f32.mrb[1].mxu0  ;;  %v854_v27 = vadd.f32 %v853_v25, %v474_v18  ;;  %v855_v28 = vpop.f32.mrb[2].mxu1 }
 0x11d   : > { %v898_v29 = vpop.f32.mrb[2].mxu0  ;;  %v895_v30 = vadd.f32 %v894_v22, %v852_v24  ;;  %v856_v32 = vadd.f32 %v855_v28, %v470_v17  ;;  %v857_v33 = vpop.f32.mrb[3].mxu1 }
 0x11e   : > { %v900_v34 = vpop.f32.mrb[3].mxu0  ;;  %v897_v35 = vadd.f32 %v896_v26, %v854_v27  ;;  %v858_v37 = vadd.f32 %v857_v33, %v474_v18 }
 0x11f   : > { %v903_v38 = vmax.f32 %v895_v30, 0.0  ;;  %v899_v39 = vadd.f32 %v898_v29, %v856_v32 }
 0x120   : > { %v904_v41 = vmax.f32 %v897_v35, 0.0  ;;  %v901_v42 = vadd.f32 %v900_v34, %v858_v37 }
 0x121   : > { %v928_v43 = vmul.f32 %v923_v31, %v903_v38  ;;  %v905_v44 = vmax.f32 %v899_v39, 0.0 }
 0x122   : > { %v929_v46 = vmul.f32 %v927_v36, %v904_v41  ;;  %v906_v47 = vmax.f32 %v901_v42, 0.0 }
 0x123   : > { %v930_v48 = vmul.f32 %v923_v31, %v905_v44  ;;  %v946_v49 = vmul.f32 %v1268_v40, %v928_v43 }
 0x124   : > { %v931_v50 = vmul.f32 %v927_v36, %v906_v47  ;;  %v947_v51 = vmul.f32 %v1268_v40, %v929_v46 }
 0x125   : > { %v948_v52 = vmul.f32 %v1269_v45, %v930_v48 }
 0x126   : > { %v949_v53 = vmul.f32 %v1269_v45, %v931_v50  ;;  %v1225_v54 = vpack.c.bf16 %v947_v51, %v946_v49 }
 0x128   : > { %v1226_v55 = vpack.c.bf16 %v949_v53, %v948_v52  ;;  %962 = vst [vmem:[%s394_s17] sm:$0xff] %v1225_v54 }
 0x12a   : > { %963 = vst [vmem:[%s394_s17 + $0x8] sm:$0xff] %v1226_v55 }
 0x12b PF: > { %s15_s20 = sadd.s32 1, %s1394_s20   ;;  %s1683_s18 = smov %s1390_s19 }
 0x12c   : > { %p12_p5 = scmp.ge.s32.totalorder %s15_s20, 4   ;;  %s1684_s19 = smov %s1686_s21 }
 0x12e   :  { %14 = sbr.rel (!%p12_p5) target bundleno = 2 (0x2), region = 82 }

// kernel: _lambda_.25
= control target key start
LH: loop header
LB: loop body
LE: loop exit
PB: predicated region body
PF: predicated region fallthrough
CT: control target
= control target key end

     0   :  { %s1425_s12 = smov 0   ;;  %s1427_s13 = smov 0   ;;  %s1709_s0 = inlined_call_operand.vmem [shape: bf16[8,512], index: 0, kind: input, shape index: {}]   ;;  %s1710_s1 = inlined_call_operand.vmem [shape: bf16[512,1024], index: 1, kind: input, shape index: {}]   ;;  %s1711_s2 = inlined_call_operand.vmem [shape: f32[1,1024], index: 2, kind: input, shape index: {}]   ;;  %s1712_s3 = inlined_call_operand.vmem [shape: bf16[8,1024], index: 3, kind: output, shape index: {}]  }
   0x1   :  { %s1429_s14 = smov 0   ;;  %s1431_s15 = smov 0  }
   0x2   :  { %s1433_s16 = smov 0  }
   0x3 LB: > { %s25_s17 = sadd.s32 1, %s1399_s15  ;;  %p65_p1 = scmp.ne.s32.totalorder %s1391_s13, %s1387_s12  ;;  %s1403_s16 = sphi %s1433_s16, %s13_s16   ;;  %s1399_s15 = sphi %s1431_s15, %s1716_s15   ;;  %s1395_s14 = sphi %s1429_s14, %s1715_s14   ;;  %s1391_s13 = sphi %s1427_s13, %s1714_s13   ;;  %s1387_s12 = sphi %s1425_s12, %s1713_s12  }
   0x4   : > { %p27_p0 = scmp.ge.s32.totalorder %s25_s17, 4  ;;  %p66_p2 = scmp.eq.s32.totalorder %s1403_s16, 0 }
   0x5   : > { %s58_s19 = sadd.s32 1, %s1391_s13  ;;  %p1139_p5 = scmp.ge.s32.totalorder %s1403_s16, 4 }
   0x6   : > { %s1718_s17 = smov (%p27_p0, %s25_s17), 0  ;;  %p67_p3 = por %p66_p2, %p65_p1 }
   0x7   : > { %s55_s18 = ssub.s32 %s1399_s15, %s1718_s17  ;;  %153 = sbr.rel (%p1139_p5) target bundleno = 82 (0x52), region = 20 }
   0x8   : > { %p56_p4 = scmp.eq.s32.totalorder %s55_s18, 0 }
   0xa   : > { %s1460_s20 = scalar_select %p56_p4, %s1391_s13, %s58_s19  }
   0xe   : > { %156 = sbr.rel (!%p67_p3) target bundleno = 82 (0x52), region = 24  ;;  %s158_s21 = sand.u32 (%p67_p3), 1, %s1391_s13  }
   0xf   : > { %s1219_s22 = sshll.u32 (%p67_p3), %s1399_s15, 3  ;;  %s1140_s23 = sshll.u32 (%p67_p3), %s158_s21, 9 }
  0x10   : > { %s1468_s26 = scalar_lea.vmem (%p67_p3), %s1710_s1, %s1219_s22  ;;  %s1473_s27 = scalar_lea.vmem (%p67_p3), [#allocation2], %s1140_s23 }
  0x11   : > { %v317_v0 = vld [vmem:[%s1468_s26] sm:$0xff] (%p67_p3) }
  0x12   : > { %v319_v1 = vld [vmem:[%s1468_s26 + $0x20] sm:$0xff] (%p67_p3)  ;;  %318 = vst [vmem:[%s1473_s27] sm:$0xff] (%p67_p3), %v317_v0 }
  0x13   : > { %v321_v2 = vld [vmem:[%s1468_s26 + $0x40] sm:$0xff] (%p67_p3)  ;;  %320 = vst [vmem:[%s1473_s27 + $0x8] sm:$0xff] (%p67_p3), %v319_v1 }
  0x14   : > { %322 = vst [vmem:[%s1473_s27 + $0x10] sm:$0xff] (%p67_p3), %v321_v2  ;;  %v323_v3 = vld [vmem:[%s1468_s26 + $0x60] sm:$0xff] (%p67_p3) }
  0x15   : > { %v325_v4 = vld [vmem:[%s1468_s26 + $0x80] sm:$0xff]  ;;  %324 = vst [vmem:[%s1473_s27 + $0x18] sm:$0xff] %v323_v3 }
  0x16   : > { %v327_v5 = vld [vmem:[%s1468_s26 + $0xa0] sm:$0xff]  ;;  %326 = vst [vmem:[%s1473_s27 + $0x20] sm:$0xff] %v325_v4 }
  0x17   : > { %328 = vst [vmem:[%s1473_s27 + $0x28] sm:$0xff] %v327_v5  ;;  %v329_v6 = vld [vmem:[%s1468_s26 + $0xc0] sm:$0xff] }
  0x18   : > { %v331_v7 = vld [vmem:[%s1468_s26 + $0xe0] sm:$0xff]  ;;  %330 = vst [vmem:[%s1473_s27 + $0x30] sm:$0xff] %v329_v6 }
  0x19   : > { %v333_v8 = vld [vmem:[%s1468_s26 + $0x100] sm:$0xff]  ;;  %332 = vst [vmem:[%s1473_s27 + $0x38] sm:$0xff] %v331_v7 }
  0x1a   : > { %334 = vst [vmem:[%s1473_s27 + $0x40] sm:$0xff] %v333_v8  ;;  %v335_v9 = vld [vmem:[%s1468_s26 + $0x120] sm:$0xff] }
  0x1b   : > { %v337_v10 = vld [vmem:[%s1468_s26 + $0x140] sm:$0xff]  ;;  %336 = vst [vmem:[%s1473_s27 + $0x48] sm:$0xff] %v335_v9 }
  0x1c   : > { %v339_v11 = vld [vmem:[%s1468_s26 + $0x160] sm:$0xff]  ;;  %338 = vst [vmem:[%s1473_s27 + $0x50] sm:$0xff] %v337_v10 }
  0x1d   : > { %340 = vst [vmem:[%s1473_s27 + $0x58] sm:$0xff] %v339_v11  ;;  %v341_v12 = vld [vmem:[%s1468_s26 + $0x180] sm:$0xff] }
  0x1e   : > { %v343_v13 = vld [vmem:[%s1468_s26 + $0x1a0] sm:$0xff]  ;;  %342 = vst [vmem:[%s1473_s27 + $0x60] sm:$0xff] %v341_v12 }
  0x1f   : > { %v345_v14 = vld [vmem:[%s1468_s26 + $0x1c0] sm:$0xff]  ;;  %344 = vst [vmem:[%s1473_s27 + $0x68] sm:$0xff] %v343_v13 }
  0x20   : > { %346 = vst [vmem:[%s1473_s27 + $0x70] sm:$0xff] %v345_v14  ;;  %v347_v15 = vld [vmem:[%s1468_s26 + $0x1e0] sm:$0xff] }
  0x21   : > { %v349_v16 = vld [vmem:[%s1468_s26 + $0x200] sm:$0xff]  ;;  %348 = vst [vmem:[%s1473_s27 + $0x78] sm:$0xff] %v347_v15 }
  0x22   : > { %v351_v17 = vld [vmem:[%s1468_s26 + $0x220] sm:$0xff]  ;;  %350 = vst [vmem:[%s1473_s27 + $0x80] sm:$0xff] %v349_v16 }
  0x23   : > { %352 = vst [vmem:[%s1473_s27 + $0x88] sm:$0xff] %v351_v17  ;;  %v353_v18 = vld [vmem:[%s1468_s26 + $0x240] sm:$0xff] }
  0x24   : > { %v355_v19 = vld [vmem:[%s1468_s26 + $0x260] sm:$0xff]  ;;  %354 = vst [vmem:[%s1473_s27 + $0x90] sm:$0xff] %v353_v18 }
  0x25   : > { %v357_v20 = vld [vmem:[%s1468_s26 + $0x280] sm:$0xff]  ;;  %356 = vst [vmem:[%s1473_s27 + $0x98] sm:$0xff] %v355_v19 }
  0x26   : > { %358 = vst [vmem:[%s1473_s27 + $0xa0] sm:$0xff] %v357_v20  ;;  %v359_v21 = vld [vmem:[%s1468_s26 + $0x2a0] sm:$0xff] }
  0x27   : > { %v361_v22 = vld [vmem:[%s1468_s26 + $0x2c0] sm:$0xff]  ;;  %360 = vst [vmem:[%s1473_s27 + $0xa8] sm:$0xff] %v359_v21 }
  0x28   : > { %v363_v23 = vld [vmem:[%s1468_s26 + $0x2e0] sm:$0xff]  ;;  %362 = vst [vmem:[%s1473_s27 + $0xb0] sm:$0xff] %v361_v22 }
  0x29   : > { %364 = vst [vmem:[%s1473_s27 + $0xb8] sm:$0xff] %v363_v23  ;;  %v365_v24 = vld [vmem:[%s1468_s26 + $0x300] sm:$0xff] }
  0x2a   : > { %v367_v25 = vld [vmem:[%s1468_s26 + $0x320] sm:$0xff]  ;;  %366 = vst [vmem:[%s1473_s27 + $0xc0] sm:$0xff] %v365_v24 }
  0x2b   : > { %v369_v26 = vld [vmem:[%s1468_s26 + $0x340] sm:$0xff]  ;;  %368 = vst [vmem:[%s1473_s27 + $0xc8] sm:$0xff] %v367_v25 }
  0x2c   : > { %370 = vst [vmem:[%s1473_s27 + $0xd0] sm:$0xff] %v369_v26  ;;  %v371_v27 = vld [vmem:[%s1468_s26 + $0x360] sm:$0xff] }
  0x2d   : > { %v373_v28 = vld [vmem:[%s1468_s26 + $0x380] sm:$0xff]  ;;  %372 = vst [vmem:[%s1473_s27 + $0xd8] sm:$0xff] %v371_v27 }
  0x2e   : > { %v375_v29 = vld [vmem:[%s1468_s26 + $0x3a0] sm:$0xff]  ;;  %374 = vst [vmem:[%s1473_s27 + $0xe0] sm:$0xff] %v373_v28 }
  0x2f   : > { %376 = vst [vmem:[%s1473_s27 + $0xe8] sm:$0xff] %v375_v29  ;;  %v377_v30 = vld [vmem:[%s1468_s26 + $0x3c0] sm:$0xff] }
  0x30   : > { %v379_v31 = vld [vmem:[%s1468_s26 + $0x3e0] sm:$0xff]  ;;  %378 = vst [vmem:[%s1473_s27 + $0xf0] sm:$0xff] %v377_v30 }
  0x31   : > { %v381_v32 = vld [vmem:[%s1468_s26 + $0x400] sm:$0xff]  ;;  %380 = vst [vmem:[%s1473_s27 + $0xf8] sm:$0xff] %v379_v31 }
  0x32   : > { %382 = vst [vmem:[%s1473_s27 + $0x100] sm:$0xff] %v381_v32  ;;  %v383_v33 = vld [vmem:[%s1468_s26 + $0x420] sm:$0xff] }
  0x33   : > { %v385_v34 = vld [vmem:[%s1468_s26 + $0x440] sm:$0xff]  ;;  %384 = vst [vmem:[%s1473_s27 + $0x108] sm:$0xff] %v383_v33 }
  0x34   : > { %v387_v35 = vld [vmem:[%s1468_s26 + $0x460] sm:$0xff]  ;;  %386 = vst [vmem:[%s1473_s27 + $0x110] sm:$0xff] %v385_v34 }
  0x35   : > { %388 = vst [vmem:[%s1473_s27 + $0x118] sm:$0xff] %v387_v35  ;;  %v389_v36 = vld [vmem:[%s1468_s26 + $0x480] sm:$0xff] }
  0x36   : > { %v391_v37 = vld [vmem:[%s1468_s26 + $0x4a0] sm:$0xff]  ;;  %390 = vst [vmem:[%s1473_s27 + $0x120] sm:$0xff] %v389_v36 }
  0x37   : > { %v393_v38 = vld [vmem:[%s1468_s26 + $0x4c0] sm:$0xff]  ;;  %392 = vst [vmem:[%s1473_s27 + $0x128] sm:$0xff] %v391_v37 }
  0x38   : > { %394 = vst [vmem:[%s1473_s27 + $0x130] sm:$0xff] %v393_v38  ;;  %v395_v39 = vld [vmem:[%s1468_s26 + $0x4e0] sm:$0xff] }
  0x39   : > { %v397_v40 = vld [vmem:[%s1468_s26 + $0x500] sm:$0xff]  ;;  %396 = vst [vmem:[%s1473_s27 + $0x138] sm:$0xff] %v395_v39 }
  0x3a   : > { %v399_v41 = vld [vmem:[%s1468_s26 + $0x520] sm:$0xff]  ;;  %398 = vst [vmem:[%s1473_s27 + $0x140] sm:$0xff] %v397_v40 }
  0x3b   : > { %400 = vst [vmem:[%s1473_s27 + $0x148] sm:$0xff] %v399_v41  ;;  %v401_v42 = vld [vmem:[%s1468_s26 + $0x540] sm:$0xff] }
  0x3c   : > { %v403_v43 = vld [vmem:[%s1468_s26 + $0x560] sm:$0xff]  ;;  %402 = vst [vmem:[%s1473_s27 + $0x150] sm:$0xff] %v401_v42 }
  0x3d   : > { %v405_v44 = vld [vmem:[%s1468_s26 + $0x580] sm:$0xff]  ;;  %404 = vst [vmem:[%s1473_s27 + $0x158] sm:$0xff] %v403_v43 }
  0x3e   : > { %406 = vst [vmem:[%s1473_s27 + $0x160] sm:$0xff] %v405_v44  ;;  %v407_v45 = vld [vmem:[%s1468_s26 + $0x5a0] sm:$0xff] }
  0x3f   : > { %v409_v46 = vld [vmem:[%s1468_s26 + $0x5c0] sm:$0xff]  ;;  %408 = vst [vmem:[%s1473_s27 + $0x168] sm:$0xff] %v407_v45 }
  0x40   : > { %v411_v47 = vld [vmem:[%s1468_s26 + $0x5e0] sm:$0xff]  ;;  %410 = vst [vmem:[%s1473_s27 + $0x170] sm:$0xff] %v409_v46 }
  0x41   : > { %412 = vst [vmem:[%s1473_s27 + $0x178] sm:$0xff] %v411_v47  ;;  %v413_v48 = vld [vmem:[%s1468_s26 + $0x600] sm:$0xff] }
  0x42   : > { %v415_v49 = vld [vmem:[%s1468_s26 + $0x620] sm:$0xff]  ;;  %414 = vst [vmem:[%s1473_s27 + $0x180] sm:$0xff] %v413_v48 }
  0x43   : > { %v417_v50 = vld [vmem:[%s1468_s26 + $0x640] sm:$0xff]  ;;  %416 = vst [vmem:[%s1473_s27 + $0x188] sm:$0xff] %v415_v49 }
  0x44   : > { %418 = vst [vmem:[%s1473_s27 + $0x190] sm:$0xff] %v417_v50  ;;  %v419_v51 = vld [vmem:[%s1468_s26 + $0x660] sm:$0xff] }
  0x45   : > { %v421_v52 = vld [vmem:[%s1468_s26 + $0x680] sm:$0xff]  ;;  %420 = vst [vmem:[%s1473_s27 + $0x198] sm:$0xff] %v419_v51 }
  0x46   : > { %v423_v53 = vld [vmem:[%s1468_s26 + $0x6a0] sm:$0xff]  ;;  %422 = vst [vmem:[%s1473_s27 + $0x1a0] sm:$0xff] %v421_v52 }
  0x47   : > { %424 = vst [vmem:[%s1473_s27 + $0x1a8] sm:$0xff] %v423_v53  ;;  %v425_v54 = vld [vmem:[%s1468_s26 + $0x6c0] sm:$0xff] }
  0x48   : > { %v427_v55 = vld [vmem:[%s1468_s26 + $0x6e0] sm:$0xff]  ;;  %426 = vst [vmem:[%s1473_s27 + $0x1b0] sm:$0xff] %v425_v54 }
  0x49   : > { %v429_v56 = vld [vmem:[%s1468_s26 + $0x700] sm:$0xff]  ;;  %428 = vst [vmem:[%s1473_s27 + $0x1b8] sm:$0xff] %v427_v55 }
  0x4a   : > { %430 = vst [vmem:[%s1473_s27 + $0x1c0] sm:$0xff] %v429_v56  ;;  %v431_v57 = vld [vmem:[%s1468_s26 + $0x720] sm:$0xff] }
  0x4b   : > { %v433_v58 = vld [vmem:[%s1468_s26 + $0x740] sm:$0xff]  ;;  %432 = vst [vmem:[%s1473_s27 + $0x1c8] sm:$0xff] %v431_v57 }
  0x4c   : > { %v435_v59 = vld [vmem:[%s1468_s26 + $0x760] sm:$0xff]  ;;  %434 = vst [vmem:[%s1473_s27 + $0x1d0] sm:$0xff] %v433_v58 }
  0x4d   : > { %436 = vst [vmem:[%s1473_s27 + $0x1d8] sm:$0xff] %v435_v59  ;;  %v437_v60 = vld [vmem:[%s1468_s26 + $0x780] sm:$0xff] }
  0x4e   : > { %v439_v61 = vld [vmem:[%s1468_s26 + $0x7a0] sm:$0xff]  ;;  %438 = vst [vmem:[%s1473_s27 + $0x1e0] sm:$0xff] %v437_v60 }
  0x4f   : > { %v441_v62 = vld [vmem:[%s1468_s26 + $0x7c0] sm:$0xff]  ;;  %440 = vst [vmem:[%s1473_s27 + $0x1e8] sm:$0xff] %v439_v61 }
  0x50   : > { %442 = vst [vmem:[%s1473_s27 + $0x1f0] sm:$0xff] %v441_v62  ;;  %v443_v63 = vld [vmem:[%s1468_s26 + $0x7e0] sm:$0xff] }
  0x51   : > { %444 = vst [vmem:[%s1473_s27 + $0x1f8] sm:$0xff] %v443_v63 }
  0x52 PF: > { %p1143_p6 = scmp.ge.s32.totalorder %s1403_s16, 1  ;;  %p457_p7 = scmp.lt.s32.totalorder %s1403_s16, 5 }
  0x54   : > { %p458_p8 = pnand %p1143_p6, %p457_p7 }
  0x55   : > { %s464_s28 = sand.u32 (!%p458_p8), 1, %s1387_s12   ;;  %v1606_v0 = vld [vmem:[%s1709_s0] sm:$0xff] (!%p458_p8)  ;;  %v1611_v1 = vld [vmem:[%s1709_s0 + $0x8] sm:$0xff] (!%p458_p8)  ;;  %s1145_s8 = sshll.u32 (!%p458_p8), %s1395_s14, 1 }
  0x56   : > { %461 = sbr.rel (%p458_p8) target bundleno = 373 (0x175), region = 66  ;;  %s1144_s6 = sshll.u32 (!%p458_p8), %s464_s28, 9  ;;  %v1149_v2 = vcombine.high (!%p458_p8), %v1606_v0, %v1606_v0  ;;  %v1151_v3 = vcombine.high (!%p458_p8), %v1611_v1, %v1611_v1 }
  0x57   : > { %s1617_s7 = scalar_lea.vmem (!%p458_p8), [#allocation2], %s1144_s6  ;;  %p507_p9 = scmp.lt.s32.totalorder (!%p458_p8), %s1145_s8, 7 }
  0x58   : > { %v1265_v4 = vld [vmem:[%s1617_s7 + $0x4] ss:$8 sps:$4 sm:$0xff] (!%p458_p8)   ;;  %965 = vmatprep.mubr.bf16.mxu1 (!%p458_p8), %v1149_v2  ;;  %1006 = vmatprep.mubr.bf16.mxu0 (!%p458_p8), %v1151_v3  ;;  %v1269_v6 = vld [vmem:[%s1617_s7] ss:$8 sps:$4 sm:$0xff] (!%p458_p8)   ;;  %v1271_v8 = vld [vmem:[%s1617_s7 + $0x14] ss:$8 sps:$4 sm:$0xff] (!%p458_p8)  }
  0x59   : > { %v1267_v5 = vld [vmem:[%s1617_s7 + $0x104] ss:$8 sps:$4 sm:$0xff] (!%p458_p8)   ;;  %933 = vmatprep.subr.bf16.mxu1 (!%p458_p8), %v1265_v4  ;;  %v1270_v7 = vld [vmem:[%s1617_s7 + $0x100] ss:$8 sps:$4 sm:$0xff] (!%p458_p8)   ;;  %v1273_v9 = vld [vmem:[%s1617_s7 + $0x114] ss:$8 sps:$4 sm:$0xff] (!%p458_p8)  }
  0x5a   : > { %974 = vmatprep.subr.bf16.mxu0 (!%p458_p8), %v1267_v5  ;;  %934 = vmatpush1.bf16.msra.mxu1 (!%p458_p8), %v1269_v6  ;;  %v1275_v10 = vld [vmem:[%s1617_s7 + $0x10] ss:$8 sps:$4 sm:$0xff] (!%p458_p8)   ;;  %v1277_v12 = vld [vmem:[%s1617_s7 + $0x24] ss:$8 sps:$4 sm:$0xff] (!%p458_p8)   ;;  %v1281_v14 = vld [vmem:[%s1617_s7 + $0x20] ss:$8 sps:$4 sm:$0xff] (!%p458_p8)   ;;  %v1148_v6 = vcombine.low (!%p458_p8), %v1606_v0, %v1606_v0 }
  0x5b   : > { %975 = vmatpush1.bf16.msra.mxu0 (!%p458_p8), %v1270_v7  ;;  %935 = vmatprep.subr.bf16.mxu1 (!%p458_p8), %v1271_v8  ;;  %v1276_v11 = vld [vmem:[%s1617_s7 + $0x110] ss:$8 sps:$4 sm:$0xff] (!%p458_p8)   ;;  %v1279_v13 = vld [vmem:[%s1617_s7 + $0x124] ss:$8 sps:$4 sm:$0xff] (!%p458_p8)   ;;  %v1282_v15 = vld [vmem:[%s1617_s7 + $0x120] ss:$8 sps:$4 sm:$0xff] (!%p458_p8)   ;;  %v1150_v7 = vcombine.low (!%p458_p8), %v1611_v1, %v1611_v1  ;;  %v589_v8 = vlaneseq (!%p458_p8) }
  0x5c   : > { %976 = vmatprep.subr.bf16.mxu0 (!%p458_p8), %v1273_v9  ;;  %v1283_v16 = vld [vmem:[%s1617_s7 + $0x34] ss:$8 sps:$4 sm:$0xff] (!%p458_p8)   ;;  %v1287_v18 = vld [vmem:[%s1617_s7 + $0x30] ss:$8 sps:$4 sm:$0xff] (!%p458_p8)   ;;  %v1289_v20 = vld [vmem:[%s1617_s7 + $0x44] ss:$8 sps:$4 sm:$0xff] (!%p458_p8)  }
  0x5d   : > { %v1285_v17 = vld [vmem:[%s1617_s7 + $0x134] ss:$8 sps:$4 sm:$0xff]   ;;  %v1288_v19 = vld [vmem:[%s1617_s7 + $0x130] ss:$8 sps:$4 sm:$0xff]   ;;  %v1291_v21 = vld [vmem:[%s1617_s7 + $0x144] ss:$8 sps:$4 sm:$0xff]  }
  0x5e   : > { %936 = vmatpush1.bf16.msra.mxu1 %v1275_v10  ;;  %v1293_v22 = vld [vmem:[%s1617_s7 + $0x40] ss:$8 sps:$4 sm:$0xff]   ;;  %v1295_v24 = vld [vmem:[%s1617_s7 + $0x54] ss:$8 sps:$4 sm:$0xff]   ;;  %v1299_v26 = vld [vmem:[%s1617_s7 + $0x50] ss:$8 sps:$4 sm:$0xff]  }
  0x5f   : > { %977 = vmatpush1.bf16.msra.mxu0 %v1276_v11  ;;  %937 = vmatprep.subr.bf16.mxu1 %v1277_v12  ;;  %v1294_v23 = vld [vmem:[%s1617_s7 + $0x140] ss:$8 sps:$4 sm:$0xff]   ;;  %v1297_v25 = vld [vmem:[%s1617_s7 + $0x154] ss:$8 sps:$4 sm:$0xff]   ;;  %v1300_v27 = vld [vmem:[%s1617_s7 + $0x150] ss:$8 sps:$4 sm:$0xff]  }
  0x60   : > { %978 = vmatprep.subr.bf16.mxu0 %v1279_v13  ;;  %v1301_v28 = vld [vmem:[%s1617_s7 + $0x64] ss:$8 sps:$4 sm:$0xff]   ;;  %v1305_v30 = vld [vmem:[%s1617_s7 + $0x60] ss:$8 sps:$4 sm:$0xff]   ;;  %v1307_v32 = vld [vmem:[%s1617_s7 + $0x74] ss:$8 sps:$4 sm:$0xff]  }
  0x61   : > { %v1303_v29 = vld [vmem:[%s1617_s7 + $0x164] ss:$8 sps:$4 sm:$0xff]   ;;  %v1306_v31 = vld [vmem:[%s1617_s7 + $0x160] ss:$8 sps:$4 sm:$0xff]   ;;  %v1309_v33 = vld [vmem:[%s1617_s7 + $0x174] ss:$8 sps:$4 sm:$0xff]  }
  0x62   : > { %938 = vmatpush1.bf16.msra.mxu1 %v1281_v14  ;;  %v1311_v34 = vld [vmem:[%s1617_s7 + $0x70] ss:$8 sps:$4 sm:$0xff]   ;;  %v1313_v36 = vld [vmem:[%s1617_s7 + $0x84] ss:$8 sps:$4 sm:$0xff]   ;;  %v1317_v38 = vld [vmem:[%s1617_s7 + $0x80] ss:$8 sps:$4 sm:$0xff]  }
  0x63   : > { %979 = vmatpush1.bf16.msra.mxu0 %v1282_v15  ;;  %939 = vmatprep.subr.bf16.mxu1 %v1283_v16  ;;  %v1312_v35 = vld [vmem:[%s1617_s7 + $0x170] ss:$8 sps:$4 sm:$0xff]   ;;  %v1315_v37 = vld [vmem:[%s1617_s7 + $0x184] ss:$8 sps:$4 sm:$0xff]   ;;  %v1318_v39 = vld [vmem:[%s1617_s7 + $0x180] ss:$8 sps:$4 sm:$0xff]  }
  0x64   : > { %980 = vmatprep.subr.bf16.mxu0 %v1285_v17  ;;  %v1319_v40 = vld [vmem:[%s1617_s7 + $0x94] ss:$8 sps:$4 sm:$0xff]   ;;  %v1323_v42 = vld [vmem:[%s1617_s7 + $0x90] ss:$8 sps:$4 sm:$0xff]   ;;  %v1325_v44 = vld [vmem:[%s1617_s7 + $0xa4] ss:$8 sps:$4 sm:$0xff]  }
  0x65   : > { %v1321_v41 = vld [vmem:[%s1617_s7 + $0x194] ss:$8 sps:$4 sm:$0xff]   ;;  %v1324_v43 = vld [vmem:[%s1617_s7 + $0x190] ss:$8 sps:$4 sm:$0xff]   ;;  %v1327_v45 = vld [vmem:[%s1617_s7 + $0x1a4] ss:$8 sps:$4 sm:$0xff]  }
  0x66   : > { %940 = vmatpush1.bf16.msra.mxu1 %v1287_v18  ;;  %v1329_v46 = vld [vmem:[%s1617_s7 + $0xa0] ss:$8 sps:$4 sm:$0xff]   ;;  %v1331_v48 = vld [vmem:[%s1617_s7 + $0xb4] ss:$8 sps:$4 sm:$0xff]   ;;  %v1335_v50 = vld [vmem:[%s1617_s7 + $0xb0] ss:$8 sps:$4 sm:$0xff]  }
  0x67   : > { %981 = vmatpush1.bf16.msra.mxu0 %v1288_v19  ;;  %941 = vmatprep.subr.bf16.mxu1 %v1289_v20  ;;  %v1330_v47 = vld [vmem:[%s1617_s7 + $0x1a0] ss:$8 sps:$4 sm:$0xff]   ;;  %v1333_v49 = vld [vmem:[%s1617_s7 + $0x1b4] ss:$8 sps:$4 sm:$0xff]   ;;  %v1336_v51 = vld [vmem:[%s1617_s7 + $0x1b0] ss:$8 sps:$4 sm:$0xff]  }
  0x68   : > { %982 = vmatprep.subr.bf16.mxu0 %v1291_v21  ;;  %v1337_v52 = vld [vmem:[%s1617_s7 + $0xc4] ss:$8 sps:$4 sm:$0xff]   ;;  %v1341_v54 = vld [vmem:[%s1617_s7 + $0xc0] ss:$8 sps:$4 sm:$0xff]   ;;  %v1343_v56 = vld [vmem:[%s1617_s7 + $0xd4] ss:$8 sps:$4 sm:$0xff]  }
  0x69   : > { %v1339_v53 = vld [vmem:[%s1617_s7 + $0x1c4] ss:$8 sps:$4 sm:$0xff]   ;;  %v1342_v55 = vld [vmem:[%s1617_s7 + $0x1c0] ss:$8 sps:$4 sm:$0xff]   ;;  %v1345_v57 = vld [vmem:[%s1617_s7 + $0x1d4] ss:$8 sps:$4 sm:$0xff]  }
  0x6a   : > { %942 = vmatpush1.bf16.msra.mxu1 %v1293_v22  ;;  %v1347_v58 = vld [vmem:[%s1617_s7 + $0xd0] ss:$8 sps:$4 sm:$0xff]   ;;  %v1349_v60 = vld [vmem:[%s1617_s7 + $0xe4] ss:$8 sps:$4 sm:$0xff]   ;;  %v1353_v62 = vld [vmem:[%s1617_s7 + $0xe0] ss:$8 sps:$4 sm:$0xff]  }
  0x6b   : > { %983 = vmatpush1.bf16.msra.mxu0 %v1294_v23  ;;  %943 = vmatprep.subr.bf16.mxu1 %v1295_v24  ;;  %v1348_v59 = vld [vmem:[%s1617_s7 + $0x1d0] ss:$8 sps:$4 sm:$0xff]   ;;  %v1351_v61 = vld [vmem:[%s1617_s7 + $0x1e4] ss:$8 sps:$4 sm:$0xff]   ;;  %v1354_v63 = vld [vmem:[%s1617_s7 + $0x1e0] ss:$8 sps:$4 sm:$0xff]  }
  0x6c   : > { %984 = vmatprep.subr.bf16.mxu0 %v1297_v25  ;;  %v1355_v2 = vld [vmem:[%s1617_s7 + $0xf4] ss:$8 sps:$4 sm:$0xff]   ;;  %v1359_v4 = vld [vmem:[%s1617_s7 + $0xf0] ss:$8 sps:$4 sm:$0xff]   ;;  %s1720_s8 = smov (!%p507_p9, %s1145_s8), 7  ;;  %v590_v9 = vshrl.u32 %v589_v8, 7 }
  0x6d   : > { %v1357_v3 = vld [vmem:[%s1617_s7 + $0x1f4] ss:$8 sps:$4 sm:$0xff]   ;;  %v1360_v5 = vld [vmem:[%s1617_s7 + $0x1f0] ss:$8 sps:$4 sm:$0xff]   ;;  %s509_s11 = scalar_lea.vmem %s1711_s2, %s1720_s8  ;;  %s1147_s12 = sshll.u32 %s1720_s8, 2 }
  0x6e   : > { %944 = vmatpush1.bf16.msra.mxu1 %v1299_v26  ;;  %v591_v10 = vsub.s32 0, %v590_v9  ;;  %v587_v11 = vld [vmem:[%s509_s11] sm:$0x3]  ;;  %v595_v12 = vsub.s32 1, %v590_v9  ;;  %s519_s19 = scalar_lea.vmem %s1712_s3, %s1147_s12 }
  0x6f   : > { %985 = vmatpush1.bf16.msra.mxu0 %v1300_v27  ;;  %945 = vmatprep.subr.bf16.mxu1 %v1301_v28 }
  0x70   : > { %986 = vmatprep.subr.bf16.mxu0 %v1303_v29  ;;  %v592_v0 = vrot.slane %v587_v11, %v591_v10  ;;  %v596_v13 = vrot.slane %v587_v11, %v595_v12 }
  0x72   : > { %946 = vmatpush1.bf16.msra.mxu1 %v1305_v30 }
  0x73   : > { %987 = vmatpush1.bf16.msra.mxu0 %v1306_v31  ;;  %947 = vmatprep.subr.bf16.mxu1 %v1307_v32 }
  0x74   : > { %988 = vmatprep.subr.bf16.mxu0 %v1309_v33 }
  0x76   : > { %948 = vmatpush1.bf16.msra.mxu1 %v1311_v34 }
  0x77   : > { %989 = vmatpush1.bf16.msra.mxu0 %v1312_v35  ;;  %949 = vmatprep.subr.bf16.mxu1 %v1313_v36 }
  0x78   : > { %990 = vmatprep.subr.bf16.mxu0 %v1315_v37 }
  0x7a   : > { %950 = vmatpush1.bf16.msra.mxu1 %v1317_v38 }
  0x7b   : > { %991 = vmatpush1.bf16.msra.mxu0 %v1318_v39  ;;  %951 = vmatprep.subr.bf16.mxu1 %v1319_v40 }
  0x7c   : > { %992 = vmatprep.subr.bf16.mxu0 %v1321_v41 }
  0x7e   : > { %952 = vmatpush1.bf16.msra.mxu1 %v1323_v42 }
  0x7f   : > { %993 = vmatpush1.bf16.msra.mxu0 %v1324_v43  ;;  %953 = vmatprep.subr.bf16.mxu1 %v1325_v44 }
  0x80   : > { %994 = vmatprep.subr.bf16.mxu0 %v1327_v45 }
  0x82   : > { %954 = vmatpush1.bf16.msra.mxu1 %v1329_v46 }
  0x83   : > { %995 = vmatpush1.bf16.msra.mxu0 %v1330_v47  ;;  %955 = vmatprep.subr.bf16.mxu1 %v1331_v48 }
  0x84   : > { %996 = vmatprep.subr.bf16.mxu0 %v1333_v49 }
  0x86   : > { %956 = vmatpush1.bf16.msra.mxu1 %v1335_v50 }
  0x87   : > { %997 = vmatpush1.bf16.msra.mxu0 %v1336_v51  ;;  %957 = vmatprep.subr.bf16.mxu1 %v1337_v52 }
  0x88   : > { %998 = vmatprep.subr.bf16.mxu0 %v1339_v53 }
  0x8a   : > { %958 = vmatpush1.bf16.msra.mxu1 %v1341_v54 }
  0x8b   : > { %999 = vmatpush1.bf16.msra.mxu0 %v1342_v55  ;;  %959 = vmatprep.subr.bf16.mxu1 %v1343_v56 }
  0x8c   : > { %1000 = vmatprep.subr.bf16.mxu0 %v1345_v57 }
  0x8e   : > { %960 = vmatpush1.bf16.msra.mxu1 %v1347_v58 }
  0x8f   : > { %1001 = vmatpush1.bf16.msra.mxu0 %v1348_v59  ;;  %961 = vmatprep.subr.bf16.mxu1 %v1349_v60 }
  0x90   : > { %1002 = vmatprep.subr.bf16.mxu0 %v1351_v61 }
  0x92   : > { %962 = vmatpush1.bf16.msra.mxu1 %v1353_v62 }
  0x93   : > { %1003 = vmatpush1.bf16.msra.mxu0 %v1354_v63  ;;  %963 = vmatprep.subr.bf16.mxu1 %v1355_v2 }
  0x94   : > { %1004 = vmatprep.subr.bf16.mxu0 %v1357_v3 }
  0x96   : > { %964 = vmatpush1.bf16.msra.mxu1 %v1359_v4 }
  0x97   : > { %1005 = vmatpush1.bf16.msra.mxu0 %v1360_v5 }
  0x99   : > { %966 = vmatmul.mubr.bf16.vlgmr.msra.gmra.mrb[0].mxu1 %v1148_v6 }
  0x9a   : > { %1007 = vmatmul.mubr.bf16.vlgmr.msra.gmra.mrb[0].mxu0 %v1150_v7 }
 0x16c   : > { %v967_v14 = vpop.f32.mrb[0].mxu1 }
 0x16d   : > { %v1008_v1 = vpop.f32.mrb[0].mxu0  ;;  %v968_v15 = vadd.f32 %v967_v14, %v592_v0  ;;  %v969_v16 = vpop.f32.mrb[1].mxu1 }
 0x16e   : > { %v1010_v17 = vpop.f32.mrb[1].mxu0  ;;  %v970_v18 = vadd.f32 %v969_v16, %v596_v13  ;;  %v971_v19 = vpop.f32.mrb[2].mxu1 }
 0x16f   : > { %v1012_v20 = vpop.f32.mrb[2].mxu0  ;;  %v1009_v21 = vadd.f32 %v1008_v1, %v968_v15  ;;  %v972_v22 = vpop.f32.mrb[3].mxu1 }
 0x170   : > { %v1013_v23 = vpop.f32.mrb[3].mxu0  ;;  %v1011_v24 = vadd.f32 %v1010_v17, %v970_v18 }
 0x172   : > { %v1220_v25 = vpack.c.bf16 %v1011_v24, %v1009_v21 }
 0x174   : > { %1023 = vst [vmem:[%s519_s19] sm:$0xff] %v1220_v25 }
 0x175 PF: > { %s13_s16 = sadd.s32 1, %s1403_s16   ;;  %s1713_s12 = smov %s1391_s13 }
 0x176   : > { %p10_p10 = scmp.ge.s32.totalorder %s13_s16, 6   ;;  %s1714_s13 = smov %s1460_s20 }
 0x177   : > { %s1715_s14 = smov %s1399_s15  ;;  %s1716_s15 = smov %s1718_s17 }
 0x178   :  { %12 = sbr.rel (!%p10_p10) target bundleno = 3 (0x3), region = 111 }

// kernel: _lambda_.26
= control target key start
LH: loop header
LB: loop body
LE: loop exit
PB: predicated region body
PF: predicated region fallthrough
CT: control target
= control target key end

     0   :  { %s1140_s18 = smov 0   ;;  %s1142_s19 = smov 0   ;;  %s1325_s0 = inlined_call_operand.vmem [shape: bf16[8,256], index: 0, kind: input, shape index: {}]   ;;  %s1326_s1 = inlined_call_operand.vmem [shape: bf16[256,1024], index: 1, kind: input, shape index: {}]   ;;  %s1327_s2 = inlined_call_operand.vmem [shape: f32[1,1024], index: 2, kind: input, shape index: {}]   ;;  %s1328_s3 = inlined_call_operand.vmem [shape: bf16[8,1], index: 3, kind: input, shape index: {}]   ;;  %s1329_s4 = inlined_call_operand.vmem [shape: bf16[8,1024], index: 4, kind: input, shape index: {}]   ;;  %s1330_s5 = inlined_call_operand.vmem [shape: bf16[8,1024], index: 5, kind: output, shape index: {}]  }
   0x1   :  { %s1144_s20 = smov 0   ;;  %s1146_s21 = smov 0  }
   0x2   :  { %s1148_s22 = smov 0  }
   0x3 LB: > { %s27_s23 = sadd.s32 1, %s1103_s21  ;;  %p67_p1 = scmp.ne.s32.totalorder %s1095_s19, %s1091_s18  ;;  %s1107_s22 = sphi %s1148_s22, %s15_s22   ;;  %s1103_s21 = sphi %s1146_s21, %s1334_s21   ;;  %s1099_s20 = sphi %s1144_s20, %s1333_s20   ;;  %s1095_s19 = sphi %s1142_s19, %s1332_s19   ;;  %s1091_s18 = sphi %s1140_s18, %s1331_s18  }
   0x4   : > { %p29_p0 = scmp.ge.s32.totalorder %s27_s23, 4  ;;  %p68_p2 = scmp.eq.s32.totalorder %s1107_s22, 0 }
   0x5   : > { %s60_s25 = sadd.s32 1, %s1095_s19  ;;  %p927_p5 = scmp.ge.s32.totalorder %s1107_s22, 4 }
   0x6   : > { %s1336_s23 = smov (%p29_p0, %s27_s23), 0  ;;  %p69_p3 = por %p68_p2, %p67_p1 }
   0x7   : > { %s57_s24 = ssub.s32 %s1103_s21, %s1336_s23  ;;  %216 = sbr.rel (%p927_p5) target bundleno = 50 (0x32), region = 24 }
   0x8   : > { %p58_p4 = scmp.eq.s32.totalorder %s57_s24, 0 }
   0xa   : > { %s1175_s26 = scalar_select %p58_p4, %s1095_s19, %s60_s25  }
   0xe   : > { %219 = sbr.rel (!%p69_p3) target bundleno = 50 (0x32), region = 28  ;;  %s221_s27 = sand.u32 (%p69_p3), 1, %s1095_s19  }
   0xf   : > { %s975_s28 = sshll.u32 (%p69_p3), %s1103_s21, 3  ;;  %s928_s29 = sshll.u32 (%p69_p3), %s221_s27, 8 }
  0x10   : > { %s1183_s7 = scalar_lea.vmem (%p69_p3), %s1326_s1, %s975_s28  ;;  %s1188_s8 = scalar_lea.vmem (%p69_p3), [#allocation2], %s928_s29 }
  0x11   : > { %v316_v0 = vld [vmem:[%s1183_s7] sm:$0xff] (%p69_p3) }
  0x12   : > { %v318_v1 = vld [vmem:[%s1183_s7 + $0x20] sm:$0xff] (%p69_p3)  ;;  %317 = vst [vmem:[%s1188_s8] sm:$0xff] (%p69_p3), %v316_v0 }
  0x13   : > { %v320_v2 = vld [vmem:[%s1183_s7 + $0x40] sm:$0xff] (%p69_p3)  ;;  %319 = vst [vmem:[%s1188_s8 + $0x8] sm:$0xff] (%p69_p3), %v318_v1 }
  0x14   : > { %321 = vst [vmem:[%s1188_s8 + $0x10] sm:$0xff] (%p69_p3), %v320_v2  ;;  %v322_v3 = vld [vmem:[%s1183_s7 + $0x60] sm:$0xff] (%p69_p3) }
  0x15   : > { %v324_v4 = vld [vmem:[%s1183_s7 + $0x80] sm:$0xff]  ;;  %323 = vst [vmem:[%s1188_s8 + $0x18] sm:$0xff] %v322_v3 }
  0x16   : > { %v326_v5 = vld [vmem:[%s1183_s7 + $0xa0] sm:$0xff]  ;;  %325 = vst [vmem:[%s1188_s8 + $0x20] sm:$0xff] %v324_v4 }
  0x17   : > { %327 = vst [vmem:[%s1188_s8 + $0x28] sm:$0xff] %v326_v5  ;;  %v328_v6 = vld [vmem:[%s1183_s7 + $0xc0] sm:$0xff] }
  0x18   : > { %v330_v7 = vld [vmem:[%s1183_s7 + $0xe0] sm:$0xff]  ;;  %329 = vst [vmem:[%s1188_s8 + $0x30] sm:$0xff] %v328_v6 }
  0x19   : > { %v332_v8 = vld [vmem:[%s1183_s7 + $0x100] sm:$0xff]  ;;  %331 = vst [vmem:[%s1188_s8 + $0x38] sm:$0xff] %v330_v7 }
  0x1a   : > { %333 = vst [vmem:[%s1188_s8 + $0x40] sm:$0xff] %v332_v8  ;;  %v334_v9 = vld [vmem:[%s1183_s7 + $0x120] sm:$0xff] }
  0x1b   : > { %v336_v10 = vld [vmem:[%s1183_s7 + $0x140] sm:$0xff]  ;;  %335 = vst [vmem:[%s1188_s8 + $0x48] sm:$0xff] %v334_v9 }
  0x1c   : > { %v338_v11 = vld [vmem:[%s1183_s7 + $0x160] sm:$0xff]  ;;  %337 = vst [vmem:[%s1188_s8 + $0x50] sm:$0xff] %v336_v10 }
  0x1d   : > { %339 = vst [vmem:[%s1188_s8 + $0x58] sm:$0xff] %v338_v11  ;;  %v340_v12 = vld [vmem:[%s1183_s7 + $0x180] sm:$0xff] }
  0x1e   : > { %v342_v13 = vld [vmem:[%s1183_s7 + $0x1a0] sm:$0xff]  ;;  %341 = vst [vmem:[%s1188_s8 + $0x60] sm:$0xff] %v340_v12 }
  0x1f   : > { %v344_v14 = vld [vmem:[%s1183_s7 + $0x1c0] sm:$0xff]  ;;  %343 = vst [vmem:[%s1188_s8 + $0x68] sm:$0xff] %v342_v13 }
  0x20   : > { %345 = vst [vmem:[%s1188_s8 + $0x70] sm:$0xff] %v344_v14  ;;  %v346_v15 = vld [vmem:[%s1183_s7 + $0x1e0] sm:$0xff] }
  0x21   : > { %v348_v16 = vld [vmem:[%s1183_s7 + $0x200] sm:$0xff]  ;;  %347 = vst [vmem:[%s1188_s8 + $0x78] sm:$0xff] %v346_v15 }
  0x22   : > { %v350_v17 = vld [vmem:[%s1183_s7 + $0x220] sm:$0xff]  ;;  %349 = vst [vmem:[%s1188_s8 + $0x80] sm:$0xff] %v348_v16 }
  0x23   : > { %351 = vst [vmem:[%s1188_s8 + $0x88] sm:$0xff] %v350_v17  ;;  %v352_v18 = vld [vmem:[%s1183_s7 + $0x240] sm:$0xff] }
  0x24   : > { %v354_v19 = vld [vmem:[%s1183_s7 + $0x260] sm:$0xff]  ;;  %353 = vst [vmem:[%s1188_s8 + $0x90] sm:$0xff] %v352_v18 }
  0x25   : > { %v356_v20 = vld [vmem:[%s1183_s7 + $0x280] sm:$0xff]  ;;  %355 = vst [vmem:[%s1188_s8 + $0x98] sm:$0xff] %v354_v19 }
  0x26   : > { %357 = vst [vmem:[%s1188_s8 + $0xa0] sm:$0xff] %v356_v20  ;;  %v358_v21 = vld [vmem:[%s1183_s7 + $0x2a0] sm:$0xff] }
  0x27   : > { %v360_v22 = vld [vmem:[%s1183_s7 + $0x2c0] sm:$0xff]  ;;  %359 = vst [vmem:[%s1188_s8 + $0xa8] sm:$0xff] %v358_v21 }
  0x28   : > { %v362_v23 = vld [vmem:[%s1183_s7 + $0x2e0] sm:$0xff]  ;;  %361 = vst [vmem:[%s1188_s8 + $0xb0] sm:$0xff] %v360_v22 }
  0x29   : > { %363 = vst [vmem:[%s1188_s8 + $0xb8] sm:$0xff] %v362_v23  ;;  %v364_v24 = vld [vmem:[%s1183_s7 + $0x300] sm:$0xff] }
  0x2a   : > { %v366_v25 = vld [vmem:[%s1183_s7 + $0x320] sm:$0xff]  ;;  %365 = vst [vmem:[%s1188_s8 + $0xc0] sm:$0xff] %v364_v24 }
  0x2b   : > { %v368_v26 = vld [vmem:[%s1183_s7 + $0x340] sm:$0xff]  ;;  %367 = vst [vmem:[%s1188_s8 + $0xc8] sm:$0xff] %v366_v25 }
  0x2c   : > { %369 = vst [vmem:[%s1188_s8 + $0xd0] sm:$0xff] %v368_v26  ;;  %v370_v27 = vld [vmem:[%s1183_s7 + $0x360] sm:$0xff] }
  0x2d   : > { %v372_v28 = vld [vmem:[%s1183_s7 + $0x380] sm:$0xff]  ;;  %371 = vst [vmem:[%s1188_s8 + $0xd8] sm:$0xff] %v370_v27 }
  0x2e   : > { %v374_v29 = vld [vmem:[%s1183_s7 + $0x3a0] sm:$0xff]  ;;  %373 = vst [vmem:[%s1188_s8 + $0xe0] sm:$0xff] %v372_v28 }
  0x2f   : > { %375 = vst [vmem:[%s1188_s8 + $0xe8] sm:$0xff] %v374_v29  ;;  %v376_v30 = vld [vmem:[%s1183_s7 + $0x3c0] sm:$0xff] }
  0x30   : > { %v378_v31 = vld [vmem:[%s1183_s7 + $0x3e0] sm:$0xff]  ;;  %377 = vst [vmem:[%s1188_s8 + $0xf0] sm:$0xff] %v376_v30 }
  0x31   : > { %379 = vst [vmem:[%s1188_s8 + $0xf8] sm:$0xff] %v378_v31 }
  0x32 PF: > { %p931_p6 = scmp.ge.s32.totalorder %s1107_s22, 1  ;;  %p405_p7 = scmp.lt.s32.totalorder %s1107_s22, 5 }
  0x34   : > { %p406_p8 = pnand %p931_p6, %p405_p7 }
  0x35   : > { %s412_s9 = sand.u32 (!%p406_p8), 1, %s1091_s18   ;;  %v1257_v32 = vld [vmem:[%s1325_s0] sm:$0xff] (!%p406_p8)  ;;  %v1109_v35 = vmov (!%p406_p8), 0   ;;  %s933_s16 = sshll.u32 (!%p406_p8), %s1099_s20, 1  ;;  %v535_v6 = vlaneseq (!%p406_p8) }
  0x36   : > { %409 = sbr.rel (%p406_p8) target bundleno = 345 (0x159), region = 74  ;;  %v753_v33 = vld [vmem:[%s1328_s3] sm:$0xf] (!%p406_p8)  ;;  %s932_s14 = sshll.u32 (!%p406_p8), %s412_s9, 8  ;;  %v939_v34 = vcombine.high (!%p406_p8), %v1257_v32, %v1257_v32  ;;  %1018 = vset.pattern.permute.xlu0 (!%p406_p8), %v1109_v35  ;;  %v938_v5 = vcombine.low (!%p406_p8), %v1257_v32, %v1257_v32 }
  0x37   : > { %v754_v36 = vunpack.c.l.bf16 (!%p406_p8), %v753_v33  ;;  %s1264_s15 = scalar_lea.vmem (!%p406_p8), [#allocation2], %s932_s14  ;;  %p472_p9 = scmp.lt.s32.totalorder (!%p406_p8), %s933_s16, 7  ;;  %v536_v7 = vshrl.u32 (!%p406_p8), %v535_v6, 7 }
  0x38   : > { %v1019_v37 = vld [vmem:[%s1264_s15 + $0x4] ss:$8 sps:$4 sm:$0xff] (!%p406_p8)   ;;  %744 = vmatprep.mubr.bf16.mxu0 (!%p406_p8), %v939_v34  ;;  %v1021_v38 = vld [vmem:[%s1264_s15] ss:$8 sps:$4 sm:$0xff] (!%p406_p8)   ;;  %v1022_v39 = vld [vmem:[%s1264_s15 + $0x14] ss:$8 sps:$4 sm:$0xff] (!%p406_p8)  }
  0x39   : > { %757 = vperm.xlu0 (!%p406_p8), %1018, %v754_v36   ;;  %712 = vmatprep.subr.bf16.mxu0 (!%p406_p8), %v1019_v37  ;;  %v1024_v40 = vld [vmem:[%s1264_s15 + $0x10] ss:$8 sps:$4 sm:$0xff] (!%p406_p8)   ;;  %v1025_v41 = vld [vmem:[%s1264_s15 + $0x24] ss:$8 sps:$4 sm:$0xff] (!%p406_p8)   ;;  %v1027_v42 = vld [vmem:[%s1264_s15 + $0x20] ss:$8 sps:$4 sm:$0xff] (!%p406_p8)  }
  0x3a   : > { %713 = vmatpush1.bf16.msra.mxu0 (!%p406_p8), %v1021_v38  ;;  %v1028_v43 = vld [vmem:[%s1264_s15 + $0x34] ss:$8 sps:$4 sm:$0xff] (!%p406_p8)   ;;  %v1030_v44 = vld [vmem:[%s1264_s15 + $0x30] ss:$8 sps:$4 sm:$0xff] (!%p406_p8)   ;;  %v1031_v45 = vld [vmem:[%s1264_s15 + $0x44] ss:$8 sps:$4 sm:$0xff] (!%p406_p8)  }
  0x3b   : > { %714 = vmatprep.subr.bf16.mxu0 (!%p406_p8), %v1022_v39  ;;  %v1033_v46 = vld [vmem:[%s1264_s15 + $0x40] ss:$8 sps:$4 sm:$0xff] (!%p406_p8)   ;;  %v1034_v47 = vld [vmem:[%s1264_s15 + $0x54] ss:$8 sps:$4 sm:$0xff] (!%p406_p8)   ;;  %v1036_v48 = vld [vmem:[%s1264_s15 + $0x50] ss:$8 sps:$4 sm:$0xff] (!%p406_p8)  }
  0x3c   : > { %v1037_v49 = vld [vmem:[%s1264_s15 + $0x64] ss:$8 sps:$4 sm:$0xff] (!%p406_p8)   ;;  %v1039_v50 = vld [vmem:[%s1264_s15 + $0x60] ss:$8 sps:$4 sm:$0xff] (!%p406_p8)   ;;  %v1040_v51 = vld [vmem:[%s1264_s15 + $0x74] ss:$8 sps:$4 sm:$0xff] (!%p406_p8)  }
  0x3d   : > { %v1042_v52 = vld [vmem:[%s1264_s15 + $0x70] ss:$8 sps:$4 sm:$0xff]   ;;  %v1043_v53 = vld [vmem:[%s1264_s15 + $0x84] ss:$8 sps:$4 sm:$0xff]   ;;  %v1045_v54 = vld [vmem:[%s1264_s15 + $0x80] ss:$8 sps:$4 sm:$0xff]  }
  0x3e   : > { %715 = vmatpush1.bf16.msra.mxu0 %v1024_v40  ;;  %v1046_v55 = vld [vmem:[%s1264_s15 + $0x94] ss:$8 sps:$4 sm:$0xff]   ;;  %v1048_v56 = vld [vmem:[%s1264_s15 + $0x90] ss:$8 sps:$4 sm:$0xff]   ;;  %v1049_v57 = vld [vmem:[%s1264_s15 + $0xa4] ss:$8 sps:$4 sm:$0xff]  }
  0x3f   : > { %716 = vmatprep.subr.bf16.mxu0 %v1025_v41  ;;  %v1051_v58 = vld [vmem:[%s1264_s15 + $0xa0] ss:$8 sps:$4 sm:$0xff]   ;;  %v1052_v59 = vld [vmem:[%s1264_s15 + $0xb4] ss:$8 sps:$4 sm:$0xff]   ;;  %v1054_v60 = vld [vmem:[%s1264_s15 + $0xb0] ss:$8 sps:$4 sm:$0xff]  }
  0x40   : > { %v1055_v61 = vld [vmem:[%s1264_s15 + $0xc4] ss:$8 sps:$4 sm:$0xff]   ;;  %v1057_v62 = vld [vmem:[%s1264_s15 + $0xc0] ss:$8 sps:$4 sm:$0xff]   ;;  %v1058_v63 = vld [vmem:[%s1264_s15 + $0xd4] ss:$8 sps:$4 sm:$0xff]  }
  0x41   : > { %v1060_v0 = vld [vmem:[%s1264_s15 + $0xd0] ss:$8 sps:$4 sm:$0xff]   ;;  %v1061_v1 = vld [vmem:[%s1264_s15 + $0xe4] ss:$8 sps:$4 sm:$0xff]   ;;  %v1063_v2 = vld [vmem:[%s1264_s15 + $0xe0] ss:$8 sps:$4 sm:$0xff]  }
  0x42   : > { %717 = vmatpush1.bf16.msra.mxu0 %v1027_v42  ;;  %v1064_v3 = vld [vmem:[%s1264_s15 + $0xf4] ss:$8 sps:$4 sm:$0xff]   ;;  %v1066_v4 = vld [vmem:[%s1264_s15 + $0xf0] ss:$8 sps:$4 sm:$0xff]   ;;  %s1338_s16 = smov (!%p472_p9, %s933_s16), 7  ;;  %v537_v8 = vsub.s32 0, %v536_v7 }
  0x43   : > { %718 = vmatprep.subr.bf16.mxu0 %v1028_v43  ;;  %s474_s24 = scalar_lea.vmem %s1327_s2, %s1338_s16  ;;  %s935_s25 = sshll.u32 %s1338_s16, 2  ;;  %v541_v10 = vsub.s32 1, %v536_v7 }
  0x44   : > { %v533_v9 = vld [vmem:[%s474_s24] sm:$0x3]  ;;  %s488_s29 = scalar_lea.vmem %s1329_s4, %s935_s25  ;;  %s498_s6 = scalar_lea.vmem %s1330_s5, %s935_s25 }
  0x45   : > { %v538_v11 = vrot.slane %v533_v9, %v537_v8  ;;  %v542_v12 = vrot.slane %v533_v9, %v541_v10  ;;  %v762_v13 = vld [vmem:[%s488_s29] sm:$0xff] }
  0x46   : > { %719 = vmatpush1.bf16.msra.mxu0 %v1030_v44  ;;  %v763_v18 = vunpack.c.l.bf16 %v762_v13  ;;  %v764_v20 = vunpack.c.h.bf16 %v762_v13 }
  0x47   : > { %720 = vmatprep.subr.bf16.mxu0 %v1031_v45 }
  0x4a   : > { %721 = vmatpush1.bf16.msra.mxu0 %v1033_v46 }
  0x4b   : > { %722 = vmatprep.subr.bf16.mxu0 %v1034_v47 }
  0x4e   : > { %723 = vmatpush1.bf16.msra.mxu0 %v1036_v48 }
  0x4f   : > { %724 = vmatprep.subr.bf16.mxu0 %v1037_v49 }
  0x52   : > { %725 = vmatpush1.bf16.msra.mxu0 %v1039_v50 }
  0x53   : > { %726 = vmatprep.subr.bf16.mxu0 %v1040_v51 }
  0x56   : > { %727 = vmatpush1.bf16.msra.mxu0 %v1042_v52 }
  0x57   : > { %728 = vmatprep.subr.bf16.mxu0 %v1043_v53 }
  0x5a   : > { %729 = vmatpush1.bf16.msra.mxu0 %v1045_v54 }
  0x5b   : > { %730 = vmatprep.subr.bf16.mxu0 %v1046_v55 }
  0x5e   : > { %731 = vmatpush1.bf16.msra.mxu0 %v1048_v56 }
  0x5f   : > { %732 = vmatprep.subr.bf16.mxu0 %v1049_v57 }
  0x62   : > { %733 = vmatpush1.bf16.msra.mxu0 %v1051_v58 }
  0x63   : > { %734 = vmatprep.subr.bf16.mxu0 %v1052_v59 }
  0x66   : > { %735 = vmatpush1.bf16.msra.mxu0 %v1054_v60 }
  0x67   : > { %736 = vmatprep.subr.bf16.mxu0 %v1055_v61 }
  0x6a   : > { %737 = vmatpush1.bf16.msra.mxu0 %v1057_v62 }
  0x6b   : > { %738 = vmatprep.subr.bf16.mxu0 %v1058_v63 }
  0x6e   : > { %739 = vmatpush1.bf16.msra.mxu0 %v1060_v0 }
  0x6f   : > { %740 = vmatprep.subr.bf16.mxu0 %v1061_v1 }
  0x72   : > { %741 = vmatpush1.bf16.msra.mxu0 %v1063_v2 }
  0x73   : > { %742 = vmatprep.subr.bf16.mxu0 %v1064_v3 }
  0x76   : > { %743 = vmatpush1.bf16.msra.mxu0 %v1066_v4 }
  0x79   : > { %745 = vmatmul.mubr.bf16.vlgmr.msra.gmra.mrb[0].mxu0 %v938_v5 }
  0xb8   : > { %v758_v15 = vpop.permute.xlu0 %757 }
 0x14c   : > { %v746_v14 = vpop.f32.mrb[0].mxu0 }
 0x14d   : > { %v747_v16 = vadd.f32 %v746_v14, %v538_v11  ;;  %v748_v17 = vpop.f32.mrb[1].mxu0 }
 0x14e   : > { %v749_v19 = vadd.f32 %v748_v17, %v542_v12  ;;  %v750_v21 = vpop.f32.mrb[2].mxu0 }
 0x14f   : > { %v760_v22 = vmul.f32 %v758_v15, %v747_v16  ;;  %v751_v23 = vpop.f32.mrb[3].mxu0 }
 0x150   : > { %v761_v24 = vmul.f32 %v758_v15, %v749_v19 }
 0x151   : > { %v765_v25 = vadd.f32 %v763_v18, %v760_v22 }
 0x152   : > { %v766_v26 = vadd.f32 %v764_v20, %v761_v24 }
 0x153   : > { %v767_v27 = vmax.f32 %v765_v25, 0.0 }
 0x154   : > { %v768_v28 = vmax.f32 %v766_v26, 0.0 }
 0x156   : > { %v976_v29 = vpack.c.bf16 %v768_v28, %v767_v27 }
 0x158   : > { %777 = vst [vmem:[%s498_s6] sm:$0xff] %v976_v29 }
 0x159 PF: > { %s15_s22 = sadd.s32 1, %s1107_s22   ;;  %s1331_s18 = smov %s1095_s19 }
 0x15a   : > { %p12_p10 = scmp.ge.s32.totalorder %s15_s22, 6   ;;  %s1332_s19 = smov %s1175_s26 }
 0x15b   : > { %s1333_s20 = smov %s1103_s21  ;;  %s1334_s21 = smov %s1336_s23 }
 0x15c   :  { %14 = sbr.rel (!%p12_p10) target bundleno = 3 (0x3), region = 125 }

// kernel: _lambda_.29
= control target key start
LH: loop header
LB: loop body
LE: loop exit
PB: predicated region body
PF: predicated region fallthrough
CT: control target
= control target key end

     0   :  { %s2353_s12 = smov 0   ;;  %s2355_s13 = smov 0   ;;  %s2858_s0 = inlined_call_operand.vmem [shape: bf16[2,1024], index: 0, kind: input, shape index: {}]   ;;  %s2859_s1 = inlined_call_operand.vmem [shape: bf16[1024,2048], index: 1, kind: input, shape index: {}]   ;;  %s2860_s2 = inlined_call_operand.vmem [shape: f32[1,2048], index: 2, kind: input, shape index: {}]   ;;  %s2861_s3 = inlined_call_operand.vmem [shape: bf16[2,2048], index: 3, kind: output, shape index: {}]  }
   0x1   :  { %s2357_s14 = smov 0   ;;  %s2359_s15 = smov 0  }
   0x2   :  { %s2361_s16 = smov 0  }
   0x3 LB: > { %s25_s17 = sadd.s32 1, %s2326_s15  ;;  %p65_p1 = scmp.ne.s32.totalorder %s2318_s13, %s2314_s12  ;;  %s2330_s16 = sphi %s2361_s16, %s13_s16   ;;  %s2326_s15 = sphi %s2359_s15, %s2865_s15   ;;  %s2322_s14 = sphi %s2357_s14, %s2864_s14   ;;  %s2318_s13 = sphi %s2355_s13, %s2863_s13   ;;  %s2314_s12 = sphi %s2353_s12, %s2862_s12  }
   0x4   : > { %p27_p0 = scmp.ge.s32.totalorder %s25_s17, 8  ;;  %p66_p2 = scmp.eq.s32.totalorder %s2330_s16, 0 }
   0x5   : > { %s58_s19 = sadd.s32 1, %s2318_s13  ;;  %p1905_p5 = scmp.ge.s32.totalorder %s2330_s16, 8 }
   0x6   : > { %s2867_s17 = smov (%p27_p0, %s25_s17), 0  ;;  %p67_p3 = por %p66_p2, %p65_p1 }
   0x7   : > { %s55_s18 = ssub.s32 %s2326_s15, %s2867_s17  ;;  %152 = sbr.rel (%p1905_p5) target bundleno = 146 (0x92), region = 20 }
   0x8   : > { %p56_p4 = scmp.eq.s32.totalorder %s55_s18, 0 }
   0xa   : > { %s2388_s20 = scalar_select %p56_p4, %s2318_s13, %s58_s19  }
   0xe   : > { %155 = sbr.rel (!%p67_p3) target bundleno = 146 (0x92), region = 24  ;;  %s157_s21 = sand.u32 (%p67_p3), 1, %s2318_s13  }
   0xf   : > { %s2045_s22 = sshll.u32 (%p67_p3), %s2326_s15, 3  ;;  %s1906_s23 = sshll.u32 (%p67_p3), %s157_s21, 10 }
  0x10   : > { %s2396_s26 = scalar_lea.vmem (%p67_p3), %s2859_s1, %s2045_s22  ;;  %s2401_s27 = scalar_lea.vmem (%p67_p3), [#allocation2], %s1906_s23 }
  0x11   : > { %v444_v0 = vld [vmem:[%s2396_s26] sm:$0xff] (%p67_p3) }
  0x12   : > { %v446_v1 = vld [vmem:[%s2396_s26 + $0x40] sm:$0xff] (%p67_p3)  ;;  %445 = vst [vmem:[%s2401_s27] sm:$0xff] (%p67_p3), %v444_v0 }
  0x13   : > { %v448_v2 = vld [vmem:[%s2396_s26 + $0x80] sm:$0xff] (%p67_p3)  ;;  %447 = vst [vmem:[%s2401_s27 + $0x8] sm:$0xff] (%p67_p3), %v446_v1 }
  0x14   : > { %449 = vst [vmem:[%s2401_s27 + $0x10] sm:$0xff] (%p67_p3), %v448_v2  ;;  %v450_v3 = vld [vmem:[%s2396_s26 + $0xc0] sm:$0xff] (%p67_p3) }
  0x15   : > { %v452_v4 = vld [vmem:[%s2396_s26 + $0x100] sm:$0xff]  ;;  %451 = vst [vmem:[%s2401_s27 + $0x18] sm:$0xff] %v450_v3 }
  0x16   : > { %v454_v5 = vld [vmem:[%s2396_s26 + $0x140] sm:$0xff]  ;;  %453 = vst [vmem:[%s2401_s27 + $0x20] sm:$0xff] %v452_v4 }
  0x17   : > { %455 = vst [vmem:[%s2401_s27 + $0x28] sm:$0xff] %v454_v5  ;;  %v456_v6 = vld [vmem:[%s2396_s26 + $0x180] sm:$0xff] }
  0x18   : > { %v458_v7 = vld [vmem:[%s2396_s26 + $0x1c0] sm:$0xff]  ;;  %457 = vst [vmem:[%s2401_s27 + $0x30] sm:$0xff] %v456_v6 }
  0x19   : > { %v460_v8 = vld [vmem:[%s2396_s26 + $0x200] sm:$0xff]  ;;  %459 = vst [vmem:[%s2401_s27 + $0x38] sm:$0xff] %v458_v7 }
  0x1a   : > { %461 = vst [vmem:[%s2401_s27 + $0x40] sm:$0xff] %v460_v8  ;;  %v462_v9 = vld [vmem:[%s2396_s26 + $0x240] sm:$0xff] }
  0x1b   : > { %v464_v10 = vld [vmem:[%s2396_s26 + $0x280] sm:$0xff]  ;;  %463 = vst [vmem:[%s2401_s27 + $0x48] sm:$0xff] %v462_v9 }
  0x1c   : > { %v466_v11 = vld [vmem:[%s2396_s26 + $0x2c0] sm:$0xff]  ;;  %465 = vst [vmem:[%s2401_s27 + $0x50] sm:$0xff] %v464_v10 }
  0x1d   : > { %467 = vst [vmem:[%s2401_s27 + $0x58] sm:$0xff] %v466_v11  ;;  %v468_v12 = vld [vmem:[%s2396_s26 + $0x300] sm:$0xff] }
  0x1e   : > { %v470_v13 = vld [vmem:[%s2396_s26 + $0x340] sm:$0xff]  ;;  %469 = vst [vmem:[%s2401_s27 + $0x60] sm:$0xff] %v468_v12 }
  0x1f   : > { %v472_v14 = vld [vmem:[%s2396_s26 + $0x380] sm:$0xff]  ;;  %471 = vst [vmem:[%s2401_s27 + $0x68] sm:$0xff] %v470_v13 }
  0x20   : > { %473 = vst [vmem:[%s2401_s27 + $0x70] sm:$0xff] %v472_v14  ;;  %v474_v15 = vld [vmem:[%s2396_s26 + $0x3c0] sm:$0xff] }
  0x21   : > { %v476_v16 = vld [vmem:[%s2396_s26 + $0x400] sm:$0xff]  ;;  %475 = vst [vmem:[%s2401_s27 + $0x78] sm:$0xff] %v474_v15 }
  0x22   : > { %v478_v17 = vld [vmem:[%s2396_s26 + $0x440] sm:$0xff]  ;;  %477 = vst [vmem:[%s2401_s27 + $0x80] sm:$0xff] %v476_v16 }
  0x23   : > { %479 = vst [vmem:[%s2401_s27 + $0x88] sm:$0xff] %v478_v17  ;;  %v480_v18 = vld [vmem:[%s2396_s26 + $0x480] sm:$0xff] }
  0x24   : > { %v482_v19 = vld [vmem:[%s2396_s26 + $0x4c0] sm:$0xff]  ;;  %481 = vst [vmem:[%s2401_s27 + $0x90] sm:$0xff] %v480_v18 }
  0x25   : > { %v484_v20 = vld [vmem:[%s2396_s26 + $0x500] sm:$0xff]  ;;  %483 = vst [vmem:[%s2401_s27 + $0x98] sm:$0xff] %v482_v19 }
  0x26   : > { %485 = vst [vmem:[%s2401_s27 + $0xa0] sm:$0xff] %v484_v20  ;;  %v486_v21 = vld [vmem:[%s2396_s26 + $0x540] sm:$0xff] }
  0x27   : > { %v488_v22 = vld [vmem:[%s2396_s26 + $0x580] sm:$0xff]  ;;  %487 = vst [vmem:[%s2401_s27 + $0xa8] sm:$0xff] %v486_v21 }
  0x28   : > { %v490_v23 = vld [vmem:[%s2396_s26 + $0x5c0] sm:$0xff]  ;;  %489 = vst [vmem:[%s2401_s27 + $0xb0] sm:$0xff] %v488_v22 }
  0x29   : > { %491 = vst [vmem:[%s2401_s27 + $0xb8] sm:$0xff] %v490_v23  ;;  %v492_v24 = vld [vmem:[%s2396_s26 + $0x600] sm:$0xff] }
  0x2a   : > { %v494_v25 = vld [vmem:[%s2396_s26 + $0x640] sm:$0xff]  ;;  %493 = vst [vmem:[%s2401_s27 + $0xc0] sm:$0xff] %v492_v24 }
  0x2b   : > { %v496_v26 = vld [vmem:[%s2396_s26 + $0x680] sm:$0xff]  ;;  %495 = vst [vmem:[%s2401_s27 + $0xc8] sm:$0xff] %v494_v25 }
  0x2c   : > { %497 = vst [vmem:[%s2401_s27 + $0xd0] sm:$0xff] %v496_v26  ;;  %v498_v27 = vld [vmem:[%s2396_s26 + $0x6c0] sm:$0xff] }
  0x2d   : > { %v500_v28 = vld [vmem:[%s2396_s26 + $0x700] sm:$0xff]  ;;  %499 = vst [vmem:[%s2401_s27 + $0xd8] sm:$0xff] %v498_v27 }
  0x2e   : > { %v502_v29 = vld [vmem:[%s2396_s26 + $0x740] sm:$0xff]  ;;  %501 = vst [vmem:[%s2401_s27 + $0xe0] sm:$0xff] %v500_v28 }
  0x2f   : > { %503 = vst [vmem:[%s2401_s27 + $0xe8] sm:$0xff] %v502_v29  ;;  %v504_v30 = vld [vmem:[%s2396_s26 + $0x780] sm:$0xff] }
  0x30   : > { %v506_v31 = vld [vmem:[%s2396_s26 + $0x7c0] sm:$0xff]  ;;  %505 = vst [vmem:[%s2401_s27 + $0xf0] sm:$0xff] %v504_v30 }
  0x31   : > { %v508_v32 = vld [vmem:[%s2396_s26 + $0x800] sm:$0xff]  ;;  %507 = vst [vmem:[%s2401_s27 + $0xf8] sm:$0xff] %v506_v31 }
  0x32   : > { %509 = vst [vmem:[%s2401_s27 + $0x100] sm:$0xff] %v508_v32  ;;  %v510_v33 = vld [vmem:[%s2396_s26 + $0x840] sm:$0xff] }
  0x33   : > { %v512_v34 = vld [vmem:[%s2396_s26 + $0x880] sm:$0xff]  ;;  %511 = vst [vmem:[%s2401_s27 + $0x108] sm:$0xff] %v510_v33 }
  0x34   : > { %v514_v35 = vld [vmem:[%s2396_s26 + $0x8c0] sm:$0xff]  ;;  %513 = vst [vmem:[%s2401_s27 + $0x110] sm:$0xff] %v512_v34 }
  0x35   : > { %515 = vst [vmem:[%s2401_s27 + $0x118] sm:$0xff] %v514_v35  ;;  %v516_v36 = vld [vmem:[%s2396_s26 + $0x900] sm:$0xff] }
  0x36   : > { %v518_v37 = vld [vmem:[%s2396_s26 + $0x940] sm:$0xff]  ;;  %517 = vst [vmem:[%s2401_s27 + $0x120] sm:$0xff] %v516_v36 }
  0x37   : > { %v520_v38 = vld [vmem:[%s2396_s26 + $0x980] sm:$0xff]  ;;  %519 = vst [vmem:[%s2401_s27 + $0x128] sm:$0xff] %v518_v37 }
  0x38   : > { %521 = vst [vmem:[%s2401_s27 + $0x130] sm:$0xff] %v520_v38  ;;  %v522_v39 = vld [vmem:[%s2396_s26 + $0x9c0] sm:$0xff] }
  0x39   : > { %v524_v40 = vld [vmem:[%s2396_s26 + $0xa00] sm:$0xff]  ;;  %523 = vst [vmem:[%s2401_s27 + $0x138] sm:$0xff] %v522_v39 }
  0x3a   : > { %v526_v41 = vld [vmem:[%s2396_s26 + $0xa40] sm:$0xff]  ;;  %525 = vst [vmem:[%s2401_s27 + $0x140] sm:$0xff] %v524_v40 }
  0x3b   : > { %527 = vst [vmem:[%s2401_s27 + $0x148] sm:$0xff] %v526_v41  ;;  %v528_v42 = vld [vmem:[%s2396_s26 + $0xa80] sm:$0xff] }
  0x3c   : > { %v530_v43 = vld [vmem:[%s2396_s26 + $0xac0] sm:$0xff]  ;;  %529 = vst [vmem:[%s2401_s27 + $0x150] sm:$0xff] %v528_v42 }
  0x3d   : > { %v532_v44 = vld [vmem:[%s2396_s26 + $0xb00] sm:$0xff]  ;;  %531 = vst [vmem:[%s2401_s27 + $0x158] sm:$0xff] %v530_v43 }
  0x3e   : > { %533 = vst [vmem:[%s2401_s27 + $0x160] sm:$0xff] %v532_v44  ;;  %v534_v45 = vld [vmem:[%s2396_s26 + $0xb40] sm:$0xff] }
  0x3f   : > { %v536_v46 = vld [vmem:[%s2396_s26 + $0xb80] sm:$0xff]  ;;  %535 = vst [vmem:[%s2401_s27 + $0x168] sm:$0xff] %v534_v45 }
  0x40   : > { %v538_v47 = vld [vmem:[%s2396_s26 + $0xbc0] sm:$0xff]  ;;  %537 = vst [vmem:[%s2401_s27 + $0x170] sm:$0xff] %v536_v46 }
  0x41   : > { %539 = vst [vmem:[%s2401_s27 + $0x178] sm:$0xff] %v538_v47  ;;  %v540_v48 = vld [vmem:[%s2396_s26 + $0xc00] sm:$0xff] }
  0x42   : > { %v542_v49 = vld [vmem:[%s2396_s26 + $0xc40] sm:$0xff]  ;;  %541 = vst [vmem:[%s2401_s27 + $0x180] sm:$0xff] %v540_v48 }
  0x43   : > { %v544_v50 = vld [vmem:[%s2396_s26 + $0xc80] sm:$0xff]  ;;  %543 = vst [vmem:[%s2401_s27 + $0x188] sm:$0xff] %v542_v49 }
  0x44   : > { %545 = vst [vmem:[%s2401_s27 + $0x190] sm:$0xff] %v544_v50  ;;  %v546_v51 = vld [vmem:[%s2396_s26 + $0xcc0] sm:$0xff] }
  0x45   : > { %v548_v52 = vld [vmem:[%s2396_s26 + $0xd00] sm:$0xff]  ;;  %547 = vst [vmem:[%s2401_s27 + $0x198] sm:$0xff] %v546_v51 }
  0x46   : > { %v550_v53 = vld [vmem:[%s2396_s26 + $0xd40] sm:$0xff]  ;;  %549 = vst [vmem:[%s2401_s27 + $0x1a0] sm:$0xff] %v548_v52 }
  0x47   : > { %551 = vst [vmem:[%s2401_s27 + $0x1a8] sm:$0xff] %v550_v53  ;;  %v552_v54 = vld [vmem:[%s2396_s26 + $0xd80] sm:$0xff] }
  0x48   : > { %v554_v55 = vld [vmem:[%s2396_s26 + $0xdc0] sm:$0xff]  ;;  %553 = vst [vmem:[%s2401_s27 + $0x1b0] sm:$0xff] %v552_v54 }
  0x49   : > { %v556_v56 = vld [vmem:[%s2396_s26 + $0xe00] sm:$0xff]  ;;  %555 = vst [vmem:[%s2401_s27 + $0x1b8] sm:$0xff] %v554_v55 }
  0x4a   : > { %557 = vst [vmem:[%s2401_s27 + $0x1c0] sm:$0xff] %v556_v56  ;;  %v558_v57 = vld [vmem:[%s2396_s26 + $0xe40] sm:$0xff] }
  0x4b   : > { %v560_v58 = vld [vmem:[%s2396_s26 + $0xe80] sm:$0xff]  ;;  %559 = vst [vmem:[%s2401_s27 + $0x1c8] sm:$0xff] %v558_v57 }
  0x4c   : > { %v562_v59 = vld [vmem:[%s2396_s26 + $0xec0] sm:$0xff]  ;;  %561 = vst [vmem:[%s2401_s27 + $0x1d0] sm:$0xff] %v560_v58 }
  0x4d   : > { %563 = vst [vmem:[%s2401_s27 + $0x1d8] sm:$0xff] %v562_v59  ;;  %v564_v60 = vld [vmem:[%s2396_s26 + $0xf00] sm:$0xff] }
  0x4e   : > { %v566_v61 = vld [vmem:[%s2396_s26 + $0xf40] sm:$0xff]  ;;  %565 = vst [vmem:[%s2401_s27 + $0x1e0] sm:$0xff] %v564_v60 }
  0x4f   : > { %v568_v62 = vld [vmem:[%s2396_s26 + $0xf80] sm:$0xff]  ;;  %567 = vst [vmem:[%s2401_s27 + $0x1e8] sm:$0xff] %v566_v61 }
  0x50   : > { %569 = vst [vmem:[%s2401_s27 + $0x1f0] sm:$0xff] %v568_v62  ;;  %v570_v63 = vld [vmem:[%s2396_s26 + $0xfc0] sm:$0xff] }
  0x51   : > { %v572_v0 = vld [vmem:[%s2396_s26 + $0x1000] sm:$0xff]  ;;  %571 = vst [vmem:[%s2401_s27 + $0x1f8] sm:$0xff] %v570_v63 }
  0x52   : > { %v574_v1 = vld [vmem:[%s2396_s26 + $0x1040] sm:$0xff]  ;;  %573 = vst [vmem:[%s2401_s27 + $0x200] sm:$0xff] %v572_v0 }
  0x53   : > { %575 = vst [vmem:[%s2401_s27 + $0x208] sm:$0xff] %v574_v1  ;;  %v576_v2 = vld [vmem:[%s2396_s26 + $0x1080] sm:$0xff] }
  0x54   : > { %v578_v3 = vld [vmem:[%s2396_s26 + $0x10c0] sm:$0xff]  ;;  %577 = vst [vmem:[%s2401_s27 + $0x210] sm:$0xff] %v576_v2 }
  0x55   : > { %v580_v4 = vld [vmem:[%s2396_s26 + $0x1100] sm:$0xff]  ;;  %579 = vst [vmem:[%s2401_s27 + $0x218] sm:$0xff] %v578_v3 }
  0x56   : > { %581 = vst [vmem:[%s2401_s27 + $0x220] sm:$0xff] %v580_v4  ;;  %v582_v5 = vld [vmem:[%s2396_s26 + $0x1140] sm:$0xff] }
  0x57   : > { %v584_v6 = vld [vmem:[%s2396_s26 + $0x1180] sm:$0xff]  ;;  %583 = vst [vmem:[%s2401_s27 + $0x228] sm:$0xff] %v582_v5 }
  0x58   : > { %v586_v7 = vld [vmem:[%s2396_s26 + $0x11c0] sm:$0xff]  ;;  %585 = vst [vmem:[%s2401_s27 + $0x230] sm:$0xff] %v584_v6 }
  0x59   : > { %587 = vst [vmem:[%s2401_s27 + $0x238] sm:$0xff] %v586_v7  ;;  %v588_v8 = vld [vmem:[%s2396_s26 + $0x1200] sm:$0xff] }
  0x5a   : > { %v590_v9 = vld [vmem:[%s2396_s26 + $0x1240] sm:$0xff]  ;;  %589 = vst [vmem:[%s2401_s27 + $0x240] sm:$0xff] %v588_v8 }
  0x5b   : > { %v592_v10 = vld [vmem:[%s2396_s26 + $0x1280] sm:$0xff]  ;;  %591 = vst [vmem:[%s2401_s27 + $0x248] sm:$0xff] %v590_v9 }
  0x5c   : > { %593 = vst [vmem:[%s2401_s27 + $0x250] sm:$0xff] %v592_v10  ;;  %v594_v11 = vld [vmem:[%s2396_s26 + $0x12c0] sm:$0xff] }
  0x5d   : > { %v596_v12 = vld [vmem:[%s2396_s26 + $0x1300] sm:$0xff]  ;;  %595 = vst [vmem:[%s2401_s27 + $0x258] sm:$0xff] %v594_v11 }
  0x5e   : > { %v598_v13 = vld [vmem:[%s2396_s26 + $0x1340] sm:$0xff]  ;;  %597 = vst [vmem:[%s2401_s27 + $0x260] sm:$0xff] %v596_v12 }
  0x5f   : > { %599 = vst [vmem:[%s2401_s27 + $0x268] sm:$0xff] %v598_v13  ;;  %v600_v14 = vld [vmem:[%s2396_s26 + $0x1380] sm:$0xff] }
  0x60   : > { %v602_v15 = vld [vmem:[%s2396_s26 + $0x13c0] sm:$0xff]  ;;  %601 = vst [vmem:[%s2401_s27 + $0x270] sm:$0xff] %v600_v14 }
  0x61   : > { %v604_v16 = vld [vmem:[%s2396_s26 + $0x1400] sm:$0xff]  ;;  %603 = vst [vmem:[%s2401_s27 + $0x278] sm:$0xff] %v602_v15 }
  0x62   : > { %605 = vst [vmem:[%s2401_s27 + $0x280] sm:$0xff] %v604_v16  ;;  %v606_v17 = vld [vmem:[%s2396_s26 + $0x1440] sm:$0xff] }
  0x63   : > { %v608_v18 = vld [vmem:[%s2396_s26 + $0x1480] sm:$0xff]  ;;  %607 = vst [vmem:[%s2401_s27 + $0x288] sm:$0xff] %v606_v17 }
  0x64   : > { %v610_v19 = vld [vmem:[%s2396_s26 + $0x14c0] sm:$0xff]  ;;  %609 = vst [vmem:[%s2401_s27 + $0x290] sm:$0xff] %v608_v18 }
  0x65   : > { %611 = vst [vmem:[%s2401_s27 + $0x298] sm:$0xff] %v610_v19  ;;  %v612_v20 = vld [vmem:[%s2396_s26 + $0x1500] sm:$0xff] }
  0x66   : > { %v614_v21 = vld [vmem:[%s2396_s26 + $0x1540] sm:$0xff]  ;;  %613 = vst [vmem:[%s2401_s27 + $0x2a0] sm:$0xff] %v612_v20 }
  0x67   : > { %v616_v22 = vld [vmem:[%s2396_s26 + $0x1580] sm:$0xff]  ;;  %615 = vst [vmem:[%s2401_s27 + $0x2a8] sm:$0xff] %v614_v21 }
  0x68   : > { %617 = vst [vmem:[%s2401_s27 + $0x2b0] sm:$0xff] %v616_v22  ;;  %v618_v23 = vld [vmem:[%s2396_s26 + $0x15c0] sm:$0xff] }
  0x69   : > { %v620_v24 = vld [vmem:[%s2396_s26 + $0x1600] sm:$0xff]  ;;  %619 = vst [vmem:[%s2401_s27 + $0x2b8] sm:$0xff] %v618_v23 }
  0x6a   : > { %v622_v25 = vld [vmem:[%s2396_s26 + $0x1640] sm:$0xff]  ;;  %621 = vst [vmem:[%s2401_s27 + $0x2c0] sm:$0xff] %v620_v24 }
  0x6b   : > { %623 = vst [vmem:[%s2401_s27 + $0x2c8] sm:$0xff] %v622_v25  ;;  %v624_v26 = vld [vmem:[%s2396_s26 + $0x1680] sm:$0xff] }
  0x6c   : > { %v626_v27 = vld [vmem:[%s2396_s26 + $0x16c0] sm:$0xff]  ;;  %625 = vst [vmem:[%s2401_s27 + $0x2d0] sm:$0xff] %v624_v26 }
  0x6d   : > { %v628_v28 = vld [vmem:[%s2396_s26 + $0x1700] sm:$0xff]  ;;  %627 = vst [vmem:[%s2401_s27 + $0x2d8] sm:$0xff] %v626_v27 }
  0x6e   : > { %629 = vst [vmem:[%s2401_s27 + $0x2e0] sm:$0xff] %v628_v28  ;;  %v630_v29 = vld [vmem:[%s2396_s26 + $0x1740] sm:$0xff] }
  0x6f   : > { %v632_v30 = vld [vmem:[%s2396_s26 + $0x1780] sm:$0xff]  ;;  %631 = vst [vmem:[%s2401_s27 + $0x2e8] sm:$0xff] %v630_v29 }
  0x70   : > { %v634_v31 = vld [vmem:[%s2396_s26 + $0x17c0] sm:$0xff]  ;;  %633 = vst [vmem:[%s2401_s27 + $0x2f0] sm:$0xff] %v632_v30 }
  0x71   : > { %635 = vst [vmem:[%s2401_s27 + $0x2f8] sm:$0xff] %v634_v31  ;;  %v636_v32 = vld [vmem:[%s2396_s26 + $0x1800] sm:$0xff] }
  0x72   : > { %v638_v33 = vld [vmem:[%s2396_s26 + $0x1840] sm:$0xff]  ;;  %637 = vst [vmem:[%s2401_s27 + $0x300] sm:$0xff] %v636_v32 }
  0x73   : > { %v640_v34 = vld [vmem:[%s2396_s26 + $0x1880] sm:$0xff]  ;;  %639 = vst [vmem:[%s2401_s27 + $0x308] sm:$0xff] %v638_v33 }
  0x74   : > { %641 = vst [vmem:[%s2401_s27 + $0x310] sm:$0xff] %v640_v34  ;;  %v642_v35 = vld [vmem:[%s2396_s26 + $0x18c0] sm:$0xff] }
  0x75   : > { %v644_v36 = vld [vmem:[%s2396_s26 + $0x1900] sm:$0xff]  ;;  %643 = vst [vmem:[%s2401_s27 + $0x318] sm:$0xff] %v642_v35 }
  0x76   : > { %v646_v37 = vld [vmem:[%s2396_s26 + $0x1940] sm:$0xff]  ;;  %645 = vst [vmem:[%s2401_s27 + $0x320] sm:$0xff] %v644_v36 }
  0x77   : > { %647 = vst [vmem:[%s2401_s27 + $0x328] sm:$0xff] %v646_v37  ;;  %v648_v38 = vld [vmem:[%s2396_s26 + $0x1980] sm:$0xff] }
  0x78   : > { %v650_v39 = vld [vmem:[%s2396_s26 + $0x19c0] sm:$0xff]  ;;  %649 = vst [vmem:[%s2401_s27 + $0x330] sm:$0xff] %v648_v38 }
  0x79   : > { %v652_v40 = vld [vmem:[%s2396_s26 + $0x1a00] sm:$0xff]  ;;  %651 = vst [vmem:[%s2401_s27 + $0x338] sm:$0xff] %v650_v39 }
  0x7a   : > { %653 = vst [vmem:[%s2401_s27 + $0x340] sm:$0xff] %v652_v40  ;;  %v654_v41 = vld [vmem:[%s2396_s26 + $0x1a40] sm:$0xff] }
  0x7b   : > { %v656_v42 = vld [vmem:[%s2396_s26 + $0x1a80] sm:$0xff]  ;;  %655 = vst [vmem:[%s2401_s27 + $0x348] sm:$0xff] %v654_v41 }
  0x7c   : > { %v658_v43 = vld [vmem:[%s2396_s26 + $0x1ac0] sm:$0xff]  ;;  %657 = vst [vmem:[%s2401_s27 + $0x350] sm:$0xff] %v656_v42 }
  0x7d   : > { %659 = vst [vmem:[%s2401_s27 + $0x358] sm:$0xff] %v658_v43  ;;  %v660_v44 = vld [vmem:[%s2396_s26 + $0x1b00] sm:$0xff] }
  0x7e   : > { %v662_v45 = vld [vmem:[%s2396_s26 + $0x1b40] sm:$0xff]  ;;  %661 = vst [vmem:[%s2401_s27 + $0x360] sm:$0xff] %v660_v44 }
  0x7f   : > { %v664_v46 = vld [vmem:[%s2396_s26 + $0x1b80] sm:$0xff]  ;;  %663 = vst [vmem:[%s2401_s27 + $0x368] sm:$0xff] %v662_v45 }
  0x80   : > { %665 = vst [vmem:[%s2401_s27 + $0x370] sm:$0xff] %v664_v46  ;;  %v666_v47 = vld [vmem:[%s2396_s26 + $0x1bc0] sm:$0xff] }
  0x81   : > { %v668_v48 = vld [vmem:[%s2396_s26 + $0x1c00] sm:$0xff]  ;;  %667 = vst [vmem:[%s2401_s27 + $0x378] sm:$0xff] %v666_v47 }
  0x82   : > { %v670_v49 = vld [vmem:[%s2396_s26 + $0x1c40] sm:$0xff]  ;;  %669 = vst [vmem:[%s2401_s27 + $0x380] sm:$0xff] %v668_v48 }
  0x83   : > { %671 = vst [vmem:[%s2401_s27 + $0x388] sm:$0xff] %v670_v49  ;;  %v672_v50 = vld [vmem:[%s2396_s26 + $0x1c80] sm:$0xff] }
  0x84   : > { %v674_v51 = vld [vmem:[%s2396_s26 + $0x1cc0] sm:$0xff]  ;;  %673 = vst [vmem:[%s2401_s27 + $0x390] sm:$0xff] %v672_v50 }
  0x85   : > { %v676_v52 = vld [vmem:[%s2396_s26 + $0x1d00] sm:$0xff]  ;;  %675 = vst [vmem:[%s2401_s27 + $0x398] sm:$0xff] %v674_v51 }
  0x86   : > { %677 = vst [vmem:[%s2401_s27 + $0x3a0] sm:$0xff] %v676_v52  ;;  %v678_v53 = vld [vmem:[%s2396_s26 + $0x1d40] sm:$0xff] }
  0x87   : > { %v680_v54 = vld [vmem:[%s2396_s26 + $0x1d80] sm:$0xff]  ;;  %679 = vst [vmem:[%s2401_s27 + $0x3a8] sm:$0xff] %v678_v53 }
  0x88   : > { %v682_v55 = vld [vmem:[%s2396_s26 + $0x1dc0] sm:$0xff]  ;;  %681 = vst [vmem:[%s2401_s27 + $0x3b0] sm:$0xff] %v680_v54 }
  0x89   : > { %683 = vst [vmem:[%s2401_s27 + $0x3b8] sm:$0xff] %v682_v55  ;;  %v684_v56 = vld [vmem:[%s2396_s26 + $0x1e00] sm:$0xff] }
  0x8a   : > { %v686_v57 = vld [vmem:[%s2396_s26 + $0x1e40] sm:$0xff]  ;;  %685 = vst [vmem:[%s2401_s27 + $0x3c0] sm:$0xff] %v684_v56 }
  0x8b   : > { %v688_v58 = vld [vmem:[%s2396_s26 + $0x1e80] sm:$0xff]  ;;  %687 = vst [vmem:[%s2401_s27 + $0x3c8] sm:$0xff] %v686_v57 }
  0x8c   : > { %689 = vst [vmem:[%s2401_s27 + $0x3d0] sm:$0xff] %v688_v58  ;;  %v690_v59 = vld [vmem:[%s2396_s26 + $0x1ec0] sm:$0xff] }
  0x8d   : > { %v692_v60 = vld [vmem:[%s2396_s26 + $0x1f00] sm:$0xff]  ;;  %691 = vst [vmem:[%s2401_s27 + $0x3d8] sm:$0xff] %v690_v59 }
  0x8e   : > { %v694_v61 = vld [vmem:[%s2396_s26 + $0x1f40] sm:$0xff]  ;;  %693 = vst [vmem:[%s2401_s27 + $0x3e0] sm:$0xff] %v692_v60 }
  0x8f   : > { %695 = vst [vmem:[%s2401_s27 + $0x3e8] sm:$0xff] %v694_v61  ;;  %v696_v62 = vld [vmem:[%s2396_s26 + $0x1f80] sm:$0xff] }
  0x90   : > { %v698_v63 = vld [vmem:[%s2396_s26 + $0x1fc0] sm:$0xff]  ;;  %697 = vst [vmem:[%s2401_s27 + $0x3f0] sm:$0xff] %v696_v62 }
  0x91   : > { %699 = vst [vmem:[%s2401_s27 + $0x3f8] sm:$0xff] %v698_v63 }
  0x92 PF: > { %p1909_p6 = scmp.ge.s32.totalorder %s2330_s16, 1  ;;  %p712_p7 = scmp.lt.s32.totalorder %s2330_s16, 9 }
  0x94   : > { %p713_p8 = pnand %p1909_p6, %p712_p7 }
  0x95   : > { %s719_s28 = sand.u32 (!%p713_p8), 1, %s2314_s12   ;;  %v772_v0 = vld [vmem:[%s2858_s0] sm:$0xff] (!%p713_p8)  ;;  %v903_v1 = vlaneseq (!%p713_p8)  ;;  %v2332_v2 = vmov (!%p713_p8), 1966171168   ;;  %s1911_s6 = sshll.u32 (!%p713_p8), %s2322_s14, 1 }
  0x96   : > { %716 = sbr.rel (%p713_p8) target bundleno = 504 (0x1f8), region = 66  ;;  %s1910_s4 = sshll.u32 (!%p713_p8), %s719_s28, 10  ;;  %v916_v3 = vunpack.c.l.s4 (!%p713_p8), %v2332_v2  ;;  %v914_v7 = vcombine.high (!%p713_p8), %v772_v0, %v772_v0 }
  0x97   : > { %v2662_v4 = vshrl.u32 (!%p713_p8), %v903_v1, 7  ;;  %s2664_s5 = scalar_lea.vmem (!%p713_p8), [#allocation2], %s1910_s4  ;;  %p759_p9 = scmp.lt.s32.totalorder (!%p713_p8), %s1911_s6, 15 }
  0x98   : > { %v2099_v5 = vld [vmem:[%s2664_s5 + $0x4] ss:$8 sps:$4 sm:$0xff] (!%p713_p8)   ;;  %v917_v6 = vunpack.c.0.s8 (!%p713_p8), %v916_v3  ;;  %v2103_v9 = vld [vmem:[%s2664_s5] ss:$8 sps:$4 sm:$0xff] (!%p713_p8)   ;;  %v2105_v12 = vld [vmem:[%s2664_s5 + $0x14] ss:$8 sps:$4 sm:$0xff] (!%p713_p8)  }
  0x99   : > { %v2101_v8 = vld [vmem:[%s2664_s5 + $0x204] ss:$8 sps:$4 sm:$0xff] (!%p713_p8)   ;;  %1611 = vmatprep.subr.bf16.mxu1 (!%p713_p8), %v2099_v5  ;;  %v2104_v10 = vld [vmem:[%s2664_s5 + $0x200] ss:$8 sps:$4 sm:$0xff] (!%p713_p8)   ;;  %v2107_v13 = vld [vmem:[%s2664_s5 + $0x214] ss:$8 sps:$4 sm:$0xff] (!%p713_p8)  }
  0x9a   : > { %v2671_v11 = vsub.s32 (!%p713_p8), %v917_v6, %v2662_v4  ;;  %1693 = vmatprep.subr.bf16.mxu0 (!%p713_p8), %v2101_v8  ;;  %1612 = vmatpush1.bf16.msra.mxu1 (!%p713_p8), %v2103_v9  ;;  %v2109_v14 = vld [vmem:[%s2664_s5 + $0x10] ss:$8 sps:$4 sm:$0xff] (!%p713_p8)   ;;  %v2111_v18 = vld [vmem:[%s2664_s5 + $0x24] ss:$8 sps:$4 sm:$0xff] (!%p713_p8)   ;;  %v2115_v22 = vld [vmem:[%s2664_s5 + $0x20] ss:$8 sps:$4 sm:$0xff] (!%p713_p8)  }
  0x9b   : > { %1694 = vmatpush1.bf16.msra.mxu0 (!%p713_p8), %v2104_v10  ;;  %1613 = vmatprep.subr.bf16.mxu1 (!%p713_p8), %v2105_v12  ;;  %v2110_v17 = vld [vmem:[%s2664_s5 + $0x210] ss:$8 sps:$4 sm:$0xff] (!%p713_p8)   ;;  %v2113_v21 = vld [vmem:[%s2664_s5 + $0x224] ss:$8 sps:$4 sm:$0xff] (!%p713_p8)   ;;  %v2116_v23 = vld [vmem:[%s2664_s5 + $0x220] ss:$8 sps:$4 sm:$0xff] (!%p713_p8)  }
  0x9c   : > { %v2677_v15 = vrot.slane (!%p713_p8), %v772_v0, %v2671_v11  ;;  %v2680_v16 = vrot.slane (!%p713_p8), %v914_v7, %v2671_v11  ;;  %1695 = vmatprep.subr.bf16.mxu0 (!%p713_p8), %v2107_v13  ;;  %v2117_v24 = vld [vmem:[%s2664_s5 + $0x34] ss:$8 sps:$4 sm:$0xff] (!%p713_p8)   ;;  %v2121_v28 = vld [vmem:[%s2664_s5 + $0x30] ss:$8 sps:$4 sm:$0xff] (!%p713_p8)   ;;  %v2123_v30 = vld [vmem:[%s2664_s5 + $0x44] ss:$8 sps:$4 sm:$0xff] (!%p713_p8)  }
  0x9d   : > { %v2119_v27 = vld [vmem:[%s2664_s5 + $0x234] ss:$8 sps:$4 sm:$0xff]   ;;  %v2122_v29 = vld [vmem:[%s2664_s5 + $0x230] ss:$8 sps:$4 sm:$0xff]   ;;  %v2125_v31 = vld [vmem:[%s2664_s5 + $0x244] ss:$8 sps:$4 sm:$0xff]  }
  0x9e   : > { %v929_v19 = vcombine.high %v2677_v15, %v2677_v15  ;;  %v930_v20 = vcombine.high %v2680_v16, %v2680_v16  ;;  %1614 = vmatpush1.bf16.msra.mxu1 %v2109_v14  ;;  %v2127_v32 = vld [vmem:[%s2664_s5 + $0x40] ss:$8 sps:$4 sm:$0xff]   ;;  %v2129_v34 = vld [vmem:[%s2664_s5 + $0x54] ss:$8 sps:$4 sm:$0xff]   ;;  %v2133_v36 = vld [vmem:[%s2664_s5 + $0x50] ss:$8 sps:$4 sm:$0xff]  }
  0x9f   : > { %1696 = vmatpush1.bf16.msra.mxu0 %v2110_v17  ;;  %1615 = vmatprep.subr.bf16.mxu1 %v2111_v18  ;;  %v2128_v33 = vld [vmem:[%s2664_s5 + $0x240] ss:$8 sps:$4 sm:$0xff]   ;;  %v2131_v35 = vld [vmem:[%s2664_s5 + $0x254] ss:$8 sps:$4 sm:$0xff]   ;;  %v2134_v37 = vld [vmem:[%s2664_s5 + $0x250] ss:$8 sps:$4 sm:$0xff]  }
  0xa0   : > { %v2693_v25 = vrot.slane %v929_v19, %v2671_v11  ;;  %v2696_v26 = vrot.slane %v930_v20, %v2671_v11  ;;  %1697 = vmatprep.subr.bf16.mxu0 %v2113_v21  ;;  %v2135_v38 = vld [vmem:[%s2664_s5 + $0x64] ss:$8 sps:$4 sm:$0xff]   ;;  %v2139_v40 = vld [vmem:[%s2664_s5 + $0x60] ss:$8 sps:$4 sm:$0xff]   ;;  %v2141_v42 = vld [vmem:[%s2664_s5 + $0x74] ss:$8 sps:$4 sm:$0xff]  }
  0xa1   : > { %v2137_v39 = vld [vmem:[%s2664_s5 + $0x264] ss:$8 sps:$4 sm:$0xff]   ;;  %v2140_v41 = vld [vmem:[%s2664_s5 + $0x260] ss:$8 sps:$4 sm:$0xff]   ;;  %v2143_v43 = vld [vmem:[%s2664_s5 + $0x274] ss:$8 sps:$4 sm:$0xff]  }
  0xa2   : > { %1643 = vmatprep.mubr.bf16.mxu1 %v2693_v25  ;;  %1725 = vmatprep.mubr.bf16.mxu0 %v2696_v26  ;;  %v2145_v44 = vld [vmem:[%s2664_s5 + $0x70] ss:$8 sps:$4 sm:$0xff]   ;;  %v2147_v46 = vld [vmem:[%s2664_s5 + $0x84] ss:$8 sps:$4 sm:$0xff]   ;;  %v2151_v48 = vld [vmem:[%s2664_s5 + $0x80] ss:$8 sps:$4 sm:$0xff]  }
  0xa3   : > { %1616 = vmatpush1.bf16.msra.mxu1 %v2115_v22  ;;  %1698 = vmatpush1.bf16.msra.mxu0 %v2116_v23  ;;  %v2146_v45 = vld [vmem:[%s2664_s5 + $0x270] ss:$8 sps:$4 sm:$0xff]   ;;  %v2149_v47 = vld [vmem:[%s2664_s5 + $0x284] ss:$8 sps:$4 sm:$0xff]   ;;  %v2152_v49 = vld [vmem:[%s2664_s5 + $0x280] ss:$8 sps:$4 sm:$0xff]   ;;  %v2757_v22 = vrot.slane %v2677_v15, %v2671_v11  ;;  %v2761_v23 = vrot.slane %v2680_v16, %v2671_v11  ;;  %v962_v15 = vcombine.high %v2696_v26, %v2696_v26 }
  0xa4   : > { %1617 = vmatprep.subr.bf16.mxu1 %v2117_v24  ;;  %1699 = vmatprep.subr.bf16.mxu0 %v2119_v27  ;;  %v2153_v50 = vld [vmem:[%s2664_s5 + $0x94] ss:$8 sps:$4 sm:$0xff]   ;;  %v2157_v52 = vld [vmem:[%s2664_s5 + $0x90] ss:$8 sps:$4 sm:$0xff]   ;;  %v2159_v54 = vld [vmem:[%s2664_s5 + $0xa4] ss:$8 sps:$4 sm:$0xff]  }
  0xa5   : > { %v2155_v51 = vld [vmem:[%s2664_s5 + $0x294] ss:$8 sps:$4 sm:$0xff]   ;;  %v2158_v53 = vld [vmem:[%s2664_s5 + $0x290] ss:$8 sps:$4 sm:$0xff]   ;;  %v2161_v55 = vld [vmem:[%s2664_s5 + $0x2a4] ss:$8 sps:$4 sm:$0xff]  }
  0xa6   : > { %v2163_v56 = vld [vmem:[%s2664_s5 + $0xa0] ss:$8 sps:$4 sm:$0xff]   ;;  %v2165_v58 = vld [vmem:[%s2664_s5 + $0xb4] ss:$8 sps:$4 sm:$0xff]   ;;  %v2169_v60 = vld [vmem:[%s2664_s5 + $0xb0] ss:$8 sps:$4 sm:$0xff]  }
  0xa7   : > { %1618 = vmatpush1.bf16.msra.mxu1 %v2121_v28  ;;  %1700 = vmatpush1.bf16.msra.mxu0 %v2122_v29  ;;  %v2164_v57 = vld [vmem:[%s2664_s5 + $0x2a0] ss:$8 sps:$4 sm:$0xff]   ;;  %v2167_v59 = vld [vmem:[%s2664_s5 + $0x2b4] ss:$8 sps:$4 sm:$0xff]   ;;  %v2170_v61 = vld [vmem:[%s2664_s5 + $0x2b0] ss:$8 sps:$4 sm:$0xff]   ;;  %v961_v28 = vcombine.high %v2693_v25, %v2693_v25 }
  0xa8   : > { %1619 = vmatprep.subr.bf16.mxu1 %v2123_v30  ;;  %1701 = vmatprep.subr.bf16.mxu0 %v2125_v31  ;;  %v2171_v62 = vld [vmem:[%s2664_s5 + $0xc4] ss:$8 sps:$4 sm:$0xff]   ;;  %v2175_v0 = vld [vmem:[%s2664_s5 + $0xc0] ss:$8 sps:$4 sm:$0xff]   ;;  %v2177_v2 = vld [vmem:[%s2664_s5 + $0xd4] ss:$8 sps:$4 sm:$0xff]  }
  0xa9   : > { %v2173_v63 = vld [vmem:[%s2664_s5 + $0x2c4] ss:$8 sps:$4 sm:$0xff]   ;;  %v2176_v1 = vld [vmem:[%s2664_s5 + $0x2c0] ss:$8 sps:$4 sm:$0xff]   ;;  %v2179_v3 = vld [vmem:[%s2664_s5 + $0x2d4] ss:$8 sps:$4 sm:$0xff]  }
  0xaa   : > { %v2181_v5 = vld [vmem:[%s2664_s5 + $0xd0] ss:$8 sps:$4 sm:$0xff]   ;;  %v2183_v7 = vld [vmem:[%s2664_s5 + $0xe4] ss:$8 sps:$4 sm:$0xff]   ;;  %v2187_v9 = vld [vmem:[%s2664_s5 + $0xe0] ss:$8 sps:$4 sm:$0xff]  }
  0xab   : > { %1620 = vmatpush1.bf16.msra.mxu1 %v2127_v32  ;;  %1702 = vmatpush1.bf16.msra.mxu0 %v2128_v33  ;;  %v2182_v6 = vld [vmem:[%s2664_s5 + $0x2d0] ss:$8 sps:$4 sm:$0xff]   ;;  %v2185_v8 = vld [vmem:[%s2664_s5 + $0x2e4] ss:$8 sps:$4 sm:$0xff]   ;;  %v2188_v10 = vld [vmem:[%s2664_s5 + $0x2e0] ss:$8 sps:$4 sm:$0xff]  }
  0xac   : > { %1621 = vmatprep.subr.bf16.mxu1 %v2129_v34  ;;  %1703 = vmatprep.subr.bf16.mxu0 %v2131_v35  ;;  %v2189_v12 = vld [vmem:[%s2664_s5 + $0xf4] ss:$8 sps:$4 sm:$0xff]   ;;  %v2193_v14 = vld [vmem:[%s2664_s5 + $0xf0] ss:$8 sps:$4 sm:$0xff]   ;;  %v2197_v18 = vld [vmem:[%s2664_s5 + $0x104] ss:$8 sps:$4 sm:$0xff]  }
  0xad   : > { %v2191_v13 = vld [vmem:[%s2664_s5 + $0x2f4] ss:$8 sps:$4 sm:$0xff]   ;;  %v2194_v17 = vld [vmem:[%s2664_s5 + $0x2f0] ss:$8 sps:$4 sm:$0xff]   ;;  %v2201_v19 = vld [vmem:[%s2664_s5 + $0x304] ss:$8 sps:$4 sm:$0xff]  }
  0xae   : > { %v2195_v20 = vld [vmem:[%s2664_s5 + $0x100] ss:$8 sps:$4 sm:$0xff]   ;;  %v2204_v24 = vld [vmem:[%s2664_s5 + $0x114] ss:$8 sps:$4 sm:$0xff]   ;;  %v2202_v16 = vld [vmem:[%s2664_s5 + $0x110] ss:$8 sps:$4 sm:$0xff]  }
  0xaf   : > { %1622 = vmatpush1.bf16.msra.mxu1 %v2133_v36  ;;  %1704 = vmatpush1.bf16.msra.mxu0 %v2134_v37  ;;  %v2199_v21 = vld [vmem:[%s2664_s5 + $0x300] ss:$8 sps:$4 sm:$0xff]   ;;  %v2207_v27 = vld [vmem:[%s2664_s5 + $0x314] ss:$8 sps:$4 sm:$0xff]   ;;  %v2205_v29 = vld [vmem:[%s2664_s5 + $0x310] ss:$8 sps:$4 sm:$0xff]  }
  0xb0   : > { %1623 = vmatprep.subr.bf16.mxu1 %v2135_v38  ;;  %1705 = vmatprep.subr.bf16.mxu0 %v2137_v39  ;;  %v2210_v30 = vld [vmem:[%s2664_s5 + $0x124] ss:$8 sps:$4 sm:$0xff]   ;;  %v2208_v26 = vld [vmem:[%s2664_s5 + $0x120] ss:$8 sps:$4 sm:$0xff]   ;;  %v2216_v32 = vld [vmem:[%s2664_s5 + $0x134] ss:$8 sps:$4 sm:$0xff]  }
  0xb1   : > { %v2213_v25 = vld [vmem:[%s2664_s5 + $0x324] ss:$8 sps:$4 sm:$0xff]   ;;  %v2211_v31 = vld [vmem:[%s2664_s5 + $0x320] ss:$8 sps:$4 sm:$0xff]   ;;  %v2219_v33 = vld [vmem:[%s2664_s5 + $0x334] ss:$8 sps:$4 sm:$0xff]  }
  0xb2   : > { %v2214_v34 = vld [vmem:[%s2664_s5 + $0x130] ss:$8 sps:$4 sm:$0xff]   ;;  %v2222_v36 = vld [vmem:[%s2664_s5 + $0x144] ss:$8 sps:$4 sm:$0xff]   ;;  %v2220_v38 = vld [vmem:[%s2664_s5 + $0x140] ss:$8 sps:$4 sm:$0xff]  }
  0xb3   : > { %1624 = vmatpush1.bf16.msra.mxu1 %v2139_v40  ;;  %1706 = vmatpush1.bf16.msra.mxu0 %v2140_v41  ;;  %v2217_v35 = vld [vmem:[%s2664_s5 + $0x330] ss:$8 sps:$4 sm:$0xff]   ;;  %v2225_v37 = vld [vmem:[%s2664_s5 + $0x344] ss:$8 sps:$4 sm:$0xff]   ;;  %v2223_v39 = vld [vmem:[%s2664_s5 + $0x340] ss:$8 sps:$4 sm:$0xff]  }
  0xb4   : > { %1625 = vmatprep.subr.bf16.mxu1 %v2141_v42  ;;  %1707 = vmatprep.subr.bf16.mxu0 %v2143_v43  ;;  %v2228_v40 = vld [vmem:[%s2664_s5 + $0x154] ss:$8 sps:$4 sm:$0xff]   ;;  %v2226_v42 = vld [vmem:[%s2664_s5 + $0x150] ss:$8 sps:$4 sm:$0xff]   ;;  %s2869_s6 = smov (!%p759_p9, %s1911_s6), 15 }
  0xb5   : > { %v2231_v41 = vld [vmem:[%s2664_s5 + $0x354] ss:$8 sps:$4 sm:$0xff]   ;;  %v2229_v43 = vld [vmem:[%s2664_s5 + $0x350] ss:$8 sps:$4 sm:$0xff]   ;;  %s761_s9 = scalar_lea.vmem %s2860_s2, %s2869_s6  ;;  %s770_s12 = scalar_lea.vmem %s2861_s3, %s2869_s6 }
  0xb7   : > { %1626 = vmatpush1.bf16.msra.mxu1 %v2145_v44  ;;  %1708 = vmatpush1.bf16.msra.mxu0 %v2146_v45  ;;  %v2234_v44 = vld [vmem:[%s2664_s5 + $0x164] ss:$8 sps:$4 sm:$0xff]  }
  0xb8   : > { %1627 = vmatprep.subr.bf16.mxu1 %v2147_v46  ;;  %1709 = vmatprep.subr.bf16.mxu0 %v2149_v47  ;;  %v2237_v45 = vld [vmem:[%s2664_s5 + $0x364] ss:$8 sps:$4 sm:$0xff]   ;;  %v2232_v46 = vld [vmem:[%s2664_s5 + $0x160] ss:$8 sps:$4 sm:$0xff]  }
  0xb9   : > { %v2235_v47 = vld [vmem:[%s2664_s5 + $0x360] ss:$8 sps:$4 sm:$0xff]  }
  0xbb   : > { %1628 = vmatpush1.bf16.msra.mxu1 %v2151_v48  ;;  %1710 = vmatpush1.bf16.msra.mxu0 %v2152_v49  ;;  %v2240_v48 = vld [vmem:[%s2664_s5 + $0x174] ss:$8 sps:$4 sm:$0xff]  }
  0xbc   : > { %1629 = vmatprep.subr.bf16.mxu1 %v2153_v50  ;;  %1711 = vmatprep.subr.bf16.mxu0 %v2155_v51  ;;  %v2243_v49 = vld [vmem:[%s2664_s5 + $0x374] ss:$8 sps:$4 sm:$0xff]   ;;  %v2238_v50 = vld [vmem:[%s2664_s5 + $0x170] ss:$8 sps:$4 sm:$0xff]  }
  0xbd   : > { %v2241_v51 = vld [vmem:[%s2664_s5 + $0x370] ss:$8 sps:$4 sm:$0xff]  }
  0xbf   : > { %1630 = vmatpush1.bf16.msra.mxu1 %v2157_v52  ;;  %1712 = vmatpush1.bf16.msra.mxu0 %v2158_v53  ;;  %v2246_v52 = vld [vmem:[%s2664_s5 + $0x184] ss:$8 sps:$4 sm:$0xff]  }
  0xc0   : > { %1631 = vmatprep.subr.bf16.mxu1 %v2159_v54  ;;  %1713 = vmatprep.subr.bf16.mxu0 %v2161_v55  ;;  %v2249_v53 = vld [vmem:[%s2664_s5 + $0x384] ss:$8 sps:$4 sm:$0xff]   ;;  %v2244_v54 = vld [vmem:[%s2664_s5 + $0x180] ss:$8 sps:$4 sm:$0xff]  }
  0xc1   : > { %v2247_v55 = vld [vmem:[%s2664_s5 + $0x380] ss:$8 sps:$4 sm:$0xff]  }
  0xc3   : > { %1632 = vmatpush1.bf16.msra.mxu1 %v2163_v56  ;;  %1714 = vmatpush1.bf16.msra.mxu0 %v2164_v57  ;;  %v2252_v56 = vld [vmem:[%s2664_s5 + $0x194] ss:$8 sps:$4 sm:$0xff]  }
  0xc4   : > { %1633 = vmatprep.subr.bf16.mxu1 %v2165_v58  ;;  %1715 = vmatprep.subr.bf16.mxu0 %v2167_v59  ;;  %v2255_v57 = vld [vmem:[%s2664_s5 + $0x394] ss:$8 sps:$4 sm:$0xff]   ;;  %v2250_v58 = vld [vmem:[%s2664_s5 + $0x190] ss:$8 sps:$4 sm:$0xff]  }
  0xc5   : > { %v2253_v59 = vld [vmem:[%s2664_s5 + $0x390] ss:$8 sps:$4 sm:$0xff]  }
  0xc7   : > { %1634 = vmatpush1.bf16.msra.mxu1 %v2169_v60  ;;  %1716 = vmatpush1.bf16.msra.mxu0 %v2170_v61  ;;  %v2258_v60 = vld [vmem:[%s2664_s5 + $0x1a4] ss:$8 sps:$4 sm:$0xff]  }
  0xc8   : > { %1635 = vmatprep.subr.bf16.mxu1 %v2171_v62  ;;  %1717 = vmatprep.subr.bf16.mxu0 %v2173_v63  ;;  %v2261_v61 = vld [vmem:[%s2664_s5 + $0x3a4] ss:$8 sps:$4 sm:$0xff]   ;;  %v2256_v62 = vld [vmem:[%s2664_s5 + $0x1a0] ss:$8 sps:$4 sm:$0xff]  }
  0xc9   : > { %v2259_v63 = vld [vmem:[%s2664_s5 + $0x3a0] ss:$8 sps:$4 sm:$0xff]  }
  0xcb   : > { %1636 = vmatpush1.bf16.msra.mxu1 %v2175_v0  ;;  %1718 = vmatpush1.bf16.msra.mxu0 %v2176_v1  ;;  %v2264_v0 = vld [vmem:[%s2664_s5 + $0x1b4] ss:$8 sps:$4 sm:$0xff]  }
  0xcc   : > { %1637 = vmatprep.subr.bf16.mxu1 %v2177_v2  ;;  %1719 = vmatprep.subr.bf16.mxu0 %v2179_v3  ;;  %v2267_v1 = vld [vmem:[%s2664_s5 + $0x3b4] ss:$8 sps:$4 sm:$0xff]   ;;  %v2262_v2 = vld [vmem:[%s2664_s5 + $0x1b0] ss:$8 sps:$4 sm:$0xff]  }
  0xcd   : > { %v2265_v3 = vld [vmem:[%s2664_s5 + $0x3b0] ss:$8 sps:$4 sm:$0xff]  }
  0xcf   : > { %1638 = vmatpush1.bf16.msra.mxu1 %v2181_v5  ;;  %1720 = vmatpush1.bf16.msra.mxu0 %v2182_v6  ;;  %v2270_v5 = vld [vmem:[%s2664_s5 + $0x1c4] ss:$8 sps:$4 sm:$0xff]  }
  0xd0   : > { %1639 = vmatprep.subr.bf16.mxu1 %v2183_v7  ;;  %1721 = vmatprep.subr.bf16.mxu0 %v2185_v8  ;;  %v2273_v6 = vld [vmem:[%s2664_s5 + $0x3c4] ss:$8 sps:$4 sm:$0xff]   ;;  %v2268_v7 = vld [vmem:[%s2664_s5 + $0x1c0] ss:$8 sps:$4 sm:$0xff]  }
  0xd1   : > { %v2271_v8 = vld [vmem:[%s2664_s5 + $0x3c0] ss:$8 sps:$4 sm:$0xff]  }
  0xd3   : > { %1640 = vmatpush1.bf16.msra.mxu1 %v2187_v9  ;;  %1722 = vmatpush1.bf16.msra.mxu0 %v2188_v10  ;;  %v2276_v9 = vld [vmem:[%s2664_s5 + $0x1d4] ss:$8 sps:$4 sm:$0xff]  }
  0xd4   : > { %1641 = vmatprep.subr.bf16.mxu1 %v2189_v12  ;;  %1723 = vmatprep.subr.bf16.mxu0 %v2191_v13  ;;  %v2279_v10 = vld [vmem:[%s2664_s5 + $0x3d4] ss:$8 sps:$4 sm:$0xff]   ;;  %v2274_v12 = vld [vmem:[%s2664_s5 + $0x1d0] ss:$8 sps:$4 sm:$0xff]  }
  0xd5   : > { %v2277_v13 = vld [vmem:[%s2664_s5 + $0x3d0] ss:$8 sps:$4 sm:$0xff]  }
  0xd7   : > { %1642 = vmatpush1.bf16.msra.mxu1 %v2193_v14  ;;  %1724 = vmatpush1.bf16.msra.mxu0 %v2194_v17  ;;  %v2282_v14 = vld [vmem:[%s2664_s5 + $0x1e4] ss:$8 sps:$4 sm:$0xff]  }
  0xd8   : > { %1652 = vmatprep.subr.bf16.mxu1 %v2197_v18  ;;  %1734 = vmatprep.subr.bf16.mxu0 %v2201_v19  ;;  %v2285_v17 = vld [vmem:[%s2664_s5 + $0x3e4] ss:$8 sps:$4 sm:$0xff]   ;;  %v2280_v18 = vld [vmem:[%s2664_s5 + $0x1e0] ss:$8 sps:$4 sm:$0xff]  }
  0xd9   : > { %v2283_v19 = vld [vmem:[%s2664_s5 + $0x3e0] ss:$8 sps:$4 sm:$0xff]  }
  0xda   : > { %1644 = vmatmul.mubr.bf16.vlgmr.msra.gmra.mrb[0].mxu1 %v2757_v22  ;;  %1726 = vmatmul.mubr.bf16.vlgmr.msra.gmra.mrb[0].mxu0 %v2761_v23 }
  0xdb   : > { %1653 = vmatpush1.bf16.msra.mxu1 %v2195_v20  ;;  %1735 = vmatpush1.bf16.msra.mxu0 %v2199_v21  ;;  %v2288_v20 = vld [vmem:[%s2664_s5 + $0x1f4] ss:$8 sps:$4 sm:$0xff]  }
  0xdc   : > { %1654 = vmatprep.subr.bf16.mxu1 %v2204_v24  ;;  %1736 = vmatprep.subr.bf16.mxu0 %v2207_v27  ;;  %v2291_v21 = vld [vmem:[%s2664_s5 + $0x3f4] ss:$8 sps:$4 sm:$0xff]   ;;  %v2286_v24 = vld [vmem:[%s2664_s5 + $0x1f0] ss:$8 sps:$4 sm:$0xff]  }
  0xdd   : > { %1684 = vmatprep.mubr.bf16.mxu1 %v961_v28  ;;  %1766 = vmatprep.mubr.bf16.mxu0 %v962_v15  ;;  %v2289_v27 = vld [vmem:[%s2664_s5 + $0x3f0] ss:$8 sps:$4 sm:$0xff]   ;;  %v959_v28 = vcombine.high %v2757_v22, %v2757_v22  ;;  %v960_v15 = vcombine.high %v2761_v23, %v2761_v23 }
  0xdf   : > { %1655 = vmatpush1.bf16.msra.mxu1 %v2202_v16  ;;  %1737 = vmatpush1.bf16.msra.mxu0 %v2205_v29  ;;  %v905_v16 = vsub.s32 0, %v2662_v4  ;;  %v901_v29 = vld [vmem:[%s761_s9] sm:$0x3] }
  0xe0   : > { %1656 = vmatprep.subr.bf16.mxu1 %v2210_v30  ;;  %1738 = vmatprep.subr.bf16.mxu0 %v2213_v25  ;;  %v909_v30 = vsub.s32 1, %v2662_v4 }
  0xe1   : > { %v906_v22 = vrot.slane %v901_v29, %v905_v16 }
  0xe2   : > { %v910_v25 = vrot.slane %v901_v29, %v909_v30 }
  0xe3   : > { %1657 = vmatpush1.bf16.msra.mxu1 %v2208_v26  ;;  %1739 = vmatpush1.bf16.msra.mxu0 %v2211_v31 }
  0xe4   : > { %1658 = vmatprep.subr.bf16.mxu1 %v2216_v32  ;;  %1740 = vmatprep.subr.bf16.mxu0 %v2219_v33 }
  0xe7   : > { %1659 = vmatpush1.bf16.msra.mxu1 %v2214_v34  ;;  %1741 = vmatpush1.bf16.msra.mxu0 %v2217_v35 }
  0xe8   : > { %1660 = vmatprep.subr.bf16.mxu1 %v2222_v36  ;;  %1742 = vmatprep.subr.bf16.mxu0 %v2225_v37 }
  0xeb   : > { %1661 = vmatpush1.bf16.msra.mxu1 %v2220_v38  ;;  %1743 = vmatpush1.bf16.msra.mxu0 %v2223_v39 }
  0xec   : > { %1662 = vmatprep.subr.bf16.mxu1 %v2228_v40  ;;  %1744 = vmatprep.subr.bf16.mxu0 %v2231_v41 }
  0xef   : > { %1663 = vmatpush1.bf16.msra.mxu1 %v2226_v42  ;;  %1745 = vmatpush1.bf16.msra.mxu0 %v2229_v43 }
  0xf0   : > { %1664 = vmatprep.subr.bf16.mxu1 %v2234_v44  ;;  %1746 = vmatprep.subr.bf16.mxu0 %v2237_v45 }
  0xf3   : > { %1665 = vmatpush1.bf16.msra.mxu1 %v2232_v46  ;;  %1747 = vmatpush1.bf16.msra.mxu0 %v2235_v47 }
  0xf4   : > { %1666 = vmatprep.subr.bf16.mxu1 %v2240_v48  ;;  %1748 = vmatprep.subr.bf16.mxu0 %v2243_v49 }
  0xf7   : > { %1667 = vmatpush1.bf16.msra.mxu1 %v2238_v50  ;;  %1749 = vmatpush1.bf16.msra.mxu0 %v2241_v51 }
  0xf8   : > { %1668 = vmatprep.subr.bf16.mxu1 %v2246_v52  ;;  %1750 = vmatprep.subr.bf16.mxu0 %v2249_v53 }
  0xfb   : > { %1669 = vmatpush1.bf16.msra.mxu1 %v2244_v54  ;;  %1751 = vmatpush1.bf16.msra.mxu0 %v2247_v55 }
  0xfc   : > { %1670 = vmatprep.subr.bf16.mxu1 %v2252_v56  ;;  %1752 = vmatprep.subr.bf16.mxu0 %v2255_v57 }
  0xff   : > { %1671 = vmatpush1.bf16.msra.mxu1 %v2250_v58  ;;  %1753 = vmatpush1.bf16.msra.mxu0 %v2253_v59 }
 0x100   : > { %1672 = vmatprep.subr.bf16.mxu1 %v2258_v60  ;;  %1754 = vmatprep.subr.bf16.mxu0 %v2261_v61 }
 0x103   : > { %1673 = vmatpush1.bf16.msra.mxu1 %v2256_v62  ;;  %1755 = vmatpush1.bf16.msra.mxu0 %v2259_v63 }
 0x104   : > { %1674 = vmatprep.subr.bf16.mxu1 %v2264_v0  ;;  %1756 = vmatprep.subr.bf16.mxu0 %v2267_v1 }
 0x107   : > { %1675 = vmatpush1.bf16.msra.mxu1 %v2262_v2  ;;  %1757 = vmatpush1.bf16.msra.mxu0 %v2265_v3 }
 0x108   : > { %1676 = vmatprep.subr.bf16.mxu1 %v2270_v5  ;;  %1758 = vmatprep.subr.bf16.mxu0 %v2273_v6 }
 0x10b   : > { %1677 = vmatpush1.bf16.msra.mxu1 %v2268_v7  ;;  %1759 = vmatpush1.bf16.msra.mxu0 %v2271_v8 }
 0x10c   : > { %1678 = vmatprep.subr.bf16.mxu1 %v2276_v9  ;;  %1760 = vmatprep.subr.bf16.mxu0 %v2279_v10 }
 0x10f   : > { %1679 = vmatpush1.bf16.msra.mxu1 %v2274_v12  ;;  %1761 = vmatpush1.bf16.msra.mxu0 %v2277_v13 }
 0x110   : > { %1680 = vmatprep.subr.bf16.mxu1 %v2282_v14  ;;  %1762 = vmatprep.subr.bf16.mxu0 %v2285_v17 }
 0x113   : > { %1681 = vmatpush1.bf16.msra.mxu1 %v2280_v18  ;;  %1763 = vmatpush1.bf16.msra.mxu0 %v2283_v19 }
 0x114   : > { %1682 = vmatprep.subr.bf16.mxu1 %v2288_v20  ;;  %1764 = vmatprep.subr.bf16.mxu0 %v2291_v21 }
 0x117   : > { %1683 = vmatpush1.bf16.msra.mxu1 %v2286_v24  ;;  %1765 = vmatpush1.bf16.msra.mxu0 %v2289_v27 }
 0x11a   : > { %1685 = vmatmul.mubr.bf16.vlgmr.msra.gmra.mrb[0].mxu1 %v959_v28  ;;  %1767 = vmatmul.mubr.bf16.vlgmr.msra.gmra.mrb[0].mxu0 %v960_v15 }
 0x1ed   : > { %v1686_v26 = vpop.f32.mrb[0].mxu1  ;;  %v1768_v23 = vpop.f32.mrb[0].mxu0 }
 0x1ee   : > { %v2046_v31 = vadd.f32 %v1686_v26, %v906_v22  ;;  %v1688_v32 = vpop.f32.mrb[1].mxu1  ;;  %v1770_v33 = vpop.f32.mrb[1].mxu0 }
 0x1ef   : > { %v2048_v34 = vadd.f32 %v1688_v32, %v910_v25  ;;  %v1690_v35 = vpop.f32.mrb[2].mxu1  ;;  %v1772_v36 = vpop.f32.mrb[2].mxu0 }
 0x1f0   : > { %v2047_v37 = vadd.f32 %v2046_v31, %v1768_v23  ;;  %v1691_v38 = vpop.f32.mrb[3].mxu1  ;;  %v1773_v39 = vpop.f32.mrb[3].mxu0 }
 0x1f1   : > { %v2049_v40 = vadd.f32 %v2048_v34, %v1770_v33 }
 0x1f3   : > { %v2041_v41 = vpack.c.bf16 %v2049_v40, %v2047_v37 }
 0x1f5   : > { %v1786_v4 = vrot.slane %v2041_v41, %v2671_v11 }
 0x1f7   : > { %2042 = vst.sshfl [vmem:[%s770_s12] sm:$0x5 pattern:$0x73625140] %v1786_v4 }
 0x1f8 PF: > { %s13_s16 = sadd.s32 1, %s2330_s16   ;;  %s2862_s12 = smov %s2318_s13 }
 0x1f9   : > { %p10_p10 = scmp.ge.s32.totalorder %s13_s16, 10   ;;  %s2863_s13 = smov %s2388_s20 }
 0x1fa   : > { %s2864_s14 = smov %s2326_s15  ;;  %s2865_s15 = smov %s2867_s17 }
 0x1fb   :  { %12 = sbr.rel (!%p10_p10) target bundleno = 3 (0x3), region = 111 }

// kernel: _lambda_.27
= control target key start
LH: loop header
LB: loop body
LE: loop exit
PB: predicated region body
PF: predicated region fallthrough
CT: control target
= control target key end

     0   :  { %s2352_s12 = smov 0   ;;  %s2354_s13 = smov 0   ;;  %s2856_s0 = inlined_call_operand.vmem [shape: bf16[2,1024], index: 0, kind: input, shape index: {}]   ;;  %s2857_s1 = inlined_call_operand.vmem [shape: bf16[1024,512], index: 1, kind: input, shape index: {}]   ;;  %s2858_s2 = inlined_call_operand.vmem [shape: f32[1,512], index: 2, kind: input, shape index: {}]   ;;  %s2859_s3 = inlined_call_operand.vmem [shape: f32[2,512], index: 3, kind: output, shape index: {}]  }
   0x1   :  { %s2356_s14 = smov 0   ;;  %s2358_s15 = smov 0  }
   0x2   :  { %s2360_s16 = smov 0  }
   0x3 LB: > { %s25_s17 = sadd.s32 1, %s2325_s15  ;;  %p65_p1 = scmp.ne.s32.totalorder %s2317_s13, %s2313_s12  ;;  %s2329_s16 = sphi %s2360_s16, %s13_s16   ;;  %s2325_s15 = sphi %s2358_s15, %s2863_s15   ;;  %s2321_s14 = sphi %s2356_s14, %s2862_s14   ;;  %s2317_s13 = sphi %s2354_s13, %s2861_s13   ;;  %s2313_s12 = sphi %s2352_s12, %s2860_s12  }
   0x4   : > { %p27_p0 = scmp.ge.s32.totalorder %s25_s17, 2  ;;  %p66_p2 = scmp.eq.s32.totalorder %s2329_s16, 0 }
   0x5   : > { %s58_s19 = sadd.s32 1, %s2317_s13  ;;  %p1904_p5 = scmp.ge.s32.totalorder %s2329_s16, 2 }
   0x6   : > { %s2865_s17 = smov (%p27_p0, %s25_s17), 0  ;;  %p67_p3 = por %p66_p2, %p65_p1 }
   0x7   : > { %s55_s18 = ssub.s32 %s2325_s15, %s2865_s17  ;;  %152 = sbr.rel (%p1904_p5) target bundleno = 82 (0x52), region = 20 }
   0x8   : > { %p56_p4 = scmp.eq.s32.totalorder %s55_s18, 0 }
   0xa   : > { %s2387_s20 = scalar_select %p56_p4, %s2317_s13, %s58_s19  }
   0xe   : > { %155 = sbr.rel (!%p67_p3) target bundleno = 82 (0x52), region = 24  ;;  %s157_s21 = sand.u32 (%p67_p3), 1, %s2317_s13  }
   0xf   : > { %s2044_s22 = sshll.u32 (%p67_p3), %s2325_s15, 3  ;;  %s1905_s23 = sshll.u32 (%p67_p3), %s157_s21, 10 }
  0x10   : > { %s2395_s26 = scalar_lea.vmem (%p67_p3), %s2857_s1, %s2044_s22  ;;  %s2400_s27 = scalar_lea.vmem (%p67_p3), [#allocation2], %s1905_s23 }
  0x11   : > { %v444_v0 = vld [vmem:[%s2395_s26] sm:$0xff] (%p67_p3)  ;;  %v446_v1 = vld [vmem:[%s2395_s26 + $0x10] sm:$0xff] (%p67_p3) }
  0x12   : > { %v448_v2 = vld [vmem:[%s2395_s26 + $0x20] sm:$0xff] (%p67_p3)  ;;  %445 = vst [vmem:[%s2400_s27] sm:$0xff] (%p67_p3), %v444_v0  ;;  %447 = vst [vmem:[%s2400_s27 + $0x8] sm:$0xff] (%p67_p3), %v446_v1  ;;  %v450_v3 = vld [vmem:[%s2395_s26 + $0x30] sm:$0xff] (%p67_p3) }
  0x13   : > { %449 = vst [vmem:[%s2400_s27 + $0x10] sm:$0xff] (%p67_p3), %v448_v2  ;;  %v452_v4 = vld [vmem:[%s2395_s26 + $0x40] sm:$0xff] (%p67_p3)  ;;  %v454_v5 = vld [vmem:[%s2395_s26 + $0x50] sm:$0xff] (%p67_p3)  ;;  %451 = vst [vmem:[%s2400_s27 + $0x18] sm:$0xff] (%p67_p3), %v450_v3 }
  0x14   : > { %453 = vst [vmem:[%s2400_s27 + $0x20] sm:$0xff] (%p67_p3), %v452_v4  ;;  %455 = vst [vmem:[%s2400_s27 + $0x28] sm:$0xff] (%p67_p3), %v454_v5  ;;  %v456_v6 = vld [vmem:[%s2395_s26 + $0x60] sm:$0xff] (%p67_p3)  ;;  %v458_v7 = vld [vmem:[%s2395_s26 + $0x70] sm:$0xff] (%p67_p3) }
  0x15   : > { %v460_v8 = vld [vmem:[%s2395_s26 + $0x80] sm:$0xff]  ;;  %457 = vst [vmem:[%s2400_s27 + $0x30] sm:$0xff] %v456_v6  ;;  %459 = vst [vmem:[%s2400_s27 + $0x38] sm:$0xff] %v458_v7  ;;  %v462_v9 = vld [vmem:[%s2395_s26 + $0x90] sm:$0xff] }
  0x16   : > { %461 = vst [vmem:[%s2400_s27 + $0x40] sm:$0xff] %v460_v8  ;;  %v464_v10 = vld [vmem:[%s2395_s26 + $0xa0] sm:$0xff]  ;;  %v466_v11 = vld [vmem:[%s2395_s26 + $0xb0] sm:$0xff]  ;;  %463 = vst [vmem:[%s2400_s27 + $0x48] sm:$0xff] %v462_v9 }
  0x17   : > { %465 = vst [vmem:[%s2400_s27 + $0x50] sm:$0xff] %v464_v10  ;;  %467 = vst [vmem:[%s2400_s27 + $0x58] sm:$0xff] %v466_v11  ;;  %v468_v12 = vld [vmem:[%s2395_s26 + $0xc0] sm:$0xff]  ;;  %v470_v13 = vld [vmem:[%s2395_s26 + $0xd0] sm:$0xff] }
  0x18   : > { %v472_v14 = vld [vmem:[%s2395_s26 + $0xe0] sm:$0xff]  ;;  %469 = vst [vmem:[%s2400_s27 + $0x60] sm:$0xff] %v468_v12  ;;  %471 = vst [vmem:[%s2400_s27 + $0x68] sm:$0xff] %v470_v13  ;;  %v474_v15 = vld [vmem:[%s2395_s26 + $0xf0] sm:$0xff] }
  0x19   : > { %473 = vst [vmem:[%s2400_s27 + $0x70] sm:$0xff] %v472_v14  ;;  %v476_v16 = vld [vmem:[%s2395_s26 + $0x100] sm:$0xff]  ;;  %v478_v17 = vld [vmem:[%s2395_s26 + $0x110] sm:$0xff]  ;;  %475 = vst [vmem:[%s2400_s27 + $0x78] sm:$0xff] %v474_v15 }
  0x1a   : > { %477 = vst [vmem:[%s2400_s27 + $0x80] sm:$0xff] %v476_v16  ;;  %479 = vst [vmem:[%s2400_s27 + $0x88] sm:$0xff] %v478_v17  ;;  %v480_v18 = vld [vmem:[%s2395_s26 + $0x120] sm:$0xff]  ;;  %v482_v19 = vld [vmem:[%s2395_s26 + $0x130] sm:$0xff] }
  0x1b   : > { %v484_v20 = vld [vmem:[%s2395_s26 + $0x140] sm:$0xff]  ;;  %481 = vst [vmem:[%s2400_s27 + $0x90] sm:$0xff] %v480_v18  ;;  %483 = vst [vmem:[%s2400_s27 + $0x98] sm:$0xff] %v482_v19  ;;  %v486_v21 = vld [vmem:[%s2395_s26 + $0x150] sm:$0xff] }
  0x1c   : > { %485 = vst [vmem:[%s2400_s27 + $0xa0] sm:$0xff] %v484_v20  ;;  %v488_v22 = vld [vmem:[%s2395_s26 + $0x160] sm:$0xff]  ;;  %v490_v23 = vld [vmem:[%s2395_s26 + $0x170] sm:$0xff]  ;;  %487 = vst [vmem:[%s2400_s27 + $0xa8] sm:$0xff] %v486_v21 }
  0x1d   : > { %489 = vst [vmem:[%s2400_s27 + $0xb0] sm:$0xff] %v488_v22  ;;  %491 = vst [vmem:[%s2400_s27 + $0xb8] sm:$0xff] %v490_v23  ;;  %v492_v24 = vld [vmem:[%s2395_s26 + $0x180] sm:$0xff]  ;;  %v494_v25 = vld [vmem:[%s2395_s26 + $0x190] sm:$0xff] }
  0x1e   : > { %v496_v26 = vld [vmem:[%s2395_s26 + $0x1a0] sm:$0xff]  ;;  %493 = vst [vmem:[%s2400_s27 + $0xc0] sm:$0xff] %v492_v24  ;;  %495 = vst [vmem:[%s2400_s27 + $0xc8] sm:$0xff] %v494_v25  ;;  %v498_v27 = vld [vmem:[%s2395_s26 + $0x1b0] sm:$0xff] }
  0x1f   : > { %497 = vst [vmem:[%s2400_s27 + $0xd0] sm:$0xff] %v496_v26  ;;  %v500_v28 = vld [vmem:[%s2395_s26 + $0x1c0] sm:$0xff]  ;;  %v502_v29 = vld [vmem:[%s2395_s26 + $0x1d0] sm:$0xff]  ;;  %499 = vst [vmem:[%s2400_s27 + $0xd8] sm:$0xff] %v498_v27 }
  0x20   : > { %501 = vst [vmem:[%s2400_s27 + $0xe0] sm:$0xff] %v500_v28  ;;  %503 = vst [vmem:[%s2400_s27 + $0xe8] sm:$0xff] %v502_v29  ;;  %v504_v30 = vld [vmem:[%s2395_s26 + $0x1e0] sm:$0xff]  ;;  %v506_v31 = vld [vmem:[%s2395_s26 + $0x1f0] sm:$0xff] }
  0x21   : > { %v508_v32 = vld [vmem:[%s2395_s26 + $0x200] sm:$0xff]  ;;  %505 = vst [vmem:[%s2400_s27 + $0xf0] sm:$0xff] %v504_v30  ;;  %507 = vst [vmem:[%s2400_s27 + $0xf8] sm:$0xff] %v506_v31  ;;  %v510_v33 = vld [vmem:[%s2395_s26 + $0x210] sm:$0xff] }
  0x22   : > { %509 = vst [vmem:[%s2400_s27 + $0x100] sm:$0xff] %v508_v32  ;;  %v512_v34 = vld [vmem:[%s2395_s26 + $0x220] sm:$0xff]  ;;  %v514_v35 = vld [vmem:[%s2395_s26 + $0x230] sm:$0xff]  ;;  %511 = vst [vmem:[%s2400_s27 + $0x108] sm:$0xff] %v510_v33 }
  0x23   : > { %513 = vst [vmem:[%s2400_s27 + $0x110] sm:$0xff] %v512_v34  ;;  %515 = vst [vmem:[%s2400_s27 + $0x118] sm:$0xff] %v514_v35  ;;  %v516_v36 = vld [vmem:[%s2395_s26 + $0x240] sm:$0xff]  ;;  %v518_v37 = vld [vmem:[%s2395_s26 + $0x250] sm:$0xff] }
  0x24   : > { %v520_v38 = vld [vmem:[%s2395_s26 + $0x260] sm:$0xff]  ;;  %517 = vst [vmem:[%s2400_s27 + $0x120] sm:$0xff] %v516_v36  ;;  %519 = vst [vmem:[%s2400_s27 + $0x128] sm:$0xff] %v518_v37  ;;  %v522_v39 = vld [vmem:[%s2395_s26 + $0x270] sm:$0xff] }
  0x25   : > { %521 = vst [vmem:[%s2400_s27 + $0x130] sm:$0xff] %v520_v38  ;;  %v524_v40 = vld [vmem:[%s2395_s26 + $0x280] sm:$0xff]  ;;  %v526_v41 = vld [vmem:[%s2395_s26 + $0x290] sm:$0xff]  ;;  %523 = vst [vmem:[%s2400_s27 + $0x138] sm:$0xff] %v522_v39 }
  0x26   : > { %525 = vst [vmem:[%s2400_s27 + $0x140] sm:$0xff] %v524_v40  ;;  %527 = vst [vmem:[%s2400_s27 + $0x148] sm:$0xff] %v526_v41  ;;  %v528_v42 = vld [vmem:[%s2395_s26 + $0x2a0] sm:$0xff]  ;;  %v530_v43 = vld [vmem:[%s2395_s26 + $0x2b0] sm:$0xff] }
  0x27   : > { %v532_v44 = vld [vmem:[%s2395_s26 + $0x2c0] sm:$0xff]  ;;  %529 = vst [vmem:[%s2400_s27 + $0x150] sm:$0xff] %v528_v42  ;;  %531 = vst [vmem:[%s2400_s27 + $0x158] sm:$0xff] %v530_v43  ;;  %v534_v45 = vld [vmem:[%s2395_s26 + $0x2d0] sm:$0xff] }
  0x28   : > { %533 = vst [vmem:[%s2400_s27 + $0x160] sm:$0xff] %v532_v44  ;;  %v536_v46 = vld [vmem:[%s2395_s26 + $0x2e0] sm:$0xff]  ;;  %v538_v47 = vld [vmem:[%s2395_s26 + $0x2f0] sm:$0xff]  ;;  %535 = vst [vmem:[%s2400_s27 + $0x168] sm:$0xff] %v534_v45 }
  0x29   : > { %537 = vst [vmem:[%s2400_s27 + $0x170] sm:$0xff] %v536_v46  ;;  %539 = vst [vmem:[%s2400_s27 + $0x178] sm:$0xff] %v538_v47  ;;  %v540_v48 = vld [vmem:[%s2395_s26 + $0x300] sm:$0xff]  ;;  %v542_v49 = vld [vmem:[%s2395_s26 + $0x310] sm:$0xff] }
  0x2a   : > { %v544_v50 = vld [vmem:[%s2395_s26 + $0x320] sm:$0xff]  ;;  %541 = vst [vmem:[%s2400_s27 + $0x180] sm:$0xff] %v540_v48  ;;  %543 = vst [vmem:[%s2400_s27 + $0x188] sm:$0xff] %v542_v49  ;;  %v546_v51 = vld [vmem:[%s2395_s26 + $0x330] sm:$0xff] }
  0x2b   : > { %545 = vst [vmem:[%s2400_s27 + $0x190] sm:$0xff] %v544_v50  ;;  %v548_v52 = vld [vmem:[%s2395_s26 + $0x340] sm:$0xff]  ;;  %v550_v53 = vld [vmem:[%s2395_s26 + $0x350] sm:$0xff]  ;;  %547 = vst [vmem:[%s2400_s27 + $0x198] sm:$0xff] %v546_v51 }
  0x2c   : > { %549 = vst [vmem:[%s2400_s27 + $0x1a0] sm:$0xff] %v548_v52  ;;  %551 = vst [vmem:[%s2400_s27 + $0x1a8] sm:$0xff] %v550_v53  ;;  %v552_v54 = vld [vmem:[%s2395_s26 + $0x360] sm:$0xff]  ;;  %v554_v55 = vld [vmem:[%s2395_s26 + $0x370] sm:$0xff] }
  0x2d   : > { %v556_v56 = vld [vmem:[%s2395_s26 + $0x380] sm:$0xff]  ;;  %553 = vst [vmem:[%s2400_s27 + $0x1b0] sm:$0xff] %v552_v54  ;;  %555 = vst [vmem:[%s2400_s27 + $0x1b8] sm:$0xff] %v554_v55  ;;  %v558_v57 = vld [vmem:[%s2395_s26 + $0x390] sm:$0xff] }
  0x2e   : > { %557 = vst [vmem:[%s2400_s27 + $0x1c0] sm:$0xff] %v556_v56  ;;  %v560_v58 = vld [vmem:[%s2395_s26 + $0x3a0] sm:$0xff]  ;;  %v562_v59 = vld [vmem:[%s2395_s26 + $0x3b0] sm:$0xff]  ;;  %559 = vst [vmem:[%s2400_s27 + $0x1c8] sm:$0xff] %v558_v57 }
  0x2f   : > { %561 = vst [vmem:[%s2400_s27 + $0x1d0] sm:$0xff] %v560_v58  ;;  %563 = vst [vmem:[%s2400_s27 + $0x1d8] sm:$0xff] %v562_v59  ;;  %v564_v60 = vld [vmem:[%s2395_s26 + $0x3c0] sm:$0xff]  ;;  %v566_v61 = vld [vmem:[%s2395_s26 + $0x3d0] sm:$0xff] }
  0x30   : > { %v568_v62 = vld [vmem:[%s2395_s26 + $0x3e0] sm:$0xff]  ;;  %565 = vst [vmem:[%s2400_s27 + $0x1e0] sm:$0xff] %v564_v60  ;;  %567 = vst [vmem:[%s2400_s27 + $0x1e8] sm:$0xff] %v566_v61  ;;  %v570_v63 = vld [vmem:[%s2395_s26 + $0x3f0] sm:$0xff] }
  0x31   : > { %569 = vst [vmem:[%s2400_s27 + $0x1f0] sm:$0xff] %v568_v62  ;;  %v572_v0 = vld [vmem:[%s2395_s26 + $0x400] sm:$0xff]  ;;  %v574_v1 = vld [vmem:[%s2395_s26 + $0x410] sm:$0xff]  ;;  %571 = vst [vmem:[%s2400_s27 + $0x1f8] sm:$0xff] %v570_v63 }
  0x32   : > { %573 = vst [vmem:[%s2400_s27 + $0x200] sm:$0xff] %v572_v0  ;;  %575 = vst [vmem:[%s2400_s27 + $0x208] sm:$0xff] %v574_v1  ;;  %v576_v2 = vld [vmem:[%s2395_s26 + $0x420] sm:$0xff]  ;;  %v578_v3 = vld [vmem:[%s2395_s26 + $0x430] sm:$0xff] }
  0x33   : > { %v580_v4 = vld [vmem:[%s2395_s26 + $0x440] sm:$0xff]  ;;  %577 = vst [vmem:[%s2400_s27 + $0x210] sm:$0xff] %v576_v2  ;;  %579 = vst [vmem:[%s2400_s27 + $0x218] sm:$0xff] %v578_v3  ;;  %v582_v5 = vld [vmem:[%s2395_s26 + $0x450] sm:$0xff] }
  0x34   : > { %581 = vst [vmem:[%s2400_s27 + $0x220] sm:$0xff] %v580_v4  ;;  %v584_v6 = vld [vmem:[%s2395_s26 + $0x460] sm:$0xff]  ;;  %v586_v7 = vld [vmem:[%s2395_s26 + $0x470] sm:$0xff]  ;;  %583 = vst [vmem:[%s2400_s27 + $0x228] sm:$0xff] %v582_v5 }
  0x35   : > { %585 = vst [vmem:[%s2400_s27 + $0x230] sm:$0xff] %v584_v6  ;;  %587 = vst [vmem:[%s2400_s27 + $0x238] sm:$0xff] %v586_v7  ;;  %v588_v8 = vld [vmem:[%s2395_s26 + $0x480] sm:$0xff]  ;;  %v590_v9 = vld [vmem:[%s2395_s26 + $0x490] sm:$0xff] }
  0x36   : > { %v592_v10 = vld [vmem:[%s2395_s26 + $0x4a0] sm:$0xff]  ;;  %589 = vst [vmem:[%s2400_s27 + $0x240] sm:$0xff] %v588_v8  ;;  %591 = vst [vmem:[%s2400_s27 + $0x248] sm:$0xff] %v590_v9  ;;  %v594_v11 = vld [vmem:[%s2395_s26 + $0x4b0] sm:$0xff] }
  0x37   : > { %593 = vst [vmem:[%s2400_s27 + $0x250] sm:$0xff] %v592_v10  ;;  %v596_v12 = vld [vmem:[%s2395_s26 + $0x4c0] sm:$0xff]  ;;  %v598_v13 = vld [vmem:[%s2395_s26 + $0x4d0] sm:$0xff]  ;;  %595 = vst [vmem:[%s2400_s27 + $0x258] sm:$0xff] %v594_v11 }
  0x38   : > { %597 = vst [vmem:[%s2400_s27 + $0x260] sm:$0xff] %v596_v12  ;;  %599 = vst [vmem:[%s2400_s27 + $0x268] sm:$0xff] %v598_v13  ;;  %v600_v14 = vld [vmem:[%s2395_s26 + $0x4e0] sm:$0xff]  ;;  %v602_v15 = vld [vmem:[%s2395_s26 + $0x4f0] sm:$0xff] }
  0x39   : > { %v604_v16 = vld [vmem:[%s2395_s26 + $0x500] sm:$0xff]  ;;  %601 = vst [vmem:[%s2400_s27 + $0x270] sm:$0xff] %v600_v14  ;;  %603 = vst [vmem:[%s2400_s27 + $0x278] sm:$0xff] %v602_v15  ;;  %v606_v17 = vld [vmem:[%s2395_s26 + $0x510] sm:$0xff] }
  0x3a   : > { %605 = vst [vmem:[%s2400_s27 + $0x280] sm:$0xff] %v604_v16  ;;  %v608_v18 = vld [vmem:[%s2395_s26 + $0x520] sm:$0xff]  ;;  %v610_v19 = vld [vmem:[%s2395_s26 + $0x530] sm:$0xff]  ;;  %607 = vst [vmem:[%s2400_s27 + $0x288] sm:$0xff] %v606_v17 }
  0x3b   : > { %609 = vst [vmem:[%s2400_s27 + $0x290] sm:$0xff] %v608_v18  ;;  %611 = vst [vmem:[%s2400_s27 + $0x298] sm:$0xff] %v610_v19  ;;  %v612_v20 = vld [vmem:[%s2395_s26 + $0x540] sm:$0xff]  ;;  %v614_v21 = vld [vmem:[%s2395_s26 + $0x550] sm:$0xff] }
  0x3c   : > { %v616_v22 = vld [vmem:[%s2395_s26 + $0x560] sm:$0xff]  ;;  %613 = vst [vmem:[%s2400_s27 + $0x2a0] sm:$0xff] %v612_v20  ;;  %615 = vst [vmem:[%s2400_s27 + $0x2a8] sm:$0xff] %v614_v21  ;;  %v618_v23 = vld [vmem:[%s2395_s26 + $0x570] sm:$0xff] }
  0x3d   : > { %617 = vst [vmem:[%s2400_s27 + $0x2b0] sm:$0xff] %v616_v22  ;;  %v620_v24 = vld [vmem:[%s2395_s26 + $0x580] sm:$0xff]  ;;  %v622_v25 = vld [vmem:[%s2395_s26 + $0x590] sm:$0xff]  ;;  %619 = vst [vmem:[%s2400_s27 + $0x2b8] sm:$0xff] %v618_v23 }
  0x3e   : > { %621 = vst [vmem:[%s2400_s27 + $0x2c0] sm:$0xff] %v620_v24  ;;  %623 = vst [vmem:[%s2400_s27 + $0x2c8] sm:$0xff] %v622_v25  ;;  %v624_v26 = vld [vmem:[%s2395_s26 + $0x5a0] sm:$0xff]  ;;  %v626_v27 = vld [vmem:[%s2395_s26 + $0x5b0] sm:$0xff] }
  0x3f   : > { %v628_v28 = vld [vmem:[%s2395_s26 + $0x5c0] sm:$0xff]  ;;  %625 = vst [vmem:[%s2400_s27 + $0x2d0] sm:$0xff] %v624_v26  ;;  %627 = vst [vmem:[%s2400_s27 + $0x2d8] sm:$0xff] %v626_v27  ;;  %v630_v29 = vld [vmem:[%s2395_s26 + $0x5d0] sm:$0xff] }
  0x40   : > { %629 = vst [vmem:[%s2400_s27 + $0x2e0] sm:$0xff] %v628_v28  ;;  %v632_v30 = vld [vmem:[%s2395_s26 + $0x5e0] sm:$0xff]  ;;  %v634_v31 = vld [vmem:[%s2395_s26 + $0x5f0] sm:$0xff]  ;;  %631 = vst [vmem:[%s2400_s27 + $0x2e8] sm:$0xff] %v630_v29 }
  0x41   : > { %633 = vst [vmem:[%s2400_s27 + $0x2f0] sm:$0xff] %v632_v30  ;;  %635 = vst [vmem:[%s2400_s27 + $0x2f8] sm:$0xff] %v634_v31  ;;  %v636_v32 = vld [vmem:[%s2395_s26 + $0x600] sm:$0xff]  ;;  %v638_v33 = vld [vmem:[%s2395_s26 + $0x610] sm:$0xff] }
  0x42   : > { %v640_v34 = vld [vmem:[%s2395_s26 + $0x620] sm:$0xff]  ;;  %637 = vst [vmem:[%s2400_s27 + $0x300] sm:$0xff] %v636_v32  ;;  %639 = vst [vmem:[%s2400_s27 + $0x308] sm:$0xff] %v638_v33  ;;  %v642_v35 = vld [vmem:[%s2395_s26 + $0x630] sm:$0xff] }
  0x43   : > { %641 = vst [vmem:[%s2400_s27 + $0x310] sm:$0xff] %v640_v34  ;;  %v644_v36 = vld [vmem:[%s2395_s26 + $0x640] sm:$0xff]  ;;  %v646_v37 = vld [vmem:[%s2395_s26 + $0x650] sm:$0xff]  ;;  %643 = vst [vmem:[%s2400_s27 + $0x318] sm:$0xff] %v642_v35 }
  0x44   : > { %645 = vst [vmem:[%s2400_s27 + $0x320] sm:$0xff] %v644_v36  ;;  %647 = vst [vmem:[%s2400_s27 + $0x328] sm:$0xff] %v646_v37  ;;  %v648_v38 = vld [vmem:[%s2395_s26 + $0x660] sm:$0xff]  ;;  %v650_v39 = vld [vmem:[%s2395_s26 + $0x670] sm:$0xff] }
  0x45   : > { %v652_v40 = vld [vmem:[%s2395_s26 + $0x680] sm:$0xff]  ;;  %649 = vst [vmem:[%s2400_s27 + $0x330] sm:$0xff] %v648_v38  ;;  %651 = vst [vmem:[%s2400_s27 + $0x338] sm:$0xff] %v650_v39  ;;  %v654_v41 = vld [vmem:[%s2395_s26 + $0x690] sm:$0xff] }
  0x46   : > { %653 = vst [vmem:[%s2400_s27 + $0x340] sm:$0xff] %v652_v40  ;;  %v656_v42 = vld [vmem:[%s2395_s26 + $0x6a0] sm:$0xff]  ;;  %v658_v43 = vld [vmem:[%s2395_s26 + $0x6b0] sm:$0xff]  ;;  %655 = vst [vmem:[%s2400_s27 + $0x348] sm:$0xff] %v654_v41 }
  0x47   : > { %657 = vst [vmem:[%s2400_s27 + $0x350] sm:$0xff] %v656_v42  ;;  %659 = vst [vmem:[%s2400_s27 + $0x358] sm:$0xff] %v658_v43  ;;  %v660_v44 = vld [vmem:[%s2395_s26 + $0x6c0] sm:$0xff]  ;;  %v662_v45 = vld [vmem:[%s2395_s26 + $0x6d0] sm:$0xff] }
  0x48   : > { %v664_v46 = vld [vmem:[%s2395_s26 + $0x6e0] sm:$0xff]  ;;  %661 = vst [vmem:[%s2400_s27 + $0x360] sm:$0xff] %v660_v44  ;;  %663 = vst [vmem:[%s2400_s27 + $0x368] sm:$0xff] %v662_v45  ;;  %v666_v47 = vld [vmem:[%s2395_s26 + $0x6f0] sm:$0xff] }
  0x49   : > { %665 = vst [vmem:[%s2400_s27 + $0x370] sm:$0xff] %v664_v46  ;;  %v668_v48 = vld [vmem:[%s2395_s26 + $0x700] sm:$0xff]  ;;  %v670_v49 = vld [vmem:[%s2395_s26 + $0x710] sm:$0xff]  ;;  %667 = vst [vmem:[%s2400_s27 + $0x378] sm:$0xff] %v666_v47 }
  0x4a   : > { %669 = vst [vmem:[%s2400_s27 + $0x380] sm:$0xff] %v668_v48  ;;  %671 = vst [vmem:[%s2400_s27 + $0x388] sm:$0xff] %v670_v49  ;;  %v672_v50 = vld [vmem:[%s2395_s26 + $0x720] sm:$0xff]  ;;  %v674_v51 = vld [vmem:[%s2395_s26 + $0x730] sm:$0xff] }
  0x4b   : > { %v676_v52 = vld [vmem:[%s2395_s26 + $0x740] sm:$0xff]  ;;  %673 = vst [vmem:[%s2400_s27 + $0x390] sm:$0xff] %v672_v50  ;;  %675 = vst [vmem:[%s2400_s27 + $0x398] sm:$0xff] %v674_v51  ;;  %v678_v53 = vld [vmem:[%s2395_s26 + $0x750] sm:$0xff] }
  0x4c   : > { %677 = vst [vmem:[%s2400_s27 + $0x3a0] sm:$0xff] %v676_v52  ;;  %v680_v54 = vld [vmem:[%s2395_s26 + $0x760] sm:$0xff]  ;;  %v682_v55 = vld [vmem:[%s2395_s26 + $0x770] sm:$0xff]  ;;  %679 = vst [vmem:[%s2400_s27 + $0x3a8] sm:$0xff] %v678_v53 }
  0x4d   : > { %681 = vst [vmem:[%s2400_s27 + $0x3b0] sm:$0xff] %v680_v54  ;;  %683 = vst [vmem:[%s2400_s27 + $0x3b8] sm:$0xff] %v682_v55  ;;  %v684_v56 = vld [vmem:[%s2395_s26 + $0x780] sm:$0xff]  ;;  %v686_v57 = vld [vmem:[%s2395_s26 + $0x790] sm:$0xff] }
  0x4e   : > { %v688_v58 = vld [vmem:[%s2395_s26 + $0x7a0] sm:$0xff]  ;;  %685 = vst [vmem:[%s2400_s27 + $0x3c0] sm:$0xff] %v684_v56  ;;  %687 = vst [vmem:[%s2400_s27 + $0x3c8] sm:$0xff] %v686_v57  ;;  %v690_v59 = vld [vmem:[%s2395_s26 + $0x7b0] sm:$0xff] }
  0x4f   : > { %689 = vst [vmem:[%s2400_s27 + $0x3d0] sm:$0xff] %v688_v58  ;;  %v692_v60 = vld [vmem:[%s2395_s26 + $0x7c0] sm:$0xff]  ;;  %v694_v61 = vld [vmem:[%s2395_s26 + $0x7d0] sm:$0xff]  ;;  %691 = vst [vmem:[%s2400_s27 + $0x3d8] sm:$0xff] %v690_v59 }
  0x50   : > { %693 = vst [vmem:[%s2400_s27 + $0x3e0] sm:$0xff] %v692_v60  ;;  %695 = vst [vmem:[%s2400_s27 + $0x3e8] sm:$0xff] %v694_v61  ;;  %v696_v62 = vld [vmem:[%s2395_s26 + $0x7e0] sm:$0xff]  ;;  %v698_v63 = vld [vmem:[%s2395_s26 + $0x7f0] sm:$0xff] }
  0x51   : > { %697 = vst [vmem:[%s2400_s27 + $0x3f0] sm:$0xff] %v696_v62  ;;  %699 = vst [vmem:[%s2400_s27 + $0x3f8] sm:$0xff] %v698_v63 }
  0x52 PF: > { %p1908_p6 = scmp.ge.s32.totalorder %s2329_s16, 1  ;;  %p712_p7 = scmp.lt.s32.totalorder %s2329_s16, 3 }
  0x54   : > { %p713_p8 = pnand %p1908_p6, %p712_p7 }
  0x55   : > { %s719_s28 = sand.u32 (!%p713_p8), 1, %s2313_s12   ;;  %v774_v0 = vld [vmem:[%s2856_s0] sm:$0xff] (!%p713_p8)  ;;  %v905_v1 = vlaneseq (!%p713_p8)  ;;  %v2331_v2 = vmov (!%p713_p8), 1966171168   ;;  %s1910_s6 = sshll.u32 (!%p713_p8), %s2321_s14, 1 }
  0x56   : > { %716 = sbr.rel (%p713_p8) target bundleno = 438 (0x1b6), region = 66  ;;  %s1909_s4 = sshll.u32 (!%p713_p8), %s719_s28, 10  ;;  %v918_v3 = vunpack.c.l.s4 (!%p713_p8), %v2331_v2  ;;  %v916_v7 = vcombine.high (!%p713_p8), %v774_v0, %v774_v0 }
  0x57   : > { %v2661_v4 = vshrl.u32 (!%p713_p8), %v905_v1, 7  ;;  %s2663_s5 = scalar_lea.vmem (!%p713_p8), [#allocation2], %s1909_s4  ;;  %p760_p9 = scmp.lt.s32.totalorder (!%p713_p8), %s1910_s6, 3 }
  0x58   : > { %v2098_v5 = vld [vmem:[%s2663_s5 + $0x4] ss:$8 sps:$4 sm:$0xff] (!%p713_p8)   ;;  %v919_v6 = vunpack.c.0.s8 (!%p713_p8), %v918_v3  ;;  %v2102_v9 = vld [vmem:[%s2663_s5] ss:$8 sps:$4 sm:$0xff] (!%p713_p8)   ;;  %v2104_v12 = vld [vmem:[%s2663_s5 + $0x14] ss:$8 sps:$4 sm:$0xff] (!%p713_p8)  }
  0x59   : > { %v2100_v8 = vld [vmem:[%s2663_s5 + $0x204] ss:$8 sps:$4 sm:$0xff] (!%p713_p8)   ;;  %1613 = vmatprep.subr.bf16.mxu1 (!%p713_p8), %v2098_v5  ;;  %v2103_v10 = vld [vmem:[%s2663_s5 + $0x200] ss:$8 sps:$4 sm:$0xff] (!%p713_p8)   ;;  %v2106_v13 = vld [vmem:[%s2663_s5 + $0x214] ss:$8 sps:$4 sm:$0xff] (!%p713_p8)  }
  0x5a   : > { %v2670_v11 = vsub.s32 (!%p713_p8), %v919_v6, %v2661_v4  ;;  %1695 = vmatprep.subr.bf16.mxu0 (!%p713_p8), %v2100_v8  ;;  %1614 = vmatpush1.bf16.msra.mxu1 (!%p713_p8), %v2102_v9  ;;  %v2108_v14 = vld [vmem:[%s2663_s5 + $0x10] ss:$8 sps:$4 sm:$0xff] (!%p713_p8)   ;;  %v2110_v18 = vld [vmem:[%s2663_s5 + $0x24] ss:$8 sps:$4 sm:$0xff] (!%p713_p8)   ;;  %v2114_v22 = vld [vmem:[%s2663_s5 + $0x20] ss:$8 sps:$4 sm:$0xff] (!%p713_p8)  }
  0x5b   : > { %1696 = vmatpush1.bf16.msra.mxu0 (!%p713_p8), %v2103_v10  ;;  %1615 = vmatprep.subr.bf16.mxu1 (!%p713_p8), %v2104_v12  ;;  %v2109_v17 = vld [vmem:[%s2663_s5 + $0x210] ss:$8 sps:$4 sm:$0xff] (!%p713_p8)   ;;  %v2112_v21 = vld [vmem:[%s2663_s5 + $0x224] ss:$8 sps:$4 sm:$0xff] (!%p713_p8)   ;;  %v2115_v23 = vld [vmem:[%s2663_s5 + $0x220] ss:$8 sps:$4 sm:$0xff] (!%p713_p8)  }
  0x5c   : > { %v2676_v15 = vrot.slane (!%p713_p8), %v774_v0, %v2670_v11  ;;  %v2679_v16 = vrot.slane (!%p713_p8), %v916_v7, %v2670_v11  ;;  %1697 = vmatprep.subr.bf16.mxu0 (!%p713_p8), %v2106_v13  ;;  %v2116_v24 = vld [vmem:[%s2663_s5 + $0x34] ss:$8 sps:$4 sm:$0xff] (!%p713_p8)   ;;  %v2120_v28 = vld [vmem:[%s2663_s5 + $0x30] ss:$8 sps:$4 sm:$0xff] (!%p713_p8)   ;;  %v2122_v30 = vld [vmem:[%s2663_s5 + $0x44] ss:$8 sps:$4 sm:$0xff] (!%p713_p8)  }
  0x5d   : > { %v2118_v27 = vld [vmem:[%s2663_s5 + $0x234] ss:$8 sps:$4 sm:$0xff]   ;;  %v2121_v29 = vld [vmem:[%s2663_s5 + $0x230] ss:$8 sps:$4 sm:$0xff]   ;;  %v2124_v31 = vld [vmem:[%s2663_s5 + $0x244] ss:$8 sps:$4 sm:$0xff]  }
  0x5e   : > { %v931_v19 = vcombine.high %v2676_v15, %v2676_v15  ;;  %v932_v20 = vcombine.high %v2679_v16, %v2679_v16  ;;  %1616 = vmatpush1.bf16.msra.mxu1 %v2108_v14  ;;  %v2126_v32 = vld [vmem:[%s2663_s5 + $0x40] ss:$8 sps:$4 sm:$0xff]   ;;  %v2128_v34 = vld [vmem:[%s2663_s5 + $0x54] ss:$8 sps:$4 sm:$0xff]   ;;  %v2132_v36 = vld [vmem:[%s2663_s5 + $0x50] ss:$8 sps:$4 sm:$0xff]  }
  0x5f   : > { %1698 = vmatpush1.bf16.msra.mxu0 %v2109_v17  ;;  %1617 = vmatprep.subr.bf16.mxu1 %v2110_v18  ;;  %v2127_v33 = vld [vmem:[%s2663_s5 + $0x240] ss:$8 sps:$4 sm:$0xff]   ;;  %v2130_v35 = vld [vmem:[%s2663_s5 + $0x254] ss:$8 sps:$4 sm:$0xff]   ;;  %v2133_v37 = vld [vmem:[%s2663_s5 + $0x250] ss:$8 sps:$4 sm:$0xff]  }
  0x60   : > { %v2692_v25 = vrot.slane %v931_v19, %v2670_v11  ;;  %v2695_v26 = vrot.slane %v932_v20, %v2670_v11  ;;  %1699 = vmatprep.subr.bf16.mxu0 %v2112_v21  ;;  %v2134_v38 = vld [vmem:[%s2663_s5 + $0x64] ss:$8 sps:$4 sm:$0xff]   ;;  %v2138_v40 = vld [vmem:[%s2663_s5 + $0x60] ss:$8 sps:$4 sm:$0xff]   ;;  %v2140_v42 = vld [vmem:[%s2663_s5 + $0x74] ss:$8 sps:$4 sm:$0xff]  }
  0x61   : > { %v2136_v39 = vld [vmem:[%s2663_s5 + $0x264] ss:$8 sps:$4 sm:$0xff]   ;;  %v2139_v41 = vld [vmem:[%s2663_s5 + $0x260] ss:$8 sps:$4 sm:$0xff]   ;;  %v2142_v43 = vld [vmem:[%s2663_s5 + $0x274] ss:$8 sps:$4 sm:$0xff]  }
  0x62   : > { %1645 = vmatprep.mubr.bf16.mxu1 %v2692_v25  ;;  %1727 = vmatprep.mubr.bf16.mxu0 %v2695_v26  ;;  %v2144_v44 = vld [vmem:[%s2663_s5 + $0x70] ss:$8 sps:$4 sm:$0xff]   ;;  %v2146_v46 = vld [vmem:[%s2663_s5 + $0x84] ss:$8 sps:$4 sm:$0xff]   ;;  %v2150_v48 = vld [vmem:[%s2663_s5 + $0x80] ss:$8 sps:$4 sm:$0xff]  }
  0x63   : > { %1618 = vmatpush1.bf16.msra.mxu1 %v2114_v22  ;;  %1700 = vmatpush1.bf16.msra.mxu0 %v2115_v23  ;;  %v2145_v45 = vld [vmem:[%s2663_s5 + $0x270] ss:$8 sps:$4 sm:$0xff]   ;;  %v2148_v47 = vld [vmem:[%s2663_s5 + $0x284] ss:$8 sps:$4 sm:$0xff]   ;;  %v2151_v49 = vld [vmem:[%s2663_s5 + $0x280] ss:$8 sps:$4 sm:$0xff]   ;;  %v2756_v22 = vrot.slane %v2676_v15, %v2670_v11  ;;  %v2760_v23 = vrot.slane %v2679_v16, %v2670_v11  ;;  %v964_v15 = vcombine.high %v2695_v26, %v2695_v26 }
  0x64   : > { %1619 = vmatprep.subr.bf16.mxu1 %v2116_v24  ;;  %1701 = vmatprep.subr.bf16.mxu0 %v2118_v27  ;;  %v2152_v50 = vld [vmem:[%s2663_s5 + $0x94] ss:$8 sps:$4 sm:$0xff]   ;;  %v2156_v52 = vld [vmem:[%s2663_s5 + $0x90] ss:$8 sps:$4 sm:$0xff]   ;;  %v2158_v54 = vld [vmem:[%s2663_s5 + $0xa4] ss:$8 sps:$4 sm:$0xff]  }
  0x65   : > { %v2154_v51 = vld [vmem:[%s2663_s5 + $0x294] ss:$8 sps:$4 sm:$0xff]   ;;  %v2157_v53 = vld [vmem:[%s2663_s5 + $0x290] ss:$8 sps:$4 sm:$0xff]   ;;  %v2160_v55 = vld [vmem:[%s2663_s5 + $0x2a4] ss:$8 sps:$4 sm:$0xff]  }
  0x66   : > { %v2162_v56 = vld [vmem:[%s2663_s5 + $0xa0] ss:$8 sps:$4 sm:$0xff]   ;;  %v2164_v58 = vld [vmem:[%s2663_s5 + $0xb4] ss:$8 sps:$4 sm:$0xff]   ;;  %v2168_v60 = vld [vmem:[%s2663_s5 + $0xb0] ss:$8 sps:$4 sm:$0xff]  }
  0x67   : > { %1620 = vmatpush1.bf16.msra.mxu1 %v2120_v28  ;;  %1702 = vmatpush1.bf16.msra.mxu0 %v2121_v29  ;;  %v2163_v57 = vld [vmem:[%s2663_s5 + $0x2a0] ss:$8 sps:$4 sm:$0xff]   ;;  %v2166_v59 = vld [vmem:[%s2663_s5 + $0x2b4] ss:$8 sps:$4 sm:$0xff]   ;;  %v2169_v61 = vld [vmem:[%s2663_s5 + $0x2b0] ss:$8 sps:$4 sm:$0xff]   ;;  %v963_v28 = vcombine.high %v2692_v25, %v2692_v25 }
  0x68   : > { %1621 = vmatprep.subr.bf16.mxu1 %v2122_v30  ;;  %1703 = vmatprep.subr.bf16.mxu0 %v2124_v31  ;;  %v2170_v62 = vld [vmem:[%s2663_s5 + $0xc4] ss:$8 sps:$4 sm:$0xff]   ;;  %v2174_v0 = vld [vmem:[%s2663_s5 + $0xc0] ss:$8 sps:$4 sm:$0xff]   ;;  %v2176_v2 = vld [vmem:[%s2663_s5 + $0xd4] ss:$8 sps:$4 sm:$0xff]  }
  0x69   : > { %v2172_v63 = vld [vmem:[%s2663_s5 + $0x2c4] ss:$8 sps:$4 sm:$0xff]   ;;  %v2175_v1 = vld [vmem:[%s2663_s5 + $0x2c0] ss:$8 sps:$4 sm:$0xff]   ;;  %v2178_v3 = vld [vmem:[%s2663_s5 + $0x2d4] ss:$8 sps:$4 sm:$0xff]  }
  0x6a   : > { %v2180_v5 = vld [vmem:[%s2663_s5 + $0xd0] ss:$8 sps:$4 sm:$0xff]   ;;  %v2182_v7 = vld [vmem:[%s2663_s5 + $0xe4] ss:$8 sps:$4 sm:$0xff]   ;;  %v2186_v9 = vld [vmem:[%s2663_s5 + $0xe0] ss:$8 sps:$4 sm:$0xff]  }
  0x6b   : > { %1622 = vmatpush1.bf16.msra.mxu1 %v2126_v32  ;;  %1704 = vmatpush1.bf16.msra.mxu0 %v2127_v33  ;;  %v2181_v6 = vld [vmem:[%s2663_s5 + $0x2d0] ss:$8 sps:$4 sm:$0xff]   ;;  %v2184_v8 = vld [vmem:[%s2663_s5 + $0x2e4] ss:$8 sps:$4 sm:$0xff]   ;;  %v2187_v10 = vld [vmem:[%s2663_s5 + $0x2e0] ss:$8 sps:$4 sm:$0xff]  }
  0x6c   : > { %1623 = vmatprep.subr.bf16.mxu1 %v2128_v34  ;;  %1705 = vmatprep.subr.bf16.mxu0 %v2130_v35  ;;  %v2188_v12 = vld [vmem:[%s2663_s5 + $0xf4] ss:$8 sps:$4 sm:$0xff]   ;;  %v2192_v14 = vld [vmem:[%s2663_s5 + $0xf0] ss:$8 sps:$4 sm:$0xff]   ;;  %v2196_v18 = vld [vmem:[%s2663_s5 + $0x104] ss:$8 sps:$4 sm:$0xff]  }
  0x6d   : > { %v2190_v13 = vld [vmem:[%s2663_s5 + $0x2f4] ss:$8 sps:$4 sm:$0xff]   ;;  %v2193_v17 = vld [vmem:[%s2663_s5 + $0x2f0] ss:$8 sps:$4 sm:$0xff]   ;;  %v2200_v19 = vld [vmem:[%s2663_s5 + $0x304] ss:$8 sps:$4 sm:$0xff]  }
  0x6e   : > { %v2194_v20 = vld [vmem:[%s2663_s5 + $0x100] ss:$8 sps:$4 sm:$0xff]   ;;  %v2203_v24 = vld [vmem:[%s2663_s5 + $0x114] ss:$8 sps:$4 sm:$0xff]   ;;  %v2201_v11 = vld [vmem:[%s2663_s5 + $0x110] ss:$8 sps:$4 sm:$0xff]  }
  0x6f   : > { %1624 = vmatpush1.bf16.msra.mxu1 %v2132_v36  ;;  %1706 = vmatpush1.bf16.msra.mxu0 %v2133_v37  ;;  %v2198_v21 = vld [vmem:[%s2663_s5 + $0x300] ss:$8 sps:$4 sm:$0xff]   ;;  %v2206_v27 = vld [vmem:[%s2663_s5 + $0x314] ss:$8 sps:$4 sm:$0xff]   ;;  %v2204_v16 = vld [vmem:[%s2663_s5 + $0x310] ss:$8 sps:$4 sm:$0xff]  }
  0x70   : > { %1625 = vmatprep.subr.bf16.mxu1 %v2134_v38  ;;  %1707 = vmatprep.subr.bf16.mxu0 %v2136_v39  ;;  %v2209_v29 = vld [vmem:[%s2663_s5 + $0x124] ss:$8 sps:$4 sm:$0xff]   ;;  %v2207_v26 = vld [vmem:[%s2663_s5 + $0x120] ss:$8 sps:$4 sm:$0xff]   ;;  %v2215_v31 = vld [vmem:[%s2663_s5 + $0x134] ss:$8 sps:$4 sm:$0xff]  }
  0x71   : > { %v2212_v25 = vld [vmem:[%s2663_s5 + $0x324] ss:$8 sps:$4 sm:$0xff]   ;;  %v2210_v30 = vld [vmem:[%s2663_s5 + $0x320] ss:$8 sps:$4 sm:$0xff]   ;;  %v2218_v32 = vld [vmem:[%s2663_s5 + $0x334] ss:$8 sps:$4 sm:$0xff]  }
  0x72   : > { %v2213_v33 = vld [vmem:[%s2663_s5 + $0x130] ss:$8 sps:$4 sm:$0xff]   ;;  %v2221_v35 = vld [vmem:[%s2663_s5 + $0x144] ss:$8 sps:$4 sm:$0xff]   ;;  %v2219_v37 = vld [vmem:[%s2663_s5 + $0x140] ss:$8 sps:$4 sm:$0xff]  }
  0x73   : > { %1626 = vmatpush1.bf16.msra.mxu1 %v2138_v40  ;;  %1708 = vmatpush1.bf16.msra.mxu0 %v2139_v41  ;;  %v2216_v34 = vld [vmem:[%s2663_s5 + $0x330] ss:$8 sps:$4 sm:$0xff]   ;;  %v2224_v36 = vld [vmem:[%s2663_s5 + $0x344] ss:$8 sps:$4 sm:$0xff]   ;;  %v2222_v38 = vld [vmem:[%s2663_s5 + $0x340] ss:$8 sps:$4 sm:$0xff]  }
  0x74   : > { %1627 = vmatprep.subr.bf16.mxu1 %v2140_v42  ;;  %1709 = vmatprep.subr.bf16.mxu0 %v2142_v43  ;;  %v2227_v39 = vld [vmem:[%s2663_s5 + $0x154] ss:$8 sps:$4 sm:$0xff]   ;;  %v2225_v41 = vld [vmem:[%s2663_s5 + $0x150] ss:$8 sps:$4 sm:$0xff]   ;;  %v2233_v43 = vld [vmem:[%s2663_s5 + $0x164] ss:$8 sps:$4 sm:$0xff]  }
  0x75   : > { %v2230_v40 = vld [vmem:[%s2663_s5 + $0x354] ss:$8 sps:$4 sm:$0xff]   ;;  %v2228_v42 = vld [vmem:[%s2663_s5 + $0x350] ss:$8 sps:$4 sm:$0xff]   ;;  %s2867_s6 = smov (!%p760_p9, %s1910_s6), 3 }
  0x76   : > { %s762_s9 = scalar_lea.vmem %s2858_s2, %s2867_s6  ;;  %s1912_s10 = sshll.u32 %s2867_s6, 1 }
  0x77   : > { %1628 = vmatpush1.bf16.msra.mxu1 %v2144_v44  ;;  %1710 = vmatpush1.bf16.msra.mxu0 %v2145_v45  ;;  %v2236_v44 = vld [vmem:[%s2663_s5 + $0x364] ss:$8 sps:$4 sm:$0xff]   ;;  %v2231_v45 = vld [vmem:[%s2663_s5 + $0x160] ss:$8 sps:$4 sm:$0xff]   ;;  %s772_s14 = scalar_lea.vmem %s2859_s3, %s1912_s10 }
  0x78   : > { %1629 = vmatprep.subr.bf16.mxu1 %v2146_v46  ;;  %1711 = vmatprep.subr.bf16.mxu0 %v2148_v47  ;;  %v2234_v46 = vld [vmem:[%s2663_s5 + $0x360] ss:$8 sps:$4 sm:$0xff]   ;;  %v2239_v47 = vld [vmem:[%s2663_s5 + $0x174] ss:$8 sps:$4 sm:$0xff]  }
  0x7b   : > { %1630 = vmatpush1.bf16.msra.mxu1 %v2150_v48  ;;  %1712 = vmatpush1.bf16.msra.mxu0 %v2151_v49  ;;  %v2242_v48 = vld [vmem:[%s2663_s5 + $0x374] ss:$8 sps:$4 sm:$0xff]   ;;  %v2237_v49 = vld [vmem:[%s2663_s5 + $0x170] ss:$8 sps:$4 sm:$0xff]  }
  0x7c   : > { %1631 = vmatprep.subr.bf16.mxu1 %v2152_v50  ;;  %1713 = vmatprep.subr.bf16.mxu0 %v2154_v51  ;;  %v2240_v50 = vld [vmem:[%s2663_s5 + $0x370] ss:$8 sps:$4 sm:$0xff]   ;;  %v2245_v51 = vld [vmem:[%s2663_s5 + $0x184] ss:$8 sps:$4 sm:$0xff]  }
  0x7f   : > { %1632 = vmatpush1.bf16.msra.mxu1 %v2156_v52  ;;  %1714 = vmatpush1.bf16.msra.mxu0 %v2157_v53  ;;  %v2248_v52 = vld [vmem:[%s2663_s5 + $0x384] ss:$8 sps:$4 sm:$0xff]   ;;  %v2243_v53 = vld [vmem:[%s2663_s5 + $0x180] ss:$8 sps:$4 sm:$0xff]  }
  0x80   : > { %1633 = vmatprep.subr.bf16.mxu1 %v2158_v54  ;;  %1715 = vmatprep.subr.bf16.mxu0 %v2160_v55  ;;  %v2246_v54 = vld [vmem:[%s2663_s5 + $0x380] ss:$8 sps:$4 sm:$0xff]   ;;  %v2251_v55 = vld [vmem:[%s2663_s5 + $0x194] ss:$8 sps:$4 sm:$0xff]  }
  0x83   : > { %1634 = vmatpush1.bf16.msra.mxu1 %v2162_v56  ;;  %1716 = vmatpush1.bf16.msra.mxu0 %v2163_v57  ;;  %v2254_v56 = vld [vmem:[%s2663_s5 + $0x394] ss:$8 sps:$4 sm:$0xff]   ;;  %v2249_v57 = vld [vmem:[%s2663_s5 + $0x190] ss:$8 sps:$4 sm:$0xff]  }
  0x84   : > { %1635 = vmatprep.subr.bf16.mxu1 %v2164_v58  ;;  %1717 = vmatprep.subr.bf16.mxu0 %v2166_v59  ;;  %v2252_v58 = vld [vmem:[%s2663_s5 + $0x390] ss:$8 sps:$4 sm:$0xff]   ;;  %v2257_v59 = vld [vmem:[%s2663_s5 + $0x1a4] ss:$8 sps:$4 sm:$0xff]  }
  0x87   : > { %1636 = vmatpush1.bf16.msra.mxu1 %v2168_v60  ;;  %1718 = vmatpush1.bf16.msra.mxu0 %v2169_v61  ;;  %v2260_v60 = vld [vmem:[%s2663_s5 + $0x3a4] ss:$8 sps:$4 sm:$0xff]   ;;  %v2255_v61 = vld [vmem:[%s2663_s5 + $0x1a0] ss:$8 sps:$4 sm:$0xff]  }
  0x88   : > { %1637 = vmatprep.subr.bf16.mxu1 %v2170_v62  ;;  %1719 = vmatprep.subr.bf16.mxu0 %v2172_v63  ;;  %v2258_v62 = vld [vmem:[%s2663_s5 + $0x3a0] ss:$8 sps:$4 sm:$0xff]   ;;  %v2263_v63 = vld [vmem:[%s2663_s5 + $0x1b4] ss:$8 sps:$4 sm:$0xff]  }
  0x8b   : > { %1638 = vmatpush1.bf16.msra.mxu1 %v2174_v0  ;;  %1720 = vmatpush1.bf16.msra.mxu0 %v2175_v1  ;;  %v2266_v0 = vld [vmem:[%s2663_s5 + $0x3b4] ss:$8 sps:$4 sm:$0xff]   ;;  %v2261_v1 = vld [vmem:[%s2663_s5 + $0x1b0] ss:$8 sps:$4 sm:$0xff]  }
  0x8c   : > { %1639 = vmatprep.subr.bf16.mxu1 %v2176_v2  ;;  %1721 = vmatprep.subr.bf16.mxu0 %v2178_v3  ;;  %v2264_v2 = vld [vmem:[%s2663_s5 + $0x3b0] ss:$8 sps:$4 sm:$0xff]   ;;  %v2269_v3 = vld [vmem:[%s2663_s5 + $0x1c4] ss:$8 sps:$4 sm:$0xff]  }
  0x8f   : > { %1640 = vmatpush1.bf16.msra.mxu1 %v2180_v5  ;;  %1722 = vmatpush1.bf16.msra.mxu0 %v2181_v6  ;;  %v2272_v5 = vld [vmem:[%s2663_s5 + $0x3c4] ss:$8 sps:$4 sm:$0xff]   ;;  %v2267_v6 = vld [vmem:[%s2663_s5 + $0x1c0] ss:$8 sps:$4 sm:$0xff]  }
  0x90   : > { %1641 = vmatprep.subr.bf16.mxu1 %v2182_v7  ;;  %1723 = vmatprep.subr.bf16.mxu0 %v2184_v8  ;;  %v2270_v7 = vld [vmem:[%s2663_s5 + $0x3c0] ss:$8 sps:$4 sm:$0xff]   ;;  %v2275_v8 = vld [vmem:[%s2663_s5 + $0x1d4] ss:$8 sps:$4 sm:$0xff]  }
  0x93   : > { %1642 = vmatpush1.bf16.msra.mxu1 %v2186_v9  ;;  %1724 = vmatpush1.bf16.msra.mxu0 %v2187_v10  ;;  %v2278_v9 = vld [vmem:[%s2663_s5 + $0x3d4] ss:$8 sps:$4 sm:$0xff]   ;;  %v2273_v10 = vld [vmem:[%s2663_s5 + $0x1d0] ss:$8 sps:$4 sm:$0xff]  }
  0x94   : > { %1643 = vmatprep.subr.bf16.mxu1 %v2188_v12  ;;  %1725 = vmatprep.subr.bf16.mxu0 %v2190_v13  ;;  %v2276_v12 = vld [vmem:[%s2663_s5 + $0x3d0] ss:$8 sps:$4 sm:$0xff]   ;;  %v2281_v13 = vld [vmem:[%s2663_s5 + $0x1e4] ss:$8 sps:$4 sm:$0xff]  }
  0x97   : > { %1644 = vmatpush1.bf16.msra.mxu1 %v2192_v14  ;;  %1726 = vmatpush1.bf16.msra.mxu0 %v2193_v17  ;;  %v2284_v14 = vld [vmem:[%s2663_s5 + $0x3e4] ss:$8 sps:$4 sm:$0xff]   ;;  %v2279_v17 = vld [vmem:[%s2663_s5 + $0x1e0] ss:$8 sps:$4 sm:$0xff]  }
  0x98   : > { %1654 = vmatprep.subr.bf16.mxu1 %v2196_v18  ;;  %1736 = vmatprep.subr.bf16.mxu0 %v2200_v19  ;;  %v2282_v18 = vld [vmem:[%s2663_s5 + $0x3e0] ss:$8 sps:$4 sm:$0xff]   ;;  %v2287_v19 = vld [vmem:[%s2663_s5 + $0x1f4] ss:$8 sps:$4 sm:$0xff]  }
  0x9a   : > { %1646 = vmatmul.mubr.bf16.vlgmr.msra.gmra.mrb[0].mxu1 %v2756_v22  ;;  %1728 = vmatmul.mubr.bf16.vlgmr.msra.gmra.mrb[0].mxu0 %v2760_v23 }
  0x9b   : > { %1655 = vmatpush1.bf16.msra.mxu1 %v2194_v20  ;;  %1737 = vmatpush1.bf16.msra.mxu0 %v2198_v21  ;;  %v2290_v20 = vld [vmem:[%s2663_s5 + $0x3f4] ss:$8 sps:$4 sm:$0xff]   ;;  %v2285_v21 = vld [vmem:[%s2663_s5 + $0x1f0] ss:$8 sps:$4 sm:$0xff]  }
  0x9c   : > { %1656 = vmatprep.subr.bf16.mxu1 %v2203_v24  ;;  %1738 = vmatprep.subr.bf16.mxu0 %v2206_v27  ;;  %v2288_v24 = vld [vmem:[%s2663_s5 + $0x3f0] ss:$8 sps:$4 sm:$0xff]   ;;  %v961_v27 = vcombine.high %v2756_v22, %v2756_v22 }
  0x9d   : > { %1686 = vmatprep.mubr.bf16.mxu1 %v963_v28  ;;  %1768 = vmatprep.mubr.bf16.mxu0 %v964_v15  ;;  %v962_v28 = vcombine.high %v2760_v23, %v2760_v23  ;;  %v907_v15 = vsub.s32 0, %v2661_v4 }
  0x9f   : > { %1657 = vmatpush1.bf16.msra.mxu1 %v2201_v11  ;;  %1739 = vmatpush1.bf16.msra.mxu0 %v2204_v16  ;;  %v903_v11 = vld [vmem:[%s762_s9] sm:$0x3]  ;;  %v911_v16 = vsub.s32 1, %v2661_v4 }
  0xa0   : > { %1658 = vmatprep.subr.bf16.mxu1 %v2209_v29  ;;  %1740 = vmatprep.subr.bf16.mxu0 %v2212_v25  ;;  %v908_v22 = vrot.slane %v903_v11, %v907_v15 }
  0xa1   : > { %v912_v29 = vrot.slane %v903_v11, %v911_v16 }
  0xa3   : > { %1659 = vmatpush1.bf16.msra.mxu1 %v2207_v26  ;;  %1741 = vmatpush1.bf16.msra.mxu0 %v2210_v30 }
  0xa4   : > { %1660 = vmatprep.subr.bf16.mxu1 %v2215_v31  ;;  %1742 = vmatprep.subr.bf16.mxu0 %v2218_v32 }
  0xa7   : > { %1661 = vmatpush1.bf16.msra.mxu1 %v2213_v33  ;;  %1743 = vmatpush1.bf16.msra.mxu0 %v2216_v34 }
  0xa8   : > { %1662 = vmatprep.subr.bf16.mxu1 %v2221_v35  ;;  %1744 = vmatprep.subr.bf16.mxu0 %v2224_v36 }
  0xab   : > { %1663 = vmatpush1.bf16.msra.mxu1 %v2219_v37  ;;  %1745 = vmatpush1.bf16.msra.mxu0 %v2222_v38 }
  0xac   : > { %1664 = vmatprep.subr.bf16.mxu1 %v2227_v39  ;;  %1746 = vmatprep.subr.bf16.mxu0 %v2230_v40 }
  0xaf   : > { %1665 = vmatpush1.bf16.msra.mxu1 %v2225_v41  ;;  %1747 = vmatpush1.bf16.msra.mxu0 %v2228_v42 }
  0xb0   : > { %1666 = vmatprep.subr.bf16.mxu1 %v2233_v43  ;;  %1748 = vmatprep.subr.bf16.mxu0 %v2236_v44 }
  0xb3   : > { %1667 = vmatpush1.bf16.msra.mxu1 %v2231_v45  ;;  %1749 = vmatpush1.bf16.msra.mxu0 %v2234_v46 }
  0xb4   : > { %1668 = vmatprep.subr.bf16.mxu1 %v2239_v47  ;;  %1750 = vmatprep.subr.bf16.mxu0 %v2242_v48 }
  0xb7   : > { %1669 = vmatpush1.bf16.msra.mxu1 %v2237_v49  ;;  %1751 = vmatpush1.bf16.msra.mxu0 %v2240_v50 }
  0xb8   : > { %1670 = vmatprep.subr.bf16.mxu1 %v2245_v51  ;;  %1752 = vmatprep.subr.bf16.mxu0 %v2248_v52 }
  0xbb   : > { %1671 = vmatpush1.bf16.msra.mxu1 %v2243_v53  ;;  %1753 = vmatpush1.bf16.msra.mxu0 %v2246_v54 }
  0xbc   : > { %1672 = vmatprep.subr.bf16.mxu1 %v2251_v55  ;;  %1754 = vmatprep.subr.bf16.mxu0 %v2254_v56 }
  0xbf   : > { %1673 = vmatpush1.bf16.msra.mxu1 %v2249_v57  ;;  %1755 = vmatpush1.bf16.msra.mxu0 %v2252_v58 }
  0xc0   : > { %1674 = vmatprep.subr.bf16.mxu1 %v2257_v59  ;;  %1756 = vmatprep.subr.bf16.mxu0 %v2260_v60 }
  0xc3   : > { %1675 = vmatpush1.bf16.msra.mxu1 %v2255_v61  ;;  %1757 = vmatpush1.bf16.msra.mxu0 %v2258_v62 }
  0xc4   : > { %1676 = vmatprep.subr.bf16.mxu1 %v2263_v63  ;;  %1758 = vmatprep.subr.bf16.mxu0 %v2266_v0 }
  0xc7   : > { %1677 = vmatpush1.bf16.msra.mxu1 %v2261_v1  ;;  %1759 = vmatpush1.bf16.msra.mxu0 %v2264_v2 }
  0xc8   : > { %1678 = vmatprep.subr.bf16.mxu1 %v2269_v3  ;;  %1760 = vmatprep.subr.bf16.mxu0 %v2272_v5 }
  0xcb   : > { %1679 = vmatpush1.bf16.msra.mxu1 %v2267_v6  ;;  %1761 = vmatpush1.bf16.msra.mxu0 %v2270_v7 }
  0xcc   : > { %1680 = vmatprep.subr.bf16.mxu1 %v2275_v8  ;;  %1762 = vmatprep.subr.bf16.mxu0 %v2278_v9 }
  0xcf   : > { %1681 = vmatpush1.bf16.msra.mxu1 %v2273_v10  ;;  %1763 = vmatpush1.bf16.msra.mxu0 %v2276_v12 }
  0xd0   : > { %1682 = vmatprep.subr.bf16.mxu1 %v2281_v13  ;;  %1764 = vmatprep.subr.bf16.mxu0 %v2284_v14 }
  0xd3   : > { %1683 = vmatpush1.bf16.msra.mxu1 %v2279_v17  ;;  %1765 = vmatpush1.bf16.msra.mxu0 %v2282_v18 }
  0xd4   : > { %1684 = vmatprep.subr.bf16.mxu1 %v2287_v19  ;;  %1766 = vmatprep.subr.bf16.mxu0 %v2290_v20 }
  0xd7   : > { %1685 = vmatpush1.bf16.msra.mxu1 %v2285_v21  ;;  %1767 = vmatpush1.bf16.msra.mxu0 %v2288_v24 }
  0xda   : > { %1687 = vmatmul.mubr.bf16.vlgmr.msra.gmra.mrb[0].mxu1 %v961_v27  ;;  %1769 = vmatmul.mubr.bf16.vlgmr.msra.gmra.mrb[0].mxu0 %v962_v28 }
 0x1ad   : > { %v1688_v25 = vpop.f32.mrb[0].mxu1  ;;  %v1770_v23 = vpop.f32.mrb[0].mxu0 }
 0x1ae   : > { %v2045_v26 = vadd.f32 %v1688_v25, %v908_v22  ;;  %v1690_v30 = vpop.f32.mrb[1].mxu1  ;;  %v1772_v31 = vpop.f32.mrb[1].mxu0 }
 0x1af   : > { %v2047_v32 = vadd.f32 %v1690_v30, %v912_v29  ;;  %v1692_v33 = vpop.f32.mrb[2].mxu1  ;;  %v1774_v34 = vpop.f32.mrb[2].mxu0 }
 0x1b0   : > { %v2046_v35 = vadd.f32 %v2045_v26, %v1770_v23  ;;  %v1693_v36 = vpop.f32.mrb[3].mxu1  ;;  %v1775_v37 = vpop.f32.mrb[3].mxu0 }
 0x1b1   : > { %v2048_v38 = vadd.f32 %v2047_v32, %v1772_v31 }
 0x1b3   : > { %v1779_v4 = vcombine.low %v2046_v35, %v2048_v38 }
 0x1b5   : > { %2041 = vst.sshfl [vmem:[%s772_s14] sm:$0x33 pattern:$0x76325410] %v1779_v4 }
 0x1b6 PF: > { %s13_s16 = sadd.s32 1, %s2329_s16   ;;  %s2860_s12 = smov %s2317_s13 }
 0x1b7   : > { %p10_p10 = scmp.ge.s32.totalorder %s13_s16, 4   ;;  %s2861_s13 = smov %s2387_s20 }
 0x1b8   : > { %s2862_s14 = smov %s2325_s15  ;;  %s2863_s15 = smov %s2865_s17 }
 0x1b9   :  { %12 = sbr.rel (!%p10_p10) target bundleno = 3 (0x3), region = 111 }

// kernel: _lambda_.28
= control target key start
LH: loop header
LB: loop body
LE: loop exit
PB: predicated region body
PF: predicated region fallthrough
CT: control target
= control target key end

     0   :  { %s2647_s18 = smov 0   ;;  %s2649_s19 = smov 0   ;;  %s3162_s0 = inlined_call_operand.vmem [shape: bf16[2,4,1024], index: 0, kind: input, shape index: {}]   ;;  %s3163_s1 = inlined_call_operand.vmem [shape: bf16[1024,512], index: 1, kind: input, shape index: {}]   ;;  %s3164_s2 = inlined_call_operand.vmem [shape: f32[1,512], index: 2, kind: input, shape index: {}]   ;;  %s3165_s3 = inlined_call_operand.vmem [shape: bf16[2,1,512], index: 3, kind: input, shape index: {}]   ;;  %s3166_s4 = inlined_call_operand.vmem [shape: bf16[2,4,1], index: 4, kind: input, shape index: {}]   ;;  %s3167_s5 = inlined_call_operand.vmem [shape: bf16[2,4,512], index: 5, kind: output, shape index: {}]  }
   0x1   :  { %s2651_s20 = smov 0   ;;  %s2653_s21 = smov 0  }
   0x2   :  { %s2655_s22 = smov 0   ;;  %s2657_s23 = smov 0  }
   0x3   :  { %s2659_s24 = smov 0  }
   0x4 LB: > { %s27_s25 = sadd.s32 1, %s2604_s22  ;;  %s34_s26 = sadd.s32 1, %s2608_s23  ;;  %s2612_s24 = sphi %s2659_s24, %s15_s24   ;;  %s2608_s23 = sphi %s2657_s23, %s3173_s23   ;;  %s2604_s22 = sphi %s2655_s22, %s3172_s22   ;;  %s2600_s21 = sphi %s2653_s21, %s3171_s21   ;;  %s2596_s20 = sphi %s2651_s20, %s3170_s20   ;;  %s2592_s19 = sphi %s2649_s19, %s3169_s19   ;;  %s2588_s18 = sphi %s2647_s18, %s3168_s18  }
   0x5   : > { %p28_p0 = scmp.ge.s32.totalorder %s27_s25, 2  ;;  %s69_s27 = sadd.s32 1, %s2592_s19 }
   0x6   : > { %p76_p1 = scmp.ne.s32.totalorder %s2592_s19, %s2588_s18  ;;  %p77_p2 = scmp.eq.s32.totalorder %s2612_s24, 0 }
   0x7   : > { %s3175_s25 = smov (%p28_p0, %s27_s25), 0  ;;  %s3177_s26 = smov (!%p28_p0, %s34_s26), %s2608_s23 }
   0x8   : > { %s66_s28 = ssub.s32 %s2604_s22, %s3175_s25  ;;  %p78_p3 = por %p77_p2, %p76_p1 }
   0x9   : > { %p36_p4 = scmp.ge.s32.totalorder %s3177_s26, 2  ;;  %p67_p5 = scmp.eq.s32.totalorder %s66_s28, 0 }
   0xa   : > { %p2143_p6 = scmp.ge.s32.totalorder %s2612_s24, 4 }
   0xb   : > { %s3179_s26 = smov (%p36_p4, %s3177_s26), 0 }
   0xc   : > { %s2696_s29 = scalar_select %p67_p5, %s2592_s19, %s69_s27  }
   0xd   : > { %214 = sbr.rel (%p2143_p6) target bundleno = 88 (0x58), region = 16 }
  0x14   : > { %229 = sbr.rel (!%p78_p3) target bundleno = 88 (0x58), region = 24  ;;  %s231_s30 = sand.u32 (%p78_p3), 1, %s2592_s19  }
  0x15   : > { %s2290_s6 = sshll.u32 (%p78_p3), %s2604_s22, 3  ;;  %s2144_s7 = sshll.u32 (%p78_p3), %s231_s30, 10 }
  0x16   : > { %s2704_s10 = scalar_lea.vmem (%p78_p3), %s3163_s1, %s2290_s6  ;;  %s2709_s11 = scalar_lea.vmem (%p78_p3), [#allocation2], %s2144_s7 }
  0x17   : > { %v518_v0 = vld [vmem:[%s2704_s10] sm:$0xff] (%p78_p3)  ;;  %v520_v1 = vld [vmem:[%s2704_s10 + $0x10] sm:$0xff] (%p78_p3) }
  0x18   : > { %v522_v2 = vld [vmem:[%s2704_s10 + $0x20] sm:$0xff] (%p78_p3)  ;;  %519 = vst [vmem:[%s2709_s11] sm:$0xff] (%p78_p3), %v518_v0  ;;  %521 = vst [vmem:[%s2709_s11 + $0x8] sm:$0xff] (%p78_p3), %v520_v1  ;;  %v524_v3 = vld [vmem:[%s2704_s10 + $0x30] sm:$0xff] (%p78_p3) }
  0x19   : > { %523 = vst [vmem:[%s2709_s11 + $0x10] sm:$0xff] (%p78_p3), %v522_v2  ;;  %v526_v4 = vld [vmem:[%s2704_s10 + $0x40] sm:$0xff] (%p78_p3)  ;;  %v528_v5 = vld [vmem:[%s2704_s10 + $0x50] sm:$0xff] (%p78_p3)  ;;  %525 = vst [vmem:[%s2709_s11 + $0x18] sm:$0xff] (%p78_p3), %v524_v3 }
  0x1a   : > { %527 = vst [vmem:[%s2709_s11 + $0x20] sm:$0xff] (%p78_p3), %v526_v4  ;;  %529 = vst [vmem:[%s2709_s11 + $0x28] sm:$0xff] (%p78_p3), %v528_v5  ;;  %v530_v6 = vld [vmem:[%s2704_s10 + $0x60] sm:$0xff] (%p78_p3)  ;;  %v532_v7 = vld [vmem:[%s2704_s10 + $0x70] sm:$0xff] (%p78_p3) }
  0x1b   : > { %v534_v8 = vld [vmem:[%s2704_s10 + $0x80] sm:$0xff]  ;;  %531 = vst [vmem:[%s2709_s11 + $0x30] sm:$0xff] %v530_v6  ;;  %533 = vst [vmem:[%s2709_s11 + $0x38] sm:$0xff] %v532_v7  ;;  %v536_v9 = vld [vmem:[%s2704_s10 + $0x90] sm:$0xff] }
  0x1c   : > { %535 = vst [vmem:[%s2709_s11 + $0x40] sm:$0xff] %v534_v8  ;;  %v538_v10 = vld [vmem:[%s2704_s10 + $0xa0] sm:$0xff]  ;;  %v540_v11 = vld [vmem:[%s2704_s10 + $0xb0] sm:$0xff]  ;;  %537 = vst [vmem:[%s2709_s11 + $0x48] sm:$0xff] %v536_v9 }
  0x1d   : > { %539 = vst [vmem:[%s2709_s11 + $0x50] sm:$0xff] %v538_v10  ;;  %541 = vst [vmem:[%s2709_s11 + $0x58] sm:$0xff] %v540_v11  ;;  %v542_v12 = vld [vmem:[%s2704_s10 + $0xc0] sm:$0xff]  ;;  %v544_v13 = vld [vmem:[%s2704_s10 + $0xd0] sm:$0xff] }
  0x1e   : > { %v546_v14 = vld [vmem:[%s2704_s10 + $0xe0] sm:$0xff]  ;;  %543 = vst [vmem:[%s2709_s11 + $0x60] sm:$0xff] %v542_v12  ;;  %545 = vst [vmem:[%s2709_s11 + $0x68] sm:$0xff] %v544_v13  ;;  %v548_v15 = vld [vmem:[%s2704_s10 + $0xf0] sm:$0xff] }
  0x1f   : > { %547 = vst [vmem:[%s2709_s11 + $0x70] sm:$0xff] %v546_v14  ;;  %v550_v16 = vld [vmem:[%s2704_s10 + $0x100] sm:$0xff]  ;;  %v552_v17 = vld [vmem:[%s2704_s10 + $0x110] sm:$0xff]  ;;  %549 = vst [vmem:[%s2709_s11 + $0x78] sm:$0xff] %v548_v15 }
  0x20   : > { %551 = vst [vmem:[%s2709_s11 + $0x80] sm:$0xff] %v550_v16  ;;  %553 = vst [vmem:[%s2709_s11 + $0x88] sm:$0xff] %v552_v17  ;;  %v554_v18 = vld [vmem:[%s2704_s10 + $0x120] sm:$0xff]  ;;  %v556_v19 = vld [vmem:[%s2704_s10 + $0x130] sm:$0xff] }
  0x21   : > { %v558_v20 = vld [vmem:[%s2704_s10 + $0x140] sm:$0xff]  ;;  %555 = vst [vmem:[%s2709_s11 + $0x90] sm:$0xff] %v554_v18  ;;  %557 = vst [vmem:[%s2709_s11 + $0x98] sm:$0xff] %v556_v19  ;;  %v560_v21 = vld [vmem:[%s2704_s10 + $0x150] sm:$0xff] }
  0x22   : > { %559 = vst [vmem:[%s2709_s11 + $0xa0] sm:$0xff] %v558_v20  ;;  %v562_v22 = vld [vmem:[%s2704_s10 + $0x160] sm:$0xff]  ;;  %v564_v23 = vld [vmem:[%s2704_s10 + $0x170] sm:$0xff]  ;;  %561 = vst [vmem:[%s2709_s11 + $0xa8] sm:$0xff] %v560_v21 }
  0x23   : > { %563 = vst [vmem:[%s2709_s11 + $0xb0] sm:$0xff] %v562_v22  ;;  %565 = vst [vmem:[%s2709_s11 + $0xb8] sm:$0xff] %v564_v23  ;;  %v566_v24 = vld [vmem:[%s2704_s10 + $0x180] sm:$0xff]  ;;  %v568_v25 = vld [vmem:[%s2704_s10 + $0x190] sm:$0xff] }
  0x24   : > { %v570_v26 = vld [vmem:[%s2704_s10 + $0x1a0] sm:$0xff]  ;;  %567 = vst [vmem:[%s2709_s11 + $0xc0] sm:$0xff] %v566_v24  ;;  %569 = vst [vmem:[%s2709_s11 + $0xc8] sm:$0xff] %v568_v25  ;;  %v572_v27 = vld [vmem:[%s2704_s10 + $0x1b0] sm:$0xff] }
  0x25   : > { %571 = vst [vmem:[%s2709_s11 + $0xd0] sm:$0xff] %v570_v26  ;;  %v574_v28 = vld [vmem:[%s2704_s10 + $0x1c0] sm:$0xff]  ;;  %v576_v29 = vld [vmem:[%s2704_s10 + $0x1d0] sm:$0xff]  ;;  %573 = vst [vmem:[%s2709_s11 + $0xd8] sm:$0xff] %v572_v27 }
  0x26   : > { %575 = vst [vmem:[%s2709_s11 + $0xe0] sm:$0xff] %v574_v28  ;;  %577 = vst [vmem:[%s2709_s11 + $0xe8] sm:$0xff] %v576_v29  ;;  %v578_v30 = vld [vmem:[%s2704_s10 + $0x1e0] sm:$0xff]  ;;  %v580_v31 = vld [vmem:[%s2704_s10 + $0x1f0] sm:$0xff] }
  0x27   : > { %v582_v32 = vld [vmem:[%s2704_s10 + $0x200] sm:$0xff]  ;;  %579 = vst [vmem:[%s2709_s11 + $0xf0] sm:$0xff] %v578_v30  ;;  %581 = vst [vmem:[%s2709_s11 + $0xf8] sm:$0xff] %v580_v31  ;;  %v584_v33 = vld [vmem:[%s2704_s10 + $0x210] sm:$0xff] }
  0x28   : > { %583 = vst [vmem:[%s2709_s11 + $0x100] sm:$0xff] %v582_v32  ;;  %v586_v34 = vld [vmem:[%s2704_s10 + $0x220] sm:$0xff]  ;;  %v588_v35 = vld [vmem:[%s2704_s10 + $0x230] sm:$0xff]  ;;  %585 = vst [vmem:[%s2709_s11 + $0x108] sm:$0xff] %v584_v33 }
  0x29   : > { %587 = vst [vmem:[%s2709_s11 + $0x110] sm:$0xff] %v586_v34  ;;  %589 = vst [vmem:[%s2709_s11 + $0x118] sm:$0xff] %v588_v35  ;;  %v590_v36 = vld [vmem:[%s2704_s10 + $0x240] sm:$0xff]  ;;  %v592_v37 = vld [vmem:[%s2704_s10 + $0x250] sm:$0xff] }
  0x2a   : > { %v594_v38 = vld [vmem:[%s2704_s10 + $0x260] sm:$0xff]  ;;  %591 = vst [vmem:[%s2709_s11 + $0x120] sm:$0xff] %v590_v36  ;;  %593 = vst [vmem:[%s2709_s11 + $0x128] sm:$0xff] %v592_v37  ;;  %v596_v39 = vld [vmem:[%s2704_s10 + $0x270] sm:$0xff] }
  0x2b   : > { %595 = vst [vmem:[%s2709_s11 + $0x130] sm:$0xff] %v594_v38  ;;  %v598_v40 = vld [vmem:[%s2704_s10 + $0x280] sm:$0xff]  ;;  %v600_v41 = vld [vmem:[%s2704_s10 + $0x290] sm:$0xff]  ;;  %597 = vst [vmem:[%s2709_s11 + $0x138] sm:$0xff] %v596_v39 }
  0x2c   : > { %599 = vst [vmem:[%s2709_s11 + $0x140] sm:$0xff] %v598_v40  ;;  %601 = vst [vmem:[%s2709_s11 + $0x148] sm:$0xff] %v600_v41  ;;  %v602_v42 = vld [vmem:[%s2704_s10 + $0x2a0] sm:$0xff]  ;;  %v604_v43 = vld [vmem:[%s2704_s10 + $0x2b0] sm:$0xff] }
  0x2d   : > { %v606_v44 = vld [vmem:[%s2704_s10 + $0x2c0] sm:$0xff]  ;;  %603 = vst [vmem:[%s2709_s11 + $0x150] sm:$0xff] %v602_v42  ;;  %605 = vst [vmem:[%s2709_s11 + $0x158] sm:$0xff] %v604_v43  ;;  %v608_v45 = vld [vmem:[%s2704_s10 + $0x2d0] sm:$0xff] }
  0x2e   : > { %607 = vst [vmem:[%s2709_s11 + $0x160] sm:$0xff] %v606_v44  ;;  %v610_v46 = vld [vmem:[%s2704_s10 + $0x2e0] sm:$0xff]  ;;  %v612_v47 = vld [vmem:[%s2704_s10 + $0x2f0] sm:$0xff]  ;;  %609 = vst [vmem:[%s2709_s11 + $0x168] sm:$0xff] %v608_v45 }
  0x2f   : > { %611 = vst [vmem:[%s2709_s11 + $0x170] sm:$0xff] %v610_v46  ;;  %613 = vst [vmem:[%s2709_s11 + $0x178] sm:$0xff] %v612_v47  ;;  %v614_v48 = vld [vmem:[%s2704_s10 + $0x300] sm:$0xff]  ;;  %v616_v49 = vld [vmem:[%s2704_s10 + $0x310] sm:$0xff] }
  0x30   : > { %v618_v50 = vld [vmem:[%s2704_s10 + $0x320] sm:$0xff]  ;;  %615 = vst [vmem:[%s2709_s11 + $0x180] sm:$0xff] %v614_v48  ;;  %617 = vst [vmem:[%s2709_s11 + $0x188] sm:$0xff] %v616_v49  ;;  %v620_v51 = vld [vmem:[%s2704_s10 + $0x330] sm:$0xff] }
  0x31   : > { %619 = vst [vmem:[%s2709_s11 + $0x190] sm:$0xff] %v618_v50  ;;  %v622_v52 = vld [vmem:[%s2704_s10 + $0x340] sm:$0xff]  ;;  %v624_v53 = vld [vmem:[%s2704_s10 + $0x350] sm:$0xff]  ;;  %621 = vst [vmem:[%s2709_s11 + $0x198] sm:$0xff] %v620_v51 }
  0x32   : > { %623 = vst [vmem:[%s2709_s11 + $0x1a0] sm:$0xff] %v622_v52  ;;  %625 = vst [vmem:[%s2709_s11 + $0x1a8] sm:$0xff] %v624_v53  ;;  %v626_v54 = vld [vmem:[%s2704_s10 + $0x360] sm:$0xff]  ;;  %v628_v55 = vld [vmem:[%s2704_s10 + $0x370] sm:$0xff] }
  0x33   : > { %v630_v56 = vld [vmem:[%s2704_s10 + $0x380] sm:$0xff]  ;;  %627 = vst [vmem:[%s2709_s11 + $0x1b0] sm:$0xff] %v626_v54  ;;  %629 = vst [vmem:[%s2709_s11 + $0x1b8] sm:$0xff] %v628_v55  ;;  %v632_v57 = vld [vmem:[%s2704_s10 + $0x390] sm:$0xff] }
  0x34   : > { %631 = vst [vmem:[%s2709_s11 + $0x1c0] sm:$0xff] %v630_v56  ;;  %v634_v58 = vld [vmem:[%s2704_s10 + $0x3a0] sm:$0xff]  ;;  %v636_v59 = vld [vmem:[%s2704_s10 + $0x3b0] sm:$0xff]  ;;  %633 = vst [vmem:[%s2709_s11 + $0x1c8] sm:$0xff] %v632_v57 }
  0x35   : > { %635 = vst [vmem:[%s2709_s11 + $0x1d0] sm:$0xff] %v634_v58  ;;  %637 = vst [vmem:[%s2709_s11 + $0x1d8] sm:$0xff] %v636_v59  ;;  %v638_v60 = vld [vmem:[%s2704_s10 + $0x3c0] sm:$0xff]  ;;  %v640_v61 = vld [vmem:[%s2704_s10 + $0x3d0] sm:$0xff] }
  0x36   : > { %v642_v62 = vld [vmem:[%s2704_s10 + $0x3e0] sm:$0xff]  ;;  %639 = vst [vmem:[%s2709_s11 + $0x1e0] sm:$0xff] %v638_v60  ;;  %641 = vst [vmem:[%s2709_s11 + $0x1e8] sm:$0xff] %v640_v61  ;;  %v644_v63 = vld [vmem:[%s2704_s10 + $0x3f0] sm:$0xff] }
  0x37   : > { %643 = vst [vmem:[%s2709_s11 + $0x1f0] sm:$0xff] %v642_v62  ;;  %v646_v0 = vld [vmem:[%s2704_s10 + $0x400] sm:$0xff]  ;;  %v648_v1 = vld [vmem:[%s2704_s10 + $0x410] sm:$0xff]  ;;  %645 = vst [vmem:[%s2709_s11 + $0x1f8] sm:$0xff] %v644_v63 }
  0x38   : > { %647 = vst [vmem:[%s2709_s11 + $0x200] sm:$0xff] %v646_v0  ;;  %649 = vst [vmem:[%s2709_s11 + $0x208] sm:$0xff] %v648_v1  ;;  %v650_v2 = vld [vmem:[%s2704_s10 + $0x420] sm:$0xff]  ;;  %v652_v3 = vld [vmem:[%s2704_s10 + $0x430] sm:$0xff] }
  0x39   : > { %v654_v4 = vld [vmem:[%s2704_s10 + $0x440] sm:$0xff]  ;;  %651 = vst [vmem:[%s2709_s11 + $0x210] sm:$0xff] %v650_v2  ;;  %653 = vst [vmem:[%s2709_s11 + $0x218] sm:$0xff] %v652_v3  ;;  %v656_v5 = vld [vmem:[%s2704_s10 + $0x450] sm:$0xff] }
  0x3a   : > { %655 = vst [vmem:[%s2709_s11 + $0x220] sm:$0xff] %v654_v4  ;;  %v658_v6 = vld [vmem:[%s2704_s10 + $0x460] sm:$0xff]  ;;  %v660_v7 = vld [vmem:[%s2704_s10 + $0x470] sm:$0xff]  ;;  %657 = vst [vmem:[%s2709_s11 + $0x228] sm:$0xff] %v656_v5 }
  0x3b   : > { %659 = vst [vmem:[%s2709_s11 + $0x230] sm:$0xff] %v658_v6  ;;  %661 = vst [vmem:[%s2709_s11 + $0x238] sm:$0xff] %v660_v7  ;;  %v662_v8 = vld [vmem:[%s2704_s10 + $0x480] sm:$0xff]  ;;  %v664_v9 = vld [vmem:[%s2704_s10 + $0x490] sm:$0xff] }
  0x3c   : > { %v666_v10 = vld [vmem:[%s2704_s10 + $0x4a0] sm:$0xff]  ;;  %663 = vst [vmem:[%s2709_s11 + $0x240] sm:$0xff] %v662_v8  ;;  %665 = vst [vmem:[%s2709_s11 + $0x248] sm:$0xff] %v664_v9  ;;  %v668_v11 = vld [vmem:[%s2704_s10 + $0x4b0] sm:$0xff] }
  0x3d   : > { %667 = vst [vmem:[%s2709_s11 + $0x250] sm:$0xff] %v666_v10  ;;  %v670_v12 = vld [vmem:[%s2704_s10 + $0x4c0] sm:$0xff]  ;;  %v672_v13 = vld [vmem:[%s2704_s10 + $0x4d0] sm:$0xff]  ;;  %669 = vst [vmem:[%s2709_s11 + $0x258] sm:$0xff] %v668_v11 }
  0x3e   : > { %671 = vst [vmem:[%s2709_s11 + $0x260] sm:$0xff] %v670_v12  ;;  %673 = vst [vmem:[%s2709_s11 + $0x268] sm:$0xff] %v672_v13  ;;  %v674_v14 = vld [vmem:[%s2704_s10 + $0x4e0] sm:$0xff]  ;;  %v676_v15 = vld [vmem:[%s2704_s10 + $0x4f0] sm:$0xff] }
  0x3f   : > { %v678_v16 = vld [vmem:[%s2704_s10 + $0x500] sm:$0xff]  ;;  %675 = vst [vmem:[%s2709_s11 + $0x270] sm:$0xff] %v674_v14  ;;  %677 = vst [vmem:[%s2709_s11 + $0x278] sm:$0xff] %v676_v15  ;;  %v680_v17 = vld [vmem:[%s2704_s10 + $0x510] sm:$0xff] }
  0x40   : > { %679 = vst [vmem:[%s2709_s11 + $0x280] sm:$0xff] %v678_v16  ;;  %v682_v18 = vld [vmem:[%s2704_s10 + $0x520] sm:$0xff]  ;;  %v684_v19 = vld [vmem:[%s2704_s10 + $0x530] sm:$0xff]  ;;  %681 = vst [vmem:[%s2709_s11 + $0x288] sm:$0xff] %v680_v17 }
  0x41   : > { %683 = vst [vmem:[%s2709_s11 + $0x290] sm:$0xff] %v682_v18  ;;  %685 = vst [vmem:[%s2709_s11 + $0x298] sm:$0xff] %v684_v19  ;;  %v686_v20 = vld [vmem:[%s2704_s10 + $0x540] sm:$0xff]  ;;  %v688_v21 = vld [vmem:[%s2704_s10 + $0x550] sm:$0xff] }
  0x42   : > { %v690_v22 = vld [vmem:[%s2704_s10 + $0x560] sm:$0xff]  ;;  %687 = vst [vmem:[%s2709_s11 + $0x2a0] sm:$0xff] %v686_v20  ;;  %689 = vst [vmem:[%s2709_s11 + $0x2a8] sm:$0xff] %v688_v21  ;;  %v692_v23 = vld [vmem:[%s2704_s10 + $0x570] sm:$0xff] }
  0x43   : > { %691 = vst [vmem:[%s2709_s11 + $0x2b0] sm:$0xff] %v690_v22  ;;  %v694_v24 = vld [vmem:[%s2704_s10 + $0x580] sm:$0xff]  ;;  %v696_v25 = vld [vmem:[%s2704_s10 + $0x590] sm:$0xff]  ;;  %693 = vst [vmem:[%s2709_s11 + $0x2b8] sm:$0xff] %v692_v23 }
  0x44   : > { %695 = vst [vmem:[%s2709_s11 + $0x2c0] sm:$0xff] %v694_v24  ;;  %697 = vst [vmem:[%s2709_s11 + $0x2c8] sm:$0xff] %v696_v25  ;;  %v698_v26 = vld [vmem:[%s2704_s10 + $0x5a0] sm:$0xff]  ;;  %v700_v27 = vld [vmem:[%s2704_s10 + $0x5b0] sm:$0xff] }
  0x45   : > { %v702_v28 = vld [vmem:[%s2704_s10 + $0x5c0] sm:$0xff]  ;;  %699 = vst [vmem:[%s2709_s11 + $0x2d0] sm:$0xff] %v698_v26  ;;  %701 = vst [vmem:[%s2709_s11 + $0x2d8] sm:$0xff] %v700_v27  ;;  %v704_v29 = vld [vmem:[%s2704_s10 + $0x5d0] sm:$0xff] }
  0x46   : > { %703 = vst [vmem:[%s2709_s11 + $0x2e0] sm:$0xff] %v702_v28  ;;  %v706_v30 = vld [vmem:[%s2704_s10 + $0x5e0] sm:$0xff]  ;;  %v708_v31 = vld [vmem:[%s2704_s10 + $0x5f0] sm:$0xff]  ;;  %705 = vst [vmem:[%s2709_s11 + $0x2e8] sm:$0xff] %v704_v29 }
  0x47   : > { %707 = vst [vmem:[%s2709_s11 + $0x2f0] sm:$0xff] %v706_v30  ;;  %709 = vst [vmem:[%s2709_s11 + $0x2f8] sm:$0xff] %v708_v31  ;;  %v710_v32 = vld [vmem:[%s2704_s10 + $0x600] sm:$0xff]  ;;  %v712_v33 = vld [vmem:[%s2704_s10 + $0x610] sm:$0xff] }
  0x48   : > { %v714_v34 = vld [vmem:[%s2704_s10 + $0x620] sm:$0xff]  ;;  %711 = vst [vmem:[%s2709_s11 + $0x300] sm:$0xff] %v710_v32  ;;  %713 = vst [vmem:[%s2709_s11 + $0x308] sm:$0xff] %v712_v33  ;;  %v716_v35 = vld [vmem:[%s2704_s10 + $0x630] sm:$0xff] }
  0x49   : > { %715 = vst [vmem:[%s2709_s11 + $0x310] sm:$0xff] %v714_v34  ;;  %v718_v36 = vld [vmem:[%s2704_s10 + $0x640] sm:$0xff]  ;;  %v720_v37 = vld [vmem:[%s2704_s10 + $0x650] sm:$0xff]  ;;  %717 = vst [vmem:[%s2709_s11 + $0x318] sm:$0xff] %v716_v35 }
  0x4a   : > { %719 = vst [vmem:[%s2709_s11 + $0x320] sm:$0xff] %v718_v36  ;;  %721 = vst [vmem:[%s2709_s11 + $0x328] sm:$0xff] %v720_v37  ;;  %v722_v38 = vld [vmem:[%s2704_s10 + $0x660] sm:$0xff]  ;;  %v724_v39 = vld [vmem:[%s2704_s10 + $0x670] sm:$0xff] }
  0x4b   : > { %v726_v40 = vld [vmem:[%s2704_s10 + $0x680] sm:$0xff]  ;;  %723 = vst [vmem:[%s2709_s11 + $0x330] sm:$0xff] %v722_v38  ;;  %725 = vst [vmem:[%s2709_s11 + $0x338] sm:$0xff] %v724_v39  ;;  %v728_v41 = vld [vmem:[%s2704_s10 + $0x690] sm:$0xff] }
  0x4c   : > { %727 = vst [vmem:[%s2709_s11 + $0x340] sm:$0xff] %v726_v40  ;;  %v730_v42 = vld [vmem:[%s2704_s10 + $0x6a0] sm:$0xff]  ;;  %v732_v43 = vld [vmem:[%s2704_s10 + $0x6b0] sm:$0xff]  ;;  %729 = vst [vmem:[%s2709_s11 + $0x348] sm:$0xff] %v728_v41 }
  0x4d   : > { %731 = vst [vmem:[%s2709_s11 + $0x350] sm:$0xff] %v730_v42  ;;  %733 = vst [vmem:[%s2709_s11 + $0x358] sm:$0xff] %v732_v43  ;;  %v734_v44 = vld [vmem:[%s2704_s10 + $0x6c0] sm:$0xff]  ;;  %v736_v45 = vld [vmem:[%s2704_s10 + $0x6d0] sm:$0xff] }
  0x4e   : > { %v738_v46 = vld [vmem:[%s2704_s10 + $0x6e0] sm:$0xff]  ;;  %735 = vst [vmem:[%s2709_s11 + $0x360] sm:$0xff] %v734_v44  ;;  %737 = vst [vmem:[%s2709_s11 + $0x368] sm:$0xff] %v736_v45  ;;  %v740_v47 = vld [vmem:[%s2704_s10 + $0x6f0] sm:$0xff] }
  0x4f   : > { %739 = vst [vmem:[%s2709_s11 + $0x370] sm:$0xff] %v738_v46  ;;  %v742_v48 = vld [vmem:[%s2704_s10 + $0x700] sm:$0xff]  ;;  %v744_v49 = vld [vmem:[%s2704_s10 + $0x710] sm:$0xff]  ;;  %741 = vst [vmem:[%s2709_s11 + $0x378] sm:$0xff] %v740_v47 }
  0x50   : > { %743 = vst [vmem:[%s2709_s11 + $0x380] sm:$0xff] %v742_v48  ;;  %745 = vst [vmem:[%s2709_s11 + $0x388] sm:$0xff] %v744_v49  ;;  %v746_v50 = vld [vmem:[%s2704_s10 + $0x720] sm:$0xff]  ;;  %v748_v51 = vld [vmem:[%s2704_s10 + $0x730] sm:$0xff] }
  0x51   : > { %v750_v52 = vld [vmem:[%s2704_s10 + $0x740] sm:$0xff]  ;;  %747 = vst [vmem:[%s2709_s11 + $0x390] sm:$0xff] %v746_v50  ;;  %749 = vst [vmem:[%s2709_s11 + $0x398] sm:$0xff] %v748_v51  ;;  %v752_v53 = vld [vmem:[%s2704_s10 + $0x750] sm:$0xff] }
  0x52   : > { %751 = vst [vmem:[%s2709_s11 + $0x3a0] sm:$0xff] %v750_v52  ;;  %v754_v54 = vld [vmem:[%s2704_s10 + $0x760] sm:$0xff]  ;;  %v756_v55 = vld [vmem:[%s2704_s10 + $0x770] sm:$0xff]  ;;  %753 = vst [vmem:[%s2709_s11 + $0x3a8] sm:$0xff] %v752_v53 }
  0x53   : > { %755 = vst [vmem:[%s2709_s11 + $0x3b0] sm:$0xff] %v754_v54  ;;  %757 = vst [vmem:[%s2709_s11 + $0x3b8] sm:$0xff] %v756_v55  ;;  %v758_v56 = vld [vmem:[%s2704_s10 + $0x780] sm:$0xff]  ;;  %v760_v57 = vld [vmem:[%s2704_s10 + $0x790] sm:$0xff] }
  0x54   : > { %v762_v58 = vld [vmem:[%s2704_s10 + $0x7a0] sm:$0xff]  ;;  %759 = vst [vmem:[%s2709_s11 + $0x3c0] sm:$0xff] %v758_v56  ;;  %761 = vst [vmem:[%s2709_s11 + $0x3c8] sm:$0xff] %v760_v57  ;;  %v764_v59 = vld [vmem:[%s2704_s10 + $0x7b0] sm:$0xff] }
  0x55   : > { %763 = vst [vmem:[%s2709_s11 + $0x3d0] sm:$0xff] %v762_v58  ;;  %v766_v60 = vld [vmem:[%s2704_s10 + $0x7c0] sm:$0xff]  ;;  %v768_v61 = vld [vmem:[%s2704_s10 + $0x7d0] sm:$0xff]  ;;  %765 = vst [vmem:[%s2709_s11 + $0x3d8] sm:$0xff] %v764_v59 }
  0x56   : > { %767 = vst [vmem:[%s2709_s11 + $0x3e0] sm:$0xff] %v766_v60  ;;  %769 = vst [vmem:[%s2709_s11 + $0x3e8] sm:$0xff] %v768_v61  ;;  %v770_v62 = vld [vmem:[%s2704_s10 + $0x7e0] sm:$0xff]  ;;  %v772_v63 = vld [vmem:[%s2704_s10 + $0x7f0] sm:$0xff] }
  0x57   : > { %771 = vst [vmem:[%s2709_s11 + $0x3f0] sm:$0xff] %v770_v62  ;;  %773 = vst [vmem:[%s2709_s11 + $0x3f8] sm:$0xff] %v772_v63 }
  0x58 PF: > { %p2147_p7 = scmp.ge.s32.totalorder %s2612_s24, 1  ;;  %p808_p8 = scmp.lt.s32.totalorder %s2612_s24, 5 }
  0x5a   : > { %p809_p9 = pnand %p2147_p7, %p808_p8 }
  0x5b   : > { %s815_s12 = sand.u32 (!%p809_p9), 1, %s2588_s18   ;;  %v2614_v8 = vmov (!%p809_p9), 0   ;;  %p878_p10 = scmp.lt.s32.totalorder (!%p809_p9), %s2600_s21, 1  ;;  %v1055_v37 = vlaneseq (!%p809_p9)  ;;  %v2615_v38 = vmov (!%p809_p9), 1983009808  }
  0x5c   : > { %812 = sbr.rel (%p809_p9) target bundleno = 449 (0x1c1), region = 74  ;;  %s2148_s13 = sshll.u32 (!%p809_p9), %s815_s12, 10  ;;  %2363 = vset.pattern.permute.xlu0 (!%p809_p9), %v2614_v8  ;;  %v1069_v39 = vunpack.c.l.s4 (!%p809_p9), %v2615_v38 }
  0x5d   : > { %s2967_s14 = scalar_lea.vmem (!%p809_p9), [#allocation2], %s2148_s13  ;;  %v3012_v43 = vshrl.u32 (!%p809_p9), %v1055_v37, 7  ;;  %s2151_s7 = sshll.u32 (!%p809_p9), %s2596_s20, 1 }
  0x5e   : > { %v2364_v0 = vld [vmem:[%s2967_s14 + $0x4] ss:$8 sps:$4 sm:$0xff] (!%p809_p9)   ;;  %v2368_v2 = vld [vmem:[%s2967_s14] ss:$8 sps:$4 sm:$0xff] (!%p809_p9)   ;;  %v2370_v4 = vld [vmem:[%s2967_s14 + $0x14] ss:$8 sps:$4 sm:$0xff] (!%p809_p9)   ;;  %v1070_v44 = vunpack.c.0.s8 (!%p809_p9), %v1069_v39 }
  0x5f   : > { %v2366_v1 = vld [vmem:[%s2967_s14 + $0x204] ss:$8 sps:$4 sm:$0xff] (!%p809_p9)   ;;  %1749 = vmatprep.subr.bf16.mxu1 (!%p809_p9), %v2364_v0  ;;  %v2369_v3 = vld [vmem:[%s2967_s14 + $0x200] ss:$8 sps:$4 sm:$0xff] (!%p809_p9)   ;;  %v2372_v5 = vld [vmem:[%s2967_s14 + $0x214] ss:$8 sps:$4 sm:$0xff] (!%p809_p9)  }
  0x60   : > { %1831 = vmatprep.subr.bf16.mxu0 (!%p809_p9), %v2366_v1  ;;  %1750 = vmatpush1.bf16.msra.mxu1 (!%p809_p9), %v2368_v2  ;;  %v2374_v6 = vld [vmem:[%s2967_s14 + $0x10] ss:$8 sps:$4 sm:$0xff] (!%p809_p9)   ;;  %v2376_v9 = vld [vmem:[%s2967_s14 + $0x24] ss:$8 sps:$4 sm:$0xff] (!%p809_p9)   ;;  %v2380_v11 = vld [vmem:[%s2967_s14 + $0x20] ss:$8 sps:$4 sm:$0xff] (!%p809_p9)   ;;  %v1073_v50 = vsub.s32 (!%p809_p9), %v1070_v44, %v3012_v43 }
  0x61   : > { %1832 = vmatpush1.bf16.msra.mxu0 (!%p809_p9), %v2369_v3  ;;  %1751 = vmatprep.subr.bf16.mxu1 (!%p809_p9), %v2370_v4  ;;  %v2375_v7 = vld [vmem:[%s2967_s14 + $0x210] ss:$8 sps:$4 sm:$0xff] (!%p809_p9)   ;;  %v2378_v10 = vld [vmem:[%s2967_s14 + $0x224] ss:$8 sps:$4 sm:$0xff] (!%p809_p9)   ;;  %v2381_v12 = vld [vmem:[%s2967_s14 + $0x220] ss:$8 sps:$4 sm:$0xff] (!%p809_p9)  }
  0x62   : > { %1833 = vmatprep.subr.bf16.mxu0 (!%p809_p9), %v2372_v5  ;;  %v2382_v13 = vld [vmem:[%s2967_s14 + $0x34] ss:$8 sps:$4 sm:$0xff] (!%p809_p9)   ;;  %v2386_v15 = vld [vmem:[%s2967_s14 + $0x30] ss:$8 sps:$4 sm:$0xff] (!%p809_p9)   ;;  %v2388_v17 = vld [vmem:[%s2967_s14 + $0x44] ss:$8 sps:$4 sm:$0xff] (!%p809_p9)  }
  0x63   : > { %v2384_v14 = vld [vmem:[%s2967_s14 + $0x234] ss:$8 sps:$4 sm:$0xff]   ;;  %v2387_v16 = vld [vmem:[%s2967_s14 + $0x230] ss:$8 sps:$4 sm:$0xff]   ;;  %v2390_v18 = vld [vmem:[%s2967_s14 + $0x244] ss:$8 sps:$4 sm:$0xff]  }
  0x64   : > { %1752 = vmatpush1.bf16.msra.mxu1 %v2374_v6  ;;  %v2392_v19 = vld [vmem:[%s2967_s14 + $0x40] ss:$8 sps:$4 sm:$0xff]   ;;  %v2394_v21 = vld [vmem:[%s2967_s14 + $0x54] ss:$8 sps:$4 sm:$0xff]   ;;  %v2398_v23 = vld [vmem:[%s2967_s14 + $0x50] ss:$8 sps:$4 sm:$0xff]  }
  0x65   : > { %1834 = vmatpush1.bf16.msra.mxu0 %v2375_v7  ;;  %1753 = vmatprep.subr.bf16.mxu1 %v2376_v9  ;;  %v2393_v20 = vld [vmem:[%s2967_s14 + $0x240] ss:$8 sps:$4 sm:$0xff]   ;;  %v2396_v22 = vld [vmem:[%s2967_s14 + $0x254] ss:$8 sps:$4 sm:$0xff]   ;;  %v2399_v24 = vld [vmem:[%s2967_s14 + $0x250] ss:$8 sps:$4 sm:$0xff]  }
  0x66   : > { %1835 = vmatprep.subr.bf16.mxu0 %v2378_v10  ;;  %v2400_v25 = vld [vmem:[%s2967_s14 + $0x64] ss:$8 sps:$4 sm:$0xff]   ;;  %v2404_v27 = vld [vmem:[%s2967_s14 + $0x60] ss:$8 sps:$4 sm:$0xff]   ;;  %v2406_v29 = vld [vmem:[%s2967_s14 + $0x74] ss:$8 sps:$4 sm:$0xff]  }
  0x67   : > { %v2402_v26 = vld [vmem:[%s2967_s14 + $0x264] ss:$8 sps:$4 sm:$0xff]   ;;  %v2405_v28 = vld [vmem:[%s2967_s14 + $0x260] ss:$8 sps:$4 sm:$0xff]   ;;  %v2408_v30 = vld [vmem:[%s2967_s14 + $0x274] ss:$8 sps:$4 sm:$0xff]  }
  0x68   : > { %1754 = vmatpush1.bf16.msra.mxu1 %v2380_v11  ;;  %v2410_v31 = vld [vmem:[%s2967_s14 + $0x70] ss:$8 sps:$4 sm:$0xff]   ;;  %v2412_v33 = vld [vmem:[%s2967_s14 + $0x84] ss:$8 sps:$4 sm:$0xff]   ;;  %v2416_v35 = vld [vmem:[%s2967_s14 + $0x80] ss:$8 sps:$4 sm:$0xff]  }
  0x69   : > { %1836 = vmatpush1.bf16.msra.mxu0 %v2381_v12  ;;  %1755 = vmatprep.subr.bf16.mxu1 %v2382_v13  ;;  %v2411_v32 = vld [vmem:[%s2967_s14 + $0x270] ss:$8 sps:$4 sm:$0xff]   ;;  %v2414_v34 = vld [vmem:[%s2967_s14 + $0x284] ss:$8 sps:$4 sm:$0xff]   ;;  %v2417_v36 = vld [vmem:[%s2967_s14 + $0x280] ss:$8 sps:$4 sm:$0xff]  }
  0x6a   : > { %1837 = vmatprep.subr.bf16.mxu0 %v2384_v14  ;;  %v2418_v40 = vld [vmem:[%s2967_s14 + $0x94] ss:$8 sps:$4 sm:$0xff]   ;;  %s3181_s21 = smov (!%p878_p10, %s2600_s21), 1  ;;  %v2422_v42 = vld [vmem:[%s2967_s14 + $0x90] ss:$8 sps:$4 sm:$0xff]   ;;  %p889_p11 = scmp.lt.s32.totalorder %s2151_s7, 3 }
  0x6b   : > { %v2420_v41 = vld [vmem:[%s2967_s14 + $0x294] ss:$8 sps:$4 sm:$0xff]   ;;  %v2423_v45 = vld [vmem:[%s2967_s14 + $0x290] ss:$8 sps:$4 sm:$0xff]   ;;  %v2424_v46 = vld [vmem:[%s2967_s14 + $0xa4] ss:$8 sps:$4 sm:$0xff]  }
  0x6c   : > { %1756 = vmatpush1.bf16.msra.mxu1 %v2386_v15  ;;  %s2291_s15 = sshll.u32 %s3181_s21, 4  ;;  %v2426_v47 = vld [vmem:[%s2967_s14 + $0x2a4] ss:$8 sps:$4 sm:$0xff]   ;;  %v2428_v48 = vld [vmem:[%s2967_s14 + $0xa0] ss:$8 sps:$4 sm:$0xff]   ;;  %s2154_s27 = sshll.u32 %s3181_s21, 1 }
  0x6d   : > { %1838 = vmatpush1.bf16.msra.mxu0 %v2387_v16  ;;  %1757 = vmatprep.subr.bf16.mxu1 %v2388_v17  ;;  %v2429_v49 = vld [vmem:[%s2967_s14 + $0x2a0] ss:$8 sps:$4 sm:$0xff]   ;;  %s886_s18 = scalar_lea.vmem %s3162_s0, %s2291_s15  ;;  %v2430_v51 = vld [vmem:[%s2967_s14 + $0xb4] ss:$8 sps:$4 sm:$0xff]   ;;  %v2434_v54 = vld [vmem:[%s2967_s14 + $0xb0] ss:$8 sps:$4 sm:$0xff]   ;;  %s908_s6 = scalar_lea.vmem %s3166_s4, %s2154_s27 }
  0x6e   : > { %1839 = vmatprep.subr.bf16.mxu0 %v2390_v18  ;;  %v2432_v52 = vld [vmem:[%s2967_s14 + $0x2b4] ss:$8 sps:$4 sm:$0xff]   ;;  %v923_v53 = vld [vmem:[%s886_s18] sm:$0xff]  ;;  %v2435_v56 = vld [vmem:[%s2967_s14 + $0x2b0] ss:$8 sps:$4 sm:$0xff]   ;;  %s3183_s7 = smov (!%p889_p11, %s2151_s7), 3 }
  0x6f   : > { %v1074_v55 = vrot.slane %v923_v53, %v1073_v50  ;;  %v924_v57 = vld [vmem:[%s886_s18 + $0x8] sm:$0xff]  ;;  %v2442_v1 = vld [vmem:[%s2967_s14 + $0xd4] ss:$8 sps:$4 sm:$0xff]   ;;  %v2446_v3 = vld [vmem:[%s2967_s14 + $0xd0] ss:$8 sps:$4 sm:$0xff]   ;;  %v1067_v11 = vcombine.high %v923_v53, %v923_v53  ;;  %s2153_s8 = sshll.u32 %s3181_s21, 2  ;;  %s891_s15 = scalar_lea.vmem %s3164_s2, %s3183_s7 }
  0x70   : > { %1758 = vmatpush1.bf16.msra.mxu1 %v2392_v19  ;;  %v2436_v58 = vld [vmem:[%s2967_s14 + $0xc4] ss:$8 sps:$4 sm:$0xff]   ;;  %v1091_v61 = vrot.slane %v924_v57, %v1073_v50  ;;  %v2440_v63 = vld [vmem:[%s2967_s14 + $0xc0] ss:$8 sps:$4 sm:$0xff]   ;;  %v2444_v2 = vld [vmem:[%s2967_s14 + $0x2d4] ss:$8 sps:$4 sm:$0xff]   ;;  %v1084_v12 = vcombine.high %v924_v57, %v924_v57  ;;  %s3124_s9 = sadd.s32 %s2153_s8, %s3183_s7 }
  0x71   : > { %1840 = vmatpush1.bf16.msra.mxu0 %v2393_v20  ;;  %1759 = vmatprep.subr.bf16.mxu1 %v2394_v21  ;;  %v2438_v59 = vld [vmem:[%s2967_s14 + $0x2c4] ss:$8 sps:$4 sm:$0xff]   ;;  %v1082_v60 = vcombine.high %v1074_v55, %v1074_v55  ;;  %v2441_v0 = vld [vmem:[%s2967_s14 + $0x2c0] ss:$8 sps:$4 sm:$0xff]   ;;  %v2447_v4 = vld [vmem:[%s2967_s14 + $0x2d0] ss:$8 sps:$4 sm:$0xff]   ;;  %v3046_v17 = vrot.slane %v1067_v11, %v1073_v50  ;;  %s900_s12 = scalar_lea.vmem %s3165_s3, %s3124_s9 }
  0x72   : > { %1841 = vmatprep.subr.bf16.mxu0 %v2396_v22  ;;  %v1099_v62 = vcombine.high %v1091_v61, %v1091_v61  ;;  %v2448_v5 = vld [vmem:[%s2967_s14 + $0xe4] ss:$8 sps:$4 sm:$0xff]   ;;  %v2452_v7 = vld [vmem:[%s2967_s14 + $0xe0] ss:$8 sps:$4 sm:$0xff]   ;;  %v2454_v9 = vld [vmem:[%s2967_s14 + $0xf4] ss:$8 sps:$4 sm:$0xff]   ;;  %v3048_v18 = vrot.slane %v1084_v12, %v1073_v50 }
  0x73   : > { %1781 = vmatprep.mubr.bf16.mxu1 %v1082_v60  ;;  %v2450_v6 = vld [vmem:[%s2967_s14 + $0x2e4] ss:$8 sps:$4 sm:$0xff]   ;;  %v2453_v8 = vld [vmem:[%s2967_s14 + $0x2e0] ss:$8 sps:$4 sm:$0xff]   ;;  %v2456_v10 = vld [vmem:[%s2967_s14 + $0x2f4] ss:$8 sps:$4 sm:$0xff]  }
  0x74   : > { %1760 = vmatpush1.bf16.msra.mxu1 %v2398_v23  ;;  %1863 = vmatprep.mubr.bf16.mxu0 %v1099_v62  ;;  %v2458_v13 = vld [vmem:[%s2967_s14 + $0xf0] ss:$8 sps:$4 sm:$0xff]   ;;  %v2463_v15 = vld [vmem:[%s2967_s14 + $0x104] ss:$8 sps:$4 sm:$0xff]   ;;  %v2461_v19 = vld [vmem:[%s2967_s14 + $0x100] ss:$8 sps:$4 sm:$0xff]   ;;  %v1083_v23 = vcombine.high %v3046_v17, %v3046_v17 }
  0x75   : > { %1842 = vmatpush1.bf16.msra.mxu0 %v2399_v24  ;;  %1761 = vmatprep.subr.bf16.mxu1 %v2400_v25  ;;  %v2459_v14 = vld [vmem:[%s2967_s14 + $0x2f0] ss:$8 sps:$4 sm:$0xff]   ;;  %v2467_v16 = vld [vmem:[%s2967_s14 + $0x304] ss:$8 sps:$4 sm:$0xff]   ;;  %v2465_v20 = vld [vmem:[%s2967_s14 + $0x300] ss:$8 sps:$4 sm:$0xff]   ;;  %v1100_v24 = vcombine.high %v3048_v18, %v3048_v18 }
  0x76   : > { %1843 = vmatprep.subr.bf16.mxu0 %v2402_v26  ;;  %v2470_v21 = vld [vmem:[%s2967_s14 + $0x114] ss:$8 sps:$4 sm:$0xff]   ;;  %v2468_v25 = vld [vmem:[%s2967_s14 + $0x110] ss:$8 sps:$4 sm:$0xff]   ;;  %v2486_v37 = vld [vmem:[%s2967_s14 + $0x140] ss:$8 sps:$4 sm:$0xff]  }
  0x77   : > { %v2473_v22 = vld [vmem:[%s2967_s14 + $0x314] ss:$8 sps:$4 sm:$0xff]   ;;  %v2471_v26 = vld [vmem:[%s2967_s14 + $0x310] ss:$8 sps:$4 sm:$0xff]   ;;  %v2489_v38 = vld [vmem:[%s2967_s14 + $0x340] ss:$8 sps:$4 sm:$0xff]  }
  0x78   : > { %1762 = vmatpush1.bf16.msra.mxu1 %v2404_v27  ;;  %v2476_v27 = vld [vmem:[%s2967_s14 + $0x124] ss:$8 sps:$4 sm:$0xff]   ;;  %v2494_v39 = vld [vmem:[%s2967_s14 + $0x154] ss:$8 sps:$4 sm:$0xff]   ;;  %v2507_v53 = vld [vmem:[%s2967_s14 + $0x370] ss:$8 sps:$4 sm:$0xff]  }
  0x79   : > { %1844 = vmatpush1.bf16.msra.mxu0 %v2405_v28  ;;  %1763 = vmatprep.subr.bf16.mxu1 %v2406_v29  ;;  %v2479_v28 = vld [vmem:[%s2967_s14 + $0x324] ss:$8 sps:$4 sm:$0xff]   ;;  %v2474_v29 = vld [vmem:[%s2967_s14 + $0x120] ss:$8 sps:$4 sm:$0xff]   ;;  %v2506_v50 = vld [vmem:[%s2967_s14 + $0x174] ss:$8 sps:$4 sm:$0xff]  }
  0x7a   : > { %1845 = vmatprep.subr.bf16.mxu0 %v2408_v30  ;;  %v2477_v30 = vld [vmem:[%s2967_s14 + $0x320] ss:$8 sps:$4 sm:$0xff]   ;;  %v2500_v44 = vld [vmem:[%s2967_s14 + $0x164] ss:$8 sps:$4 sm:$0xff]   ;;  %v2516_v60 = vld [vmem:[%s2967_s14 + $0x190] ss:$8 sps:$4 sm:$0xff]  }
  0x7b   : > { %v2513_v57 = vld [vmem:[%s2967_s14 + $0x380] ss:$8 sps:$4 sm:$0xff]   ;;  %v2524_v62 = vld [vmem:[%s2967_s14 + $0x1a4] ss:$8 sps:$4 sm:$0xff]   ;;  %v2545_v11 = vld [vmem:[%s2967_s14 + $0x3d4] ss:$8 sps:$4 sm:$0xff]  }
  0x7c   : > { %1764 = vmatpush1.bf16.msra.mxu1 %v2410_v31  ;;  %v2482_v31 = vld [vmem:[%s2967_s14 + $0x134] ss:$8 sps:$4 sm:$0xff]   ;;  %v2540_v12 = vld [vmem:[%s2967_s14 + $0x1d0] ss:$8 sps:$4 sm:$0xff]   ;;  %s2157_s20 = sshll.u32 %s3124_s9, 1 }
  0x7d   : > { %1846 = vmatpush1.bf16.msra.mxu0 %v2411_v32  ;;  %1765 = vmatprep.subr.bf16.mxu1 %v2412_v33  ;;  %v2485_v32 = vld [vmem:[%s2967_s14 + $0x334] ss:$8 sps:$4 sm:$0xff]   ;;  %v2480_v33 = vld [vmem:[%s2967_s14 + $0x130] ss:$8 sps:$4 sm:$0xff]   ;;  %s921_s17 = scalar_lea.vmem %s3167_s5, %s2157_s20 }
  0x7e   : > { %1847 = vmatprep.subr.bf16.mxu0 %v2414_v34  ;;  %v2483_v34 = vld [vmem:[%s2967_s14 + $0x330] ss:$8 sps:$4 sm:$0xff]  }
  0x80   : > { %1766 = vmatpush1.bf16.msra.mxu1 %v2416_v35  ;;  %v2488_v35 = vld [vmem:[%s2967_s14 + $0x144] ss:$8 sps:$4 sm:$0xff]  }
  0x81   : > { %1848 = vmatpush1.bf16.msra.mxu0 %v2417_v36  ;;  %1767 = vmatprep.subr.bf16.mxu1 %v2418_v40  ;;  %v2491_v36 = vld [vmem:[%s2967_s14 + $0x344] ss:$8 sps:$4 sm:$0xff]   ;;  %v2497_v40 = vld [vmem:[%s2967_s14 + $0x354] ss:$8 sps:$4 sm:$0xff]  }
  0x82   : > { %1849 = vmatprep.subr.bf16.mxu0 %v2420_v41  ;;  %v2492_v41 = vld [vmem:[%s2967_s14 + $0x150] ss:$8 sps:$4 sm:$0xff]  }
  0x84   : > { %1768 = vmatpush1.bf16.msra.mxu1 %v2422_v42  ;;  %v2495_v42 = vld [vmem:[%s2967_s14 + $0x350] ss:$8 sps:$4 sm:$0xff]  }
  0x85   : > { %1850 = vmatpush1.bf16.msra.mxu0 %v2423_v45  ;;  %1769 = vmatprep.subr.bf16.mxu1 %v2424_v46  ;;  %v2503_v45 = vld [vmem:[%s2967_s14 + $0x364] ss:$8 sps:$4 sm:$0xff]   ;;  %v1938_v46 = vld [vmem:[%s908_s6] sm:$0x3] }
  0x86   : > { %1851 = vmatprep.subr.bf16.mxu0 %v2426_v47  ;;  %v1939_v47 = vunpack.c.l.bf16 %v1938_v46 }
  0x88   : > { %1770 = vmatpush1.bf16.msra.mxu1 %v2428_v48  ;;  %v2498_v48 = vld [vmem:[%s2967_s14 + $0x160] ss:$8 sps:$4 sm:$0xff]   ;;  %1942 = vperm.xlu0 %2363, %v1939_v47  }
  0x89   : > { %1852 = vmatpush1.bf16.msra.mxu0 %v2429_v49  ;;  %1771 = vmatprep.subr.bf16.mxu1 %v2430_v51  ;;  %v2501_v49 = vld [vmem:[%s2967_s14 + $0x360] ss:$8 sps:$4 sm:$0xff]   ;;  %v2509_v51 = vld [vmem:[%s2967_s14 + $0x374] ss:$8 sps:$4 sm:$0xff]  }
  0x8a   : > { %1853 = vmatprep.subr.bf16.mxu0 %v2432_v52  ;;  %v2504_v52 = vld [vmem:[%s2967_s14 + $0x170] ss:$8 sps:$4 sm:$0xff]  }
  0x8c   : > { %1772 = vmatpush1.bf16.msra.mxu1 %v2434_v54  ;;  %v2512_v54 = vld [vmem:[%s2967_s14 + $0x184] ss:$8 sps:$4 sm:$0xff]  }
  0x8d   : > { %1854 = vmatpush1.bf16.msra.mxu0 %v2435_v56  ;;  %1773 = vmatprep.subr.bf16.mxu1 %v2436_v58  ;;  %v2510_v56 = vld [vmem:[%s2967_s14 + $0x180] ss:$8 sps:$4 sm:$0xff]   ;;  %v2518_v58 = vld [vmem:[%s2967_s14 + $0x194] ss:$8 sps:$4 sm:$0xff]  }
  0x8e   : > { %1855 = vmatprep.subr.bf16.mxu0 %v2438_v59  ;;  %v2521_v59 = vld [vmem:[%s2967_s14 + $0x394] ss:$8 sps:$4 sm:$0xff]  }
  0x90   : > { %1774 = vmatpush1.bf16.msra.mxu1 %v2440_v63  ;;  %v2527_v63 = vld [vmem:[%s2967_s14 + $0x3a4] ss:$8 sps:$4 sm:$0xff]  }
  0x91   : > { %1856 = vmatpush1.bf16.msra.mxu0 %v2441_v0  ;;  %1775 = vmatprep.subr.bf16.mxu1 %v2442_v1  ;;  %v2522_v0 = vld [vmem:[%s2967_s14 + $0x1a0] ss:$8 sps:$4 sm:$0xff]  }
  0x92   : > { %1857 = vmatprep.subr.bf16.mxu0 %v2444_v2  ;;  %v2525_v1 = vld [vmem:[%s2967_s14 + $0x3a0] ss:$8 sps:$4 sm:$0xff]   ;;  %v2530_v2 = vld [vmem:[%s2967_s14 + $0x1b4] ss:$8 sps:$4 sm:$0xff]  }
  0x94   : > { %1776 = vmatpush1.bf16.msra.mxu1 %v2446_v3  ;;  %v2533_v3 = vld [vmem:[%s2967_s14 + $0x3b4] ss:$8 sps:$4 sm:$0xff]  }
  0x95   : > { %1858 = vmatpush1.bf16.msra.mxu0 %v2447_v4  ;;  %1777 = vmatprep.subr.bf16.mxu1 %v2448_v5  ;;  %v2528_v4 = vld [vmem:[%s2967_s14 + $0x1b0] ss:$8 sps:$4 sm:$0xff]  }
  0x96   : > { %1859 = vmatprep.subr.bf16.mxu0 %v2450_v6  ;;  %v2531_v5 = vld [vmem:[%s2967_s14 + $0x3b0] ss:$8 sps:$4 sm:$0xff]   ;;  %v2536_v6 = vld [vmem:[%s2967_s14 + $0x1c4] ss:$8 sps:$4 sm:$0xff]  }
  0x98   : > { %1778 = vmatpush1.bf16.msra.mxu1 %v2452_v7  ;;  %v2539_v7 = vld [vmem:[%s2967_s14 + $0x3c4] ss:$8 sps:$4 sm:$0xff]  }
  0x99   : > { %1860 = vmatpush1.bf16.msra.mxu0 %v2453_v8  ;;  %1779 = vmatprep.subr.bf16.mxu1 %v2454_v9  ;;  %v2534_v8 = vld [vmem:[%s2967_s14 + $0x1c0] ss:$8 sps:$4 sm:$0xff]  }
  0x9a   : > { %1861 = vmatprep.subr.bf16.mxu0 %v2456_v10  ;;  %v2537_v9 = vld [vmem:[%s2967_s14 + $0x3c0] ss:$8 sps:$4 sm:$0xff]   ;;  %v2542_v10 = vld [vmem:[%s2967_s14 + $0x1d4] ss:$8 sps:$4 sm:$0xff]  }
  0x9c   : > { %1780 = vmatpush1.bf16.msra.mxu1 %v2458_v13  ;;  %v2543_v13 = vld [vmem:[%s2967_s14 + $0x3d0] ss:$8 sps:$4 sm:$0xff]  }
  0x9d   : > { %1862 = vmatpush1.bf16.msra.mxu0 %v2459_v14  ;;  %1790 = vmatprep.subr.bf16.mxu1 %v2463_v15  ;;  %v2548_v14 = vld [vmem:[%s2967_s14 + $0x1e4] ss:$8 sps:$4 sm:$0xff]  }
  0x9e   : > { %1872 = vmatprep.subr.bf16.mxu0 %v2467_v16  ;;  %v2551_v15 = vld [vmem:[%s2967_s14 + $0x3e4] ss:$8 sps:$4 sm:$0xff]   ;;  %v2546_v16 = vld [vmem:[%s2967_s14 + $0x1e0] ss:$8 sps:$4 sm:$0xff]  }
  0x9f   : > { %1782 = vmatmul.mubr.bf16.vlgmr.msra.gmra.mrb[0].mxu1 %v1074_v55  ;;  %v2515_v55 = vld [vmem:[%s2967_s14 + $0x384] ss:$8 sps:$4 sm:$0xff]  }
  0xa0   : > { %1864 = vmatmul.mubr.bf16.vlgmr.msra.gmra.mrb[0].mxu0 %v1091_v61  ;;  %1791 = vmatpush1.bf16.msra.mxu1 %v2461_v19  ;;  %v2519_v61 = vld [vmem:[%s2967_s14 + $0x390] ss:$8 sps:$4 sm:$0xff]   ;;  %v2549_v19 = vld [vmem:[%s2967_s14 + $0x3e0] ss:$8 sps:$4 sm:$0xff]  }
  0xa1   : > { %1873 = vmatpush1.bf16.msra.mxu0 %v2465_v20  ;;  %1792 = vmatprep.subr.bf16.mxu1 %v2470_v21  ;;  %v2554_v20 = vld [vmem:[%s2967_s14 + $0x1f4] ss:$8 sps:$4 sm:$0xff]  }
  0xa2   : > { %1874 = vmatprep.subr.bf16.mxu0 %v2473_v22  ;;  %1822 = vmatprep.mubr.bf16.mxu1 %v1083_v23  ;;  %v2557_v21 = vld [vmem:[%s2967_s14 + $0x3f4] ss:$8 sps:$4 sm:$0xff]   ;;  %v2552_v22 = vld [vmem:[%s2967_s14 + $0x1f0] ss:$8 sps:$4 sm:$0xff]  }
  0xa3   : > { %1904 = vmatprep.mubr.bf16.mxu0 %v1100_v24  ;;  %v2555_v23 = vld [vmem:[%s2967_s14 + $0x3f0] ss:$8 sps:$4 sm:$0xff]   ;;  %v2616_v24 = vmov 839922192  }
  0xa4   : > { %1793 = vmatpush1.bf16.msra.mxu1 %v2468_v25  ;;  %v1946_v25 = vunpack.c.l.s4 %v2616_v24 }
  0xa5   : > { %1875 = vmatpush1.bf16.msra.mxu0 %v2471_v26  ;;  %1794 = vmatprep.subr.bf16.mxu1 %v2476_v27  ;;  %v1053_v26 = vld [vmem:[%s891_s15] sm:$0x3]  ;;  %v1061_v27 = vsub.s32 1, %v3012_v43 }
  0xa6   : > { %1876 = vmatprep.subr.bf16.mxu0 %v2479_v28  ;;  %v1947_v28 = vunpack.c.0.s8 %v1946_v25 }
  0xa8   : > { %1795 = vmatpush1.bf16.msra.mxu1 %v2474_v29 }
  0xa9   : > { %1877 = vmatpush1.bf16.msra.mxu0 %v2477_v30  ;;  %1796 = vmatprep.subr.bf16.mxu1 %v2482_v31  ;;  %v1924_v30 = vsub.s32 2, %v3012_v43 }
  0xaa   : > { %1878 = vmatprep.subr.bf16.mxu0 %v2485_v32  ;;  %v1062_v32 = vrot.slane %v1053_v26, %v1061_v27 }
  0xac   : > { %1797 = vmatpush1.bf16.msra.mxu1 %v2480_v33  ;;  %v1950_v33 = vsub.s32 %v1947_v28, %v3012_v43 }
  0xad   : > { %1879 = vmatpush1.bf16.msra.mxu0 %v2483_v34  ;;  %1798 = vmatprep.subr.bf16.mxu1 %v2488_v35 }
  0xae   : > { %1880 = vmatprep.subr.bf16.mxu0 %v2491_v36 }
  0xb0   : > { %1799 = vmatpush1.bf16.msra.mxu1 %v2486_v37 }
  0xb1   : > { %1881 = vmatpush1.bf16.msra.mxu0 %v2489_v38  ;;  %1800 = vmatprep.subr.bf16.mxu1 %v2494_v39 }
  0xb2   : > { %1882 = vmatprep.subr.bf16.mxu0 %v2497_v40 }
  0xb4   : > { %1801 = vmatpush1.bf16.msra.mxu1 %v2492_v41 }
  0xb5   : > { %1883 = vmatpush1.bf16.msra.mxu0 %v2495_v42  ;;  %1802 = vmatprep.subr.bf16.mxu1 %v2500_v44 }
  0xb6   : > { %1884 = vmatprep.subr.bf16.mxu0 %v2503_v45 }
  0xb8   : > { %1803 = vmatpush1.bf16.msra.mxu1 %v2498_v48 }
  0xb9   : > { %1885 = vmatpush1.bf16.msra.mxu0 %v2501_v49  ;;  %1804 = vmatprep.subr.bf16.mxu1 %v2506_v50 }
  0xba   : > { %1886 = vmatprep.subr.bf16.mxu0 %v2509_v51 }
  0xbc   : > { %1805 = vmatpush1.bf16.msra.mxu1 %v2504_v52 }
  0xbd   : > { %1887 = vmatpush1.bf16.msra.mxu0 %v2507_v53  ;;  %1806 = vmatprep.subr.bf16.mxu1 %v2512_v54 }
  0xbe   : > { %1888 = vmatprep.subr.bf16.mxu0 %v2515_v55 }
  0xc0   : > { %1807 = vmatpush1.bf16.msra.mxu1 %v2510_v56 }
  0xc1   : > { %1889 = vmatpush1.bf16.msra.mxu0 %v2513_v57  ;;  %1808 = vmatprep.subr.bf16.mxu1 %v2518_v58 }
  0xc2   : > { %1890 = vmatprep.subr.bf16.mxu0 %v2521_v59 }
  0xc4   : > { %1809 = vmatpush1.bf16.msra.mxu1 %v2516_v60 }
  0xc5   : > { %1891 = vmatpush1.bf16.msra.mxu0 %v2519_v61  ;;  %1810 = vmatprep.subr.bf16.mxu1 %v2524_v62 }
  0xc6   : > { %1892 = vmatprep.subr.bf16.mxu0 %v2527_v63 }
  0xc8   : > { %1811 = vmatpush1.bf16.msra.mxu1 %v2522_v0 }
  0xc9   : > { %1893 = vmatpush1.bf16.msra.mxu0 %v2525_v1  ;;  %1812 = vmatprep.subr.bf16.mxu1 %v2530_v2 }
  0xca   : > { %1894 = vmatprep.subr.bf16.mxu0 %v2533_v3 }
  0xcc   : > { %1813 = vmatpush1.bf16.msra.mxu1 %v2528_v4 }
  0xcd   : > { %1895 = vmatpush1.bf16.msra.mxu0 %v2531_v5  ;;  %1814 = vmatprep.subr.bf16.mxu1 %v2536_v6 }
  0xce   : > { %1896 = vmatprep.subr.bf16.mxu0 %v2539_v7 }
  0xd0   : > { %1815 = vmatpush1.bf16.msra.mxu1 %v2534_v8 }
  0xd1   : > { %1897 = vmatpush1.bf16.msra.mxu0 %v2537_v9  ;;  %1816 = vmatprep.subr.bf16.mxu1 %v2542_v10 }
  0xd2   : > { %1898 = vmatprep.subr.bf16.mxu0 %v2545_v11 }
  0xd4   : > { %1817 = vmatpush1.bf16.msra.mxu1 %v2540_v12 }
  0xd5   : > { %1899 = vmatpush1.bf16.msra.mxu0 %v2543_v13  ;;  %1818 = vmatprep.subr.bf16.mxu1 %v2548_v14 }
  0xd6   : > { %1900 = vmatprep.subr.bf16.mxu0 %v2551_v15 }
  0xd8   : > { %1819 = vmatpush1.bf16.msra.mxu1 %v2546_v16 }
  0xd9   : > { %1901 = vmatpush1.bf16.msra.mxu0 %v2549_v19  ;;  %1820 = vmatprep.subr.bf16.mxu1 %v2554_v20 }
  0xda   : > { %1902 = vmatprep.subr.bf16.mxu0 %v2557_v21 }
  0xdc   : > { %1821 = vmatpush1.bf16.msra.mxu1 %v2552_v22 }
  0xdd   : > { %1903 = vmatpush1.bf16.msra.mxu0 %v2555_v23 }
  0xdf   : > { %1823 = vmatmul.mubr.bf16.vlgmr.msra.gmra.mrb[0].mxu1 %v3046_v17  ;;  %v1915_v17 = vld [vmem:[%s900_s12] sm:$0x3] }
  0xe0   : > { %1905 = vmatmul.mubr.bf16.vlgmr.msra.gmra.mrb[0].mxu0 %v3048_v18  ;;  %v1057_v18 = vsub.s32 0, %v3012_v43  ;;  %v1916_v29 = vunpack.c.l.bf16 %v1915_v17 }
  0xe2   : > { %v1058_v31 = vrot.slane %v1053_v26, %v1057_v18  ;;  %v1921_v34 = vrot.slane %v1916_v29, %v1057_v18  ;;  %v1925_v38 = vrot.slane %v1916_v29, %v1924_v30 }
  0xe4   : > { %v1931_v48 = vrot.slane %v1921_v34, %v1057_v18  ;;  %v1935_v52 = vrot.slane %v1925_v38, %v1057_v18 }
 0x107   : > { %v1943_v35 = vpop.permute.xlu0 %1942 }
 0x108   : > { %v1951_v46 = vrot.slane %v1943_v35, %v1950_v33 }
 0x10a   : > { %v1953_v54 = vcombine.high %v1951_v46, %v1951_v46 }
 0x1b2   : > { %v1824_v36 = vpop.f32.mrb[0].mxu1 }
 0x1b3   : > { %v1906_v37 = vpop.f32.mrb[0].mxu0  ;;  %v2292_v39 = vadd.f32 %v1824_v36, %v1058_v31  ;;  %v1826_v40 = vpop.f32.mrb[1].mxu1 }
 0x1b4   : > { %v1908_v41 = vpop.f32.mrb[1].mxu0  ;;  %v2294_v42 = vadd.f32 %v1826_v40, %v1062_v32  ;;  %v1828_v44 = vpop.f32.mrb[2].mxu1 }
 0x1b5   : > { %v1910_v45 = vpop.f32.mrb[2].mxu0  ;;  %v2293_v47 = vadd.f32 %v2292_v39, %v1906_v37  ;;  %v1829_v49 = vpop.f32.mrb[3].mxu1 }
 0x1b6   : > { %v1911_v50 = vpop.f32.mrb[3].mxu0  ;;  %v2295_v51 = vadd.f32 %v2294_v42, %v1908_v41 }
 0x1b7   : > { %v1913_v43 = vmax.f32 %v2293_v47, 0.0 }
 0x1b8   : > { %v1914_v53 = vmax.f32 %v2295_v51, 0.0 }
 0x1b9   : > { %v1936_v55 = vmul.f32 %v1931_v48, %v1913_v43 }
 0x1ba   : > { %v1937_v56 = vmul.f32 %v1935_v52, %v1914_v53 }
 0x1bb   : > { %v1955_v57 = vmul.f32 %v1951_v46, %v1936_v55 }
 0x1bc   : > { %v1956_v58 = vmul.f32 %v1953_v54, %v1937_v56 }
 0x1be   : > { %v2286_v59 = vpack.c.bf16 %v1956_v58, %v1955_v57 }
 0x1c0   : > { %2287 = vst.sshfl [vmem:[%s921_s17] sm:$0x33 pattern:$0x76325410] %v2286_v59 }
 0x1c1 PF: > { %s15_s24 = sadd.s32 1, %s2612_s24   ;;  %s3168_s18 = smov %s2592_s19 }
 0x1c2   : > { %p12_p12 = scmp.ge.s32.totalorder %s15_s24, 6   ;;  %s3169_s19 = smov %s2696_s29 }
 0x1c3   : > { %s3170_s20 = smov %s2604_s22  ;;  %s3171_s21 = smov %s2608_s23 }
 0x1c4   : > { %s3172_s22 = smov %s3175_s25  ;;  %s3173_s23 = smov %s3179_s26 }
 0x1c5   :  { %14 = sbr.rel (!%p12_p12) target bundleno = 4 (0x4), region = 125 }

// kernel: _lambda_.30
= control target key start
LH: loop header
LB: loop body
LE: loop exit
PB: predicated region body
PF: predicated region fallthrough
CT: control target
= control target key end

     0   :  { %s1625_s18 = smov 0   ;;  %s1627_s19 = smov 0   ;;  %s1922_s0 = inlined_call_operand.vmem [shape: bf16[2,512], index: 0, kind: input, shape index: {}]   ;;  %s1923_s1 = inlined_call_operand.vmem [shape: bf16[512,2048], index: 1, kind: input, shape index: {}]   ;;  %s1924_s2 = inlined_call_operand.vmem [shape: f32[1,2048], index: 2, kind: input, shape index: {}]   ;;  %s1925_s3 = inlined_call_operand.vmem [shape: bf16[2,1], index: 3, kind: input, shape index: {}]   ;;  %s1926_s4 = inlined_call_operand.vmem [shape: bf16[2,2048], index: 4, kind: input, shape index: {}]   ;;  %s1927_s5 = inlined_call_operand.vmem [shape: bf16[2,2048], index: 5, kind: output, shape index: {}]  }
   0x1   :  { %s1629_s20 = smov 0   ;;  %s1631_s21 = smov 0  }
   0x2   :  { %s1633_s22 = smov 0  }
   0x3 LB: > { %s27_s23 = sadd.s32 1, %s1585_s21  ;;  %p67_p1 = scmp.ne.s32.totalorder %s1577_s19, %s1573_s18  ;;  %s1589_s22 = sphi %s1633_s22, %s15_s22   ;;  %s1585_s21 = sphi %s1631_s21, %s1931_s21   ;;  %s1581_s20 = sphi %s1629_s20, %s1930_s20   ;;  %s1577_s19 = sphi %s1627_s19, %s1929_s19   ;;  %s1573_s18 = sphi %s1625_s18, %s1928_s18  }
   0x4   : > { %p29_p0 = scmp.ge.s32.totalorder %s27_s23, 8  ;;  %p68_p2 = scmp.eq.s32.totalorder %s1589_s22, 0 }
   0x5   : > { %s60_s25 = sadd.s32 1, %s1577_s19  ;;  %p1327_p5 = scmp.ge.s32.totalorder %s1589_s22, 8 }
   0x6   : > { %s1933_s23 = smov (%p29_p0, %s27_s23), 0  ;;  %p69_p3 = por %p68_p2, %p67_p1 }
   0x7   : > { %s57_s24 = ssub.s32 %s1585_s21, %s1933_s23  ;;  %214 = sbr.rel (%p1327_p5) target bundleno = 82 (0x52), region = 24 }
   0x8   : > { %p58_p4 = scmp.eq.s32.totalorder %s57_s24, 0 }
   0xa   : > { %s1660_s26 = scalar_select %p58_p4, %s1577_s19, %s60_s25  }
   0xe   : > { %217 = sbr.rel (!%p69_p3) target bundleno = 82 (0x52), region = 28  ;;  %s219_s27 = sand.u32 (%p69_p3), 1, %s1577_s19  }
   0xf   : > { %s1405_s28 = sshll.u32 (%p69_p3), %s1585_s21, 3  ;;  %s1328_s29 = sshll.u32 (%p69_p3), %s219_s27, 9 }
  0x10   : > { %s1668_s7 = scalar_lea.vmem (%p69_p3), %s1923_s1, %s1405_s28  ;;  %s1673_s8 = scalar_lea.vmem (%p69_p3), [#allocation2], %s1328_s29 }
  0x11   : > { %v378_v0 = vld [vmem:[%s1668_s7] sm:$0xff] (%p69_p3) }
  0x12   : > { %v380_v1 = vld [vmem:[%s1668_s7 + $0x40] sm:$0xff] (%p69_p3)  ;;  %379 = vst [vmem:[%s1673_s8] sm:$0xff] (%p69_p3), %v378_v0 }
  0x13   : > { %v382_v2 = vld [vmem:[%s1668_s7 + $0x80] sm:$0xff] (%p69_p3)  ;;  %381 = vst [vmem:[%s1673_s8 + $0x8] sm:$0xff] (%p69_p3), %v380_v1 }
  0x14   : > { %383 = vst [vmem:[%s1673_s8 + $0x10] sm:$0xff] (%p69_p3), %v382_v2  ;;  %v384_v3 = vld [vmem:[%s1668_s7 + $0xc0] sm:$0xff] (%p69_p3) }
  0x15   : > { %v386_v4 = vld [vmem:[%s1668_s7 + $0x100] sm:$0xff]  ;;  %385 = vst [vmem:[%s1673_s8 + $0x18] sm:$0xff] %v384_v3 }
  0x16   : > { %v388_v5 = vld [vmem:[%s1668_s7 + $0x140] sm:$0xff]  ;;  %387 = vst [vmem:[%s1673_s8 + $0x20] sm:$0xff] %v386_v4 }
  0x17   : > { %389 = vst [vmem:[%s1673_s8 + $0x28] sm:$0xff] %v388_v5  ;;  %v390_v6 = vld [vmem:[%s1668_s7 + $0x180] sm:$0xff] }
  0x18   : > { %v392_v7 = vld [vmem:[%s1668_s7 + $0x1c0] sm:$0xff]  ;;  %391 = vst [vmem:[%s1673_s8 + $0x30] sm:$0xff] %v390_v6 }
  0x19   : > { %v394_v8 = vld [vmem:[%s1668_s7 + $0x200] sm:$0xff]  ;;  %393 = vst [vmem:[%s1673_s8 + $0x38] sm:$0xff] %v392_v7 }
  0x1a   : > { %395 = vst [vmem:[%s1673_s8 + $0x40] sm:$0xff] %v394_v8  ;;  %v396_v9 = vld [vmem:[%s1668_s7 + $0x240] sm:$0xff] }
  0x1b   : > { %v398_v10 = vld [vmem:[%s1668_s7 + $0x280] sm:$0xff]  ;;  %397 = vst [vmem:[%s1673_s8 + $0x48] sm:$0xff] %v396_v9 }
  0x1c   : > { %v400_v11 = vld [vmem:[%s1668_s7 + $0x2c0] sm:$0xff]  ;;  %399 = vst [vmem:[%s1673_s8 + $0x50] sm:$0xff] %v398_v10 }
  0x1d   : > { %401 = vst [vmem:[%s1673_s8 + $0x58] sm:$0xff] %v400_v11  ;;  %v402_v12 = vld [vmem:[%s1668_s7 + $0x300] sm:$0xff] }
  0x1e   : > { %v404_v13 = vld [vmem:[%s1668_s7 + $0x340] sm:$0xff]  ;;  %403 = vst [vmem:[%s1673_s8 + $0x60] sm:$0xff] %v402_v12 }
  0x1f   : > { %v406_v14 = vld [vmem:[%s1668_s7 + $0x380] sm:$0xff]  ;;  %405 = vst [vmem:[%s1673_s8 + $0x68] sm:$0xff] %v404_v13 }
  0x20   : > { %407 = vst [vmem:[%s1673_s8 + $0x70] sm:$0xff] %v406_v14  ;;  %v408_v15 = vld [vmem:[%s1668_s7 + $0x3c0] sm:$0xff] }
  0x21   : > { %v410_v16 = vld [vmem:[%s1668_s7 + $0x400] sm:$0xff]  ;;  %409 = vst [vmem:[%s1673_s8 + $0x78] sm:$0xff] %v408_v15 }
  0x22   : > { %v412_v17 = vld [vmem:[%s1668_s7 + $0x440] sm:$0xff]  ;;  %411 = vst [vmem:[%s1673_s8 + $0x80] sm:$0xff] %v410_v16 }
  0x23   : > { %413 = vst [vmem:[%s1673_s8 + $0x88] sm:$0xff] %v412_v17  ;;  %v414_v18 = vld [vmem:[%s1668_s7 + $0x480] sm:$0xff] }
  0x24   : > { %v416_v19 = vld [vmem:[%s1668_s7 + $0x4c0] sm:$0xff]  ;;  %415 = vst [vmem:[%s1673_s8 + $0x90] sm:$0xff] %v414_v18 }
  0x25   : > { %v418_v20 = vld [vmem:[%s1668_s7 + $0x500] sm:$0xff]  ;;  %417 = vst [vmem:[%s1673_s8 + $0x98] sm:$0xff] %v416_v19 }
  0x26   : > { %419 = vst [vmem:[%s1673_s8 + $0xa0] sm:$0xff] %v418_v20  ;;  %v420_v21 = vld [vmem:[%s1668_s7 + $0x540] sm:$0xff] }
  0x27   : > { %v422_v22 = vld [vmem:[%s1668_s7 + $0x580] sm:$0xff]  ;;  %421 = vst [vmem:[%s1673_s8 + $0xa8] sm:$0xff] %v420_v21 }
  0x28   : > { %v424_v23 = vld [vmem:[%s1668_s7 + $0x5c0] sm:$0xff]  ;;  %423 = vst [vmem:[%s1673_s8 + $0xb0] sm:$0xff] %v422_v22 }
  0x29   : > { %425 = vst [vmem:[%s1673_s8 + $0xb8] sm:$0xff] %v424_v23  ;;  %v426_v24 = vld [vmem:[%s1668_s7 + $0x600] sm:$0xff] }
  0x2a   : > { %v428_v25 = vld [vmem:[%s1668_s7 + $0x640] sm:$0xff]  ;;  %427 = vst [vmem:[%s1673_s8 + $0xc0] sm:$0xff] %v426_v24 }
  0x2b   : > { %v430_v26 = vld [vmem:[%s1668_s7 + $0x680] sm:$0xff]  ;;  %429 = vst [vmem:[%s1673_s8 + $0xc8] sm:$0xff] %v428_v25 }
  0x2c   : > { %431 = vst [vmem:[%s1673_s8 + $0xd0] sm:$0xff] %v430_v26  ;;  %v432_v27 = vld [vmem:[%s1668_s7 + $0x6c0] sm:$0xff] }
  0x2d   : > { %v434_v28 = vld [vmem:[%s1668_s7 + $0x700] sm:$0xff]  ;;  %433 = vst [vmem:[%s1673_s8 + $0xd8] sm:$0xff] %v432_v27 }
  0x2e   : > { %v436_v29 = vld [vmem:[%s1668_s7 + $0x740] sm:$0xff]  ;;  %435 = vst [vmem:[%s1673_s8 + $0xe0] sm:$0xff] %v434_v28 }
  0x2f   : > { %437 = vst [vmem:[%s1673_s8 + $0xe8] sm:$0xff] %v436_v29  ;;  %v438_v30 = vld [vmem:[%s1668_s7 + $0x780] sm:$0xff] }
  0x30   : > { %v440_v31 = vld [vmem:[%s1668_s7 + $0x7c0] sm:$0xff]  ;;  %439 = vst [vmem:[%s1673_s8 + $0xf0] sm:$0xff] %v438_v30 }
  0x31   : > { %v442_v32 = vld [vmem:[%s1668_s7 + $0x800] sm:$0xff]  ;;  %441 = vst [vmem:[%s1673_s8 + $0xf8] sm:$0xff] %v440_v31 }
  0x32   : > { %443 = vst [vmem:[%s1673_s8 + $0x100] sm:$0xff] %v442_v32  ;;  %v444_v33 = vld [vmem:[%s1668_s7 + $0x840] sm:$0xff] }
  0x33   : > { %v446_v34 = vld [vmem:[%s1668_s7 + $0x880] sm:$0xff]  ;;  %445 = vst [vmem:[%s1673_s8 + $0x108] sm:$0xff] %v444_v33 }
  0x34   : > { %v448_v35 = vld [vmem:[%s1668_s7 + $0x8c0] sm:$0xff]  ;;  %447 = vst [vmem:[%s1673_s8 + $0x110] sm:$0xff] %v446_v34 }
  0x35   : > { %449 = vst [vmem:[%s1673_s8 + $0x118] sm:$0xff] %v448_v35  ;;  %v450_v36 = vld [vmem:[%s1668_s7 + $0x900] sm:$0xff] }
  0x36   : > { %v452_v37 = vld [vmem:[%s1668_s7 + $0x940] sm:$0xff]  ;;  %451 = vst [vmem:[%s1673_s8 + $0x120] sm:$0xff] %v450_v36 }
  0x37   : > { %v454_v38 = vld [vmem:[%s1668_s7 + $0x980] sm:$0xff]  ;;  %453 = vst [vmem:[%s1673_s8 + $0x128] sm:$0xff] %v452_v37 }
  0x38   : > { %455 = vst [vmem:[%s1673_s8 + $0x130] sm:$0xff] %v454_v38  ;;  %v456_v39 = vld [vmem:[%s1668_s7 + $0x9c0] sm:$0xff] }
  0x39   : > { %v458_v40 = vld [vmem:[%s1668_s7 + $0xa00] sm:$0xff]  ;;  %457 = vst [vmem:[%s1673_s8 + $0x138] sm:$0xff] %v456_v39 }
  0x3a   : > { %v460_v41 = vld [vmem:[%s1668_s7 + $0xa40] sm:$0xff]  ;;  %459 = vst [vmem:[%s1673_s8 + $0x140] sm:$0xff] %v458_v40 }
  0x3b   : > { %461 = vst [vmem:[%s1673_s8 + $0x148] sm:$0xff] %v460_v41  ;;  %v462_v42 = vld [vmem:[%s1668_s7 + $0xa80] sm:$0xff] }
  0x3c   : > { %v464_v43 = vld [vmem:[%s1668_s7 + $0xac0] sm:$0xff]  ;;  %463 = vst [vmem:[%s1673_s8 + $0x150] sm:$0xff] %v462_v42 }
  0x3d   : > { %v466_v44 = vld [vmem:[%s1668_s7 + $0xb00] sm:$0xff]  ;;  %465 = vst [vmem:[%s1673_s8 + $0x158] sm:$0xff] %v464_v43 }
  0x3e   : > { %467 = vst [vmem:[%s1673_s8 + $0x160] sm:$0xff] %v466_v44  ;;  %v468_v45 = vld [vmem:[%s1668_s7 + $0xb40] sm:$0xff] }
  0x3f   : > { %v470_v46 = vld [vmem:[%s1668_s7 + $0xb80] sm:$0xff]  ;;  %469 = vst [vmem:[%s1673_s8 + $0x168] sm:$0xff] %v468_v45 }
  0x40   : > { %v472_v47 = vld [vmem:[%s1668_s7 + $0xbc0] sm:$0xff]  ;;  %471 = vst [vmem:[%s1673_s8 + $0x170] sm:$0xff] %v470_v46 }
  0x41   : > { %473 = vst [vmem:[%s1673_s8 + $0x178] sm:$0xff] %v472_v47  ;;  %v474_v48 = vld [vmem:[%s1668_s7 + $0xc00] sm:$0xff] }
  0x42   : > { %v476_v49 = vld [vmem:[%s1668_s7 + $0xc40] sm:$0xff]  ;;  %475 = vst [vmem:[%s1673_s8 + $0x180] sm:$0xff] %v474_v48 }
  0x43   : > { %v478_v50 = vld [vmem:[%s1668_s7 + $0xc80] sm:$0xff]  ;;  %477 = vst [vmem:[%s1673_s8 + $0x188] sm:$0xff] %v476_v49 }
  0x44   : > { %479 = vst [vmem:[%s1673_s8 + $0x190] sm:$0xff] %v478_v50  ;;  %v480_v51 = vld [vmem:[%s1668_s7 + $0xcc0] sm:$0xff] }
  0x45   : > { %v482_v52 = vld [vmem:[%s1668_s7 + $0xd00] sm:$0xff]  ;;  %481 = vst [vmem:[%s1673_s8 + $0x198] sm:$0xff] %v480_v51 }
  0x46   : > { %v484_v53 = vld [vmem:[%s1668_s7 + $0xd40] sm:$0xff]  ;;  %483 = vst [vmem:[%s1673_s8 + $0x1a0] sm:$0xff] %v482_v52 }
  0x47   : > { %485 = vst [vmem:[%s1673_s8 + $0x1a8] sm:$0xff] %v484_v53  ;;  %v486_v54 = vld [vmem:[%s1668_s7 + $0xd80] sm:$0xff] }
  0x48   : > { %v488_v55 = vld [vmem:[%s1668_s7 + $0xdc0] sm:$0xff]  ;;  %487 = vst [vmem:[%s1673_s8 + $0x1b0] sm:$0xff] %v486_v54 }
  0x49   : > { %v490_v56 = vld [vmem:[%s1668_s7 + $0xe00] sm:$0xff]  ;;  %489 = vst [vmem:[%s1673_s8 + $0x1b8] sm:$0xff] %v488_v55 }
  0x4a   : > { %491 = vst [vmem:[%s1673_s8 + $0x1c0] sm:$0xff] %v490_v56  ;;  %v492_v57 = vld [vmem:[%s1668_s7 + $0xe40] sm:$0xff] }
  0x4b   : > { %v494_v58 = vld [vmem:[%s1668_s7 + $0xe80] sm:$0xff]  ;;  %493 = vst [vmem:[%s1673_s8 + $0x1c8] sm:$0xff] %v492_v57 }
  0x4c   : > { %v496_v59 = vld [vmem:[%s1668_s7 + $0xec0] sm:$0xff]  ;;  %495 = vst [vmem:[%s1673_s8 + $0x1d0] sm:$0xff] %v494_v58 }
  0x4d   : > { %497 = vst [vmem:[%s1673_s8 + $0x1d8] sm:$0xff] %v496_v59  ;;  %v498_v60 = vld [vmem:[%s1668_s7 + $0xf00] sm:$0xff] }
  0x4e   : > { %v500_v61 = vld [vmem:[%s1668_s7 + $0xf40] sm:$0xff]  ;;  %499 = vst [vmem:[%s1673_s8 + $0x1e0] sm:$0xff] %v498_v60 }
  0x4f   : > { %v502_v62 = vld [vmem:[%s1668_s7 + $0xf80] sm:$0xff]  ;;  %501 = vst [vmem:[%s1673_s8 + $0x1e8] sm:$0xff] %v500_v61 }
  0x50   : > { %503 = vst [vmem:[%s1673_s8 + $0x1f0] sm:$0xff] %v502_v62  ;;  %v504_v63 = vld [vmem:[%s1668_s7 + $0xfc0] sm:$0xff] }
  0x51   : > { %505 = vst [vmem:[%s1673_s8 + $0x1f8] sm:$0xff] %v504_v63 }
  0x52 PF: > { %p1331_p6 = scmp.ge.s32.totalorder %s1589_s22, 1  ;;  %p530_p7 = scmp.lt.s32.totalorder %s1589_s22, 9 }
  0x54   : > { %p531_p8 = pnand %p1331_p6, %p530_p7 }
  0x55   : > { %s537_s9 = sand.u32 (!%p531_p8), 1, %s1573_s18   ;;  %v1806_v0 = vld.sshfl [vmem:[%s1922_s0] sm:$0x33 pattern:$0x75316420] (!%p531_p8)  ;;  %v684_v1 = vlaneseq (!%p531_p8)  ;;  %v1591_v2 = vmov (!%p531_p8), 0  }
  0x56   : > { %534 = sbr.rel (%p531_p8) target bundleno = 381 (0x17d), region = 74  ;;  %s1332_s12 = sshll.u32 (!%p531_p8), %s537_s9, 9  ;;  %1454 = vset.pattern.permute.xlu0 (!%p531_p8), %v1591_v2  ;;  %v1125_v3 = vld [vmem:[%s1925_s3] sm:$0x1] (!%p531_p8)  ;;  %v1592_v5 = vmov (!%p531_p8), 1966171168   ;;  %v702_v10 = vcombine.high (!%p531_p8), %v1806_v0, %v1806_v0 }
  0x57   : > { %v1811_v4 = vshrl.u32 (!%p531_p8), %v684_v1, 7  ;;  %v704_v6 = vunpack.c.l.s4 (!%p531_p8), %v1592_v5  ;;  %v1126_v7 = vunpack.c.l.bf16 (!%p531_p8), %v1125_v3  ;;  %s1813_s15 = scalar_lea.vmem (!%p531_p8), [#allocation2], %s1332_s12  ;;  %s1333_s16 = sshll.u32 (!%p531_p8), %s1581_s20, 1 }
  0x58   : > { %v1455_v8 = vld [vmem:[%s1813_s15 + $0x4] ss:$8 sps:$4 sm:$0xff] (!%p531_p8)   ;;  %v1459_v12 = vld [vmem:[%s1813_s15] ss:$8 sps:$4 sm:$0xff] (!%p531_p8)   ;;  %v1461_v14 = vld [vmem:[%s1813_s15 + $0x14] ss:$8 sps:$4 sm:$0xff] (!%p531_p8)  }
  0x59   : > { %v1457_v9 = vld [vmem:[%s1813_s15 + $0x104] ss:$8 sps:$4 sm:$0xff] (!%p531_p8)   ;;  %v705_v11 = vunpack.c.0.s8 (!%p531_p8), %v704_v6  ;;  %1129 = vperm.xlu0 (!%p531_p8), %1454, %v1126_v7   ;;  %1043 = vmatprep.subr.bf16.mxu1 (!%p531_p8), %v1455_v8  ;;  %v1460_v13 = vld [vmem:[%s1813_s15 + $0x100] ss:$8 sps:$4 sm:$0xff] (!%p531_p8)   ;;  %v1463_v16 = vld [vmem:[%s1813_s15 + $0x114] ss:$8 sps:$4 sm:$0xff] (!%p531_p8)  }
  0x5a   : > { %1084 = vmatprep.subr.bf16.mxu0 (!%p531_p8), %v1457_v9  ;;  %1044 = vmatpush1.bf16.msra.mxu1 (!%p531_p8), %v1459_v12  ;;  %v1465_v17 = vld [vmem:[%s1813_s15 + $0x10] ss:$8 sps:$4 sm:$0xff] (!%p531_p8)   ;;  %v1467_v20 = vld [vmem:[%s1813_s15 + $0x24] ss:$8 sps:$4 sm:$0xff] (!%p531_p8)   ;;  %v1471_v22 = vld [vmem:[%s1813_s15 + $0x20] ss:$8 sps:$4 sm:$0xff] (!%p531_p8)  }
  0x5b   : > { %v1823_v15 = vsub.s32 (!%p531_p8), %v705_v11, %v1811_v4  ;;  %1085 = vmatpush1.bf16.msra.mxu0 (!%p531_p8), %v1460_v13  ;;  %1045 = vmatprep.subr.bf16.mxu1 (!%p531_p8), %v1461_v14  ;;  %v1466_v18 = vld [vmem:[%s1813_s15 + $0x110] ss:$8 sps:$4 sm:$0xff] (!%p531_p8)   ;;  %v1469_v21 = vld [vmem:[%s1813_s15 + $0x124] ss:$8 sps:$4 sm:$0xff] (!%p531_p8)   ;;  %v1472_v23 = vld [vmem:[%s1813_s15 + $0x120] ss:$8 sps:$4 sm:$0xff] (!%p531_p8)  }
  0x5c   : > { %1086 = vmatprep.subr.bf16.mxu0 (!%p531_p8), %v1463_v16  ;;  %v1473_v25 = vld [vmem:[%s1813_s15 + $0x34] ss:$8 sps:$4 sm:$0xff] (!%p531_p8)   ;;  %v1477_v27 = vld [vmem:[%s1813_s15 + $0x30] ss:$8 sps:$4 sm:$0xff] (!%p531_p8)   ;;  %v1479_v29 = vld [vmem:[%s1813_s15 + $0x44] ss:$8 sps:$4 sm:$0xff] (!%p531_p8)  }
  0x5d   : > { %v716_v19 = vrot.slane %v702_v10, %v1823_v15  ;;  %v1475_v26 = vld [vmem:[%s1813_s15 + $0x134] ss:$8 sps:$4 sm:$0xff]   ;;  %v1478_v28 = vld [vmem:[%s1813_s15 + $0x130] ss:$8 sps:$4 sm:$0xff]   ;;  %v1481_v30 = vld [vmem:[%s1813_s15 + $0x144] ss:$8 sps:$4 sm:$0xff]   ;;  %v709_v13 = vrot.slane %v1806_v0, %v1823_v15 }
  0x5e   : > { %1046 = vmatpush1.bf16.msra.mxu1 %v1465_v17  ;;  %v1483_v31 = vld [vmem:[%s1813_s15 + $0x40] ss:$8 sps:$4 sm:$0xff]   ;;  %v1485_v33 = vld [vmem:[%s1813_s15 + $0x54] ss:$8 sps:$4 sm:$0xff]   ;;  %v1489_v35 = vld [vmem:[%s1813_s15 + $0x50] ss:$8 sps:$4 sm:$0xff]  }
  0x5f   : > { %1075 = vmatprep.mubr.bf16.mxu1 %v716_v19  ;;  %v718_v24 = vcombine.high %v716_v19, %v716_v19  ;;  %1087 = vmatpush1.bf16.msra.mxu0 %v1466_v18  ;;  %v1484_v32 = vld [vmem:[%s1813_s15 + $0x140] ss:$8 sps:$4 sm:$0xff]   ;;  %v1487_v34 = vld [vmem:[%s1813_s15 + $0x154] ss:$8 sps:$4 sm:$0xff]   ;;  %v1490_v36 = vld [vmem:[%s1813_s15 + $0x150] ss:$8 sps:$4 sm:$0xff]   ;;  %v717_v17 = vcombine.high %v709_v13, %v709_v13 }
  0x60   : > { %1047 = vmatprep.subr.bf16.mxu1 %v1467_v20  ;;  %1088 = vmatprep.subr.bf16.mxu0 %v1469_v21  ;;  %v1491_v37 = vld [vmem:[%s1813_s15 + $0x64] ss:$8 sps:$4 sm:$0xff]   ;;  %v1495_v39 = vld [vmem:[%s1813_s15 + $0x60] ss:$8 sps:$4 sm:$0xff]   ;;  %v1497_v41 = vld [vmem:[%s1813_s15 + $0x74] ss:$8 sps:$4 sm:$0xff]  }
  0x61   : > { %1116 = vmatprep.mubr.bf16.mxu0 %v718_v24  ;;  %v1493_v38 = vld [vmem:[%s1813_s15 + $0x164] ss:$8 sps:$4 sm:$0xff]   ;;  %v1496_v40 = vld [vmem:[%s1813_s15 + $0x160] ss:$8 sps:$4 sm:$0xff]   ;;  %v1499_v42 = vld [vmem:[%s1813_s15 + $0x174] ss:$8 sps:$4 sm:$0xff]  }
  0x62   : > { %1048 = vmatpush1.bf16.msra.mxu1 %v1471_v22  ;;  %v1501_v43 = vld [vmem:[%s1813_s15 + $0x70] ss:$8 sps:$4 sm:$0xff]   ;;  %v1503_v45 = vld [vmem:[%s1813_s15 + $0x84] ss:$8 sps:$4 sm:$0xff]   ;;  %v1507_v47 = vld [vmem:[%s1813_s15 + $0x80] ss:$8 sps:$4 sm:$0xff]  }
  0x63   : > { %1089 = vmatpush1.bf16.msra.mxu0 %v1472_v23  ;;  %1049 = vmatprep.subr.bf16.mxu1 %v1473_v25  ;;  %v1502_v44 = vld [vmem:[%s1813_s15 + $0x170] ss:$8 sps:$4 sm:$0xff]   ;;  %v1505_v46 = vld [vmem:[%s1813_s15 + $0x184] ss:$8 sps:$4 sm:$0xff]   ;;  %v1508_v48 = vld [vmem:[%s1813_s15 + $0x180] ss:$8 sps:$4 sm:$0xff]  }
  0x64   : > { %1090 = vmatprep.subr.bf16.mxu0 %v1475_v26  ;;  %v1509_v49 = vld [vmem:[%s1813_s15 + $0x94] ss:$8 sps:$4 sm:$0xff]   ;;  %v1513_v51 = vld [vmem:[%s1813_s15 + $0x90] ss:$8 sps:$4 sm:$0xff]   ;;  %v1515_v53 = vld [vmem:[%s1813_s15 + $0xa4] ss:$8 sps:$4 sm:$0xff]  }
  0x65   : > { %v1511_v50 = vld [vmem:[%s1813_s15 + $0x194] ss:$8 sps:$4 sm:$0xff]   ;;  %v1514_v52 = vld [vmem:[%s1813_s15 + $0x190] ss:$8 sps:$4 sm:$0xff]   ;;  %v1517_v54 = vld [vmem:[%s1813_s15 + $0x1a4] ss:$8 sps:$4 sm:$0xff]  }
  0x66   : > { %1050 = vmatpush1.bf16.msra.mxu1 %v1477_v27  ;;  %v1519_v55 = vld [vmem:[%s1813_s15 + $0xa0] ss:$8 sps:$4 sm:$0xff]   ;;  %v1521_v57 = vld [vmem:[%s1813_s15 + $0xb4] ss:$8 sps:$4 sm:$0xff]   ;;  %v1525_v59 = vld [vmem:[%s1813_s15 + $0xb0] ss:$8 sps:$4 sm:$0xff]  }
  0x67   : > { %1091 = vmatpush1.bf16.msra.mxu0 %v1478_v28  ;;  %1051 = vmatprep.subr.bf16.mxu1 %v1479_v29  ;;  %v1520_v56 = vld [vmem:[%s1813_s15 + $0x1a0] ss:$8 sps:$4 sm:$0xff]   ;;  %v1523_v58 = vld [vmem:[%s1813_s15 + $0x1b4] ss:$8 sps:$4 sm:$0xff]   ;;  %v1526_v60 = vld [vmem:[%s1813_s15 + $0x1b0] ss:$8 sps:$4 sm:$0xff]  }
  0x68   : > { %1092 = vmatprep.subr.bf16.mxu0 %v1481_v30  ;;  %v1527_v61 = vld [vmem:[%s1813_s15 + $0xc4] ss:$8 sps:$4 sm:$0xff]   ;;  %v1531_v63 = vld [vmem:[%s1813_s15 + $0xc0] ss:$8 sps:$4 sm:$0xff]   ;;  %v1533_v2 = vld [vmem:[%s1813_s15 + $0xd4] ss:$8 sps:$4 sm:$0xff]  }
  0x69   : > { %v1529_v62 = vld [vmem:[%s1813_s15 + $0x1c4] ss:$8 sps:$4 sm:$0xff]   ;;  %v1532_v1 = vld [vmem:[%s1813_s15 + $0x1c0] ss:$8 sps:$4 sm:$0xff]   ;;  %v1535_v3 = vld [vmem:[%s1813_s15 + $0x1d4] ss:$8 sps:$4 sm:$0xff]  }
  0x6a   : > { %1052 = vmatpush1.bf16.msra.mxu1 %v1483_v31  ;;  %v1537_v5 = vld [vmem:[%s1813_s15 + $0xd0] ss:$8 sps:$4 sm:$0xff]   ;;  %v1539_v7 = vld [vmem:[%s1813_s15 + $0xe4] ss:$8 sps:$4 sm:$0xff]   ;;  %v1543_v9 = vld [vmem:[%s1813_s15 + $0xe0] ss:$8 sps:$4 sm:$0xff]  }
  0x6b   : > { %1093 = vmatpush1.bf16.msra.mxu0 %v1484_v32  ;;  %1053 = vmatprep.subr.bf16.mxu1 %v1485_v33  ;;  %v1538_v6 = vld [vmem:[%s1813_s15 + $0x1d0] ss:$8 sps:$4 sm:$0xff]   ;;  %v1541_v8 = vld [vmem:[%s1813_s15 + $0x1e4] ss:$8 sps:$4 sm:$0xff]   ;;  %v1544_v10 = vld [vmem:[%s1813_s15 + $0x1e0] ss:$8 sps:$4 sm:$0xff]  }
  0x6c   : > { %1094 = vmatprep.subr.bf16.mxu0 %v1487_v34  ;;  %v1545_v11 = vld [vmem:[%s1813_s15 + $0xf4] ss:$8 sps:$4 sm:$0xff]   ;;  %v1549_v14 = vld [vmem:[%s1813_s15 + $0xf0] ss:$8 sps:$4 sm:$0xff]   ;;  %v1593_v18 = vmov 269488144  }
  0x6d   : > { %v1547_v12 = vld [vmem:[%s1813_s15 + $0x1f4] ss:$8 sps:$4 sm:$0xff]   ;;  %v1550_v16 = vld [vmem:[%s1813_s15 + $0x1f0] ss:$8 sps:$4 sm:$0xff]   ;;  %v1133_v19 = vunpack.c.l.s4 %v1593_v18  ;;  %p592_p9 = scmp.lt.s32.totalorder %s1333_s16, 15  ;;  %v686_v25 = vsub.s32 0, %v1811_v4 }
  0x6e   : > { %1054 = vmatpush1.bf16.msra.mxu1 %v1489_v35  ;;  %v1594_v21 = vmov 1983009808   ;;  %v690_v30 = vsub.s32 1, %v1811_v4 }
  0x6f   : > { %1095 = vmatpush1.bf16.msra.mxu0 %v1490_v36  ;;  %1055 = vmatprep.subr.bf16.mxu1 %v1491_v37  ;;  %v1134_v20 = vunpack.c.0.s8 %v1133_v19  ;;  %v1141_v22 = vunpack.c.l.s4 %v1594_v21  ;;  %s1935_s16 = smov (!%p592_p9, %s1333_s16), 15 }
  0x70   : > { %1096 = vmatprep.subr.bf16.mxu0 %v1493_v38  ;;  %s606_s24 = scalar_lea.vmem %s1926_s4, %s1935_s16  ;;  %s594_s27 = scalar_lea.vmem %s1924_s2, %s1935_s16 }
  0x71   : > { %v1142_v0 = vunpack.c.0.s8 %v1141_v22  ;;  %v1137_v23 = vsub.s32 %v1134_v20, %v1811_v4  ;;  %v1152_v26 = vld [vmem:[%s606_s24] sm:$0x3]  ;;  %s615_s30 = scalar_lea.vmem %s1927_s5, %s1935_s16 }
  0x72   : > { %1056 = vmatpush1.bf16.msra.mxu1 %v1495_v39  ;;  %v682_v29 = vld [vmem:[%s594_s27] sm:$0x3]  ;;  %v1153_v31 = vunpack.c.l.bf16 %v1152_v26 }
  0x73   : > { %1097 = vmatpush1.bf16.msra.mxu0 %v1496_v40  ;;  %1057 = vmatprep.subr.bf16.mxu1 %v1497_v41  ;;  %v1145_v28 = vsub.s32 %v1142_v0, %v1811_v4  ;;  %v687_v32 = vrot.slane %v682_v29, %v686_v25  ;;  %v691_v34 = vrot.slane %v682_v29, %v690_v30 }
  0x74   : > { %1098 = vmatprep.subr.bf16.mxu0 %v1499_v42 }
  0x75   : > { %v1161_v37 = vrot.slane %v1153_v31, %v1145_v28 }
  0x76   : > { %1058 = vmatpush1.bf16.msra.mxu1 %v1501_v43 }
  0x77   : > { %1099 = vmatpush1.bf16.msra.mxu0 %v1502_v44  ;;  %1059 = vmatprep.subr.bf16.mxu1 %v1503_v45  ;;  %v1162_v4 = vcombine.high %v1161_v37, %v1161_v37 }
  0x78   : > { %1100 = vmatprep.subr.bf16.mxu0 %v1505_v46 }
  0x7a   : > { %1060 = vmatpush1.bf16.msra.mxu1 %v1507_v47 }
  0x7b   : > { %1101 = vmatpush1.bf16.msra.mxu0 %v1508_v48  ;;  %1061 = vmatprep.subr.bf16.mxu1 %v1509_v49 }
  0x7c   : > { %1102 = vmatprep.subr.bf16.mxu0 %v1511_v50 }
  0x7e   : > { %1062 = vmatpush1.bf16.msra.mxu1 %v1513_v51 }
  0x7f   : > { %1103 = vmatpush1.bf16.msra.mxu0 %v1514_v52  ;;  %1063 = vmatprep.subr.bf16.mxu1 %v1515_v53 }
  0x80   : > { %1104 = vmatprep.subr.bf16.mxu0 %v1517_v54 }
  0x82   : > { %1064 = vmatpush1.bf16.msra.mxu1 %v1519_v55 }
  0x83   : > { %1105 = vmatpush1.bf16.msra.mxu0 %v1520_v56  ;;  %1065 = vmatprep.subr.bf16.mxu1 %v1521_v57 }
  0x84   : > { %1106 = vmatprep.subr.bf16.mxu0 %v1523_v58 }
  0x86   : > { %1066 = vmatpush1.bf16.msra.mxu1 %v1525_v59 }
  0x87   : > { %1107 = vmatpush1.bf16.msra.mxu0 %v1526_v60  ;;  %1067 = vmatprep.subr.bf16.mxu1 %v1527_v61 }
  0x88   : > { %1108 = vmatprep.subr.bf16.mxu0 %v1529_v62 }
  0x8a   : > { %1068 = vmatpush1.bf16.msra.mxu1 %v1531_v63 }
  0x8b   : > { %1109 = vmatpush1.bf16.msra.mxu0 %v1532_v1  ;;  %1069 = vmatprep.subr.bf16.mxu1 %v1533_v2 }
  0x8c   : > { %1110 = vmatprep.subr.bf16.mxu0 %v1535_v3 }
  0x8e   : > { %1070 = vmatpush1.bf16.msra.mxu1 %v1537_v5 }
  0x8f   : > { %1111 = vmatpush1.bf16.msra.mxu0 %v1538_v6  ;;  %1071 = vmatprep.subr.bf16.mxu1 %v1539_v7 }
  0x90   : > { %1112 = vmatprep.subr.bf16.mxu0 %v1541_v8 }
  0x92   : > { %1072 = vmatpush1.bf16.msra.mxu1 %v1543_v9 }
  0x93   : > { %1113 = vmatpush1.bf16.msra.mxu0 %v1544_v10  ;;  %1073 = vmatprep.subr.bf16.mxu1 %v1545_v11 }
  0x94   : > { %1114 = vmatprep.subr.bf16.mxu0 %v1547_v12 }
  0x96   : > { %1074 = vmatpush1.bf16.msra.mxu1 %v1549_v14 }
  0x97   : > { %1115 = vmatpush1.bf16.msra.mxu0 %v1550_v16 }
  0x99   : > { %1076 = vmatmul.mubr.bf16.vlgmr.msra.gmra.mrb[0].mxu1 %v709_v13 }
  0x9a   : > { %1117 = vmatmul.mubr.bf16.vlgmr.msra.gmra.mrb[0].mxu0 %v717_v17 }
  0xd8   : > { %v1130_v24 = vpop.permute.xlu0 %1129 }
  0xd9   : > { %v1138_v27 = vrot.slane %v1130_v24, %v1137_v23 }
  0xdb   : > { %v1146_v33 = vrot.slane %v1138_v27, %v1145_v28 }
  0xdd   : > { %v1147_v42 = vcombine.high %v1146_v33, %v1146_v33 }
 0x16c   : > { %v1077_v35 = vpop.f32.mrb[0].mxu1 }
 0x16d   : > { %v1118_v36 = vpop.f32.mrb[0].mxu0  ;;  %v1078_v38 = vadd.f32 %v1077_v35, %v687_v32  ;;  %v1079_v39 = vpop.f32.mrb[1].mxu1 }
 0x16e   : > { %v1120_v40 = vpop.f32.mrb[1].mxu0  ;;  %v1080_v41 = vadd.f32 %v1079_v39, %v691_v34  ;;  %v1081_v43 = vpop.f32.mrb[2].mxu1 }
 0x16f   : > { %v1122_v44 = vpop.f32.mrb[2].mxu0  ;;  %v1119_v45 = vadd.f32 %v1118_v36, %v1078_v38  ;;  %v1082_v46 = vpop.f32.mrb[3].mxu1 }
 0x170   : > { %v1123_v47 = vpop.f32.mrb[3].mxu0  ;;  %v1121_v48 = vadd.f32 %v1120_v40, %v1080_v41 }
 0x171   : > { %v1150_v49 = vmul.f32 %v1146_v33, %v1119_v45 }
 0x172   : > { %v1151_v50 = vmul.f32 %v1147_v42, %v1121_v48 }
 0x173   : > { %v1165_v51 = vadd.f32 %v1161_v37, %v1150_v49 }
 0x174   : > { %v1166_v52 = vadd.f32 %v1162_v4, %v1151_v50 }
 0x175   : > { %v1167_v53 = vmax.f32 %v1165_v51, 0.0 }
 0x176   : > { %v1168_v54 = vmax.f32 %v1166_v52, 0.0 }
 0x178   : > { %v1401_v55 = vpack.c.bf16 %v1168_v54, %v1167_v53 }
 0x17a   : > { %v1180_v56 = vrot.slane %v1401_v55, %v1823_v15 }
 0x17c   : > { %1402 = vst.sshfl [vmem:[%s615_s30] sm:$0x5 pattern:$0x73625140] %v1180_v56 }
 0x17d PF: > { %s15_s22 = sadd.s32 1, %s1589_s22   ;;  %s1928_s18 = smov %s1577_s19 }
 0x17e   : > { %p12_p10 = scmp.ge.s32.totalorder %s15_s22, 10   ;;  %s1929_s19 = smov %s1660_s26 }
 0x17f   : > { %s1930_s20 = smov %s1585_s21  ;;  %s1931_s21 = smov %s1933_s23 }
 0x180   :  { %14 = sbr.rel (!%p12_p10) target bundleno = 3 (0x3), region = 125 }

// kernel: _lambda_.31
= control target key start
LH: loop header
LB: loop body
LE: loop exit
PB: predicated region body
PF: predicated region fallthrough
CT: control target
= control target key end

     0   :  { %v287_v28 = vlaneseq  ;;  %v1962_v36 = vmov 1966171168   ;;  %s2413_s0 = inlined_call_operand.vmem [shape: bf16[2,2048], index: 0, kind: input, shape index: {}]   ;;  %s2414_s1 = inlined_call_operand.vmem [shape: bf16[2048,10], index: 1, kind: input, shape index: {}]   ;;  %s2415_s2 = inlined_call_operand.vmem [shape: f32[1,10], index: 2, kind: input, shape index: {}]   ;;  %s2416_s3 = inlined_call_operand.hbm [shape: f32[2,10], index: 3, kind: output, shape index: {}]  }
   0x1   :  { %v1808_v0 = vld [vmem:[%s2414_s1 + $0x40] sm:$0xff]   ;;  %v1812_v4 = vld [vmem:[%s2414_s1 + $0x48] sm:$0xff]   ;;  %v1816_v8 = vld [vmem:[%s2414_s1 + $0x50] sm:$0xff]   ;;  %v285_v37 = vunpack.c.l.s4 %v1962_v36 }
   0x2   :  { %v1809_v1 = vld [vmem:[%s2414_s1 + $0xc0] sm:$0xff]   ;;  %1630 = vmatprep.subr.bf16.mxu0 %v1808_v0  ;;  %v1813_v5 = vld [vmem:[%s2414_s1 + $0xc8] sm:$0xff]   ;;  %v1817_v9 = vld [vmem:[%s2414_s1 + $0xd0] sm:$0xff]   ;;  %v288_v33 = vshrl.u32 %v287_v28, 7 }
   0x3   :  { %v1810_v2 = vld [vmem:[%s2414_s1] sm:$0xff]   ;;  %1652 = vmatprep.subr.bf16.mxu1 %v1809_v1  ;;  %v1814_v6 = vld [vmem:[%s2414_s1 + $0x8] sm:$0xff]   ;;  %v1818_v10 = vld [vmem:[%s2414_s1 + $0x10] sm:$0xff]   ;;  %v286_v40 = vunpack.c.0.s8 %v285_v37 }
   0x4   :  { %v1811_v3 = vld [vmem:[%s2414_s1 + $0x80] sm:$0xff]   ;;  %1631 = vmatpush3.bf16.msra.mxu0 %v1810_v2  ;;  %v1815_v7 = vld [vmem:[%s2414_s1 + $0x88] sm:$0xff]   ;;  %v1819_v11 = vld [vmem:[%s2414_s1 + $0x90] sm:$0xff]  }
   0x5   :  { %1653 = vmatpush3.bf16.msra.mxu1 %v1811_v3  ;;  %1632 = vmatprep.subr.bf16.mxu0 %v1812_v4  ;;  %v1820_v12 = vld [vmem:[%s2414_s1 + $0x58] sm:$0xff]   ;;  %v1824_v16 = vld [vmem:[%s2414_s1 + $0x60] sm:$0xff]   ;;  %v1828_v20 = vld [vmem:[%s2414_s1 + $0x68] sm:$0xff]   ;;  %v2089_v41 = vsub.s32 %v286_v40, %v288_v33 }
   0x6   :  { %1654 = vmatprep.subr.bf16.mxu1 %v1813_v5  ;;  %v1821_v13 = vld [vmem:[%s2414_s1 + $0xd8] sm:$0xff]   ;;  %v1825_v17 = vld [vmem:[%s2414_s1 + $0xe0] sm:$0xff]   ;;  %v1829_v21 = vld [vmem:[%s2414_s1 + $0xe8] sm:$0xff]  }
   0x7   :  { %v1822_v14 = vld [vmem:[%s2414_s1 + $0x18] sm:$0xff]   ;;  %v1826_v18 = vld [vmem:[%s2414_s1 + $0x20] sm:$0xff]   ;;  %v1830_v22 = vld [vmem:[%s2414_s1 + $0x28] sm:$0xff]  }
   0x8   :  { %1633 = vmatpush3.bf16.msra.mxu0 %v1814_v6  ;;  %v1823_v15 = vld [vmem:[%s2414_s1 + $0x98] sm:$0xff]   ;;  %v1827_v19 = vld [vmem:[%s2414_s1 + $0xa0] sm:$0xff]   ;;  %v1831_v23 = vld [vmem:[%s2414_s1 + $0xa8] sm:$0xff]  }
   0x9   :  { %1655 = vmatpush3.bf16.msra.mxu1 %v1815_v7  ;;  %1634 = vmatprep.subr.bf16.mxu0 %v1816_v8  ;;  %v1832_v24 = vld [vmem:[%s2414_s1 + $0x70] sm:$0xff]   ;;  %v1836_v29 = vld [vmem:[%s2414_s1 + $0x78] sm:$0xff]   ;;  %v16_v34 = vld [vmem:[%s2413_s0] sm:$0xff] }
   0xa   :  { %1656 = vmatprep.subr.bf16.mxu1 %v1817_v9  ;;  %v1833_v25 = vld [vmem:[%s2414_s1 + $0xf0] sm:$0xff]   ;;  %v1837_v30 = vld [vmem:[%s2414_s1 + $0xf8] sm:$0xff]   ;;  %v1841_v35 = vld [vmem:[%s2414_s1 + $0x140] sm:$0xff]   ;;  %v283_v39 = vcombine.high %v16_v34, %v16_v34  ;;  %v290_v42 = vrot.slane %v16_v34, %v2089_v41 }
   0xb   :  { %v1834_v26 = vld [vmem:[%s2414_s1 + $0x30] sm:$0xff]   ;;  %v1838_v31 = vld [vmem:[%s2414_s1 + $0x38] sm:$0xff]   ;;  %v1842_v38 = vld [vmem:[%s2414_s1 + $0x1c0] sm:$0xff]  }
   0xc   :  { %1635 = vmatpush3.bf16.msra.mxu0 %v1818_v10  ;;  %v1835_v27 = vld [vmem:[%s2414_s1 + $0xb0] sm:$0xff]   ;;  %v1839_v32 = vld [vmem:[%s2414_s1 + $0xb8] sm:$0xff]   ;;  %v2093_v43 = vrot.slane %v283_v39, %v2089_v41  ;;  %v298_v44 = vcombine.high %v290_v42, %v290_v42  ;;  %v306_v45 = vrot.slane %v290_v42, %v2089_v41  ;;  %v1843_v48 = vld [vmem:[%s2414_s1 + $0x100] sm:$0xff]  }
   0xd   :  { %1657 = vmatpush3.bf16.msra.mxu1 %v1819_v11  ;;  %1636 = vmatprep.subr.bf16.mxu0 %v1820_v12  ;;  %v1845_v51 = vld [vmem:[%s2414_s1 + $0x148] sm:$0xff]   ;;  %v1844_v53 = vld [vmem:[%s2414_s1 + $0x180] sm:$0xff]   ;;  %v1849_v57 = vld [vmem:[%s2414_s1 + $0x150] sm:$0xff]  }
   0xe   :  { %1658 = vmatprep.subr.bf16.mxu1 %v1821_v13  ;;  %v299_v46 = vcombine.high %v2093_v43, %v2093_v43  ;;  %v320_v47 = vrot.slane %v298_v44, %v2089_v41  ;;  %v328_v50 = vcombine.high %v306_v45, %v306_v45  ;;  %v1846_v54 = vld [vmem:[%s2414_s1 + $0x1c8] sm:$0xff]   ;;  %v1850_v59 = vld [vmem:[%s2414_s1 + $0x1d0] sm:$0xff]   ;;  %v1853_v61 = vld [vmem:[%s2414_s1 + $0x158] sm:$0xff]  }
   0xf   :  { %v1847_v56 = vld [vmem:[%s2414_s1 + $0x108] sm:$0xff]   ;;  %v1851_v60 = vld [vmem:[%s2414_s1 + $0x110] sm:$0xff]   ;;  %v1854_v63 = vld [vmem:[%s2414_s1 + $0x1d8] sm:$0xff]  }
  0x10   :  { %1637 = vmatpush3.bf16.msra.mxu0 %v1822_v14  ;;  %v327_v49 = vrot.slane %v299_v46, %v2089_v41  ;;  %1197 = vmatprep.mubr.bf16.mxu0 %v320_v47  ;;  %v330_v52 = vcombine.high %v320_v47, %v320_v47  ;;  %v1848_v58 = vld [vmem:[%s2414_s1 + $0x188] sm:$0xff]   ;;  %v1852_v62 = vld [vmem:[%s2414_s1 + $0x190] sm:$0xff]   ;;  %v1855_v0 = vld [vmem:[%s2414_s1 + $0x118] sm:$0xff]  }
  0x11   :  { %1659 = vmatpush3.bf16.msra.mxu1 %v1823_v15  ;;  %1638 = vmatprep.subr.bf16.mxu0 %v1824_v16  ;;  %v1857_v1 = vld [vmem:[%s2414_s1 + $0x160] sm:$0xff]   ;;  %v1856_v2 = vld [vmem:[%s2414_s1 + $0x198] sm:$0xff]   ;;  %v1861_v5 = vld [vmem:[%s2414_s1 + $0x168] sm:$0xff]  }
  0x12   :  { %1660 = vmatprep.subr.bf16.mxu1 %v1825_v17  ;;  %v331_v55 = vcombine.high %v327_v49, %v327_v49  ;;  %1237 = vmatprep.mubr.bf16.mxu1 %v330_v52  ;;  %v1858_v3 = vld [vmem:[%s2414_s1 + $0x1e0] sm:$0xff]   ;;  %v1862_v7 = vld [vmem:[%s2414_s1 + $0x1e8] sm:$0xff]   ;;  %v1865_v9 = vld [vmem:[%s2414_s1 + $0x170] sm:$0xff]   ;;  %v313_v17 = vrot.slane %v2093_v43, %v2089_v41 }
  0x13   :  { %v1859_v4 = vld [vmem:[%s2414_s1 + $0x120] sm:$0xff]   ;;  %v1863_v8 = vld [vmem:[%s2414_s1 + $0x128] sm:$0xff]   ;;  %v1866_v11 = vld [vmem:[%s2414_s1 + $0x1f0] sm:$0xff]  }
  0x14   :  { %1639 = vmatpush3.bf16.msra.mxu0 %v1826_v18  ;;  %v1860_v6 = vld [vmem:[%s2414_s1 + $0x1a0] sm:$0xff]   ;;  %v1864_v10 = vld [vmem:[%s2414_s1 + $0x1a8] sm:$0xff]   ;;  %v1867_v12 = vld [vmem:[%s2414_s1 + $0x130] sm:$0xff]  }
  0x15   :  { %1661 = vmatpush3.bf16.msra.mxu1 %v1827_v19  ;;  %1640 = vmatprep.subr.bf16.mxu0 %v1828_v20  ;;  %v1869_v13 = vld [vmem:[%s2414_s1 + $0x178] sm:$0xff]   ;;  %v1868_v14 = vld [vmem:[%s2414_s1 + $0x1b0] sm:$0xff]   ;;  %v1873_v18 = vld [vmem:[%s2414_s1 + $0x240] sm:$0xff]  }
  0x16   :  { %1662 = vmatprep.subr.bf16.mxu1 %v1829_v21  ;;  %v1870_v15 = vld [vmem:[%s2414_s1 + $0x1f8] sm:$0xff]   ;;  %v1874_v20 = vld [vmem:[%s2414_s1 + $0x2c0] sm:$0xff]   ;;  %v1880_v28 = vld [vmem:[%s2414_s1 + $0x288] sm:$0xff]  }
  0x17   :  { %v1871_v16 = vld [vmem:[%s2414_s1 + $0x138] sm:$0xff]   ;;  %v1875_v21 = vld [vmem:[%s2414_s1 + $0x200] sm:$0xff]   ;;  %v1893_v39 = vld [vmem:[%s2414_s1 + $0x268] sm:$0xff]  }
  0x18   :  { %1641 = vmatpush3.bf16.msra.mxu0 %v1830_v22  ;;  %v1872_v19 = vld [vmem:[%s2414_s1 + $0x1b8] sm:$0xff]   ;;  %v329_v22 = vcombine.high %v313_v17, %v313_v17  ;;  %v1890_v37 = vld [vmem:[%s2414_s1 + $0x2e0] sm:$0xff]   ;;  %v1894_v42 = vld [vmem:[%s2414_s1 + $0x2e8] sm:$0xff]  }
  0x19   :  { %1663 = vmatpush3.bf16.msra.mxu1 %v1831_v23  ;;  %1642 = vmatprep.subr.bf16.mxu0 %v1832_v24  ;;  %v1877_v23 = vld [vmem:[%s2414_s1 + $0x248] sm:$0xff]   ;;  %v1876_v24 = vld [vmem:[%s2414_s1 + $0x280] sm:$0xff]   ;;  %v1886_v33 = vld [vmem:[%s2414_s1 + $0x2d8] sm:$0xff]  }
  0x1a   :  { %1664 = vmatprep.subr.bf16.mxu1 %v1833_v25  ;;  %v1878_v25 = vld [vmem:[%s2414_s1 + $0x2c8] sm:$0xff]   ;;  %v1887_v34 = vld [vmem:[%s2414_s1 + $0x218] sm:$0xff]   ;;  %v1892_v40 = vld [vmem:[%s2414_s1 + $0x2a0] sm:$0xff]  }
  0x1b   :  { %v1888_v36 = vld [vmem:[%s2414_s1 + $0x298] sm:$0xff]   ;;  %v1895_v43 = vld [vmem:[%s2414_s1 + $0x228] sm:$0xff]   ;;  %v1897_v44 = vld [vmem:[%s2414_s1 + $0x270] sm:$0xff]  }
  0x1c   :  { %1643 = vmatpush3.bf16.msra.mxu0 %v1834_v26  ;;  %v1879_v26 = vld [vmem:[%s2414_s1 + $0x208] sm:$0xff]  }
  0x1d   :  { %1665 = vmatpush3.bf16.msra.mxu1 %v1835_v27  ;;  %1644 = vmatprep.subr.bf16.mxu0 %v1836_v29  ;;  %v1881_v27 = vld [vmem:[%s2414_s1 + $0x250] sm:$0xff]   ;;  %v1896_v46 = vld [vmem:[%s2414_s1 + $0x2a8] sm:$0xff]  }
  0x1e   :  { %1666 = vmatprep.subr.bf16.mxu1 %v1837_v30  ;;  %v1882_v29 = vld [vmem:[%s2414_s1 + $0x2d0] sm:$0xff]  }
  0x1f   :  { %v1883_v30 = vld [vmem:[%s2414_s1 + $0x210] sm:$0xff]  }
  0x20   :  { %1645 = vmatpush3.bf16.msra.mxu0 %v1838_v31  ;;  %v1885_v31 = vld [vmem:[%s2414_s1 + $0x258] sm:$0xff]  }
  0x21   :  { %1667 = vmatpush3.bf16.msra.mxu1 %v1839_v32  ;;  %1674 = vmatprep.subr.bf16.mxu0 %v1841_v35  ;;  %v1884_v32 = vld [vmem:[%s2414_s1 + $0x290] sm:$0xff]   ;;  %v1889_v35 = vld [vmem:[%s2414_s1 + $0x260] sm:$0xff]  }
  0x22   :  { %1696 = vmatprep.subr.bf16.mxu1 %v1842_v38  ;;  %v1891_v38 = vld [vmem:[%s2414_s1 + $0x220] sm:$0xff]  }
  0x23   :  { %1198 = vmatmul.mubr.bf16.vlgmr.msra.gmra.mrb[0].mxu0 %v306_v45  ;;  %v17_v45 = vld [vmem:[%s2413_s0 + $0x8] sm:$0xff] }
  0x24   :  { %1675 = vmatpush3.bf16.msra.mxu0 %v1843_v48  ;;  %1238 = vmatmul.mubr.bf16.vlgmr.msra.gmra.mrb[0].mxu1 %v328_v50  ;;  %v339_v47 = vrot.slane %v17_v45, %v2089_v41  ;;  %v332_v48 = vcombine.high %v17_v45, %v17_v45  ;;  %v1899_v50 = vld [vmem:[%s2414_s1 + $0x230] sm:$0xff]  }
  0x25   :  { %1676 = vmatprep.subr.bf16.mxu0 %v1845_v51  ;;  %1697 = vmatpush3.bf16.msra.mxu1 %v1844_v53  ;;  %v1901_v53 = vld [vmem:[%s2414_s1 + $0x278] sm:$0xff]  }
  0x26   :  { %1277 = vmatprep.mubr.bf16.mxu0 %v327_v49  ;;  %1698 = vmatprep.subr.bf16.mxu1 %v1846_v54  ;;  %v1898_v49 = vld [vmem:[%s2414_s1 + $0x2f0] sm:$0xff]   ;;  %v347_v51 = vcombine.high %v339_v47, %v339_v47  ;;  %v2278_v52 = vrot.slane %v332_v48, %v2089_v41 }
  0x27   :  { %1317 = vmatprep.mubr.bf16.mxu1 %v331_v55  ;;  %v1900_v54 = vld [vmem:[%s2414_s1 + $0x2b0] sm:$0xff]  }
  0x28   :  { %1677 = vmatpush3.bf16.msra.mxu0 %v1847_v56  ;;  %v369_v55 = vrot.slane %v347_v51, %v2089_v41  ;;  %v348_v56 = vcombine.high %v2278_v52, %v2278_v52 }
  0x29   :  { %1678 = vmatprep.subr.bf16.mxu0 %v1849_v57  ;;  %1699 = vmatpush3.bf16.msra.mxu1 %v1848_v58  ;;  %v1902_v57 = vld [vmem:[%s2414_s1 + $0x2f8] sm:$0xff]  }
  0x2a   :  { %1700 = vmatprep.subr.bf16.mxu1 %v1850_v59  ;;  %v1903_v58 = vld [vmem:[%s2414_s1 + $0x238] sm:$0xff]   ;;  %v379_v59 = vcombine.high %v369_v55, %v369_v55 }
  0x2c   :  { %1679 = vmatpush3.bf16.msra.mxu0 %v1851_v60  ;;  %v355_v60 = vrot.slane %v339_v47, %v2089_v41 }
  0x2d   :  { %1680 = vmatprep.subr.bf16.mxu0 %v1853_v61  ;;  %1701 = vmatpush3.bf16.msra.mxu1 %v1852_v62  ;;  %v1905_v61 = vld [vmem:[%s2414_s1 + $0x340] sm:$0xff]   ;;  %v1904_v62 = vld [vmem:[%s2414_s1 + $0x2b8] sm:$0xff]  }
  0x2e   :  { %1702 = vmatprep.subr.bf16.mxu1 %v1854_v63  ;;  %v376_v63 = vrot.slane %v348_v56, %v2089_v41 }
  0x30   :  { %1681 = vmatpush3.bf16.msra.mxu0 %v1855_v0  ;;  %v1906_v0 = vld [vmem:[%s2414_s1 + $0x3c0] sm:$0xff]  }
  0x31   :  { %1682 = vmatprep.subr.bf16.mxu0 %v1857_v1  ;;  %1703 = vmatpush3.bf16.msra.mxu1 %v1856_v2  ;;  %v1907_v1 = vld [vmem:[%s2414_s1 + $0x300] sm:$0xff]   ;;  %v377_v2 = vcombine.high %v355_v60, %v355_v60 }
  0x32   :  { %1704 = vmatprep.subr.bf16.mxu1 %v1858_v3  ;;  %v1909_v3 = vld [vmem:[%s2414_s1 + $0x348] sm:$0xff]  }
  0x34   :  { %1683 = vmatpush3.bf16.msra.mxu0 %v1859_v4  ;;  %v1908_v4 = vld [vmem:[%s2414_s1 + $0x380] sm:$0xff]  }
  0x35   :  { %1684 = vmatprep.subr.bf16.mxu0 %v1861_v5  ;;  %1705 = vmatpush3.bf16.msra.mxu1 %v1860_v6  ;;  %v380_v5 = vcombine.high %v376_v63, %v376_v63  ;;  %v1910_v6 = vld [vmem:[%s2414_s1 + $0x3c8] sm:$0xff]  }
  0x36   :  { %1706 = vmatprep.subr.bf16.mxu1 %v1862_v7  ;;  %v1911_v7 = vld [vmem:[%s2414_s1 + $0x308] sm:$0xff]  }
  0x38   :  { %1685 = vmatpush3.bf16.msra.mxu0 %v1863_v8  ;;  %v1913_v8 = vld [vmem:[%s2414_s1 + $0x350] sm:$0xff]  }
  0x39   :  { %1686 = vmatprep.subr.bf16.mxu0 %v1865_v9  ;;  %1707 = vmatpush3.bf16.msra.mxu1 %v1864_v10  ;;  %v1912_v9 = vld [vmem:[%s2414_s1 + $0x388] sm:$0xff]   ;;  %v1914_v10 = vld [vmem:[%s2414_s1 + $0x3d0] sm:$0xff]  }
  0x3a   :  { %1708 = vmatprep.subr.bf16.mxu1 %v1866_v11  ;;  %v1915_v11 = vld [vmem:[%s2414_s1 + $0x310] sm:$0xff]  }
  0x3c   :  { %1687 = vmatpush3.bf16.msra.mxu0 %v1867_v12  ;;  %v1917_v12 = vld [vmem:[%s2414_s1 + $0x358] sm:$0xff]  }
  0x3d   :  { %1688 = vmatprep.subr.bf16.mxu0 %v1869_v13  ;;  %1709 = vmatpush3.bf16.msra.mxu1 %v1868_v14  ;;  %v1916_v13 = vld [vmem:[%s2414_s1 + $0x390] sm:$0xff]   ;;  %v1918_v14 = vld [vmem:[%s2414_s1 + $0x3d8] sm:$0xff]  }
  0x3e   :  { %1710 = vmatprep.subr.bf16.mxu1 %v1870_v15  ;;  %v1919_v15 = vld [vmem:[%s2414_s1 + $0x318] sm:$0xff]  }
  0x40   :  { %1689 = vmatpush3.bf16.msra.mxu0 %v1871_v16  ;;  %v1921_v16 = vld [vmem:[%s2414_s1 + $0x360] sm:$0xff]  }
  0x41   :  { %1718 = vmatprep.subr.bf16.mxu0 %v1873_v18  ;;  %1711 = vmatpush3.bf16.msra.mxu1 %v1872_v19  ;;  %v1922_v18 = vld [vmem:[%s2414_s1 + $0x3e0] sm:$0xff]  }
  0x42   :  { %1740 = vmatprep.subr.bf16.mxu1 %v1874_v20  ;;  %v1923_v19 = vld [vmem:[%s2414_s1 + $0x320] sm:$0xff]   ;;  %v1925_v20 = vld [vmem:[%s2414_s1 + $0x368] sm:$0xff]  }
  0x43   :  { %1278 = vmatmul.mubr.bf16.vlgmr.msra.gmra.mrb[4].mxu0 %v313_v17  ;;  %v1920_v17 = vld [vmem:[%s2414_s1 + $0x398] sm:$0xff]  }
  0x44   :  { %1719 = vmatpush3.bf16.msra.mxu0 %v1875_v21  ;;  %1318 = vmatmul.mubr.bf16.vlgmr.msra.gmra.mrb[4].mxu1 %v329_v22  ;;  %v1924_v21 = vld [vmem:[%s2414_s1 + $0x3a0] sm:$0xff]   ;;  %v1926_v22 = vld [vmem:[%s2414_s1 + $0x3e8] sm:$0xff]  }
  0x45   :  { %1720 = vmatprep.subr.bf16.mxu0 %v1877_v23  ;;  %1741 = vmatpush3.bf16.msra.mxu1 %v1876_v24  ;;  %v1927_v23 = vld [vmem:[%s2414_s1 + $0x328] sm:$0xff]   ;;  %v1929_v24 = vld [vmem:[%s2414_s1 + $0x370] sm:$0xff]  }
  0x46   :  { %1742 = vmatprep.subr.bf16.mxu1 %v1878_v25  ;;  %1357 = vmatprep.mubr.bf16.mxu0 %v369_v55 }
  0x47   :  { %1397 = vmatprep.mubr.bf16.mxu1 %v379_v59 }
  0x48   :  { %1721 = vmatpush3.bf16.msra.mxu0 %v1879_v26 }
  0x49   :  { %1722 = vmatprep.subr.bf16.mxu0 %v1881_v27  ;;  %1743 = vmatpush3.bf16.msra.mxu1 %v1880_v28 }
  0x4a   :  { %1744 = vmatprep.subr.bf16.mxu1 %v1882_v29 }
  0x4c   :  { %1723 = vmatpush3.bf16.msra.mxu0 %v1883_v30 }
  0x4d   :  { %1724 = vmatprep.subr.bf16.mxu0 %v1885_v31  ;;  %1745 = vmatpush3.bf16.msra.mxu1 %v1884_v32 }
  0x4e   :  { %1746 = vmatprep.subr.bf16.mxu1 %v1886_v33 }
  0x50   :  { %1725 = vmatpush3.bf16.msra.mxu0 %v1887_v34 }
  0x51   :  { %1726 = vmatprep.subr.bf16.mxu0 %v1889_v35  ;;  %1747 = vmatpush3.bf16.msra.mxu1 %v1888_v36 }
  0x52   :  { %1748 = vmatprep.subr.bf16.mxu1 %v1890_v37 }
  0x54   :  { %1727 = vmatpush3.bf16.msra.mxu0 %v1891_v38 }
  0x55   :  { %1728 = vmatprep.subr.bf16.mxu0 %v1893_v39  ;;  %1749 = vmatpush3.bf16.msra.mxu1 %v1892_v40 }
  0x56   :  { %1750 = vmatprep.subr.bf16.mxu1 %v1894_v42 }
  0x58   :  { %1729 = vmatpush3.bf16.msra.mxu0 %v1895_v43 }
  0x59   :  { %1730 = vmatprep.subr.bf16.mxu0 %v1897_v44  ;;  %1751 = vmatpush3.bf16.msra.mxu1 %v1896_v46 }
  0x5a   :  { %1752 = vmatprep.subr.bf16.mxu1 %v1898_v49 }
  0x5c   :  { %1731 = vmatpush3.bf16.msra.mxu0 %v1899_v50 }
  0x5d   :  { %1732 = vmatprep.subr.bf16.mxu0 %v1901_v53  ;;  %1753 = vmatpush3.bf16.msra.mxu1 %v1900_v54 }
  0x5e   :  { %1754 = vmatprep.subr.bf16.mxu1 %v1902_v57 }
  0x60   :  { %1733 = vmatpush3.bf16.msra.mxu0 %v1903_v58 }
  0x61   :  { %1762 = vmatprep.subr.bf16.mxu0 %v1905_v61  ;;  %1755 = vmatpush3.bf16.msra.mxu1 %v1904_v62 }
  0x62   :  { %1784 = vmatprep.subr.bf16.mxu1 %v1906_v0 }
  0x63   :  { %1358 = vmatmul.mubr.bf16.vlgmr.msra.gmra.mrb[8].mxu0 %v355_v60 }
  0x64   :  { %1763 = vmatpush3.bf16.msra.mxu0 %v1907_v1  ;;  %1437 = vmatprep.mubr.bf16.mxu0 %v376_v63 }
  0x65   :  { %1398 = vmatmul.mubr.bf16.vlgmr.msra.gmra.mrb[8].mxu1 %v377_v2  ;;  %1764 = vmatprep.subr.bf16.mxu0 %v1909_v3 }
  0x66   :  { %1785 = vmatpush3.bf16.msra.mxu1 %v1908_v4  ;;  %1477 = vmatprep.mubr.bf16.mxu1 %v380_v5 }
  0x67   :  { %1786 = vmatprep.subr.bf16.mxu1 %v1910_v6 }
  0x68   :  { %1765 = vmatpush3.bf16.msra.mxu0 %v1911_v7 }
  0x69   :  { %1766 = vmatprep.subr.bf16.mxu0 %v1913_v8 }
  0x6a   :  { %1787 = vmatpush3.bf16.msra.mxu1 %v1912_v9 }
  0x6b   :  { %1788 = vmatprep.subr.bf16.mxu1 %v1914_v10 }
  0x6c   :  { %1767 = vmatpush3.bf16.msra.mxu0 %v1915_v11 }
  0x6d   :  { %1768 = vmatprep.subr.bf16.mxu0 %v1917_v12 }
  0x6e   :  { %1789 = vmatpush3.bf16.msra.mxu1 %v1916_v13 }
  0x6f   :  { %1790 = vmatprep.subr.bf16.mxu1 %v1918_v14 }
  0x70   :  { %1769 = vmatpush3.bf16.msra.mxu0 %v1919_v15 }
  0x71   :  { %1770 = vmatprep.subr.bf16.mxu0 %v1921_v16 }
  0x72   :  { %1791 = vmatpush3.bf16.msra.mxu1 %v1920_v17 }
  0x73   :  { %1792 = vmatprep.subr.bf16.mxu1 %v1922_v18 }
  0x74   :  { %1771 = vmatpush3.bf16.msra.mxu0 %v1923_v19 }
  0x75   :  { %1772 = vmatprep.subr.bf16.mxu0 %v1925_v20 }
  0x76   :  { %8 = vsyncpa [#allocation3], 0  ;;  %1793 = vmatpush3.bf16.msra.mxu1 %v1924_v21  ;;  %v1928_v25 = vld [vmem:[%s2414_s1 + $0x3a8] sm:$0xff]   ;;  %v1930_v26 = vld [vmem:[%s2414_s1 + $0x3f0] sm:$0xff]   ;;  %v362_v32 = vrot.slane %v2278_v52, %v2089_v41  ;;  %vm1485_vm0 = vcmask 74752  }
  0x77   :  { %1794 = vmatprep.subr.bf16.mxu1 %v1926_v22  ;;  %v1931_v27 = vld [vmem:[%s2414_s1 + $0x330] sm:$0xff]   ;;  %v1933_v28 = vld [vmem:[%s2414_s1 + $0x378] sm:$0xff]   ;;  %v1501_v36 = vld [vmem:[%s2415_s2] ss:$0 sm:$0xff] }
  0x78   :  { %1773 = vmatpush3.bf16.msra.mxu0 %v1927_v23  ;;  %v1932_v29 = vld [vmem:[%s2414_s1 + $0x3b0] sm:$0xff]   ;;  %v1934_v30 = vld [vmem:[%s2414_s1 + $0x3f8] sm:$0xff]   ;;  %v378_v34 = vcombine.high %v362_v32, %v362_v32 }
  0x79   :  { %1774 = vmatprep.subr.bf16.mxu0 %v1929_v24  ;;  %v1935_v31 = vld [vmem:[%s2414_s1 + $0x338] sm:$0xff]  }
  0x7a   :  { %1795 = vmatpush3.bf16.msra.mxu1 %v1928_v25  ;;  %v1936_v33 = vld [vmem:[%s2414_s1 + $0x3b8] sm:$0xff]   ;;  %s1963_s1 = smov [#allocation2]  }
  0x7b   :  { %1796 = vmatprep.subr.bf16.mxu1 %v1930_v26  ;;  %s1493_s2 = sshll.u32 %s1963_s1, 4  ;;  %s1494_s2 = int_to_ptr.vmem [resolvable:$true] %s1493_s2 }
  0x7c   :  { %1775 = vmatpush3.bf16.msra.mxu0 %v1931_v27  ;;  %s1938_s28 = scalar_lea.vmem %s1494_s2, 32  ;;  %p1943_p1 = scmp.lt.s32.totalorder %s1494_s2, %s1494_s2 }
  0x7d   :  { %1776 = vmatprep.subr.bf16.mxu0 %v1933_v28  ;;  %p1939_p0 = scmp.ne.s32.totalorder %s1494_s2, %s1938_s28  ;;  %p1944_p2 = scmp.lt.s32.totalorder %s1938_s28, %s1938_s28 }
  0x7e   :  { %1797 = vmatpush3.bf16.msra.mxu1 %v1932_v29 }
  0x7f   :  { %1798 = vmatprep.subr.bf16.mxu1 %v1934_v30  ;;  %p1945_p3 = por %p1944_p2, %p1943_p1 }
  0x80   :  { %1777 = vmatpush3.bf16.msra.mxu0 %v1935_v31 }
  0x81   :  { %p1946_p4 = pnand %p1945_p3, %p1939_p0 }
  0x82   :  { %1799 = vmatpush3.bf16.msra.mxu1 %v1936_v33 }
  0x83   :  { %1438 = vmatmul.mubr.bf16.vlgmr.msra.gmra.mrb[12].mxu0 %v362_v32 }
  0x85   :  { %1478 = vmatmul.mubr.bf16.vlgmr.msra.gmra.mrb[12].mxu1 %v378_v34 }
  0xf6   :  { %v1646_v35 = vpop.f32.mrb[0].mxu0 }
  0xf7   :  { %v1647_v37 = vpop.f32.mrb[1].mxu0  ;;  %v1668_v38 = vpop.f32.mrb[0].mxu1 }
  0xf8   :  { %v1648_v39 = vadd.f32 %v1647_v37, %v1646_v35  ;;  %v1649_v41 = vpop.f32.mrb[2].mxu0  ;;  %v1669_v40 = vpop.f32.mrb[1].mxu1 }
  0xf9   :  { %v1650_v42 = vpop.f32.mrb[3].mxu0  ;;  %v1670_v44 = vadd.f32 %v1669_v40, %v1668_v38  ;;  %v1671_v45 = vpop.f32.mrb[2].mxu1 }
  0xfa   :  { %v1200_v43 = vadd.f32 %v1648_v39, %v1501_v36  ;;  %v1672_v46 = vpop.f32.mrb[3].mxu1 }
  0xfc   :  { %v1240_v47 = vadd.f32 %v1670_v44, %v1200_v43 }
 0x116   :  { %v1690_v48 = vpop.f32.mrb[4].mxu0 }
 0x117   :  { %v1691_v49 = vpop.f32.mrb[5].mxu0  ;;  %v1712_v50 = vpop.f32.mrb[4].mxu1 }
 0x118   :  { %v1692_v51 = vadd.f32 %v1691_v49, %v1690_v48  ;;  %v1693_v52 = vpop.f32.mrb[6].mxu0  ;;  %v1713_v53 = vpop.f32.mrb[5].mxu1 }
 0x119   :  { %v1694_v54 = vpop.f32.mrb[7].mxu0  ;;  %v1714_v56 = vadd.f32 %v1713_v53, %v1712_v50  ;;  %v1715_v57 = vpop.f32.mrb[6].mxu1 }
 0x11a   :  { %v1280_v55 = vadd.f32 %v1692_v51, %v1240_v47  ;;  %v1716_v58 = vpop.f32.mrb[7].mxu1 }
 0x11c   :  { %v1320_v59 = vadd.f32 %v1714_v56, %v1280_v55 }
 0x136   :  { %v1734_v60 = vpop.f32.mrb[8].mxu0 }
 0x137   :  { %v1735_v61 = vpop.f32.mrb[9].mxu0 }
 0x138   :  { %v1756_v62 = vpop.f32.mrb[8].mxu1  ;;  %v1736_v63 = vadd.f32 %v1735_v61, %v1734_v60  ;;  %v1737_v0 = vpop.f32.mrb[10].mxu0 }
 0x139   :  { %v1757_v1 = vpop.f32.mrb[9].mxu1  ;;  %v1738_v2 = vpop.f32.mrb[11].mxu0 }
 0x13a   :  { %v1360_v3 = vadd.f32 %v1736_v63, %v1320_v59  ;;  %v1758_v4 = vadd.f32 %v1757_v1, %v1756_v62  ;;  %v1759_v5 = vpop.f32.mrb[10].mxu1 }
 0x13b   :  { %v1760_v6 = vpop.f32.mrb[11].mxu1 }
 0x13c   :  { %v1400_v7 = vadd.f32 %v1758_v4, %v1360_v3 }
 0x156   :  { %v1778_v8 = vpop.f32.mrb[12].mxu0 }
 0x157   :  { %v1779_v9 = vpop.f32.mrb[13].mxu0 }
 0x158   :  { %v1800_v10 = vpop.f32.mrb[12].mxu1  ;;  %v1780_v11 = vadd.f32 %v1779_v9, %v1778_v8  ;;  %v1781_v12 = vpop.f32.mrb[14].mxu0 }
 0x159   :  { %v1801_v13 = vpop.f32.mrb[13].mxu1  ;;  %v1782_v14 = vpop.f32.mrb[15].mxu0 }
 0x15a   :  { %v1440_v15 = vadd.f32 %v1780_v11, %v1400_v7  ;;  %v1802_v16 = vadd.f32 %v1801_v13, %v1800_v10  ;;  %v1803_v17 = vpop.f32.mrb[14].mxu1 }
 0x15b   :  { %v1804_v18 = vpop.f32.mrb[15].mxu1 }
 0x15c   :  { %v1480_v19 = vadd.f32 %v1802_v16, %v1440_v15 }
 0x15e   :  { %1486 = vst.msk [vmem:[#allocation2] sm:$0x3] %vm1485_vm0, %v1480_v19 }
 0x15f   :  { %1949 = shalt.err (!%p1946_p4)
}
 0x160   :  { %s1950_s4 = scalar_lea.hbm %s2416_s3, 32 }
 0x161   :  { %p1951_p5 = scmp.ne.s32.totalorder %s2416_s3, %s1950_s4  ;;  %p1954_p6 = scmp.lt.u32.totalorder %s1950_s4, %s2416_s3 }
 0x163   :  { %p1956_p7 = pnand %p1954_p6, %p1951_p5 }
 0x165   :  { %1959 = shalt.err (!%p1956_p7)
}
 0x166   :  { %1496 = dma.vmem_to_hbm [thread:$0]  %s1494_s2, 32, %s2416_s3, [#allocation3]  }
 0x167   :  { %1960 = dma.done.wait [#allocation3], 32  }
 0x168   :  { %1961 = vsyncadd [#allocation3], 4294967264 }
 0x169   :  { %1500 = vsyncpa [#allocation3], 1 }

</bundles_post_ra>
